<compile_context>
chip_gen: v6e
topology: v6e:2x2x1
jax: 0.10.0
libtpu: 0.0.40
codegen_flags: <defaults>
</compile_context>

<pallas_src>
import functools
import math

import jax
import jax.numpy as jnp
from jax.experimental import pallas as pl
from jax.experimental.pallas import tpu as pltpu

BN_EPS = 1e-5
BN_SCALE = 1.0 / math.sqrt(1.0 + BN_EPS)  # gamma=1, running_var=1
BN_SHIFT = 1e-4                           # beta=1e-4, running_mean=0

VMEM_LIMIT = 40 * 1024 * 1024             # safe on v5e/v6e (128 MiB) and v7x (64 MiB)


def _make_divisible(v, divisor, min_value=None):
    if min_value is None:
        min_value = divisor
    new_v = max(min_value, int(v + divisor / 2) // divisor * divisor)
    if new_v < 0.9 * v:
        new_v += divisor
    return new_v


def _cparams():
    return pltpu.CompilerParams(dimension_semantics=("parallel",),
                                vmem_limit_bytes=VMEM_LIMIT)


# ----------------------------- Pallas kernels -----------------------------

def _matmul_kernel(a_ref, b_ref, s_ref, c_ref, o_ref, *, act):
    """(tm, K) @ (K, N) on MXU (bf16 operands, f32 acc) * scale + bias (+ReLU)."""
    y = jnp.dot(a_ref[...], b_ref[...], preferred_element_type=jnp.float32)
    y = y * s_ref[...] + c_ref[...]
    if act == "relu":
        y = jnp.maximum(y, 0.0)
    o_ref[...] = y.astype(o_ref.dtype)


def matmul_bn_act(a, b, scale, bias, act=None, tm_max=1024):
    """Tiled fused conv(1x1/im2col)+BN+act.  a:(M,K) bf16, b:(K,N) bf16."""
    M, K = a.shape
    N = b.shape[1]
    tm = M if M <= tm_max else tm_max
    kern = functools.partial(_matmul_kernel, act=act)
    return pl.pallas_call(
        kern,
        out_shape=jax.ShapeDtypeStruct((M, N), jnp.bfloat16),
        grid=(pl.cdiv(M, tm),),
        in_specs=[pl.BlockSpec((tm, K), lambda i: (i, 0)),
                  pl.BlockSpec((K, N), lambda i: (0, 0)),
                  pl.BlockSpec((1, N), lambda i: (0, 0)),
                  pl.BlockSpec((1, N), lambda i: (0, 0))],
        out_specs=pl.BlockSpec((tm, N), lambda i: (i, 0)),
        compiler_params=_cparams(),
    )(a, b, scale.reshape(1, N), bias.reshape(1, N))


def _ghost_kernel(*args, H, W, ic, relu, res_mode):
    """Fused GhostModule (+ optional fused residual / shortcut pointwise).

    Primary 1x1 conv uses a weight widened to oup columns (upper slab
    replicates the first oup-ic primary channels), so the cheap 3x3 depthwise
    (whose weights are zero on the lower slab) lands its output directly in
    the upper channel slab -> one lane-dense (M, oup) output store.
    """
    if res_mode == "none":
        (x_ref, col_ref, wp_ref, sp_ref, bp_ref, wc_ref, scd_ref, bcd_ref,
         o_ref, pad_ref) = args
    elif res_mode == "add":
        (x_ref, col_ref, wp_ref, sp_ref, bp_ref, wc_ref, scd_ref, bcd_ref,
         res_ref, o_ref, pad_ref) = args
    else:  # "pw": shortcut depthwise output + fused 1x1 pointwise conv + BN
        (x_ref, col_ref, wp_ref, sp_ref, bp_ref, wc_ref, scd_ref, bcd_ref,
         res_ref, pww_ref, pws_ref, pwb_ref, o_ref, pad_ref) = args
    M = H * W
    oup = pad_ref.shape[1]

    # primary 1x1 conv (MXU) + folded BN (+ReLU), widened to oup columns
    x1w = jnp.dot(x_ref[0], wp_ref[...], preferred_element_type=jnp.float32)
    x1w = x1w * sp_ref[...] + bp_ref[...]
    if relu:
        x1w = jnp.maximum(x1w, 0.0)

    # flat zero-halo buffer: [ zeros(W+1) | x1w (M rows) | zeros(W+1) ]
    pad_ref[0:W + 1, :] = jnp.zeros((W + 1, oup), jnp.float32)
    pad_ref[W + 1 + M:M + 2 * W + 2, :] = jnp.zeros((W + 1, oup), jnp.float32)
    pad_ref[W + 1:W + 1 + M, :] = x1w          # single interior store

    # cheap op: 3x3 stride-1 depthwise as flat shifted slices + edge masks
    colv = col_ref[...]                        # (M, 1) int32: w coordinate
    acc = jnp.zeros((M, oup), jnp.float32)
    for dy in range(3):
        for dx in range(3):
            tap = pad_ref[dy * W + dx:dy * W + dx + M, :]
            if dx == 0:
                tap = jnp.where(colv > 0, tap, 0.0)
            elif dx == 2:
                tap = jnp.where(colv < W - 1, tap, 0.0)
            acc = acc + tap * wc_ref[3 * dy + dx:3 * dy + dx + 1, :]
    x2w = acc * scd_ref[...] + bcd_ref[...]
    if relu:
        x2w = jnp.maximum(x2w, 0.0)

    # combine slabs entirely in-register (x2w is zero on the lower slab)
    lane = jax.lax.broadcasted_iota(jnp.int32, (1, oup), 1)
    y = jnp.where(lane < ic, x1w, 0.0) + x2w

    # fused residual / shortcut
    if res_mode == "add":
        y = y + res_ref[0].astype(jnp.float32)
    elif res_mode == "pw":
        sc = jnp.dot(res_ref[0], pww_ref[...], preferred_element_type=jnp.float32)
        y = y + (sc * pws_ref[...] + pwb_ref[...])
    o_ref[0] = y.astype(o_ref.dtype)


def _dw_phases_kernel(*args, k, stride, Ho, Wo, act, nph):
    """Depthwise conv + BN from stride^2 phase tiles (in-kernel tap gather).

    Each phase tile is cast to f32 once into VMEM scratch; the k*k taps are
    unit-stride slices of those scratch buffers (no k^2 taps in HBM)."""
    ph_refs = args[:nph]
    w_ref, s_ref, c_ref, o_ref = args[nph:nph + 4]
    scr_refs = args[nph + 4:]
    C = w_ref.shape[1]
    for i in range(nph):
        scr_refs[i][...] = ph_refs[i][0].astype(jnp.float32)
    acc = jnp.zeros((Ho, Wo, C), jnp.float32)
    for dy in range(k):
        for dx in range(k):
            scr = scr_refs[(dy % stride) * stride + (dx % stride)]
            oy0, ox0 = dy // stride, dx // stride
            tap = scr[oy0:oy0 + Ho, ox0:ox0 + Wo, :]
            acc = acc + tap * w_ref[k * dy + dx:k * dy + dx + 1, :]
    y = acc * s_ref[...] + c_ref[...]
    if act == "relu":
        y = jnp.maximum(y, 0.0)
    o_ref[0] = y.astype(o_ref.dtype)


def _head_kernel(x_ref, wh_ref, sh_ref, bh_ref, wc_ref, bc_ref, o_ref):
    """Fused global-avg-pool + conv_head + bn2 + ReLU + classifier."""
    pooled = jnp.mean(x_ref[...].astype(jnp.float32), axis=1)          # (B, C)
    y = jnp.dot(pooled.astype(jnp.bfloat16), wh_ref[...],
                preferred_element_type=jnp.float32)
    y = jnp.maximum(y * sh_ref[...] + bh_ref[...], 0.0)
    # dropout: eval-mode identity
    o_ref[...] = (jnp.dot(y.astype(jnp.bfloat16), wc_ref[...],
                          preferred_element_type=jnp.float32) + bc_ref[...])


# ----------------------------- layer wrappers -----------------------------

def ghost_module_fwd(p, x, res=None, res_mode="none", pw=None):
    """x: (B, H, W, Cin) bf16 -> (B, H, W, oup) bf16 (with optional fused
    residual add or shortcut-pointwise add)."""
    B, H, W, Cin = x.shape
    M = H * W
    ic = p["init_ch"]
    oup = p["oup"]
    col = (jnp.arange(M, dtype=jnp.int32) % W).reshape(M, 1)
    kern = functools.partial(_ghost_kernel, H=H, W=W, ic=ic, relu=p["relu"],
                             res_mode=res_mode)
    ins = [x.reshape(B, M, Cin), col, p["primary_w"],
           p["primary_scale"].reshape(1, oup), p["primary_bias"].reshape(1, oup),
           p["cheap_w"],
           p["cheap_scale"].reshape(1, oup), p["cheap_bias"].reshape(1, oup)]
    in_specs = [pl.BlockSpec((1, M, Cin), lambda b: (b, 0, 0)),
                pl.BlockSpec((M, 1), lambda b: (0, 0)),
                pl.BlockSpec((Cin, oup), lambda b: (0, 0)),
                pl.BlockSpec((1, oup), lambda b: (0, 0)),
                pl.BlockSpec((1, oup), lambda b: (0, 0)),
                pl.BlockSpec((9, oup), lambda b: (0, 0)),
                pl.BlockSpec((1, oup), lambda b: (0, 0)),
                pl.BlockSpec((1, oup), lambda b: (0, 0))]
    if res_mode == "add":
        ins.append(res.reshape(B, M, oup))
        in_specs.append(pl.BlockSpec((1, M, oup), lambda b: (b, 0, 0)))
    elif res_mode == "pw":
        w_pw, s_pw, b_pw = pw
        csc = res.shape[-1]
        ins += [res.reshape(B, M, csc), w_pw,
                s_pw.reshape(1, oup), b_pw.reshape(1, oup)]
        in_specs += [pl.BlockSpec((1, M, csc), lambda b: (b, 0, 0)),
                     pl.BlockSpec((csc, oup), lambda b: (0, 0)),
                     pl.BlockSpec((1, oup), lambda b: (0, 0)),
                     pl.BlockSpec((1, oup), lambda b: (0, 0))]
    out = pl.pallas_call(
        kern,
        out_shape=jax.ShapeDtypeStruct((B, M, oup), jnp.bfloat16),
        grid=(B,),
        in_specs=in_specs,
        out_specs=pl.BlockSpec((1, M, oup), lambda b: (b, 0, 0)),
        scratch_shapes=[pltpu.VMEM((M + 2 * W + 2, oup), jnp.float32)],
        compiler_params=_cparams(),
    )(*ins)
    return out.reshape(B, H, W, oup)


def conv1x1_bn_act(x, w_flat, scale, bias, act=None):
    B, H, W, Cin = x.shape
    Cout = w_flat.shape[1]
    y = matmul_bn_act(x.reshape(B * H * W, Cin), w_flat, scale, bias, act)
    return y.reshape(B, H, W, Cout)


def convkxk_bn_act(x, w_flat, scale, bias, k, stride, act=None):
    """Standard conv via im2col + fused MXU matmul (only used for the stem,
    where Cin=3 so the im2col expansion is negligible)."""
    B, H, W, Cin = x.shape
    Cout = w_flat.shape[1]
    pad = k // 2
    xp = jnp.pad(x, ((0, 0), (pad, pad), (pad, pad), (0, 0)))
    Hp, Wp = H + 2 * pad, W + 2 * pad
    Ho = (Hp - k) // stride + 1
    Wo = (Wp - k) // stride + 1
    taps = [xp[:, dy:dy + (Ho - 1) * stride + 1:stride,
               dx:dx + (Wo - 1) * stride + 1:stride, :]
            for dy in range(k) for dx in range(k)]
    a = jnp.concatenate(taps, axis=-1).reshape(B * Ho * Wo, k * k * Cin)
    y = matmul_bn_act(a, w_flat, scale, bias, act)
    return y.reshape(B, Ho, Wo, Cout)


def dwconv_bn_act(x, w_taps, scale, bias, k, stride, act=None):
    """Depthwise conv + BN (+act).  Padded input split into stride^2 phases
    in JAX (~1x HBM traffic); taps gathered in-kernel."""
    B, H, W, C = x.shape
    pad = k // 2
    xp = jnp.pad(x, ((0, 0), (pad, pad), (pad, pad), (0, 0)))
    Hp, Wp = H + 2 * pad, W + 2 * pad
    Ho = (Hp - k) // stride + 1
    Wo = (Wp - k) // stride + 1
    phases = [xp[:, sy::stride, sx::stride, :]
              for sy in range(stride) for sx in range(stride)]
    nph = stride * stride
    kern = functools.partial(_dw_phases_kernel, k=k, stride=stride,
                             Ho=Ho, Wo=Wo, act=act, nph=nph)
    in_specs = [pl.BlockSpec((1,) + ph.shape[1:], lambda b: (b, 0, 0, 0))
                for ph in phases]
    in_specs += [pl.BlockSpec((k * k, C), lambda b: (0, 0)),
                 pl.BlockSpec((1, C), lambda b: (0, 0)),
                 pl.BlockSpec((1, C), lambda b: (0, 0))]
    return pl.pallas_call(
        kern,
        out_shape=jax.ShapeDtypeStruct((B, Ho, Wo, C), jnp.bfloat16),
        grid=(B,),
        in_specs=in_specs,
        out_specs=pl.BlockSpec((1, Ho, Wo, C), lambda b: (b, 0, 0, 0)),
        scratch_shapes=[pltpu.VMEM(ph.shape[1:], jnp.float32) for ph in phases],
        compiler_params=_cparams(),
    )(*(phases + [w_taps, scale.reshape(1, C), bias.reshape(1, C)]))


def pool_head_classifier(x, wh, hscale, hbias, wcls, bcls):
    """x: (B, HW, C) bf16 -> logits (B, num_classes) f32."""
    B, HW, C = x.shape
    Nh = wh.shape[1]
    Nc = wcls.shape[1]
    return pl.pallas_call(
        _head_kernel,
        out_shape=jax.ShapeDtypeStruct((B, Nc), jnp.float32),
        grid=(1,),
        in_specs=[pl.BlockSpec((B, HW, C), lambda i: (0, 0, 0)),
                  pl.BlockSpec((C, Nh), lambda i: (0, 0)),
                  pl.BlockSpec((1, Nh), lambda i: (0, 0)),
                  pl.BlockSpec((1, Nh), lambda i: (0, 0)),
                  pl.BlockSpec((Nh, Nc), lambda i: (0, 0)),
                  pl.BlockSpec((1, Nc), lambda i: (0, 0))],
        out_specs=pl.BlockSpec((B, Nc), lambda i: (0, 0)),
        compiler_params=pltpu.CompilerParams(vmem_limit_bytes=VMEM_LIMIT),
    )(x, wh, hscale.reshape(1, Nh), hbias.reshape(1, Nh), wcls,
      bcls.reshape(1, Nc))


# ----------------------------- parameter init -----------------------------

class KeyGen:
    def __init__(self, key):
        self.key = key
        self.i = 0

    def __call__(self):
        self.i += 1
        return jax.random.fold_in(self.key, self.i)


def _bn_affine(c):
    return (jnp.full((c,), BN_SCALE, jnp.float32),
            jnp.full((c,), BN_SHIFT, jnp.float32))


def _conv_w(kg, cout, cin_per_group, k, std):
    return std * jax.random.normal(kg(), (cout, cin_per_group, k, k), jnp.float32)


def _dw_taps(w):                      # (C, 1, k, k) -> (k*k, C) f32, tap-major
    k = w.shape[-1]
    return jnp.transpose(w[:, 0], (1, 2, 0)).reshape(k * k, w.shape[0])


def _pw_mat(w):                       # (Cout, Cin, 1, 1) -> (Cin, Cout) bf16
    return w.reshape(w.shape[0], w.shape[1]).T.astype(jnp.bfloat16)


def _init_ghost_module(kg, inp, oup, relu):
    init_ch = math.ceil(oup / 2)      # ratio = 2 -> new_channels == init_ch
    nc2 = oup - init_ch               # channels kept from the cheap op
    wp = _conv_w(kg, init_ch, inp, 1, 1.0 / inp).reshape(init_ch, inp).T  # (inp, ic)
    s1, b1 = _bn_affine(init_ch)
    wc = _dw_taps(_conv_w(kg, init_ch, 1, 3, 1.0))                         # (9, ic)
    s2, b2 = _bn_affine(init_ch)
    zc = jnp.zeros((init_ch,), jnp.float32)
    return {
        "relu": relu, "oup": oup, "init_ch": init_ch,
        # widened primary weight/BN: lower slab = primary conv, upper slab
        # replicates its first nc2 channels (input of the cheap op)
        "primary_w": jnp.concatenate([wp, wp[:, :nc2]], axis=1).astype(jnp.bfloat16),
        "primary_scale": jnp.concatenate([s1, s1[:nc2]]),
        "primary_bias": jnp.concatenate([b1, b1[:nc2]]),
        # widened cheap weight/BN: zero on the lower slab
        "cheap_w": jnp.concatenate([jnp.zeros((9, init_ch), jnp.float32),
                                    wc[:, :nc2]], axis=1),
        "cheap_scale": jnp.concatenate([zc, s2[:nc2]]),
        "cheap_bias": jnp.concatenate([zc, b2[:nc2]]),
    }


def _init_bottleneck(kg, in_chs, mid_chs, out_chs, k, s):
    p = {"stride": s, "k": k}
    p["ghost1"] = _init_ghost_module(kg, in_chs, mid_chs, True)
    if s > 1:
        p["dw_w"] = _dw_taps(_conv_w(kg, mid_chs, 1, k, 1.0))
        p["dw_scale"], p["dw_bias"] = _bn_affine(mid_chs)
    p["ghost2"] = _init_ghost_module(kg, mid_chs, out_chs, False)
    if not (in_chs == out_chs and s == 1):
        p["sc_dw_w"] = _dw_taps(_conv_w(kg, in_chs, 1, k, 1.0))
        p["sc_dw_scale"], p["sc_dw_bias"] = _bn_affine(in_chs)
        p["sc_pw_w"] = _pw_mat(_conv_w(kg, out_chs, in_chs, 1, 1.0 / in_chs))
        p["sc_pw_scale"], p["sc_pw_bias"] = _bn_affine(out_chs)
    return p


def init_ghostnet(key, cfgs, num_classes=10, width=1.0):
    kg = KeyGen(key)
    params = {}
    out_ch = _make_divisible(16 * width, 4)
    w = _conv_w(kg, out_ch, 3, 3, 0.01)            # 'first' in name -> std 0.01
    params["first_w"] = jnp.transpose(w, (2, 3, 1, 0)).reshape(27, out_ch).astype(jnp.bfloat16)
    params["first_scale"], params["first_bias"] = _bn_affine(out_ch)
    in_ch = out_ch

    blocks = []
    exp_size = 16
    for cfg in cfgs:
        stage = []
        for k, exp_size, c, _se, s in cfg:
            oc = _make_divisible(c * width, 4)
            hc = _make_divisible(exp_size * width, 4)
            stage.append(_init_bottleneck(kg, in_ch, hc, oc, k, s))
            in_ch = oc
        blocks.append(stage)
    params["blocks"] = blocks

    last_ch = _make_divisible(exp_size * width, 4)
    params["convbnact_w"] = _pw_mat(_conv_w(kg, last_ch, in_ch, 1, 1.0 / in_ch))
    params["convbnact_scale"], params["convbnact_bias"] = _bn_affine(last_ch)
    in_ch = last_ch

    head_ch = 1280
    wh = _conv_w(kg, head_ch, in_ch, 1, 1.0 / in_ch)
    params["head_w"] = wh.reshape(head_ch, in_ch).T.astype(jnp.bfloat16)
    hs, hb = _bn_affine(head_ch)
    params["head_scale"] = hs
    params["head_bias"] = hb                                  # conv bias = 0 folded
    params["cls_w"] = (0.01 * jax.random.normal(kg(), (num_classes, head_ch),
                                                jnp.float32)).T.astype(jnp.bfloat16)
    params["cls_b"] = jnp.zeros((num_classes,), jnp.float32)
    return params


# ----------------------------- forward -----------------------------

def _bottleneck_fwd(p, x):
    y = ghost_module_fwd(p["ghost1"], x)
    if p["stride"] > 1:
        y = dwconv_bn_act(y, p["dw_w"], p["dw_scale"], p["dw_bias"],
                          p["k"], p["stride"], None)
    if "sc_dw_w" in p:
        sc_dw = dwconv_bn_act(x, p["sc_dw_w"], p["sc_dw_scale"],
                              p["sc_dw_bias"], p["k"], p["stride"], None)
        # shortcut pointwise conv + BN + residual add fused into ghost2
        return ghost_module_fwd(p["ghost2"], y, res=sc_dw, res_mode="pw",
                                pw=(p["sc_pw_w"], p["sc_pw_scale"],
                                    p["sc_pw_bias"]))
    # identity shortcut fused into ghost2 epilogue
    return ghost_module_fwd(p["ghost2"], y, res=x, res_mode="add")


def ghostnet_forward(params, x_nchw):
    x = jnp.transpose(x_nchw, (0, 2, 3, 1)).astype(jnp.bfloat16)  # NCHW -> NHWC
    x = convkxk_bn_act(x, params["first_w"], params["first_scale"],
                       params["first_bias"], 3, 2, "relu")
    for stage in params["blocks"]:
        for bp in stage:
            x = _bottleneck_fwd(bp, x)
    x = conv1x1_bn_act(x, params["convbnact_w"], params["convbnact_scale"],
                       params["convbnact_bias"], "relu")
    B, H, W, C = x.shape
    logits = pool_head_classifier(x.reshape(B, H * W, C), params["head_w"],
                                  params["head_scale"], params["head_bias"],
                                  params["cls_w"], params["cls_b"])
    return logits


# ----------------------------- main -----------------------------

if __name__ == "__main__":
    # small GhostNet config: (kernel, exp_size, out_ch, se_ratio, stride)
    CFGS = [
        [[3, 16, 16, 0, 1]],
        [[3, 48, 24, 0, 2]],
        [[3, 72, 24, 0, 1]],
        [[5, 72, 40, 0, 2]],
    ]
    NUM_CLASSES = 10

    key = jax.random.PRNGKey(0)
    pkey, xkey = jax.random.split(key)
    params = init_ghostnet(pkey, CFGS, num_classes=NUM_CLASSES, width=1.0)

    x = jax.random.normal(xkey, (2, 3, 16, 16), jnp.float32)  # NCHW, like PyTorch

    fwd = jax.jit(lambda inp: ghostnet_forward(params, inp))
    logits = fwd(x)
    jax.block_until_ready(logits)
    assert logits.shape == (2, NUM_CLASSES)
    print("KERNEL_OK")
</pallas_src>

<mosaic_0001>
module attributes {stable_mosaic.version = 11 : i64} {
  func.func @_matmul_kernel(%arg0: i32, %arg1: memref<128x27xbf16, #tpu.memory_space<vmem>>, %arg2: memref<27x16xbf16, #tpu.memory_space<vmem>>, %arg3: memref<1x16xf32, #tpu.memory_space<vmem>>, %arg4: memref<1x16xf32, #tpu.memory_space<vmem>>, %arg5: memref<128x16xbf16, #tpu.memory_space<vmem>>) attributes {dimension_semantics = [#tpu.dimension_semantics<parallel>], iteration_bounds = array<i64: 1>, scalar_prefetch = 0 : i64, scratch_operands = 0 : i64, tpu.core_type = #tpu.core_type<tc>, window_params = [{transform_indices = @transform_0, window_bounds = array<i64: 128, 27>}, {pipeline_mode = #tpu.pipeline_mode<synchronous>, transform_indices = @transform_1, window_bounds = array<i64: 27, 16>}, {pipeline_mode = #tpu.pipeline_mode<synchronous>, transform_indices = @transform_2, window_bounds = array<i64: 1, 16>}, {pipeline_mode = #tpu.pipeline_mode<synchronous>, transform_indices = @transform_3, window_bounds = array<i64: 1, 16>}, {transform_indices = @transform_4, window_bounds = array<i64: 128, 16>}]} {
    %c0 = arith.constant 0 : index
    %c0_0 = arith.constant 0 : index
    %0 = vector.load %arg1[%c0, %c0_0] : memref<128x27xbf16, #tpu.memory_space<vmem>>, vector<128x27xbf16>
    %c0_1 = arith.constant 0 : index
    %c0_2 = arith.constant 0 : index
    %1 = vector.load %arg2[%c0_1, %c0_2] : memref<27x16xbf16, #tpu.memory_space<vmem>>, vector<27x16xbf16>
    %cst = arith.constant dense<0.000000e+00> : vector<128x16xf32>
    %2 = tpu.matmul %0, %1, %cst {dimension_numbers = #tpu.dot_dimension_numbers<[1], [0], [0], [1], [0, 0, 1, 1], [], []>} : vector<128x27xbf16>, vector<27x16xbf16>, vector<128x16xf32> -> vector<128x16xf32>
    %c0_3 = arith.constant 0 : index
    %c0_4 = arith.constant 0 : index
    %3 = vector.load %arg3[%c0_3, %c0_4] : memref<1x16xf32, #tpu.memory_space<vmem>>, vector<1x16xf32>
    %4 = vector.broadcast %3 : vector<1x16xf32> to vector<128x16xf32>
    %5 = arith.mulf %2, %4 : vector<128x16xf32>
    %c0_5 = arith.constant 0 : index
    %c0_6 = arith.constant 0 : index
    %6 = vector.load %arg4[%c0_5, %c0_6] : memref<1x16xf32, #tpu.memory_space<vmem>>, vector<1x16xf32>
    %7 = vector.broadcast %6 : vector<1x16xf32> to vector<128x16xf32>
    %8 = arith.addf %5, %7 : vector<128x16xf32>
    %cst_7 = arith.constant 0.000000e+00 : f32
    %9 = vector.broadcast %cst_7 : f32 to vector<128x16xf32>
    %10 = arith.maximumf %8, %9 : vector<128x16xf32>
    %11 = arith.truncf %10 : vector<128x16xf32> to vector<128x16xbf16>
    %c0_8 = arith.constant 0 : index
    %c0_9 = arith.constant 0 : index
    %12 = vector.load %arg5[%c0_8, %c0_9] : memref<128x16xbf16, #tpu.memory_space<vmem>>, vector<128x16xbf16>
    tpu.vector_store %arg5[%c0_8, %c0_9], %11 {strides = array<i32>} : memref<128x16xbf16, #tpu.memory_space<vmem>>, vector<128x16xbf16>,
    return
  }
  func.func @transform_0(%arg0: i32) -> (i32, i32) {
    %c0_i32 = arith.constant 0 : i32
    %c0_i32_0 = arith.constant 0 : i32
    return %arg0, %c0_i32 : i32, i32
  }
  func.func @transform_1(%arg0: i32) -> (i32, i32) {
    %c0_i32 = arith.constant 0 : i32
    %c0_i32_0 = arith.constant 0 : i32
    %c0_i32_1 = arith.constant 0 : i32
    return %c0_i32, %c0_i32_0 : i32, i32
  }
  func.func @transform_2(%arg0: i32) -> (i32, i32) {
    %c0_i32 = arith.constant 0 : i32
    %c0_i32_0 = arith.constant 0 : i32
    %c0_i32_1 = arith.constant 0 : i32
    return %c0_i32, %c0_i32_0 : i32, i32
  }
  func.func @transform_3(%arg0: i32) -> (i32, i32) {
    %c0_i32 = arith.constant 0 : i32
    %c0_i32_0 = arith.constant 0 : i32
    %c0_i32_1 = arith.constant 0 : i32
    return %c0_i32, %c0_i32_0 : i32, i32
  }
  func.func @transform_4(%arg0: i32) -> (i32, i32) {
    %c0_i32 = arith.constant 0 : i32
    %c0_i32_0 = arith.constant 0 : i32
    return %arg0, %c0_i32 : i32, i32
  }
}

module attributes {stable_mosaic.version = 11 : i64} {
  func.func @_ghost_kernel(%arg0: i32, %arg1: memref<1x64x16xbf16, #tpu.memory_space<vmem>>, %arg2: memref<64x1xi32, #tpu.memory_space<vmem>>, %arg3: memref<16x16xbf16, #tpu.memory_space<vmem>>, %arg4: memref<1x16xf32, #tpu.memory_space<vmem>>, %arg5: memref<1x16xf32, #tpu.memory_space<vmem>>, %arg6: memref<9x16xf32, #tpu.memory_space<vmem>>, %arg7: memref<1x16xf32, #tpu.memory_space<vmem>>, %arg8: memref<1x16xf32, #tpu.memory_space<vmem>>, %arg9: memref<1x64x16xbf16, #tpu.memory_space<vmem>>, %arg10: memref<82x16xf32, #tpu.memory_space<vmem>>) attributes {dimension_semantics = [#tpu.dimension_semantics<parallel>], iteration_bounds = array<i64: 2>, scalar_prefetch = 0 : i64, scratch_operands = 1 : i64, tpu.core_type = #tpu.core_type<tc>, window_params = [{transform_indices = @transform_0, window_bounds = array<i64: 1, 64, 16>}, {pipeline_mode = #tpu.pipeline_mode<synchronous>, transform_indices = @transform_1, window_bounds = array<i64: 64, 1>}, {pipeline_mode = #tpu.pipeline_mode<synchronous>, transform_indices = @transform_2, window_bounds = array<i64: 16, 16>}, {pipeline_mode = #tpu.pipeline_mode<synchronous>, transform_indices = @transform_3, window_bounds = array<i64: 1, 16>}, {pipeline_mode = #tpu.pipeline_mode<synchronous>, transform_indices = @transform_4, window_bounds = array<i64: 1, 16>}, {pipeline_mode = #tpu.pipeline_mode<synchronous>, transform_indices = @transform_5, window_bounds = array<i64: 9, 16>}, {pipeline_mode = #tpu.pipeline_mode<synchronous>, transform_indices = @transform_6, window_bounds = array<i64: 1, 16>}, {pipeline_mode = #tpu.pipeline_mode<synchronous>, transform_indices = @transform_7, window_bounds = array<i64: 1, 16>}, {transform_indices = @transform_8, window_bounds = array<i64: 1, 64, 16>}]} {
    %c0 = arith.constant 0 : index
    %c0_0 = arith.constant 0 : index
    %c0_1 = arith.constant 0 : index
    %0 = vector.load %arg1[%c0, %c0_0, %c0_1] : memref<1x64x16xbf16, #tpu.memory_space<vmem>>, vector<1x64x16xbf16>
    %1 = vector.shape_cast %0 : vector<1x64x16xbf16> to vector<64x16xbf16>
    %c0_2 = arith.constant 0 : index
    %c0_3 = arith.constant 0 : index
    %2 = vector.load %arg3[%c0_2, %c0_3] : memref<16x16xbf16, #tpu.memory_space<vmem>>, vector<16x16xbf16>
    %cst = arith.constant dense<0.000000e+00> : vector<64x16xf32>
    %3 = tpu.matmul %1, %2, %cst {dimension_numbers = #tpu.dot_dimension_numbers<[1], [0], [0], [1], [0, 0, 1, 1], [], []>} : vector<64x16xbf16>, vector<16x16xbf16>, vector<64x16xf32> -> vector<64x16xf32>
    %c0_4 = arith.constant 0 : index
    %c0_5 = arith.constant 0 : index
    %4 = vector.load %arg4[%c0_4, %c0_5] : memref<1x16xf32, #tpu.memory_space<vmem>>, vector<1x16xf32>
    %5 = vector.broadcast %4 : vector<1x16xf32> to vector<64x16xf32>
    %6 = arith.mulf %3, %5 : vector<64x16xf32>
    %c0_6 = arith.constant 0 : index
    %c0_7 = arith.constant 0 : index
    %7 = vector.load %arg5[%c0_6, %c0_7] : memref<1x16xf32, #tpu.memory_space<vmem>>, vector<1x16xf32>
    %8 = vector.broadcast %7 : vector<1x16xf32> to vector<64x16xf32>
    %9 = arith.addf %6, %8 : vector<64x16xf32>
    %cst_8 = arith.constant 0.000000e+00 : f32
    %10 = vector.broadcast %cst_8 : f32 to vector<64x16xf32>
    %11 = arith.maximumf %9, %10 : vector<64x16xf32>
    %cst_9 = arith.constant 0.000000e+00 : f32
    %12 = vector.broadcast %cst_9 : f32 to vector<9x16xf32>
    %c0_10 = arith.constant 0 : index
    %c0_11 = arith.constant 0 : index
    %13 = vector.load %arg10[%c0_10, %c0_11] : memref<82x16xf32, #tpu.memory_space<vmem>>, vector<9x16xf32>
    tpu.vector_store %arg10[%c0_10, %c0_11], %12 {strides = array<i32>} : memref<82x16xf32, #tpu.memory_space<vmem>>, vector<9x16xf32>,
    %cst_12 = arith.constant 0.000000e+00 : f32
    %14 = vector.broadcast %cst_12 : f32 to vector<9x16xf32>
    %c73 = arith.constant 73 : index
    %c0_13 = arith.constant 0 : index
    %15 = vector.load %arg10[%c73, %c0_13] : memref<82x16xf32, #tpu.memory_space<vmem>>, vector<9x16xf32>
    tpu.vector_store %arg10[%c73, %c0_13], %14 {strides = array<i32>} : memref<82x16xf32, #tpu.memory_space<vmem>>, vector<9x16xf32>,
    %c9 = arith.constant 9 : index
    %c0_14 = arith.constant 0 : index
    %16 = vector.load %arg10[%c9, %c0_14] : memref<82x16xf32, #tpu.memory_space<vmem>>, vector<64x16xf32>
    tpu.vector_store %arg10[%c9, %c0_14], %11 {strides = array<i32>} : memref<82x16xf32, #tpu.memory_space<vmem>>, vector<64x16xf32>,
    %c0_15 = arith.constant 0 : index
    %c0_16 = arith.constant 0 : index
    %17 = vector.load %arg2[%c0_15, %c0_16] : memref<64x1xi32, #tpu.memory_space<vmem>>, vector<64x1xi32>
    %cst_17 = arith.constant 0.000000e+00 : f32
    %18 = vector.broadcast %cst_17 : f32 to vector<64x16xf32>
    %c0_18 = arith.constant 0 : index
    %c0_19 = arith.constant 0 : index
    %19 = vector.load %arg10[%c0_18, %c0_19] : memref<82x16xf32, #tpu.memory_space<vmem>>, vector<64x16xf32>
    %c0_i32 = arith.constant 0 : i32
    %20 = vector.broadcast %c0_i32 : i32 to vector<64x1xi32>
    %21 = arith.cmpi sgt, %17, %20 : vector<64x1xi32>
    %cst_20 = arith.constant 0.000000e+00 : f32
    %22 = vector.shape_cast %21 : vector<64x1xi1> to vector<64x1xi1>
    %23 = vector.broadcast %22 : vector<64x1xi1> to vector<64x16xi1>
    %24 = vector.broadcast %cst_20 : f32 to vector<64x16xf32>
    %25 = arith.select %23, %19, %24 : vector<64x16xi1>, vector<64x16xf32>
    %c0_21 = arith.constant 0 : index
    %c0_22 = arith.constant 0 : index
    %26 = vector.load %arg6[%c0_21, %c0_22] : memref<9x16xf32, #tpu.memory_space<vmem>>, vector<1x16xf32>
    %27 = vector.broadcast %26 : vector<1x16xf32> to vector<64x16xf32>
    %28 = arith.mulf %25, %27 : vector<64x16xf32>
    %29 = arith.addf %18, %28 : vector<64x16xf32>
    %c1 = arith.constant 1 : index
    %c0_23 = arith.constant 0 : index
    %30 = vector.load %arg10[%c1, %c0_23] : memref<82x16xf32, #tpu.memory_space<vmem>>, vector<64x16xf32>
    %c1_24 = arith.constant 1 : index
    %c0_25 = arith.constant 0 : index
    %31 = vector.load %arg6[%c1_24, %c0_25] : memref<9x16xf32, #tpu.memory_space<vmem>>, vector<1x16xf32>
    %32 = vector.broadcast %31 : vector<1x16xf32> to vector<64x16xf32>
    %33 = arith.mulf %30, %32 : vector<64x16xf32>
    %34 = arith.addf %29, %33 : vector<64x16xf32>
    %c2 = arith.constant 2 : index
    %c0_26 = arith.constant 0 : index
    %35 = vector.load %arg10[%c2, %c0_26] : memref<82x16xf32, #tpu.memory_space<vmem>>, vector<64x16xf32>
    %c7_i32 = arith.constant 7 : i32
    %36 = vector.broadcast %c7_i32 : i32 to vector<64x1xi32>
    %37 = arith.cmpi slt, %17, %36 : vector<64x1xi32>
    %cst_27 = arith.constant 0.000000e+00 : f32
    %38 = vector.shape_cast %37 : vector<64x1xi1> to vector<64x1xi1>
    %39 = vector.broadcast %38 : vector<64x1xi1> to vector<64x16xi1>
    %40 = vector.broadcast %cst_27 : f32 to vector<64x16xf32>
    %41 = arith.select %39, %35, %40 : vector<64x16xi1>, vector<64x16xf32>
    %c2_28 = arith.constant 2 : index
    %c0_29 = arith.constant 0 : index
    %42 = vector.load %arg6[%c2_28, %c0_29] : memref<9x16xf32, #tpu.memory_space<vmem>>, vector<1x16xf32>
    %43 = vector.broadcast %42 : vector<1x16xf32> to vector<64x16xf32>
    %44 = arith.mulf %41, %43 : vector<64x16xf32>
    %45 = arith.addf %34, %44 : vector<64x16xf32>
    %c8 = arith.constant 8 : index
    %c0_30 = arith.constant 0 : index
    %46 = vector.load %arg10[%c8, %c0_30] : memref<82x16xf32, #tpu.memory_space<vmem>>, vector<64x16xf32>
    %c0_i32_31 = arith.constant 0 : i32
    %47 = vector.broadcast %c0_i32_31 : i32 to vector<64x1xi32>
    %48 = arith.cmpi sgt, %17, %47 : vector<64x1xi32>
    %cst_32 = arith.constant 0.000000e+00 : f32
    %49 = vector.shape_cast %48 : vector<64x1xi1> to vector<64x1xi1>
    %50 = vector.broadcast %49 : vector<64x1xi1> to vector<64x16xi1>
    %51 = vector.broadcast %cst_32 : f32 to vector<64x16xf32>
    %52 = arith.select %50, %46, %51 : vector<64x16xi1>, vector<64x16xf32>
    %c3 = arith.constant 3 : index
    %c0_33 = arith.constant 0 : index
    %53 = vector.load %arg6[%c3, %c0_33] : memref<9x16xf32, #tpu.memory_space<vmem>>, vector<1x16xf32>
    %54 = vector.broadcast %53 : vector<1x16xf32> to vector<64x16xf32>
    %55 = arith.mulf %52, %54 : vector<64x16xf32>
    %56 = arith.addf %45, %55 : vector<64x16xf32>
    %c9_34 = arith.constant 9 : index
    %c0_35 = arith.constant 0 : index
    %57 = vector.load %arg10[%c9_34, %c0_35] : memref<82x16xf32, #tpu.memory_space<vmem>>, vector<64x16xf32>
    %c4 = arith.constant 4 : index
    %c0_36 = arith.constant 0 : index
    %58 = vector.load %arg6[%c4, %c0_36] : memref<9x16xf32, #tpu.memory_space<vmem>>, vector<1x16xf32>
    %59 = vector.broadcast %58 : vector<1x16xf32> to vector<64x16xf32>
    %60 = arith.mulf %57, %59 : vector<64x16xf32>
    %61 = arith.addf %56, %60 : vector<64x16xf32>
    %c10 = arith.constant 10 : index
    %c0_37 = arith.constant 0 : index
    %62 = vector.load %arg10[%c10, %c0_37] : memref<82x16xf32, #tpu.memory_space<vmem>>, vector<64x16xf32>
    %c7_i32_38 = arith.constant 7 : i32
    %63 = vector.broadcast %c7_i32_38 : i32 to vector<64x1xi32>
    %64 = arith.cmpi slt, %17, %63 : vector<64x1xi32>
    %cst_39 = arith.constant 0.000000e+00 : f32
    %65 = vector.shape_cast %64 : vector<64x1xi1> to vector<64x1xi1>
    %66 = vector.broadcast %65 : vector<64x1xi1> to vector<64x16xi1>
    %67 = vector.broadcast %cst_39 : f32 to vector<64x16xf32>
    %68 = arith.select %66, %62, %67 : vector<64x16xi1>, vector<64x16xf32>
    %c5 = arith.constant 5 : index
    %c0_40 = arith.constant 0 : index
    %69 = vector.load %arg6[%c5, %c0_40] : memref<9x16xf32, #tpu.memory_space<vmem>>, vector<1x16xf32>
    %70 = vector.broadcast %69 : vector<1x16xf32> to vector<64x16xf32>
    %71 = arith.mulf %68, %70 : vector<64x16xf32>
    %72 = arith.addf %61, %71 : vector<64x16xf32>
    %c16 = arith.constant 16 : index
    %c0_41 = arith.constant 0 : index
    %73 = vector.load %arg10[%c16, %c0_41] : memref<82x16xf32, #tpu.memory_space<vmem>>, vector<64x16xf32>
    %c0_i32_42 = arith.constant 0 : i32
    %74 = vector.broadcast %c0_i32_42 : i32 to vector<64x1xi32>
    %75 = arith.cmpi sgt, %17, %74 : vector<64x1xi32>
    %cst_43 = arith.constant 0.000000e+00 : f32
    %76 = vector.shape_cast %75 : vector<64x1xi1> to vector<64x1xi1>
    %77 = vector.broadcast %76 : vector<64x1xi1> to vector<64x16xi1>
    %78 = vector.broadcast %cst_43 : f32 to vector<64x16xf32>
    %79 = arith.select %77, %73, %78 : vector<64x16xi1>, vector<64x16xf32>
    %c6 = arith.constant 6 : index
    %c0_44 = arith.constant 0 : index
    %80 = vector.load %arg6[%c6, %c0_44] : memref<9x16xf32, #tpu.memory_space<vmem>>, vector<1x16xf32>
    %81 = vector.broadcast %80 : vector<1x16xf32> to vector<64x16xf32>
    %82 = arith.mulf %79, %81 : vector<64x16xf32>
    %83 = arith.addf %72, %82 : vector<64x16xf32>
    %c17 = arith.constant 17 : index
    %c0_45 = arith.constant 0 : index
    %84 = vector.load %arg10[%c17, %c0_45] : memref<82x16xf32, #tpu.memory_space<vmem>>, vector<64x16xf32>
    %c7 = arith.constant 7 : index
    %c0_46 = arith.constant 0 : index
    %85 = vector.load %arg6[%c7, %c0_46] : memref<9x16xf32, #tpu.memory_space<vmem>>, vector<1x16xf32>
    %86 = vector.broadcast %85 : vector<1x16xf32> to vector<64x16xf32>
    %87 = arith.mulf %84, %86 : vector<64x16xf32>
    %88 = arith.addf %83, %87 : vector<64x16xf32>
    %c18 = arith.constant 18 : index
    %c0_47 = arith.constant 0 : index
    %89 = vector.load %arg10[%c18, %c0_47] : memref<82x16xf32, #tpu.memory_space<vmem>>, vector<64x16xf32>
    %c7_i32_48 = arith.constant 7 : i32
    %90 = vector.broadcast %c7_i32_48 : i32 to vector<64x1xi32>
    %91 = arith.cmpi slt, %17, %90 : vector<64x1xi32>
    %cst_49 = arith.constant 0.000000e+00 : f32
    %92 = vector.shape_cast %91 : vector<64x1xi1> to vector<64x1xi1>
    %93 = vector.broadcast %92 : vector<64x1xi1> to vector<64x16xi1>
    %94 = vector.broadcast %cst_49 : f32 to vector<64x16xf32>
    %95 = arith.select %93, %89, %94 : vector<64x16xi1>, vector<64x16xf32>
    %c8_50 = arith.constant 8 : index
    %c0_51 = arith.constant 0 : index
    %96 = vector.load %arg6[%c8_50, %c0_51] : memref<9x16xf32, #tpu.memory_space<vmem>>, vector<1x16xf32>
    %97 = vector.broadcast %96 : vector<1x16xf32> to vector<64x16xf32>
    %98 = arith.mulf %95, %97 : vector<64x16xf32>
    %99 = arith.addf %88, %98 : vector<64x16xf32>
    %c0_52 = arith.constant 0 : index
    %c0_53 = arith.constant 0 : index
    %100 = vector.load %arg7[%c0_52, %c0_53] : memref<1x16xf32, #tpu.memory_space<vmem>>, vector<1x16xf32>
    %101 = vector.broadcast %100 : vector<1x16xf32> to vector<64x16xf32>
    %102 = arith.mulf %99, %101 : vector<64x16xf32>
    %c0_54 = arith.constant 0 : index
    %c0_55 = arith.constant 0 : index
    %103 = vector.load %arg8[%c0_54, %c0_55] : memref<1x16xf32, #tpu.memory_space<vmem>>, vector<1x16xf32>
    %104 = vector.broadcast %103 : vector<1x16xf32> to vector<64x16xf32>
    %105 = arith.addf %102, %104 : vector<64x16xf32>
    %cst_56 = arith.constant 0.000000e+00 : f32
    %106 = vector.broadcast %cst_56 : f32 to vector<64x16xf32>
    %107 = arith.maximumf %105, %106 : vector<64x16xf32>
    %108 = tpu.iota {dimensions = array<i32: 1>} : vector<1x16xi32>
    %c8_i32 = arith.constant 8 : i32
    %109 = vector.broadcast %c8_i32 : i32 to vector<1x16xi32>
    %110 = arith.cmpi slt, %108, %109 : vector<1x16xi32>
    %cst_57 = arith.constant 0.000000e+00 : f32
    %111 = vector.shape_cast %110 : vector<1x16xi1> to vector<1x16xi1>
    %112 = vector.broadcast %111 : vector<1x16xi1> to vector<64x16xi1>
    %113 = vector.broadcast %cst_57 : f32 to vector<64x16xf32>
    %114 = arith.select %112, %11, %113 : vector<64x16xi1>, vector<64x16xf32>
    %115 = arith.addf %114, %107 : vector<64x16xf32>
    %116 = arith.truncf %115 : vector<64x16xf32> to vector<64x16xbf16>
    %c0_58 = arith.constant 0 : index
    %c0_59 = arith.constant 0 : index
    %c0_60 = arith.constant 0 : index
    %117 = vector.load %arg9[%c0_58, %c0_59, %c0_60] : memref<1x64x16xbf16, #tpu.memory_space<vmem>>, vector<1x64x16xbf16>
    %118 = vector.shape_cast %117 : vector<1x64x16xbf16> to vector<64x16xbf16>
    %119 = vector.shape_cast %116 : vector<64x16xbf16> to vector<1x64x16xbf16>
    tpu.vector_store %arg9[%c0_58, %c0_59, %c0_60], %119 {strides = array<i32>} : memref<1x64x16xbf16, #tpu.memory_space<vmem>>, vector<1x64x16xbf16>,
    return
  }
  func.func @transform_0(%arg0: i32) -> (i32, i32, i32) {
    %c0_i32 = arith.constant 0 : i32
    %c0_i32_0 = arith.constant 0 : i32
    %c0_i32_1 = arith.constant 0 : i32
    return %arg0, %c0_i32, %c0_i32_0 : i32, i32, i32
  }
  func.func @transform_1(%arg0: i32) -> (i32, i32) {
    %c0_i32 = arith.constant 0 : i32
    %c0_i32_0 = arith.constant 0 : i32
    %c0_i32_1 = arith.constant 0 : i32
    return %c0_i32, %c0_i32_0 : i32, i32
  }
  func.func @transform_2(%arg0: i32) -> (i32, i32) {
    %c0_i32 = arith.constant 0 : i32
    %c0_i32_0 = arith.constant 0 : i32
    %c0_i32_1 = arith.constant 0 : i32
    return %c0_i32, %c0_i32_0 : i32, i32
  }
  func.func @transform_3(%arg0: i32) -> (i32, i32) {
    %c0_i32 = arith.constant 0 : i32
    %c0_i32_0 = arith.constant 0 : i32
    %c0_i32_1 = arith.constant 0 : i32
    return %c0_i32, %c0_i32_0 : i32, i32
  }
  func.func @transform_4(%arg0: i32) -> (i32, i32) {
    %c0_i32 = arith.constant 0 : i32
    %c0_i32_0 = arith.constant 0 : i32
    %c0_i32_1 = arith.constant 0 : i32
    return %c0_i32, %c0_i32_0 : i32, i32
  }
  func.func @transform_5(%arg0: i32) -> (i32, i32) {
    %c0_i32 = arith.constant 0 : i32
    %c0_i32_0 = arith.constant 0 : i32
    %c0_i32_1 = arith.constant 0 : i32
    return %c0_i32, %c0_i32_0 : i32, i32
  }
  func.func @transform_6(%arg0: i32) -> (i32, i32) {
    %c0_i32 = arith.constant 0 : i32
    %c0_i32_0 = arith.constant 0 : i32
    %c0_i32_1 = arith.constant 0 : i32
    return %c0_i32, %c0_i32_0 : i32, i32
  }
  func.func @transform_7(%arg0: i32) -> (i32, i32) {
    %c0_i32 = arith.constant 0 : i32
    %c0_i32_0 = arith.constant 0 : i32
    %c0_i32_1 = arith.constant 0 : i32
    return %c0_i32, %c0_i32_0 : i32, i32
  }
  func.func @transform_8(%arg0: i32) -> (i32, i32, i32) {
    %c0_i32 = arith.constant 0 : i32
    %c0_i32_0 = arith.constant 0 : i32
    %c0_i32_1 = arith.constant 0 : i32
    return %arg0, %c0_i32, %c0_i32_0 : i32, i32, i32
  }
}

module attributes {stable_mosaic.version = 11 : i64} {
  func.func @_ghost_kernel(%arg0: i32, %arg1: memref<1x64x16xbf16, #tpu.memory_space<vmem>>, %arg2: memref<64x1xi32, #tpu.memory_space<vmem>>, %arg3: memref<16x16xbf16, #tpu.memory_space<vmem>>, %arg4: memref<1x16xf32, #tpu.memory_space<vmem>>, %arg5: memref<1x16xf32, #tpu.memory_space<vmem>>, %arg6: memref<9x16xf32, #tpu.memory_space<vmem>>, %arg7: memref<1x16xf32, #tpu.memory_space<vmem>>, %arg8: memref<1x16xf32, #tpu.memory_space<vmem>>, %arg9: memref<1x64x16xbf16, #tpu.memory_space<vmem>>, %arg10: memref<1x64x16xbf16, #tpu.memory_space<vmem>>, %arg11: memref<82x16xf32, #tpu.memory_space<vmem>>) attributes {dimension_semantics = [#tpu.dimension_semantics<parallel>], iteration_bounds = array<i64: 2>, scalar_prefetch = 0 : i64, scratch_operands = 1 : i64, tpu.core_type = #tpu.core_type<tc>, window_params = [{transform_indices = @transform_0, window_bounds = array<i64: 1, 64, 16>}, {pipeline_mode = #tpu.pipeline_mode<synchronous>, transform_indices = @transform_1, window_bounds = array<i64: 64, 1>}, {pipeline_mode = #tpu.pipeline_mode<synchronous>, transform_indices = @transform_2, window_bounds = array<i64: 16, 16>}, {pipeline_mode = #tpu.pipeline_mode<synchronous>, transform_indices = @transform_3, window_bounds = array<i64: 1, 16>}, {pipeline_mode = #tpu.pipeline_mode<synchronous>, transform_indices = @transform_4, window_bounds = array<i64: 1, 16>}, {pipeline_mode = #tpu.pipeline_mode<synchronous>, transform_indices = @transform_5, window_bounds = array<i64: 9, 16>}, {pipeline_mode = #tpu.pipeline_mode<synchronous>, transform_indices = @transform_6, window_bounds = array<i64: 1, 16>}, {pipeline_mode = #tpu.pipeline_mode<synchronous>, transform_indices = @transform_7, window_bounds = array<i64: 1, 16>}, {transform_indices = @transform_8, window_bounds = array<i64: 1, 64, 16>}, {transform_indices = @transform_9, window_bounds = array<i64: 1, 64, 16>}]} {
    %c0 = arith.constant 0 : index
    %c0_0 = arith.constant 0 : index
    %c0_1 = arith.constant 0 : index
    %0 = vector.load %arg1[%c0, %c0_0, %c0_1] : memref<1x64x16xbf16, #tpu.memory_space<vmem>>, vector<1x64x16xbf16>
    %1 = vector.shape_cast %0 : vector<1x64x16xbf16> to vector<64x16xbf16>
    %c0_2 = arith.constant 0 : index
    %c0_3 = arith.constant 0 : index
    %2 = vector.load %arg3[%c0_2, %c0_3] : memref<16x16xbf16, #tpu.memory_space<vmem>>, vector<16x16xbf16>
    %cst = arith.constant dense<0.000000e+00> : vector<64x16xf32>
    %3 = tpu.matmul %1, %2, %cst {dimension_numbers = #tpu.dot_dimension_numbers<[1], [0], [0], [1], [0, 0, 1, 1], [], []>} : vector<64x16xbf16>, vector<16x16xbf16>, vector<64x16xf32> -> vector<64x16xf32>
    %c0_4 = arith.constant 0 : index
    %c0_5 = arith.constant 0 : index
    %4 = vector.load %arg4[%c0_4, %c0_5] : memref<1x16xf32, #tpu.memory_space<vmem>>, vector<1x16xf32>
    %5 = vector.broadcast %4 : vector<1x16xf32> to vector<64x16xf32>
    %6 = arith.mulf %3, %5 : vector<64x16xf32>
    %c0_6 = arith.constant 0 : index
    %c0_7 = arith.constant 0 : index
    %7 = vector.load %arg5[%c0_6, %c0_7] : memref<1x16xf32, #tpu.memory_space<vmem>>, vector<1x16xf32>
    %8 = vector.broadcast %7 : vector<1x16xf32> to vector<64x16xf32>
    %9 = arith.addf %6, %8 : vector<64x16xf32>
    %cst_8 = arith.constant 0.000000e+00 : f32
    %10 = vector.broadcast %cst_8 : f32 to vector<9x16xf32>
    %c0_9 = arith.constant 0 : index
    %c0_10 = arith.constant 0 : index
    %11 = vector.load %arg11[%c0_9, %c0_10] : memref<82x16xf32, #tpu.memory_space<vmem>>, vector<9x16xf32>
    tpu.vector_store %arg11[%c0_9, %c0_10], %10 {strides = array<i32>} : memref<82x16xf32, #tpu.memory_space<vmem>>, vector<9x16xf32>,
    %cst_11 = arith.constant 0.000000e+00 : f32
    %12 = vector.broadcast %cst_11 : f32 to vector<9x16xf32>
    %c73 = arith.constant 73 : index
    %c0_12 = arith.constant 0 : index
    %13 = vector.load %arg11[%c73, %c0_12] : memref<82x16xf32, #tpu.memory_space<vmem>>, vector<9x16xf32>
    tpu.vector_store %arg11[%c73, %c0_12], %12 {strides = array<i32>} : memref<82x16xf32, #tpu.memory_space<vmem>>, vector<9x16xf32>,
    %c9 = arith.constant 9 : index
    %c0_13 = arith.constant 0 : index
    %14 = vector.load %arg11[%c9, %c0_13] : memref<82x16xf32, #tpu.memory_space<vmem>>, vector<64x16xf32>
    tpu.vector_store %arg11[%c9, %c0_13], %9 {strides = array<i32>} : memref<82x16xf32, #tpu.memory_space<vmem>>, vector<64x16xf32>,
    %c0_14 = arith.constant 0 : index
    %c0_15 = arith.constant 0 : index
    %15 = vector.load %arg2[%c0_14, %c0_15] : memref<64x1xi32, #tpu.memory_space<vmem>>, vector<64x1xi32>
    %cst_16 = arith.constant 0.000000e+00 : f32
    %16 = vector.broadcast %cst_16 : f32 to vector<64x16xf32>
    %c0_17 = arith.constant 0 : index
    %c0_18 = arith.constant 0 : index
    %17 = vector.load %arg11[%c0_17, %c0_18] : memref<82x16xf32, #tpu.memory_space<vmem>>, vector<64x16xf32>
    %c0_i32 = arith.constant 0 : i32
    %18 = vector.broadcast %c0_i32 : i32 to vector<64x1xi32>
    %19 = arith.cmpi sgt, %15, %18 : vector<64x1xi32>
    %cst_19 = arith.constant 0.000000e+00 : f32
    %20 = vector.shape_cast %19 : vector<64x1xi1> to vector<64x1xi1>
    %21 = vector.broadcast %20 : vector<64x1xi1> to vector<64x16xi1>
    %22 = vector.broadcast %cst_19 : f32 to vector<64x16xf32>
    %23 = arith.select %21, %17, %22 : vector<64x16xi1>, vector<64x16xf32>
    %c0_20 = arith.constant 0 : index
    %c0_21 = arith.constant 0 : index
    %24 = vector.load %arg6[%c0_20, %c0_21] : memref<9x16xf32, #tpu.memory_space<vmem>>, vector<1x16xf32>
    %25 = vector.broadcast %24 : vector<1x16xf32> to vector<64x16xf32>
    %26 = arith.mulf %23, %25 : vector<64x16xf32>
    %27 = arith.addf %16, %26 : vector<64x16xf32>
    %c1 = arith.constant 1 : index
    %c0_22 = arith.constant 0 : index
    %28 = vector.load %arg11[%c1, %c0_22] : memref<82x16xf32, #tpu.memory_space<vmem>>, vector<64x16xf32>
    %c1_23 = arith.constant 1 : index
    %c0_24 = arith.constant 0 : index
    %29 = vector.load %arg6[%c1_23, %c0_24] : memref<9x16xf32, #tpu.memory_space<vmem>>, vector<1x16xf32>
    %30 = vector.broadcast %29 : vector<1x16xf32> to vector<64x16xf32>
    %31 = arith.mulf %28, %30 : vector<64x16xf32>
    %32 = arith.addf %27, %31 : vector<64x16xf32>
    %c2 = arith.constant 2 : index
    %c0_25 = arith.constant 0 : index
    %33 = vector.load %arg11[%c2, %c0_25] : memref<82x16xf32, #tpu.memory_space<vmem>>, vector<64x16xf32>
    %c7_i32 = arith.constant 7 : i32
    %34 = vector.broadcast %c7_i32 : i32 to vector<64x1xi32>
    %35 = arith.cmpi slt, %15, %34 : vector<64x1xi32>
    %cst_26 = arith.constant 0.000000e+00 : f32
    %36 = vector.shape_cast %35 : vector<64x1xi1> to vector<64x1xi1>
    %37 = vector.broadcast %36 : vector<64x1xi1> to vector<64x16xi1>
    %38 = vector.broadcast %cst_26 : f32 to vector<64x16xf32>
    %39 = arith.select %37, %33, %38 : vector<64x16xi1>, vector<64x16xf32>
    %c2_27 = arith.constant 2 : index
    %c0_28 = arith.constant 0 : index
    %40 = vector.load %arg6[%c2_27, %c0_28] : memref<9x16xf32, #tpu.memory_space<vmem>>, vector<1x16xf32>
    %41 = vector.broadcast %40 : vector<1x16xf32> to vector<64x16xf32>
    %42 = arith.mulf %39, %41 : vector<64x16xf32>
    %43 = arith.addf %32, %42 : vector<64x16xf32>
    %c8 = arith.constant 8 : index
    %c0_29 = arith.constant 0 : index
    %44 = vector.load %arg11[%c8, %c0_29] : memref<82x16xf32, #tpu.memory_space<vmem>>, vector<64x16xf32>
    %c0_i32_30 = arith.constant 0 : i32
    %45 = vector.broadcast %c0_i32_30 : i32 to vector<64x1xi32>
    %46 = arith.cmpi sgt, %15, %45 : vector<64x1xi32>
    %cst_31 = arith.constant 0.000000e+00 : f32
    %47 = vector.shape_cast %46 : vector<64x1xi1> to vector<64x1xi1>
    %48 = vector.broadcast %47 : vector<64x1xi1> to vector<64x16xi1>
    %49 = vector.broadcast %cst_31 : f32 to vector<64x16xf32>
    %50 = arith.select %48, %44, %49 : vector<64x16xi1>, vector<64x16xf32>
    %c3 = arith.constant 3 : index
    %c0_32 = arith.constant 0 : index
    %51 = vector.load %arg6[%c3, %c0_32] : memref<9x16xf32, #tpu.memory_space<vmem>>, vector<1x16xf32>
    %52 = vector.broadcast %51 : vector<1x16xf32> to vector<64x16xf32>
    %53 = arith.mulf %50, %52 : vector<64x16xf32>
    %54 = arith.addf %43, %53 : vector<64x16xf32>
    %c9_33 = arith.constant 9 : index
    %c0_34 = arith.constant 0 : index
    %55 = vector.load %arg11[%c9_33, %c0_34] : memref<82x16xf32, #tpu.memory_space<vmem>>, vector<64x16xf32>
    %c4 = arith.constant 4 : index
    %c0_35 = arith.constant 0 : index
    %56 = vector.load %arg6[%c4, %c0_35] : memref<9x16xf32, #tpu.memory_space<vmem>>, vector<1x16xf32>
    %57 = vector.broadcast %56 : vector<1x16xf32> to vector<64x16xf32>
    %58 = arith.mulf %55, %57 : vector<64x16xf32>
    %59 = arith.addf %54, %58 : vector<64x16xf32>
    %c10 = arith.constant 10 : index
    %c0_36 = arith.constant 0 : index
    %60 = vector.load %arg11[%c10, %c0_36] : memref<82x16xf32, #tpu.memory_space<vmem>>, vector<64x16xf32>
    %c7_i32_37 = arith.constant 7 : i32
    %61 = vector.broadcast %c7_i32_37 : i32 to vector<64x1xi32>
    %62 = arith.cmpi slt, %15, %61 : vector<64x1xi32>
    %cst_38 = arith.constant 0.000000e+00 : f32
    %63 = vector.shape_cast %62 : vector<64x1xi1> to vector<64x1xi1>
    %64 = vector.broadcast %63 : vector<64x1xi1> to vector<64x16xi1>
    %65 = vector.broadcast %cst_38 : f32 to vector<64x16xf32>
    %66 = arith.select %64, %60, %65 : vector<64x16xi1>, vector<64x16xf32>
    %c5 = arith.constant 5 : index
    %c0_39 = arith.constant 0 : index
    %67 = vector.load %arg6[%c5, %c0_39] : memref<9x16xf32, #tpu.memory_space<vmem>>, vector<1x16xf32>
    %68 = vector.broadcast %67 : vector<1x16xf32> to vector<64x16xf32>
    %69 = arith.mulf %66, %68 : vector<64x16xf32>
    %70 = arith.addf %59, %69 : vector<64x16xf32>
    %c16 = arith.constant 16 : index
    %c0_40 = arith.constant 0 : index
    %71 = vector.load %arg11[%c16, %c0_40] : memref<82x16xf32, #tpu.memory_space<vmem>>, vector<64x16xf32>
    %c0_i32_41 = arith.constant 0 : i32
    %72 = vector.broadcast %c0_i32_41 : i32 to vector<64x1xi32>
    %73 = arith.cmpi sgt, %15, %72 : vector<64x1xi32>
    %cst_42 = arith.constant 0.000000e+00 : f32
    %74 = vector.shape_cast %73 : vector<64x1xi1> to vector<64x1xi1>
    %75 = vector.broadcast %74 : vector<64x1xi1> to vector<64x16xi1>
    %76 = vector.broadcast %cst_42 : f32 to vector<64x16xf32>
    %77 = arith.select %75, %71, %76 : vector<64x16xi1>, vector<64x16xf32>
    %c6 = arith.constant 6 : index
    %c0_43 = arith.constant 0 : index
    %78 = vector.load %arg6[%c6, %c0_43] : memref<9x16xf32, #tpu.memory_space<vmem>>, vector<1x16xf32>
    %79 = vector.broadcast %78 : vector<1x16xf32> to vector<64x16xf32>
    %80 = arith.mulf %77, %79 : vector<64x16xf32>
    %81 = arith.addf %70, %80 : vector<64x16xf32>
    %c17 = arith.constant 17 : index
    %c0_44 = arith.constant 0 : index
    %82 = vector.load %arg11[%c17, %c0_44] : memref<82x16xf32, #tpu.memory_space<vmem>>, vector<64x16xf32>
    %c7 = arith.constant 7 : index
    %c0_45 = arith.constant 0 : index
    %83 = vector.load %arg6[%c7, %c0_45] : memref<9x16xf32, #tpu.memory_space<vmem>>, vector<1x16xf32>
    %84 = vector.broadcast %83 : vector<1x16xf32> to vector<64x16xf32>
    %85 = arith.mulf %82, %84 : vector<64x16xf32>
    %86 = arith.addf %81, %85 : vector<64x16xf32>
    %c18 = arith.constant 18 : index
    %c0_46 = arith.constant 0 : index
    %87 = vector.load %arg11[%c18, %c0_46] : memref<82x16xf32, #tpu.memory_space<vmem>>, vector<64x16xf32>
    %c7_i32_47 = arith.constant 7 : i32
    %88 = vector.broadcast %c7_i32_47 : i32 to vector<64x1xi32>
    %89 = arith.cmpi slt, %15, %88 : vector<64x1xi32>
    %cst_48 = arith.constant 0.000000e+00 : f32
    %90 = vector.shape_cast %89 : vector<64x1xi1> to vector<64x1xi1>
    %91 = vector.broadcast %90 : vector<64x1xi1> to vector<64x16xi1>
    %92 = vector.broadcast %cst_48 : f32 to vector<64x16xf32>
    %93 = arith.select %91, %87, %92 : vector<64x16xi1>, vector<64x16xf32>
    %c8_49 = arith.constant 8 : index
    %c0_50 = arith.constant 0 : index
    %94 = vector.load %arg6[%c8_49, %c0_50] : memref<9x16xf32, #tpu.memory_space<vmem>>, vector<1x16xf32>
    %95 = vector.broadcast %94 : vector<1x16xf32> to vector<64x16xf32>
    %96 = arith.mulf %93, %95 : vector<64x16xf32>
    %97 = arith.addf %86, %96 : vector<64x16xf32>
    %c0_51 = arith.constant 0 : index
    %c0_52 = arith.constant 0 : index
    %98 = vector.load %arg7[%c0_51, %c0_52] : memref<1x16xf32, #tpu.memory_space<vmem>>, vector<1x16xf32>
    %99 = vector.broadcast %98 : vector<1x16xf32> to vector<64x16xf32>
    %100 = arith.mulf %97, %99 : vector<64x16xf32>
    %c0_53 = arith.constant 0 : index
    %c0_54 = arith.constant 0 : index
    %101 = vector.load %arg8[%c0_53, %c0_54] : memref<1x16xf32, #tpu.memory_space<vmem>>, vector<1x16xf32>
    %102 = vector.broadcast %101 : vector<1x16xf32> to vector<64x16xf32>
    %103 = arith.addf %100, %102 : vector<64x16xf32>
    %104 = tpu.iota {dimensions = array<i32: 1>} : vector<1x16xi32>
    %c8_i32 = arith.constant 8 : i32
    %105 = vector.broadcast %c8_i32 : i32 to vector<1x16xi32>
    %106 = arith.cmpi slt, %104, %105 : vector<1x16xi32>
    %cst_55 = arith.constant 0.000000e+00 : f32
    %107 = vector.shape_cast %106 : vector<1x16xi1> to vector<1x16xi1>
    %108 = vector.broadcast %107 : vector<1x16xi1> to vector<64x16xi1>
    %109 = vector.broadcast %cst_55 : f32 to vector<64x16xf32>
    %110 = arith.select %108, %9, %109 : vector<64x16xi1>, vector<64x16xf32>
    %111 = arith.addf %110, %103 : vector<64x16xf32>
    %c0_56 = arith.constant 0 : index
    %c0_57 = arith.constant 0 : index
    %c0_58 = arith.constant 0 : index
    %112 = vector.load %arg9[%c0_56, %c0_57, %c0_58] : memref<1x64x16xbf16, #tpu.memory_space<vmem>>, vector<1x64x16xbf16>
    %113 = vector.shape_cast %112 : vector<1x64x16xbf16> to vector<64x16xbf16>
    %114 = arith.extf %113 : vector<64x16xbf16> to vector<64x16xf32>
    %115 = arith.addf %111, %114 : vector<64x16xf32>
    %116 = arith.truncf %115 : vector<64x16xf32> to vector<64x16xbf16>
    %c0_59 = arith.constant 0 : index
    %c0_60 = arith.constant 0 : index
    %c0_61 = arith.constant 0 : index
    %117 = vector.load %arg10[%c0_59, %c0_60, %c0_61] : memref<1x64x16xbf16, #tpu.memory_space<vmem>>, vector<1x64x16xbf16>
    %118 = vector.shape_cast %117 : vector<1x64x16xbf16> to vector<64x16xbf16>
    %119 = vector.shape_cast %116 : vector<64x16xbf16> to vector<1x64x16xbf16>
    tpu.vector_store %arg10[%c0_59, %c0_60, %c0_61], %119 {strides = array<i32>} : memref<1x64x16xbf16, #tpu.memory_space<vmem>>, vector<1x64x16xbf16>,
    return
  }
  func.func @transform_0(%arg0: i32) -> (i32, i32, i32) {
    %c0_i32 = arith.constant 0 : i32
    %c0_i32_0 = arith.constant 0 : i32
    %c0_i32_1 = arith.constant 0 : i32
    return %arg0, %c0_i32, %c0_i32_0 : i32, i32, i32
  }
  func.func @transform_1(%arg0: i32) -> (i32, i32) {
    %c0_i32 = arith.constant 0 : i32
    %c0_i32_0 = arith.constant 0 : i32
    %c0_i32_1 = arith.constant 0 : i32
    return %c0_i32, %c0_i32_0 : i32, i32
  }
  func.func @transform_2(%arg0: i32) -> (i32, i32) {
    %c0_i32 = arith.constant 0 : i32
    %c0_i32_0 = arith.constant 0 : i32
    %c0_i32_1 = arith.constant 0 : i32
    return %c0_i32, %c0_i32_0 : i32, i32
  }
  func.func @transform_3(%arg0: i32) -> (i32, i32) {
    %c0_i32 = arith.constant 0 : i32
    %c0_i32_0 = arith.constant 0 : i32
    %c0_i32_1 = arith.constant 0 : i32
    return %c0_i32, %c0_i32_0 : i32, i32
  }
  func.func @transform_4(%arg0: i32) -> (i32, i32) {
    %c0_i32 = arith.constant 0 : i32
    %c0_i32_0 = arith.constant 0 : i32
    %c0_i32_1 = arith.constant 0 : i32
    return %c0_i32, %c0_i32_0 : i32, i32
  }
  func.func @transform_5(%arg0: i32) -> (i32, i32) {
    %c0_i32 = arith.constant 0 : i32
    %c0_i32_0 = arith.constant 0 : i32
    %c0_i32_1 = arith.constant 0 : i32
    return %c0_i32, %c0_i32_0 : i32, i32
  }
  func.func @transform_6(%arg0: i32) -> (i32, i32) {
    %c0_i32 = arith.constant 0 : i32
    %c0_i32_0 = arith.constant 0 : i32
    %c0_i32_1 = arith.constant 0 : i32
    return %c0_i32, %c0_i32_0 : i32, i32
  }
  func.func @transform_7(%arg0: i32) -> (i32, i32) {
    %c0_i32 = arith.constant 0 : i32
    %c0_i32_0 = arith.constant 0 : i32
    %c0_i32_1 = arith.constant 0 : i32
    return %c0_i32, %c0_i32_0 : i32, i32
  }
  func.func @transform_8(%arg0: i32) -> (i32, i32, i32) {
    %c0_i32 = arith.constant 0 : i32
    %c0_i32_0 = arith.constant 0 : i32
    %c0_i32_1 = arith.constant 0 : i32
    return %arg0, %c0_i32, %c0_i32_0 : i32, i32, i32
  }
  func.func @transform_9(%arg0: i32) -> (i32, i32, i32) {
    %c0_i32 = arith.constant 0 : i32
    %c0_i32_0 = arith.constant 0 : i32
    %c0_i32_1 = arith.constant 0 : i32
    return %arg0, %c0_i32, %c0_i32_0 : i32, i32, i32
  }
}

module attributes {stable_mosaic.version = 11 : i64} {
  func.func @_dw_phases_kernel(%arg0: i32, %arg1: memref<1x5x5x16xbf16, #tpu.memory_space<vmem>>, %arg2: memref<1x5x5x16xbf16, #tpu.memory_space<vmem>>, %arg3: memref<1x5x5x16xbf16, #tpu.memory_space<vmem>>, %arg4: memref<1x5x5x16xbf16, #tpu.memory_space<vmem>>, %arg5: memref<9x16xf32, #tpu.memory_space<vmem>>, %arg6: memref<1x16xf32, #tpu.memory_space<vmem>>, %arg7: memref<1x16xf32, #tpu.memory_space<vmem>>, %arg8: memref<1x4x4x16xbf16, #tpu.memory_space<vmem>>, %arg9: memref<5x5x16xf32, #tpu.memory_space<vmem>>, %arg10: memref<5x5x16xf32, #tpu.memory_space<vmem>>, %arg11: memref<5x5x16xf32, #tpu.memory_space<vmem>>, %arg12: memref<5x5x16xf32, #tpu.memory_space<vmem>>) attributes {dimension_semantics = [#tpu.dimension_semantics<parallel>], iteration_bounds = array<i64: 2>, scalar_prefetch = 0 : i64, scratch_operands = 4 : i64, tpu.core_type = #tpu.core_type<tc>, window_params = [{transform_indices = @transform_0, window_bounds = array<i64: 1, 5, 5, 16>}, {transform_indices = @transform_1, window_bounds = array<i64: 1, 5, 5, 16>}, {transform_indices = @transform_2, window_bounds = array<i64: 1, 5, 5, 16>}, {transform_indices = @transform_3, window_bounds = array<i64: 1, 5, 5, 16>}, {pipeline_mode = #tpu.pipeline_mode<synchronous>, transform_indices = @transform_4, window_bounds = array<i64: 9, 16>}, {pipeline_mode = #tpu.pipeline_mode<synchronous>, transform_indices = @transform_5, window_bounds = array<i64: 1, 16>}, {pipeline_mode = #tpu.pipeline_mode<synchronous>, transform_indices = @transform_6, window_bounds = array<i64: 1, 16>}, {transform_indices = @transform_7, window_bounds = array<i64: 1, 4, 4, 16>}]} {
    %c0 = arith.constant 0 : index
    %c0_0 = arith.constant 0 : index
    %c0_1 = arith.constant 0 : index
    %c0_2 = arith.constant 0 : index
    %0 = vector.load %arg1[%c0, %c0_0, %c0_1, %c0_2] : memref<1x5x5x16xbf16, #tpu.memory_space<vmem>>, vector<1x5x5x16xbf16>
    %1 = vector.shape_cast %0 : vector<1x5x5x16xbf16> to vector<5x5x16xbf16>
    %2 = arith.extf %1 : vector<5x5x16xbf16> to vector<5x5x16xf32>
    %c0_3 = arith.constant 0 : index
    %c0_4 = arith.constant 0 : index
    %c0_5 = arith.constant 0 : index
    %3 = vector.load %arg9[%c0_3, %c0_4, %c0_5] : memref<5x5x16xf32, #tpu.memory_space<vmem>>, vector<5x5x16xf32>
    tpu.vector_store %arg9[%c0_3, %c0_4, %c0_5], %2 {strides = array<i32>} : memref<5x5x16xf32, #tpu.memory_space<vmem>>, vector<5x5x16xf32>,
    %c0_6 = arith.constant 0 : index
    %c0_7 = arith.constant 0 : index
    %c0_8 = arith.constant 0 : index
    %c0_9 = arith.constant 0 : index
    %4 = vector.load %arg2[%c0_6, %c0_7, %c0_8, %c0_9] : memref<1x5x5x16xbf16, #tpu.memory_space<vmem>>, vector<1x5x5x16xbf16>
    %5 = vector.shape_cast %4 : vector<1x5x5x16xbf16> to vector<5x5x16xbf16>
    %6 = arith.extf %5 : vector<5x5x16xbf16> to vector<5x5x16xf32>
    %c0_10 = arith.constant 0 : index
    %c0_11 = arith.constant 0 : index
    %c0_12 = arith.constant 0 : index
    %7 = vector.load %arg10[%c0_10, %c0_11, %c0_12] : memref<5x5x16xf32, #tpu.memory_space<vmem>>, vector<5x5x16xf32>
    tpu.vector_store %arg10[%c0_10, %c0_11, %c0_12], %6 {strides = array<i32>} : memref<5x5x16xf32, #tpu.memory_space<vmem>>, vector<5x5x16xf32>,
    %c0_13 = arith.constant 0 : index
    %c0_14 = arith.constant 0 : index
    %c0_15 = arith.constant 0 : index
    %c0_16 = arith.constant 0 : index
    %8 = vector.load %arg3[%c0_13, %c0_14, %c0_15, %c0_16] : memref<1x5x5x16xbf16, #tpu.memory_space<vmem>>, vector<1x5x5x16xbf16>
    %9 = vector.shape_cast %8 : vector<1x5x5x16xbf16> to vector<5x5x16xbf16>
    %10 = arith.extf %9 : vector<5x5x16xbf16> to vector<5x5x16xf32>
    %c0_17 = arith.constant 0 : index
    %c0_18 = arith.constant 0 : index
    %c0_19 = arith.constant 0 : index
    %11 = vector.load %arg11[%c0_17, %c0_18, %c0_19] : memref<5x5x16xf32, #tpu.memory_space<vmem>>, vector<5x5x16xf32>
    tpu.vector_store %arg11[%c0_17, %c0_18, %c0_19], %10 {strides = array<i32>} : memref<5x5x16xf32, #tpu.memory_space<vmem>>, vector<5x5x16xf32>,
    %c0_20 = arith.constant 0 : index
    %c0_21 = arith.constant 0 : index
    %c0_22 = arith.constant 0 : index
    %c0_23 = arith.constant 0 : index
    %12 = vector.load %arg4[%c0_20, %c0_21, %c0_22, %c0_23] : memref<1x5x5x16xbf16, #tpu.memory_space<vmem>>, vector<1x5x5x16xbf16>
    %13 = vector.shape_cast %12 : vector<1x5x5x16xbf16> to vector<5x5x16xbf16>
    %14 = arith.extf %13 : vector<5x5x16xbf16> to vector<5x5x16xf32>
    %c0_24 = arith.constant 0 : index
    %c0_25 = arith.constant 0 : index
    %c0_26 = arith.constant 0 : index
    %15 = vector.load %arg12[%c0_24, %c0_25, %c0_26] : memref<5x5x16xf32, #tpu.memory_space<vmem>>, vector<5x5x16xf32>
    tpu.vector_store %arg12[%c0_24, %c0_25, %c0_26], %14 {strides = array<i32>} : memref<5x5x16xf32, #tpu.memory_space<vmem>>, vector<5x5x16xf32>,
    %cst = arith.constant 0.000000e+00 : f32
    %16 = vector.broadcast %cst : f32 to vector<4x4x16xf32>
    %c0_27 = arith.constant 0 : index
    %c0_28 = arith.constant 0 : index
    %c0_29 = arith.constant 0 : index
    %17 = vector.load %arg9[%c0_27, %c0_28, %c0_29] : memref<5x5x16xf32, #tpu.memory_space<vmem>>, vector<4x4x16xf32>
    %c0_30 = arith.constant 0 : index
    %c0_31 = arith.constant 0 : index
    %18 = vector.load %arg5[%c0_30, %c0_31] : memref<9x16xf32, #tpu.memory_space<vmem>>, vector<1x16xf32>
    %19 = vector.shape_cast %18 : vector<1x16xf32> to vector<1x1x16xf32>
    %20 = vector.broadcast %19 : vector<1x1x16xf32> to vector<4x4x16xf32>
    %21 = arith.mulf %17, %20 : vector<4x4x16xf32>
    %22 = arith.addf %16, %21 : vector<4x4x16xf32>
    %c0_32 = arith.constant 0 : index
    %c0_33 = arith.constant 0 : index
    %c0_34 = arith.constant 0 : index
    %23 = vector.load %arg10[%c0_32, %c0_33, %c0_34] : memref<5x5x16xf32, #tpu.memory_space<vmem>>, vector<4x4x16xf32>
    %c1 = arith.constant 1 : index
    %c0_35 = arith.constant 0 : index
    %24 = vector.load %arg5[%c1, %c0_35] : memref<9x16xf32, #tpu.memory_space<vmem>>, vector<1x16xf32>
    %25 = vector.shape_cast %24 : vector<1x16xf32> to vector<1x1x16xf32>
    %26 = vector.broadcast %25 : vector<1x1x16xf32> to vector<4x4x16xf32>
    %27 = arith.mulf %23, %26 : vector<4x4x16xf32>
    %28 = arith.addf %22, %27 : vector<4x4x16xf32>
    %c0_36 = arith.constant 0 : index
    %c1_37 = arith.constant 1 : index
    %c0_38 = arith.constant 0 : index
    %29 = vector.load %arg9[%c0_36, %c1_37, %c0_38] : memref<5x5x16xf32, #tpu.memory_space<vmem>>, vector<4x4x16xf32>
    %c2 = arith.constant 2 : index
    %c0_39 = arith.constant 0 : index
    %30 = vector.load %arg5[%c2, %c0_39] : memref<9x16xf32, #tpu.memory_space<vmem>>, vector<1x16xf32>
    %31 = vector.shape_cast %30 : vector<1x16xf32> to vector<1x1x16xf32>
    %32 = vector.broadcast %31 : vector<1x1x16xf32> to vector<4x4x16xf32>
    %33 = arith.mulf %29, %32 : vector<4x4x16xf32>
    %34 = arith.addf %28, %33 : vector<4x4x16xf32>
    %c0_40 = arith.constant 0 : index
    %c0_41 = arith.constant 0 : index
    %c0_42 = arith.constant 0 : index
    %35 = vector.load %arg11[%c0_40, %c0_41, %c0_42] : memref<5x5x16xf32, #tpu.memory_space<vmem>>, vector<4x4x16xf32>
    %c3 = arith.constant 3 : index
    %c0_43 = arith.constant 0 : index
    %36 = vector.load %arg5[%c3, %c0_43] : memref<9x16xf32, #tpu.memory_space<vmem>>, vector<1x16xf32>
    %37 = vector.shape_cast %36 : vector<1x16xf32> to vector<1x1x16xf32>
    %38 = vector.broadcast %37 : vector<1x1x16xf32> to vector<4x4x16xf32>
    %39 = arith.mulf %35, %38 : vector<4x4x16xf32>
    %40 = arith.addf %34, %39 : vector<4x4x16xf32>
    %c0_44 = arith.constant 0 : index
    %c0_45 = arith.constant 0 : index
    %c0_46 = arith.constant 0 : index
    %41 = vector.load %arg12[%c0_44, %c0_45, %c0_46] : memref<5x5x16xf32, #tpu.memory_space<vmem>>, vector<4x4x16xf32>
    %c4 = arith.constant 4 : index
    %c0_47 = arith.constant 0 : index
    %42 = vector.load %arg5[%c4, %c0_47] : memref<9x16xf32, #tpu.memory_space<vmem>>, vector<1x16xf32>
    %43 = vector.shape_cast %42 : vector<1x16xf32> to vector<1x1x16xf32>
    %44 = vector.broadcast %43 : vector<1x1x16xf32> to vector<4x4x16xf32>
    %45 = arith.mulf %41, %44 : vector<4x4x16xf32>
    %46 = arith.addf %40, %45 : vector<4x4x16xf32>
    %c0_48 = arith.constant 0 : index
    %c1_49 = arith.constant 1 : index
    %c0_50 = arith.constant 0 : index
    %47 = vector.load %arg11[%c0_48, %c1_49, %c0_50] : memref<5x5x16xf32, #tpu.memory_space<vmem>>, vector<4x4x16xf32>
    %c5 = arith.constant 5 : index
    %c0_51 = arith.constant 0 : index
    %48 = vector.load %arg5[%c5, %c0_51] : memref<9x16xf32, #tpu.memory_space<vmem>>, vector<1x16xf32>
    %49 = vector.shape_cast %48 : vector<1x16xf32> to vector<1x1x16xf32>
    %50 = vector.broadcast %49 : vector<1x1x16xf32> to vector<4x4x16xf32>
    %51 = arith.mulf %47, %50 : vector<4x4x16xf32>
    %52 = arith.addf %46, %51 : vector<4x4x16xf32>
    %c1_52 = arith.constant 1 : index
    %c0_53 = arith.constant 0 : index
    %c0_54 = arith.constant 0 : index
    %53 = vector.load %arg9[%c1_52, %c0_53, %c0_54] : memref<5x5x16xf32, #tpu.memory_space<vmem>>, vector<4x4x16xf32>
    %c6 = arith.constant 6 : index
    %c0_55 = arith.constant 0 : index
    %54 = vector.load %arg5[%c6, %c0_55] : memref<9x16xf32, #tpu.memory_space<vmem>>, vector<1x16xf32>
    %55 = vector.shape_cast %54 : vector<1x16xf32> to vector<1x1x16xf32>
    %56 = vector.broadcast %55 : vector<1x1x16xf32> to vector<4x4x16xf32>
    %57 = arith.mulf %53, %56 : vector<4x4x16xf32>
    %58 = arith.addf %52, %57 : vector<4x4x16xf32>
    %c1_56 = arith.constant 1 : index
    %c0_57 = arith.constant 0 : index
    %c0_58 = arith.constant 0 : index
    %59 = vector.load %arg10[%c1_56, %c0_57, %c0_58] : memref<5x5x16xf32, #tpu.memory_space<vmem>>, vector<4x4x16xf32>
    %c7 = arith.constant 7 : index
    %c0_59 = arith.constant 0 : index
    %60 = vector.load %arg5[%c7, %c0_59] : memref<9x16xf32, #tpu.memory_space<vmem>>, vector<1x16xf32>
    %61 = vector.shape_cast %60 : vector<1x16xf32> to vector<1x1x16xf32>
    %62 = vector.broadcast %61 : vector<1x1x16xf32> to vector<4x4x16xf32>
    %63 = arith.mulf %59, %62 : vector<4x4x16xf32>
    %64 = arith.addf %58, %63 : vector<4x4x16xf32>
    %c1_60 = arith.constant 1 : index
    %c1_61 = arith.constant 1 : index
    %c0_62 = arith.constant 0 : index
    %65 = vector.load %arg9[%c1_60, %c1_61, %c0_62] : memref<5x5x16xf32, #tpu.memory_space<vmem>>, vector<4x4x16xf32>
    %c8 = arith.constant 8 : index
    %c0_63 = arith.constant 0 : index
    %66 = vector.load %arg5[%c8, %c0_63] : memref<9x16xf32, #tpu.memory_space<vmem>>, vector<1x16xf32>
    %67 = vector.shape_cast %66 : vector<1x16xf32> to vector<1x1x16xf32>
    %68 = vector.broadcast %67 : vector<1x1x16xf32> to vector<4x4x16xf32>
    %69 = arith.mulf %65, %68 : vector<4x4x16xf32>
    %70 = arith.addf %64, %69 : vector<4x4x16xf32>
    %c0_64 = arith.constant 0 : index
    %c0_65 = arith.constant 0 : index
    %71 = vector.load %arg6[%c0_64, %c0_65] : memref<1x16xf32, #tpu.memory_space<vmem>>, vector<1x16xf32>
    %72 = vector.shape_cast %71 : vector<1x16xf32> to vector<1x1x16xf32>
    %73 = vector.broadcast %72 : vector<1x1x16xf32> to vector<4x4x16xf32>
    %74 = arith.mulf %70, %73 : vector<4x4x16xf32>
    %c0_66 = arith.constant 0 : index
    %c0_67 = arith.constant 0 : index
    %75 = vector.load %arg7[%c0_66, %c0_67] : memref<1x16xf32, #tpu.memory_space<vmem>>, vector<1x16xf32>
    %76 = vector.shape_cast %75 : vector<1x16xf32> to vector<1x1x16xf32>
    %77 = vector.broadcast %76 : vector<1x1x16xf32> to vector<4x4x16xf32>
    %78 = arith.addf %74, %77 : vector<4x4x16xf32>
    %79 = arith.truncf %78 : vector<4x4x16xf32> to vector<4x4x16xbf16>
    %c0_68 = arith.constant 0 : index
    %c0_69 = arith.constant 0 : index
    %c0_70 = arith.constant 0 : index
    %c0_71 = arith.constant 0 : index
    %80 = vector.load %arg8[%c0_68, %c0_69, %c0_70, %c0_71] : memref<1x4x4x16xbf16, #tpu.memory_space<vmem>>, vector<1x4x4x16xbf16>
    %81 = vector.shape_cast %80 : vector<1x4x4x16xbf16> to vector<4x4x16xbf16>
    %82 = vector.shape_cast %79 : vector<4x4x16xbf16> to vector<1x4x4x16xbf16>
    tpu.vector_store %arg8[%c0_68, %c0_69, %c0_70, %c0_71], %82 {strides = array<i32>} : memref<1x4x4x16xbf16, #tpu.memory_space<vmem>>, vector<1x4x4x16xbf16>,
    return
  }
  func.func @transform_0(%arg0: i32) -> (i32, i32, i32, i32) {
    %c0_i32 = arith.constant 0 : i32
    %c0_i32_0 = arith.constant 0 : i32
    %c0_i32_1 = arith.constant 0 : i32
    %c0_i32_2 = arith.constant 0 : i32
    return %arg0, %c0_i32, %c0_i32_0, %c0_i32_1 : i32, i32, i32, i32
  }
  func.func @transform_1(%arg0: i32) -> (i32, i32, i32, i32) {
    %c0_i32 = arith.constant 0 : i32
    %c0_i32_0 = arith.constant 0 : i32
    %c0_i32_1 = arith.constant 0 : i32
    %c0_i32_2 = arith.constant 0 : i32
    return %arg0, %c0_i32, %c0_i32_0, %c0_i32_1 : i32, i32, i32, i32
  }
  func.func @transform_2(%arg0: i32) -> (i32, i32, i32, i32) {
    %c0_i32 = arith.constant 0 : i32
    %c0_i32_0 = arith.constant 0 : i32
    %c0_i32_1 = arith.constant 0 : i32
    %c0_i32_2 = arith.constant 0 : i32
    return %arg0, %c0_i32, %c0_i32_0, %c0_i32_1 : i32, i32, i32, i32
  }
  func.func @transform_3(%arg0: i32) -> (i32, i32, i32, i32) {
    %c0_i32 = arith.constant 0 : i32
    %c0_i32_0 = arith.constant 0 : i32
    %c0_i32_1 = arith.constant 0 : i32
    %c0_i32_2 = arith.constant 0 : i32
    return %arg0, %c0_i32, %c0_i32_0, %c0_i32_1 : i32, i32, i32, i32
  }
  func.func @transform_4(%arg0: i32) -> (i32, i32) {
    %c0_i32 = arith.constant 0 : i32
    %c0_i32_0 = arith.constant 0 : i32
    %c0_i32_1 = arith.constant 0 : i32
    return %c0_i32, %c0_i32_0 : i32, i32
  }
  func.func @transform_5(%arg0: i32) -> (i32, i32) {
    %c0_i32 = arith.constant 0 : i32
    %c0_i32_0 = arith.constant 0 : i32
    %c0_i32_1 = arith.constant 0 : i32
    return %c0_i32, %c0_i32_0 : i32, i32
  }
  func.func @transform_6(%arg0: i32) -> (i32, i32) {
    %c0_i32 = arith.constant 0 : i32
    %c0_i32_0 = arith.constant 0 : i32
    %c0_i32_1 = arith.constant 0 : i32
    return %c0_i32, %c0_i32_0 : i32, i32
  }
  func.func @transform_7(%arg0: i32) -> (i32, i32, i32, i32) {
    %c0_i32 = arith.constant 0 : i32
    %c0_i32_0 = arith.constant 0 : i32
    %c0_i32_1 = arith.constant 0 : i32
    %c0_i32_2 = arith.constant 0 : i32
    return %arg0, %c0_i32, %c0_i32_0, %c0_i32_1 : i32, i32, i32, i32
  }
}

module attributes {stable_mosaic.version = 11 : i64} {
  func.func @_ghost_kernel(%arg0: i32, %arg1: memref<1x64x16xbf16, #tpu.memory_space<vmem>>, %arg2: memref<64x1xi32, #tpu.memory_space<vmem>>, %arg3: memref<16x48xbf16, #tpu.memory_space<vmem>>, %arg4: memref<1x48xf32, #tpu.memory_space<vmem>>, %arg5: memref<1x48xf32, #tpu.memory_space<vmem>>, %arg6: memref<9x48xf32, #tpu.memory_space<vmem>>, %arg7: memref<1x48xf32, #tpu.memory_space<vmem>>, %arg8: memref<1x48xf32, #tpu.memory_space<vmem>>, %arg9: memref<1x64x48xbf16, #tpu.memory_space<vmem>>, %arg10: memref<82x48xf32, #tpu.memory_space<vmem>>) attributes {dimension_semantics = [#tpu.dimension_semantics<parallel>], iteration_bounds = array<i64: 2>, scalar_prefetch = 0 : i64, scratch_operands = 1 : i64, tpu.core_type = #tpu.core_type<tc>, window_params = [{transform_indices = @transform_0, window_bounds = array<i64: 1, 64, 16>}, {pipeline_mode = #tpu.pipeline_mode<synchronous>, transform_indices = @transform_1, window_bounds = array<i64: 64, 1>}, {pipeline_mode = #tpu.pipeline_mode<synchronous>, transform_indices = @transform_2, window_bounds = array<i64: 16, 48>}, {pipeline_mode = #tpu.pipeline_mode<synchronous>, transform_indices = @transform_3, window_bounds = array<i64: 1, 48>}, {pipeline_mode = #tpu.pipeline_mode<synchronous>, transform_indices = @transform_4, window_bounds = array<i64: 1, 48>}, {pipeline_mode = #tpu.pipeline_mode<synchronous>, transform_indices = @transform_5, window_bounds = array<i64: 9, 48>}, {pipeline_mode = #tpu.pipeline_mode<synchronous>, transform_indices = @transform_6, window_bounds = array<i64: 1, 48>}, {pipeline_mode = #tpu.pipeline_mode<synchronous>, transform_indices = @transform_7, window_bounds = array<i64: 1, 48>}, {transform_indices = @transform_8, window_bounds = array<i64: 1, 64, 48>}]} {
    %c0 = arith.constant 0 : index
    %c0_0 = arith.constant 0 : index
    %c0_1 = arith.constant 0 : index
    %0 = vector.load %arg1[%c0, %c0_0, %c0_1] : memref<1x64x16xbf16, #tpu.memory_space<vmem>>, vector<1x64x16xbf16>
    %1 = vector.shape_cast %0 : vector<1x64x16xbf16> to vector<64x16xbf16>
    %c0_2 = arith.constant 0 : index
    %c0_3 = arith.constant 0 : index
    %2 = vector.load %arg3[%c0_2, %c0_3] : memref<16x48xbf16, #tpu.memory_space<vmem>>, vector<16x48xbf16>
    %cst = arith.constant dense<0.000000e+00> : vector<64x48xf32>
    %3 = tpu.matmul %1, %2, %cst {dimension_numbers = #tpu.dot_dimension_numbers<[1], [0], [0], [1], [0, 0, 1, 1], [], []>} : vector<64x16xbf16>, vector<16x48xbf16>, vector<64x48xf32> -> vector<64x48xf32>
    %c0_4 = arith.constant 0 : index
    %c0_5 = arith.constant 0 : index
    %4 = vector.load %arg4[%c0_4, %c0_5] : memref<1x48xf32, #tpu.memory_space<vmem>>, vector<1x48xf32>
    %5 = vector.broadcast %4 : vector<1x48xf32> to vector<64x48xf32>
    %6 = arith.mulf %3, %5 : vector<64x48xf32>
    %c0_6 = arith.constant 0 : index
    %c0_7 = arith.constant 0 : index
    %7 = vector.load %arg5[%c0_6, %c0_7] : memref<1x48xf32, #tpu.memory_space<vmem>>, vector<1x48xf32>
    %8 = vector.broadcast %7 : vector<1x48xf32> to vector<64x48xf32>
    %9 = arith.addf %6, %8 : vector<64x48xf32>
    %cst_8 = arith.constant 0.000000e+00 : f32
    %10 = vector.broadcast %cst_8 : f32 to vector<64x48xf32>
    %11 = arith.maximumf %9, %10 : vector<64x48xf32>
    %cst_9 = arith.constant 0.000000e+00 : f32
    %12 = vector.broadcast %cst_9 : f32 to vector<9x48xf32>
    %c0_10 = arith.constant 0 : index
    %c0_11 = arith.constant 0 : index
    %13 = vector.load %arg10[%c0_10, %c0_11] : memref<82x48xf32, #tpu.memory_space<vmem>>, vector<9x48xf32>
    tpu.vector_store %arg10[%c0_10, %c0_11], %12 {strides = array<i32>} : memref<82x48xf32, #tpu.memory_space<vmem>>, vector<9x48xf32>,
    %cst_12 = arith.constant 0.000000e+00 : f32
    %14 = vector.broadcast %cst_12 : f32 to vector<9x48xf32>
    %c73 = arith.constant 73 : index
    %c0_13 = arith.constant 0 : index
    %15 = vector.load %arg10[%c73, %c0_13] : memref<82x48xf32, #tpu.memory_space<vmem>>, vector<9x48xf32>
    tpu.vector_store %arg10[%c73, %c0_13], %14 {strides = array<i32>} : memref<82x48xf32, #tpu.memory_space<vmem>>, vector<9x48xf32>,
    %c9 = arith.constant 9 : index
    %c0_14 = arith.constant 0 : index
    %16 = vector.load %arg10[%c9, %c0_14] : memref<82x48xf32, #tpu.memory_space<vmem>>, vector<64x48xf32>
    tpu.vector_store %arg10[%c9, %c0_14], %11 {strides = array<i32>} : memref<82x48xf32, #tpu.memory_space<vmem>>, vector<64x48xf32>,
    %c0_15 = arith.constant 0 : index
    %c0_16 = arith.constant 0 : index
    %17 = vector.load %arg2[%c0_15, %c0_16] : memref<64x1xi32, #tpu.memory_space<vmem>>, vector<64x1xi32>
    %cst_17 = arith.constant 0.000000e+00 : f32
    %18 = vector.broadcast %cst_17 : f32 to vector<64x48xf32>
    %c0_18 = arith.constant 0 : index
    %c0_19 = arith.constant 0 : index
    %19 = vector.load %arg10[%c0_18, %c0_19] : memref<82x48xf32, #tpu.memory_space<vmem>>, vector<64x48xf32>
    %c0_i32 = arith.constant 0 : i32
    %20 = vector.broadcast %c0_i32 : i32 to vector<64x1xi32>
    %21 = arith.cmpi sgt, %17, %20 : vector<64x1xi32>
    %cst_20 = arith.constant 0.000000e+00 : f32
    %22 = vector.shape_cast %21 : vector<64x1xi1> to vector<64x1xi1>
    %23 = vector.broadcast %22 : vector<64x1xi1> to vector<64x48xi1>
    %24 = vector.broadcast %cst_20 : f32 to vector<64x48xf32>
    %25 = arith.select %23, %19, %24 : vector<64x48xi1>, vector<64x48xf32>
    %c0_21 = arith.constant 0 : index
    %c0_22 = arith.constant 0 : index
    %26 = vector.load %arg6[%c0_21, %c0_22] : memref<9x48xf32, #tpu.memory_space<vmem>>, vector<1x48xf32>
    %27 = vector.broadcast %26 : vector<1x48xf32> to vector<64x48xf32>
    %28 = arith.mulf %25, %27 : vector<64x48xf32>
    %29 = arith.addf %18, %28 : vector<64x48xf32>
    %c1 = arith.constant 1 : index
    %c0_23 = arith.constant 0 : index
    %30 = vector.load %arg10[%c1, %c0_23] : memref<82x48xf32, #tpu.memory_space<vmem>>, vector<64x48xf32>
    %c1_24 = arith.constant 1 : index
    %c0_25 = arith.constant 0 : index
    %31 = vector.load %arg6[%c1_24, %c0_25] : memref<9x48xf32, #tpu.memory_space<vmem>>, vector<1x48xf32>
    %32 = vector.broadcast %31 : vector<1x48xf32> to vector<64x48xf32>
    %33 = arith.mulf %30, %32 : vector<64x48xf32>
    %34 = arith.addf %29, %33 : vector<64x48xf32>
    %c2 = arith.constant 2 : index
    %c0_26 = arith.constant 0 : index
    %35 = vector.load %arg10[%c2, %c0_26] : memref<82x48xf32, #tpu.memory_space<vmem>>, vector<64x48xf32>
    %c7_i32 = arith.constant 7 : i32
    %36 = vector.broadcast %c7_i32 : i32 to vector<64x1xi32>
    %37 = arith.cmpi slt, %17, %36 : vector<64x1xi32>
    %cst_27 = arith.constant 0.000000e+00 : f32
    %38 = vector.shape_cast %37 : vector<64x1xi1> to vector<64x1xi1>
    %39 = vector.broadcast %38 : vector<64x1xi1> to vector<64x48xi1>
    %40 = vector.broadcast %cst_27 : f32 to vector<64x48xf32>
    %41 = arith.select %39, %35, %40 : vector<64x48xi1>, vector<64x48xf32>
    %c2_28 = arith.constant 2 : index
    %c0_29 = arith.constant 0 : index
    %42 = vector.load %arg6[%c2_28, %c0_29] : memref<9x48xf32, #tpu.memory_space<vmem>>, vector<1x48xf32>
    %43 = vector.broadcast %42 : vector<1x48xf32> to vector<64x48xf32>
    %44 = arith.mulf %41, %43 : vector<64x48xf32>
    %45 = arith.addf %34, %44 : vector<64x48xf32>
    %c8 = arith.constant 8 : index
    %c0_30 = arith.constant 0 : index
    %46 = vector.load %arg10[%c8, %c0_30] : memref<82x48xf32, #tpu.memory_space<vmem>>, vector<64x48xf32>
    %c0_i32_31 = arith.constant 0 : i32
    %47 = vector.broadcast %c0_i32_31 : i32 to vector<64x1xi32>
    %48 = arith.cmpi sgt, %17, %47 : vector<64x1xi32>
    %cst_32 = arith.constant 0.000000e+00 : f32
    %49 = vector.shape_cast %48 : vector<64x1xi1> to vector<64x1xi1>
    %50 = vector.broadcast %49 : vector<64x1xi1> to vector<64x48xi1>
    %51 = vector.broadcast %cst_32 : f32 to vector<64x48xf32>
    %52 = arith.select %50, %46, %51 : vector<64x48xi1>, vector<64x48xf32>
    %c3 = arith.constant 3 : index
    %c0_33 = arith.constant 0 : index
    %53 = vector.load %arg6[%c3, %c0_33] : memref<9x48xf32, #tpu.memory_space<vmem>>, vector<1x48xf32>
    %54 = vector.broadcast %53 : vector<1x48xf32> to vector<64x48xf32>
    %55 = arith.mulf %52, %54 : vector<64x48xf32>
    %56 = arith.addf %45, %55 : vector<64x48xf32>
    %c9_34 = arith.constant 9 : index
    %c0_35 = arith.constant 0 : index
    %57 = vector.load %arg10[%c9_34, %c0_35] : memref<82x48xf32, #tpu.memory_space<vmem>>, vector<64x48xf32>
    %c4 = arith.constant 4 : index
    %c0_36 = arith.constant 0 : index
    %58 = vector.load %arg6[%c4, %c0_36] : memref<9x48xf32, #tpu.memory_space<vmem>>, vector<1x48xf32>
    %59 = vector.broadcast %58 : vector<1x48xf32> to vector<64x48xf32>
    %60 = arith.mulf %57, %59 : vector<64x48xf32>
    %61 = arith.addf %56, %60 : vector<64x48xf32>
    %c10 = arith.constant 10 : index
    %c0_37 = arith.constant 0 : index
    %62 = vector.load %arg10[%c10, %c0_37] : memref<82x48xf32, #tpu.memory_space<vmem>>, vector<64x48xf32>
    %c7_i32_38 = arith.constant 7 : i32
    %63 = vector.broadcast %c7_i32_38 : i32 to vector<64x1xi32>
    %64 = arith.cmpi slt, %17, %63 : vector<64x1xi32>
    %cst_39 = arith.constant 0.000000e+00 : f32
    %65 = vector.shape_cast %64 : vector<64x1xi1> to vector<64x1xi1>
    %66 = vector.broadcast %65 : vector<64x1xi1> to vector<64x48xi1>
    %67 = vector.broadcast %cst_39 : f32 to vector<64x48xf32>
    %68 = arith.select %66, %62, %67 : vector<64x48xi1>, vector<64x48xf32>
    %c5 = arith.constant 5 : index
    %c0_40 = arith.constant 0 : index
    %69 = vector.load %arg6[%c5, %c0_40] : memref<9x48xf32, #tpu.memory_space<vmem>>, vector<1x48xf32>
    %70 = vector.broadcast %69 : vector<1x48xf32> to vector<64x48xf32>
    %71 = arith.mulf %68, %70 : vector<64x48xf32>
    %72 = arith.addf %61, %71 : vector<64x48xf32>
    %c16 = arith.constant 16 : index
    %c0_41 = arith.constant 0 : index
    %73 = vector.load %arg10[%c16, %c0_41] : memref<82x48xf32, #tpu.memory_space<vmem>>, vector<64x48xf32>
    %c0_i32_42 = arith.constant 0 : i32
    %74 = vector.broadcast %c0_i32_42 : i32 to vector<64x1xi32>
    %75 = arith.cmpi sgt, %17, %74 : vector<64x1xi32>
    %cst_43 = arith.constant 0.000000e+00 : f32
    %76 = vector.shape_cast %75 : vector<64x1xi1> to vector<64x1xi1>
    %77 = vector.broadcast %76 : vector<64x1xi1> to vector<64x48xi1>
    %78 = vector.broadcast %cst_43 : f32 to vector<64x48xf32>
    %79 = arith.select %77, %73, %78 : vector<64x48xi1>, vector<64x48xf32>
    %c6 = arith.constant 6 : index
    %c0_44 = arith.constant 0 : index
    %80 = vector.load %arg6[%c6, %c0_44] : memref<9x48xf32, #tpu.memory_space<vmem>>, vector<1x48xf32>
    %81 = vector.broadcast %80 : vector<1x48xf32> to vector<64x48xf32>
    %82 = arith.mulf %79, %81 : vector<64x48xf32>
    %83 = arith.addf %72, %82 : vector<64x48xf32>
    %c17 = arith.constant 17 : index
    %c0_45 = arith.constant 0 : index
    %84 = vector.load %arg10[%c17, %c0_45] : memref<82x48xf32, #tpu.memory_space<vmem>>, vector<64x48xf32>
    %c7 = arith.constant 7 : index
    %c0_46 = arith.constant 0 : index
    %85 = vector.load %arg6[%c7, %c0_46] : memref<9x48xf32, #tpu.memory_space<vmem>>, vector<1x48xf32>
    %86 = vector.broadcast %85 : vector<1x48xf32> to vector<64x48xf32>
    %87 = arith.mulf %84, %86 : vector<64x48xf32>
    %88 = arith.addf %83, %87 : vector<64x48xf32>
    %c18 = arith.constant 18 : index
    %c0_47 = arith.constant 0 : index
    %89 = vector.load %arg10[%c18, %c0_47] : memref<82x48xf32, #tpu.memory_space<vmem>>, vector<64x48xf32>
    %c7_i32_48 = arith.constant 7 : i32
    %90 = vector.broadcast %c7_i32_48 : i32 to vector<64x1xi32>
    %91 = arith.cmpi slt, %17, %90 : vector<64x1xi32>
    %cst_49 = arith.constant 0.000000e+00 : f32
    %92 = vector.shape_cast %91 : vector<64x1xi1> to vector<64x1xi1>
    %93 = vector.broadcast %92 : vector<64x1xi1> to vector<64x48xi1>
    %94 = vector.broadcast %cst_49 : f32 to vector<64x48xf32>
    %95 = arith.select %93, %89, %94 : vector<64x48xi1>, vector<64x48xf32>
    %c8_50 = arith.constant 8 : index
    %c0_51 = arith.constant 0 : index
    %96 = vector.load %arg6[%c8_50, %c0_51] : memref<9x48xf32, #tpu.memory_space<vmem>>, vector<1x48xf32>
    %97 = vector.broadcast %96 : vector<1x48xf32> to vector<64x48xf32>
    %98 = arith.mulf %95, %97 : vector<64x48xf32>
    %99 = arith.addf %88, %98 : vector<64x48xf32>
    %c0_52 = arith.constant 0 : index
    %c0_53 = arith.constant 0 : index
    %100 = vector.load %arg7[%c0_52, %c0_53] : memref<1x48xf32, #tpu.memory_space<vmem>>, vector<1x48xf32>
    %101 = vector.broadcast %100 : vector<1x48xf32> to vector<64x48xf32>
    %102 = arith.mulf %99, %101 : vector<64x48xf32>
    %c0_54 = arith.constant 0 : index
    %c0_55 = arith.constant 0 : index
    %103 = vector.load %arg8[%c0_54, %c0_55] : memref<1x48xf32, #tpu.memory_space<vmem>>, vector<1x48xf32>
    %104 = vector.broadcast %103 : vector<1x48xf32> to vector<64x48xf32>
    %105 = arith.addf %102, %104 : vector<64x48xf32>
    %cst_56 = arith.constant 0.000000e+00 : f32
    %106 = vector.broadcast %cst_56 : f32 to vector<64x48xf32>
    %107 = arith.maximumf %105, %106 : vector<64x48xf32>
    %108 = tpu.iota {dimensions = array<i32: 1>} : vector<1x48xi32>
    %c24_i32 = arith.constant 24 : i32
    %109 = vector.broadcast %c24_i32 : i32 to vector<1x48xi32>
    %110 = arith.cmpi slt, %108, %109 : vector<1x48xi32>
    %cst_57 = arith.constant 0.000000e+00 : f32
    %111 = vector.shape_cast %110 : vector<1x48xi1> to vector<1x48xi1>
    %112 = vector.broadcast %111 : vector<1x48xi1> to vector<64x48xi1>
    %113 = vector.broadcast %cst_57 : f32 to vector<64x48xf32>
    %114 = arith.select %112, %11, %113 : vector<64x48xi1>, vector<64x48xf32>
    %115 = arith.addf %114, %107 : vector<64x48xf32>
    %116 = arith.truncf %115 : vector<64x48xf32> to vector<64x48xbf16>
    %c0_58 = arith.constant 0 : index
    %c0_59 = arith.constant 0 : index
    %c0_60 = arith.constant 0 : index
    %117 = vector.load %arg9[%c0_58, %c0_59, %c0_60] : memref<1x64x48xbf16, #tpu.memory_space<vmem>>, vector<1x64x48xbf16>
    %118 = vector.shape_cast %117 : vector<1x64x48xbf16> to vector<64x48xbf16>
    %119 = vector.shape_cast %116 : vector<64x48xbf16> to vector<1x64x48xbf16>
    tpu.vector_store %arg9[%c0_58, %c0_59, %c0_60], %119 {strides = array<i32>} : memref<1x64x48xbf16, #tpu.memory_space<vmem>>, vector<1x64x48xbf16>,
    return
  }
  func.func @transform_0(%arg0: i32) -> (i32, i32, i32) {
    %c0_i32 = arith.constant 0 : i32
    %c0_i32_0 = arith.constant 0 : i32
    %c0_i32_1 = arith.constant 0 : i32
    return %arg0, %c0_i32, %c0_i32_0 : i32, i32, i32
  }
  func.func @transform_1(%arg0: i32) -> (i32, i32) {
    %c0_i32 = arith.constant 0 : i32
    %c0_i32_0 = arith.constant 0 : i32
    %c0_i32_1 = arith.constant 0 : i32
    return %c0_i32, %c0_i32_0 : i32, i32
  }
  func.func @transform_2(%arg0: i32) -> (i32, i32) {
    %c0_i32 = arith.constant 0 : i32
    %c0_i32_0 = arith.constant 0 : i32
    %c0_i32_1 = arith.constant 0 : i32
    return %c0_i32, %c0_i32_0 : i32, i32
  }
  func.func @transform_3(%arg0: i32) -> (i32, i32) {
    %c0_i32 = arith.constant 0 : i32
    %c0_i32_0 = arith.constant 0 : i32
    %c0_i32_1 = arith.constant 0 : i32
    return %c0_i32, %c0_i32_0 : i32, i32
  }
  func.func @transform_4(%arg0: i32) -> (i32, i32) {
    %c0_i32 = arith.constant 0 : i32
    %c0_i32_0 = arith.constant 0 : i32
    %c0_i32_1 = arith.constant 0 : i32
    return %c0_i32, %c0_i32_0 : i32, i32
  }
  func.func @transform_5(%arg0: i32) -> (i32, i32) {
    %c0_i32 = arith.constant 0 : i32
    %c0_i32_0 = arith.constant 0 : i32
    %c0_i32_1 = arith.constant 0 : i32
    return %c0_i32, %c0_i32_0 : i32, i32
  }
  func.func @transform_6(%arg0: i32) -> (i32, i32) {
    %c0_i32 = arith.constant 0 : i32
    %c0_i32_0 = arith.constant 0 : i32
    %c0_i32_1 = arith.constant 0 : i32
    return %c0_i32, %c0_i32_0 : i32, i32
  }
  func.func @transform_7(%arg0: i32) -> (i32, i32) {
    %c0_i32 = arith.constant 0 : i32
    %c0_i32_0 = arith.constant 0 : i32
    %c0_i32_1 = arith.constant 0 : i32
    return %c0_i32, %c0_i32_0 : i32, i32
  }
  func.func @transform_8(%arg0: i32) -> (i32, i32, i32) {
    %c0_i32 = arith.constant 0 : i32
    %c0_i32_0 = arith.constant 0 : i32
    %c0_i32_1 = arith.constant 0 : i32
    return %arg0, %c0_i32, %c0_i32_0 : i32, i32, i32
  }
}

module attributes {stable_mosaic.version = 11 : i64} {
  func.func @_ghost_kernel(%arg0: i32, %arg1: memref<1x16x48xbf16, #tpu.memory_space<vmem>>, %arg2: memref<16x1xi32, #tpu.memory_space<vmem>>, %arg3: memref<48x24xbf16, #tpu.memory_space<vmem>>, %arg4: memref<1x24xf32, #tpu.memory_space<vmem>>, %arg5: memref<1x24xf32, #tpu.memory_space<vmem>>, %arg6: memref<9x24xf32, #tpu.memory_space<vmem>>, %arg7: memref<1x24xf32, #tpu.memory_space<vmem>>, %arg8: memref<1x24xf32, #tpu.memory_space<vmem>>, %arg9: memref<1x16x16xbf16, #tpu.memory_space<vmem>>, %arg10: memref<16x24xbf16, #tpu.memory_space<vmem>>, %arg11: memref<1x24xf32, #tpu.memory_space<vmem>>, %arg12: memref<1x24xf32, #tpu.memory_space<vmem>>, %arg13: memref<1x16x24xbf16, #tpu.memory_space<vmem>>, %arg14: memref<26x24xf32, #tpu.memory_space<vmem>>) attributes {dimension_semantics = [#tpu.dimension_semantics<parallel>], iteration_bounds = array<i64: 2>, scalar_prefetch = 0 : i64, scratch_operands = 1 : i64, tpu.core_type = #tpu.core_type<tc>, window_params = [{transform_indices = @transform_0, window_bounds = array<i64: 1, 16, 48>}, {pipeline_mode = #tpu.pipeline_mode<synchronous>, transform_indices = @transform_1, window_bounds = array<i64: 16, 1>}, {pipeline_mode = #tpu.pipeline_mode<synchronous>, transform_indices = @transform_2, window_bounds = array<i64: 48, 24>}, {pipeline_mode = #tpu.pipeline_mode<synchronous>, transform_indices = @transform_3, window_bounds = array<i64: 1, 24>}, {pipeline_mode = #tpu.pipeline_mode<synchronous>, transform_indices = @transform_4, window_bounds = array<i64: 1, 24>}, {pipeline_mode = #tpu.pipeline_mode<synchronous>, transform_indices = @transform_5, window_bounds = array<i64: 9, 24>}, {pipeline_mode = #tpu.pipeline_mode<synchronous>, transform_indices = @transform_6, window_bounds = array<i64: 1, 24>}, {pipeline_mode = #tpu.pipeline_mode<synchronous>, transform_indices = @transform_7, window_bounds = array<i64: 1, 24>}, {transform_indices = @transform_8, window_bounds = array<i64: 1, 16, 16>}, {pipeline_mode = #tpu.pipeline_mode<synchronous>, transform_indices = @transform_9, window_bounds = array<i64: 16, 24>}, {pipeline_mode = #tpu.pipeline_mode<synchronous>, transform_indices = @transform_10, window_bounds = array<i64: 1, 24>}, {pipeline_mode = #tpu.pipeline_mode<synchronous>, transform_indices = @transform_11, window_bounds = array<i64: 1, 24>}, {transform_indices = @transform_12, window_bounds = array<i64: 1, 16, 24>}]} {
    %c0 = arith.constant 0 : index
    %c0_0 = arith.constant 0 : index
    %c0_1 = arith.constant 0 : index
    %0 = vector.load %arg1[%c0, %c0_0, %c0_1] : memref<1x16x48xbf16, #tpu.memory_space<vmem>>, vector<1x16x48xbf16>
    %1 = vector.shape_cast %0 : vector<1x16x48xbf16> to vector<16x48xbf16>
    %c0_2 = arith.constant 0 : index
    %c0_3 = arith.constant 0 : index
    %2 = vector.load %arg3[%c0_2, %c0_3] : memref<48x24xbf16, #tpu.memory_space<vmem>>, vector<48x24xbf16>
    %cst = arith.constant dense<0.000000e+00> : vector<16x24xf32>
    %3 = tpu.matmul %1, %2, %cst {dimension_numbers = #tpu.dot_dimension_numbers<[1], [0], [0], [1], [0, 0, 1, 1], [], []>} : vector<16x48xbf16>, vector<48x24xbf16>, vector<16x24xf32> -> vector<16x24xf32>
    %c0_4 = arith.constant 0 : index
    %c0_5 = arith.constant 0 : index
    %4 = vector.load %arg4[%c0_4, %c0_5] : memref<1x24xf32, #tpu.memory_space<vmem>>, vector<1x24xf32>
    %5 = vector.broadcast %4 : vector<1x24xf32> to vector<16x24xf32>
    %6 = arith.mulf %3, %5 : vector<16x24xf32>
    %c0_6 = arith.constant 0 : index
    %c0_7 = arith.constant 0 : index
    %7 = vector.load %arg5[%c0_6, %c0_7] : memref<1x24xf32, #tpu.memory_space<vmem>>, vector<1x24xf32>
    %8 = vector.broadcast %7 : vector<1x24xf32> to vector<16x24xf32>
    %9 = arith.addf %6, %8 : vector<16x24xf32>
    %cst_8 = arith.constant 0.000000e+00 : f32
    %10 = vector.broadcast %cst_8 : f32 to vector<5x24xf32>
    %c0_9 = arith.constant 0 : index
    %c0_10 = arith.constant 0 : index
    %11 = vector.load %arg14[%c0_9, %c0_10] : memref<26x24xf32, #tpu.memory_space<vmem>>, vector<5x24xf32>
    tpu.vector_store %arg14[%c0_9, %c0_10], %10 {strides = array<i32>} : memref<26x24xf32, #tpu.memory_space<vmem>>, vector<5x24xf32>,
    %cst_11 = arith.constant 0.000000e+00 : f32
    %12 = vector.broadcast %cst_11 : f32 to vector<5x24xf32>
    %c21 = arith.constant 21 : index
    %c0_12 = arith.constant 0 : index
    %13 = vector.load %arg14[%c21, %c0_12] : memref<26x24xf32, #tpu.memory_space<vmem>>, vector<5x24xf32>
    tpu.vector_store %arg14[%c21, %c0_12], %12 {strides = array<i32>} : memref<26x24xf32, #tpu.memory_space<vmem>>, vector<5x24xf32>,
    %c5 = arith.constant 5 : index
    %c0_13 = arith.constant 0 : index
    %14 = vector.load %arg14[%c5, %c0_13] : memref<26x24xf32, #tpu.memory_space<vmem>>, vector<16x24xf32>
    tpu.vector_store %arg14[%c5, %c0_13], %9 {strides = array<i32>} : memref<26x24xf32, #tpu.memory_space<vmem>>, vector<16x24xf32>,
    %c0_14 = arith.constant 0 : index
    %c0_15 = arith.constant 0 : index
    %15 = vector.load %arg2[%c0_14, %c0_15] : memref<16x1xi32, #tpu.memory_space<vmem>>, vector<16x1xi32>
    %cst_16 = arith.constant 0.000000e+00 : f32
    %16 = vector.broadcast %cst_16 : f32 to vector<16x24xf32>
    %c0_17 = arith.constant 0 : index
    %c0_18 = arith.constant 0 : index
    %17 = vector.load %arg14[%c0_17, %c0_18] : memref<26x24xf32, #tpu.memory_space<vmem>>, vector<16x24xf32>
    %c0_i32 = arith.constant 0 : i32
    %18 = vector.broadcast %c0_i32 : i32 to vector<16x1xi32>
    %19 = arith.cmpi sgt, %15, %18 : vector<16x1xi32>
    %cst_19 = arith.constant 0.000000e+00 : f32
    %20 = vector.shape_cast %19 : vector<16x1xi1> to vector<16x1xi1>
    %21 = vector.broadcast %20 : vector<16x1xi1> to vector<16x24xi1>
    %22 = vector.broadcast %cst_19 : f32 to vector<16x24xf32>
    %23 = arith.select %21, %17, %22 : vector<16x24xi1>, vector<16x24xf32>
    %c0_20 = arith.constant 0 : index
    %c0_21 = arith.constant 0 : index
    %24 = vector.load %arg6[%c0_20, %c0_21] : memref<9x24xf32, #tpu.memory_space<vmem>>, vector<1x24xf32>
    %25 = vector.broadcast %24 : vector<1x24xf32> to vector<16x24xf32>
    %26 = arith.mulf %23, %25 : vector<16x24xf32>
    %27 = arith.addf %16, %26 : vector<16x24xf32>
    %c1 = arith.constant 1 : index
    %c0_22 = arith.constant 0 : index
    %28 = vector.load %arg14[%c1, %c0_22] : memref<26x24xf32, #tpu.memory_space<vmem>>, vector<16x24xf32>
    %c1_23 = arith.constant 1 : index
    %c0_24 = arith.constant 0 : index
    %29 = vector.load %arg6[%c1_23, %c0_24] : memref<9x24xf32, #tpu.memory_space<vmem>>, vector<1x24xf32>
    %30 = vector.broadcast %29 : vector<1x24xf32> to vector<16x24xf32>
    %31 = arith.mulf %28, %30 : vector<16x24xf32>
    %32 = arith.addf %27, %31 : vector<16x24xf32>
    %c2 = arith.constant 2 : index
    %c0_25 = arith.constant 0 : index
    %33 = vector.load %arg14[%c2, %c0_25] : memref<26x24xf32, #tpu.memory_space<vmem>>, vector<16x24xf32>
    %c3_i32 = arith.constant 3 : i32
    %34 = vector.broadcast %c3_i32 : i32 to vector<16x1xi32>
    %35 = arith.cmpi slt, %15, %34 : vector<16x1xi32>
    %cst_26 = arith.constant 0.000000e+00 : f32
    %36 = vector.shape_cast %35 : vector<16x1xi1> to vector<16x1xi1>
    %37 = vector.broadcast %36 : vector<16x1xi1> to vector<16x24xi1>
    %38 = vector.broadcast %cst_26 : f32 to vector<16x24xf32>
    %39 = arith.select %37, %33, %38 : vector<16x24xi1>, vector<16x24xf32>
    %c2_27 = arith.constant 2 : index
    %c0_28 = arith.constant 0 : index
    %40 = vector.load %arg6[%c2_27, %c0_28] : memref<9x24xf32, #tpu.memory_space<vmem>>, vector<1x24xf32>
    %41 = vector.broadcast %40 : vector<1x24xf32> to vector<16x24xf32>
    %42 = arith.mulf %39, %41 : vector<16x24xf32>
    %43 = arith.addf %32, %42 : vector<16x24xf32>
    %c4 = arith.constant 4 : index
    %c0_29 = arith.constant 0 : index
    %44 = vector.load %arg14[%c4, %c0_29] : memref<26x24xf32, #tpu.memory_space<vmem>>, vector<16x24xf32>
    %c0_i32_30 = arith.constant 0 : i32
    %45 = vector.broadcast %c0_i32_30 : i32 to vector<16x1xi32>
    %46 = arith.cmpi sgt, %15, %45 : vector<16x1xi32>
    %cst_31 = arith.constant 0.000000e+00 : f32
    %47 = vector.shape_cast %46 : vector<16x1xi1> to vector<16x1xi1>
    %48 = vector.broadcast %47 : vector<16x1xi1> to vector<16x24xi1>
    %49 = vector.broadcast %cst_31 : f32 to vector<16x24xf32>
    %50 = arith.select %48, %44, %49 : vector<16x24xi1>, vector<16x24xf32>
    %c3 = arith.constant 3 : index
    %c0_32 = arith.constant 0 : index
    %51 = vector.load %arg6[%c3, %c0_32] : memref<9x24xf32, #tpu.memory_space<vmem>>, vector<1x24xf32>
    %52 = vector.broadcast %51 : vector<1x24xf32> to vector<16x24xf32>
    %53 = arith.mulf %50, %52 : vector<16x24xf32>
    %54 = arith.addf %43, %53 : vector<16x24xf32>
    %c5_33 = arith.constant 5 : index
    %c0_34 = arith.constant 0 : index
    %55 = vector.load %arg14[%c5_33, %c0_34] : memref<26x24xf32, #tpu.memory_space<vmem>>, vector<16x24xf32>
    %c4_35 = arith.constant 4 : index
    %c0_36 = arith.constant 0 : index
    %56 = vector.load %arg6[%c4_35, %c0_36] : memref<9x24xf32, #tpu.memory_space<vmem>>, vector<1x24xf32>
    %57 = vector.broadcast %56 : vector<1x24xf32> to vector<16x24xf32>
    %58 = arith.mulf %55, %57 : vector<16x24xf32>
    %59 = arith.addf %54, %58 : vector<16x24xf32>
    %c6 = arith.constant 6 : index
    %c0_37 = arith.constant 0 : index
    %60 = vector.load %arg14[%c6, %c0_37] : memref<26x24xf32, #tpu.memory_space<vmem>>, vector<16x24xf32>
    %c3_i32_38 = arith.constant 3 : i32
    %61 = vector.broadcast %c3_i32_38 : i32 to vector<16x1xi32>
    %62 = arith.cmpi slt, %15, %61 : vector<16x1xi32>
    %cst_39 = arith.constant 0.000000e+00 : f32
    %63 = vector.shape_cast %62 : vector<16x1xi1> to vector<16x1xi1>
    %64 = vector.broadcast %63 : vector<16x1xi1> to vector<16x24xi1>
    %65 = vector.broadcast %cst_39 : f32 to vector<16x24xf32>
    %66 = arith.select %64, %60, %65 : vector<16x24xi1>, vector<16x24xf32>
    %c5_40 = arith.constant 5 : index
    %c0_41 = arith.constant 0 : index
    %67 = vector.load %arg6[%c5_40, %c0_41] : memref<9x24xf32, #tpu.memory_space<vmem>>, vector<1x24xf32>
    %68 = vector.broadcast %67 : vector<1x24xf32> to vector<16x24xf32>
    %69 = arith.mulf %66, %68 : vector<16x24xf32>
    %70 = arith.addf %59, %69 : vector<16x24xf32>
    %c8 = arith.constant 8 : index
    %c0_42 = arith.constant 0 : index
    %71 = vector.load %arg14[%c8, %c0_42] : memref<26x24xf32, #tpu.memory_space<vmem>>, vector<16x24xf32>
    %c0_i32_43 = arith.constant 0 : i32
    %72 = vector.broadcast %c0_i32_43 : i32 to vector<16x1xi32>
    %73 = arith.cmpi sgt, %15, %72 : vector<16x1xi32>
    %cst_44 = arith.constant 0.000000e+00 : f32
    %74 = vector.shape_cast %73 : vector<16x1xi1> to vector<16x1xi1>
    %75 = vector.broadcast %74 : vector<16x1xi1> to vector<16x24xi1>
    %76 = vector.broadcast %cst_44 : f32 to vector<16x24xf32>
    %77 = arith.select %75, %71, %76 : vector<16x24xi1>, vector<16x24xf32>
    %c6_45 = arith.constant 6 : index
    %c0_46 = arith.constant 0 : index
    %78 = vector.load %arg6[%c6_45, %c0_46] : memref<9x24xf32, #tpu.memory_space<vmem>>, vector<1x24xf32>
    %79 = vector.broadcast %78 : vector<1x24xf32> to vector<16x24xf32>
    %80 = arith.mulf %77, %79 : vector<16x24xf32>
    %81 = arith.addf %70, %80 : vector<16x24xf32>
    %c9 = arith.constant 9 : index
    %c0_47 = arith.constant 0 : index
    %82 = vector.load %arg14[%c9, %c0_47] : memref<26x24xf32, #tpu.memory_space<vmem>>, vector<16x24xf32>
    %c7 = arith.constant 7 : index
    %c0_48 = arith.constant 0 : index
    %83 = vector.load %arg6[%c7, %c0_48] : memref<9x24xf32, #tpu.memory_space<vmem>>, vector<1x24xf32>
    %84 = vector.broadcast %83 : vector<1x24xf32> to vector<16x24xf32>
    %85 = arith.mulf %82, %84 : vector<16x24xf32>
    %86 = arith.addf %81, %85 : vector<16x24xf32>
    %c10 = arith.constant 10 : index
    %c0_49 = arith.constant 0 : index
    %87 = vector.load %arg14[%c10, %c0_49] : memref<26x24xf32, #tpu.memory_space<vmem>>, vector<16x24xf32>
    %c3_i32_50 = arith.constant 3 : i32
    %88 = vector.broadcast %c3_i32_50 : i32 to vector<16x1xi32>
    %89 = arith.cmpi slt, %15, %88 : vector<16x1xi32>
    %cst_51 = arith.constant 0.000000e+00 : f32
    %90 = vector.shape_cast %89 : vector<16x1xi1> to vector<16x1xi1>
    %91 = vector.broadcast %90 : vector<16x1xi1> to vector<16x24xi1>
    %92 = vector.broadcast %cst_51 : f32 to vector<16x24xf32>
    %93 = arith.select %91, %87, %92 : vector<16x24xi1>, vector<16x24xf32>
    %c8_52 = arith.constant 8 : index
    %c0_53 = arith.constant 0 : index
    %94 = vector.load %arg6[%c8_52, %c0_53] : memref<9x24xf32, #tpu.memory_space<vmem>>, vector<1x24xf32>
    %95 = vector.broadcast %94 : vector<1x24xf32> to vector<16x24xf32>
    %96 = arith.mulf %93, %95 : vector<16x24xf32>
    %97 = arith.addf %86, %96 : vector<16x24xf32>
    %c0_54 = arith.constant 0 : index
    %c0_55 = arith.constant 0 : index
    %98 = vector.load %arg7[%c0_54, %c0_55] : memref<1x24xf32, #tpu.memory_space<vmem>>, vector<1x24xf32>
    %99 = vector.broadcast %98 : vector<1x24xf32> to vector<16x24xf32>
    %100 = arith.mulf %97, %99 : vector<16x24xf32>
    %c0_56 = arith.constant 0 : index
    %c0_57 = arith.constant 0 : index
    %101 = vector.load %arg8[%c0_56, %c0_57] : memref<1x24xf32, #tpu.memory_space<vmem>>, vector<1x24xf32>
    %102 = vector.broadcast %101 : vector<1x24xf32> to vector<16x24xf32>
    %103 = arith.addf %100, %102 : vector<16x24xf32>
    %104 = tpu.iota {dimensions = array<i32: 1>} : vector<1x24xi32>
    %c12_i32 = arith.constant 12 : i32
    %105 = vector.broadcast %c12_i32 : i32 to vector<1x24xi32>
    %106 = arith.cmpi slt, %104, %105 : vector<1x24xi32>
    %cst_58 = arith.constant 0.000000e+00 : f32
    %107 = vector.shape_cast %106 : vector<1x24xi1> to vector<1x24xi1>
    %108 = vector.broadcast %107 : vector<1x24xi1> to vector<16x24xi1>
    %109 = vector.broadcast %cst_58 : f32 to vector<16x24xf32>
    %110 = arith.select %108, %9, %109 : vector<16x24xi1>, vector<16x24xf32>
    %111 = arith.addf %110, %103 : vector<16x24xf32>
    %c0_59 = arith.constant 0 : index
    %c0_60 = arith.constant 0 : index
    %c0_61 = arith.constant 0 : index
    %112 = vector.load %arg9[%c0_59, %c0_60, %c0_61] : memref<1x16x16xbf16, #tpu.memory_space<vmem>>, vector<1x16x16xbf16>
    %113 = vector.shape_cast %112 : vector<1x16x16xbf16> to vector<16x16xbf16>
    %c0_62 = arith.constant 0 : index
    %c0_63 = arith.constant 0 : index
    %114 = vector.load %arg10[%c0_62, %c0_63] : memref<16x24xbf16, #tpu.memory_space<vmem>>, vector<16x24xbf16>
    %cst_64 = arith.constant dense<0.000000e+00> : vector<16x24xf32>
    %115 = tpu.matmul %113, %114, %cst_64 {dimension_numbers = #tpu.dot_dimension_numbers<[1], [0], [0], [1], [0, 0, 1, 1], [], []>} : vector<16x16xbf16>, vector<16x24xbf16>, vector<16x24xf32> -> vector<16x24xf32>
    %c0_65 = arith.constant 0 : index
    %c0_66 = arith.constant 0 : index
    %116 = vector.load %arg11[%c0_65, %c0_66] : memref<1x24xf32, #tpu.memory_space<vmem>>, vector<1x24xf32>
    %117 = vector.broadcast %116 : vector<1x24xf32> to vector<16x24xf32>
    %118 = arith.mulf %115, %117 : vector<16x24xf32>
    %c0_67 = arith.constant 0 : index
    %c0_68 = arith.constant 0 : index
    %119 = vector.load %arg12[%c0_67, %c0_68] : memref<1x24xf32, #tpu.memory_space<vmem>>, vector<1x24xf32>
    %120 = vector.broadcast %119 : vector<1x24xf32> to vector<16x24xf32>
    %121 = arith.addf %118, %120 : vector<16x24xf32>
    %122 = arith.addf %111, %121 : vector<16x24xf32>
    %123 = arith.truncf %122 : vector<16x24xf32> to vector<16x24xbf16>
    %c0_69 = arith.constant 0 : index
    %c0_70 = arith.constant 0 : index
    %c0_71 = arith.constant 0 : index
    %124 = vector.load %arg13[%c0_69, %c0_70, %c0_71] : memref<1x16x24xbf16, #tpu.memory_space<vmem>>, vector<1x16x24xbf16>
    %125 = vector.shape_cast %124 : vector<1x16x24xbf16> to vector<16x24xbf16>
    %126 = vector.shape_cast %123 : vector<16x24xbf16> to vector<1x16x24xbf16>
    tpu.vector_store %arg13[%c0_69, %c0_70, %c0_71], %126 {strides = array<i32>} : memref<1x16x24xbf16, #tpu.memory_space<vmem>>, vector<1x16x24xbf16>,
    return
  }
  func.func @transform_0(%arg0: i32) -> (i32, i32, i32) {
    %c0_i32 = arith.constant 0 : i32
    %c0_i32_0 = arith.constant 0 : i32
    %c0_i32_1 = arith.constant 0 : i32
    return %arg0, %c0_i32, %c0_i32_0 : i32, i32, i32
  }
  func.func @transform_1(%arg0: i32) -> (i32, i32) {
    %c0_i32 = arith.constant 0 : i32
    %c0_i32_0 = arith.constant 0 : i32
    %c0_i32_1 = arith.constant 0 : i32
    return %c0_i32, %c0_i32_0 : i32, i32
  }
  func.func @transform_2(%arg0: i32) -> (i32, i32) {
    %c0_i32 = arith.constant 0 : i32
    %c0_i32_0 = arith.constant 0 : i32
    %c0_i32_1 = arith.constant 0 : i32
    return %c0_i32, %c0_i32_0 : i32, i32
  }
  func.func @transform_3(%arg0: i32) -> (i32, i32) {
    %c0_i32 = arith.constant 0 : i32
    %c0_i32_0 = arith.constant 0 : i32
    %c0_i32_1 = arith.constant 0 : i32
    return %c0_i32, %c0_i32_0 : i32, i32
  }
  func.func @transform_4(%arg0: i32) -> (i32, i32) {
    %c0_i32 = arith.constant 0 : i32
    %c0_i32_0 = arith.constant 0 : i32
    %c0_i32_1 = arith.constant 0 : i32
    return %c0_i32, %c0_i32_0 : i32, i32
  }
  func.func @transform_5(%arg0: i32) -> (i32, i32) {
    %c0_i32 = arith.constant 0 : i32
    %c0_i32_0 = arith.constant 0 : i32
    %c0_i32_1 = arith.constant 0 : i32
    return %c0_i32, %c0_i32_0 : i32, i32
  }
  func.func @transform_6(%arg0: i32) -> (i32, i32) {
    %c0_i32 = arith.constant 0 : i32
    %c0_i32_0 = arith.constant 0 : i32
    %c0_i32_1 = arith.constant 0 : i32
    return %c0_i32, %c0_i32_0 : i32, i32
  }
  func.func @transform_7(%arg0: i32) -> (i32, i32) {
    %c0_i32 = arith.constant 0 : i32
    %c0_i32_0 = arith.constant 0 : i32
    %c0_i32_1 = arith.constant 0 : i32
    return %c0_i32, %c0_i32_0 : i32, i32
  }
  func.func @transform_8(%arg0: i32) -> (i32, i32, i32) {
    %c0_i32 = arith.constant 0 : i32
    %c0_i32_0 = arith.constant 0 : i32
    %c0_i32_1 = arith.constant 0 : i32
    return %arg0, %c0_i32, %c0_i32_0 : i32, i32, i32
  }
  func.func @transform_9(%arg0: i32) -> (i32, i32) {
    %c0_i32 = arith.constant 0 : i32
    %c0_i32_0 = arith.constant 0 : i32
    %c0_i32_1 = arith.constant 0 : i32
    return %c0_i32, %c0_i32_0 : i32, i32
  }
  func.func @transform_10(%arg0: i32) -> (i32, i32) {
    %c0_i32 = arith.constant 0 : i32
    %c0_i32_0 = arith.constant 0 : i32
    %c0_i32_1 = arith.constant 0 : i32
    return %c0_i32, %c0_i32_0 : i32, i32
  }
  func.func @transform_11(%arg0: i32) -> (i32, i32) {
    %c0_i32 = arith.constant 0 : i32
    %c0_i32_0 = arith.constant 0 : i32
    %c0_i32_1 = arith.constant 0 : i32
    return %c0_i32, %c0_i32_0 : i32, i32
  }
  func.func @transform_12(%arg0: i32) -> (i32, i32, i32) {
    %c0_i32 = arith.constant 0 : i32
    %c0_i32_0 = arith.constant 0 : i32
    %c0_i32_1 = arith.constant 0 : i32
    return %arg0, %c0_i32, %c0_i32_0 : i32, i32, i32
  }
}

module attributes {stable_mosaic.version = 11 : i64} {
  func.func @_dw_phases_kernel(%arg0: i32, %arg1: memref<1x5x5x48xbf16, #tpu.memory_space<vmem>>, %arg2: memref<1x5x5x48xbf16, #tpu.memory_space<vmem>>, %arg3: memref<1x5x5x48xbf16, #tpu.memory_space<vmem>>, %arg4: memref<1x5x5x48xbf16, #tpu.memory_space<vmem>>, %arg5: memref<9x48xf32, #tpu.memory_space<vmem>>, %arg6: memref<1x48xf32, #tpu.memory_space<vmem>>, %arg7: memref<1x48xf32, #tpu.memory_space<vmem>>, %arg8: memref<1x4x4x48xbf16, #tpu.memory_space<vmem>>, %arg9: memref<5x5x48xf32, #tpu.memory_space<vmem>>, %arg10: memref<5x5x48xf32, #tpu.memory_space<vmem>>, %arg11: memref<5x5x48xf32, #tpu.memory_space<vmem>>, %arg12: memref<5x5x48xf32, #tpu.memory_space<vmem>>) attributes {dimension_semantics = [#tpu.dimension_semantics<parallel>], iteration_bounds = array<i64: 2>, scalar_prefetch = 0 : i64, scratch_operands = 4 : i64, tpu.core_type = #tpu.core_type<tc>, window_params = [{transform_indices = @transform_0, window_bounds = array<i64: 1, 5, 5, 48>}, {transform_indices = @transform_1, window_bounds = array<i64: 1, 5, 5, 48>}, {transform_indices = @transform_2, window_bounds = array<i64: 1, 5, 5, 48>}, {transform_indices = @transform_3, window_bounds = array<i64: 1, 5, 5, 48>}, {pipeline_mode = #tpu.pipeline_mode<synchronous>, transform_indices = @transform_4, window_bounds = array<i64: 9, 48>}, {pipeline_mode = #tpu.pipeline_mode<synchronous>, transform_indices = @transform_5, window_bounds = array<i64: 1, 48>}, {pipeline_mode = #tpu.pipeline_mode<synchronous>, transform_indices = @transform_6, window_bounds = array<i64: 1, 48>}, {transform_indices = @transform_7, window_bounds = array<i64: 1, 4, 4, 48>}]} {
    %c0 = arith.constant 0 : index
    %c0_0 = arith.constant 0 : index
    %c0_1 = arith.constant 0 : index
    %c0_2 = arith.constant 0 : index
    %0 = vector.load %arg1[%c0, %c0_0, %c0_1, %c0_2] : memref<1x5x5x48xbf16, #tpu.memory_space<vmem>>, vector<1x5x5x48xbf16>
    %1 = vector.shape_cast %0 : vector<1x5x5x48xbf16> to vector<5x5x48xbf16>
    %2 = arith.extf %1 : vector<5x5x48xbf16> to vector<5x5x48xf32>
    %c0_3 = arith.constant 0 : index
    %c0_4 = arith.constant 0 : index
    %c0_5 = arith.constant 0 : index
    %3 = vector.load %arg9[%c0_3, %c0_4, %c0_5] : memref<5x5x48xf32, #tpu.memory_space<vmem>>, vector<5x5x48xf32>
    tpu.vector_store %arg9[%c0_3, %c0_4, %c0_5], %2 {strides = array<i32>} : memref<5x5x48xf32, #tpu.memory_space<vmem>>, vector<5x5x48xf32>,
    %c0_6 = arith.constant 0 : index
    %c0_7 = arith.constant 0 : index
    %c0_8 = arith.constant 0 : index
    %c0_9 = arith.constant 0 : index
    %4 = vector.load %arg2[%c0_6, %c0_7, %c0_8, %c0_9] : memref<1x5x5x48xbf16, #tpu.memory_space<vmem>>, vector<1x5x5x48xbf16>
    %5 = vector.shape_cast %4 : vector<1x5x5x48xbf16> to vector<5x5x48xbf16>
    %6 = arith.extf %5 : vector<5x5x48xbf16> to vector<5x5x48xf32>
    %c0_10 = arith.constant 0 : index
    %c0_11 = arith.constant 0 : index
    %c0_12 = arith.constant 0 : index
    %7 = vector.load %arg10[%c0_10, %c0_11, %c0_12] : memref<5x5x48xf32, #tpu.memory_space<vmem>>, vector<5x5x48xf32>
    tpu.vector_store %arg10[%c0_10, %c0_11, %c0_12], %6 {strides = array<i32>} : memref<5x5x48xf32, #tpu.memory_space<vmem>>, vector<5x5x48xf32>,
    %c0_13 = arith.constant 0 : index
    %c0_14 = arith.constant 0 : index
    %c0_15 = arith.constant 0 : index
    %c0_16 = arith.constant 0 : index
    %8 = vector.load %arg3[%c0_13, %c0_14, %c0_15, %c0_16] : memref<1x5x5x48xbf16, #tpu.memory_space<vmem>>, vector<1x5x5x48xbf16>
    %9 = vector.shape_cast %8 : vector<1x5x5x48xbf16> to vector<5x5x48xbf16>
    %10 = arith.extf %9 : vector<5x5x48xbf16> to vector<5x5x48xf32>
    %c0_17 = arith.constant 0 : index
    %c0_18 = arith.constant 0 : index
    %c0_19 = arith.constant 0 : index
    %11 = vector.load %arg11[%c0_17, %c0_18, %c0_19] : memref<5x5x48xf32, #tpu.memory_space<vmem>>, vector<5x5x48xf32>
    tpu.vector_store %arg11[%c0_17, %c0_18, %c0_19], %10 {strides = array<i32>} : memref<5x5x48xf32, #tpu.memory_space<vmem>>, vector<5x5x48xf32>,
    %c0_20 = arith.constant 0 : index
    %c0_21 = arith.constant 0 : index
    %c0_22 = arith.constant 0 : index
    %c0_23 = arith.constant 0 : index
    %12 = vector.load %arg4[%c0_20, %c0_21, %c0_22, %c0_23] : memref<1x5x5x48xbf16, #tpu.memory_space<vmem>>, vector<1x5x5x48xbf16>
    %13 = vector.shape_cast %12 : vector<1x5x5x48xbf16> to vector<5x5x48xbf16>
    %14 = arith.extf %13 : vector<5x5x48xbf16> to vector<5x5x48xf32>
    %c0_24 = arith.constant 0 : index
    %c0_25 = arith.constant 0 : index
    %c0_26 = arith.constant 0 : index
    %15 = vector.load %arg12[%c0_24, %c0_25, %c0_26] : memref<5x5x48xf32, #tpu.memory_space<vmem>>, vector<5x5x48xf32>
    tpu.vector_store %arg12[%c0_24, %c0_25, %c0_26], %14 {strides = array<i32>} : memref<5x5x48xf32, #tpu.memory_space<vmem>>, vector<5x5x48xf32>,
    %cst = arith.constant 0.000000e+00 : f32
    %16 = vector.broadcast %cst : f32 to vector<4x4x48xf32>
    %c0_27 = arith.constant 0 : index
    %c0_28 = arith.constant 0 : index
    %c0_29 = arith.constant 0 : index
    %17 = vector.load %arg9[%c0_27, %c0_28, %c0_29] : memref<5x5x48xf32, #tpu.memory_space<vmem>>, vector<4x4x48xf32>
    %c0_30 = arith.constant 0 : index
    %c0_31 = arith.constant 0 : index
    %18 = vector.load %arg5[%c0_30, %c0_31] : memref<9x48xf32, #tpu.memory_space<vmem>>, vector<1x48xf32>
    %19 = vector.shape_cast %18 : vector<1x48xf32> to vector<1x1x48xf32>
    %20 = vector.broadcast %19 : vector<1x1x48xf32> to vector<4x4x48xf32>
    %21 = arith.mulf %17, %20 : vector<4x4x48xf32>
    %22 = arith.addf %16, %21 : vector<4x4x48xf32>
    %c0_32 = arith.constant 0 : index
    %c0_33 = arith.constant 0 : index
    %c0_34 = arith.constant 0 : index
    %23 = vector.load %arg10[%c0_32, %c0_33, %c0_34] : memref<5x5x48xf32, #tpu.memory_space<vmem>>, vector<4x4x48xf32>
    %c1 = arith.constant 1 : index
    %c0_35 = arith.constant 0 : index
    %24 = vector.load %arg5[%c1, %c0_35] : memref<9x48xf32, #tpu.memory_space<vmem>>, vector<1x48xf32>
    %25 = vector.shape_cast %24 : vector<1x48xf32> to vector<1x1x48xf32>
    %26 = vector.broadcast %25 : vector<1x1x48xf32> to vector<4x4x48xf32>
    %27 = arith.mulf %23, %26 : vector<4x4x48xf32>
    %28 = arith.addf %22, %27 : vector<4x4x48xf32>
    %c0_36 = arith.constant 0 : index
    %c1_37 = arith.constant 1 : index
    %c0_38 = arith.constant 0 : index
    %29 = vector.load %arg9[%c0_36, %c1_37, %c0_38] : memref<5x5x48xf32, #tpu.memory_space<vmem>>, vector<4x4x48xf32>
    %c2 = arith.constant 2 : index
    %c0_39 = arith.constant 0 : index
    %30 = vector.load %arg5[%c2, %c0_39] : memref<9x48xf32, #tpu.memory_space<vmem>>, vector<1x48xf32>
    %31 = vector.shape_cast %30 : vector<1x48xf32> to vector<1x1x48xf32>
    %32 = vector.broadcast %31 : vector<1x1x48xf32> to vector<4x4x48xf32>
    %33 = arith.mulf %29, %32 : vector<4x4x48xf32>
    %34 = arith.addf %28, %33 : vector<4x4x48xf32>
    %c0_40 = arith.constant 0 : index
    %c0_41 = arith.constant 0 : index
    %c0_42 = arith.constant 0 : index
    %35 = vector.load %arg11[%c0_40, %c0_41, %c0_42] : memref<5x5x48xf32, #tpu.memory_space<vmem>>, vector<4x4x48xf32>
    %c3 = arith.constant 3 : index
    %c0_43 = arith.constant 0 : index
    %36 = vector.load %arg5[%c3, %c0_43] : memref<9x48xf32, #tpu.memory_space<vmem>>, vector<1x48xf32>
    %37 = vector.shape_cast %36 : vector<1x48xf32> to vector<1x1x48xf32>
    %38 = vector.broadcast %37 : vector<1x1x48xf32> to vector<4x4x48xf32>
    %39 = arith.mulf %35, %38 : vector<4x4x48xf32>
    %40 = arith.addf %34, %39 : vector<4x4x48xf32>
    %c0_44 = arith.constant 0 : index
    %c0_45 = arith.constant 0 : index
    %c0_46 = arith.constant 0 : index
    %41 = vector.load %arg12[%c0_44, %c0_45, %c0_46] : memref<5x5x48xf32, #tpu.memory_space<vmem>>, vector<4x4x48xf32>
    %c4 = arith.constant 4 : index
    %c0_47 = arith.constant 0 : index
    %42 = vector.load %arg5[%c4, %c0_47] : memref<9x48xf32, #tpu.memory_space<vmem>>, vector<1x48xf32>
    %43 = vector.shape_cast %42 : vector<1x48xf32> to vector<1x1x48xf32>
    %44 = vector.broadcast %43 : vector<1x1x48xf32> to vector<4x4x48xf32>
    %45 = arith.mulf %41, %44 : vector<4x4x48xf32>
    %46 = arith.addf %40, %45 : vector<4x4x48xf32>
    %c0_48 = arith.constant 0 : index
    %c1_49 = arith.constant 1 : index
    %c0_50 = arith.constant 0 : index
    %47 = vector.load %arg11[%c0_48, %c1_49, %c0_50] : memref<5x5x48xf32, #tpu.memory_space<vmem>>, vector<4x4x48xf32>
    %c5 = arith.constant 5 : index
    %c0_51 = arith.constant 0 : index
    %48 = vector.load %arg5[%c5, %c0_51] : memref<9x48xf32, #tpu.memory_space<vmem>>, vector<1x48xf32>
    %49 = vector.shape_cast %48 : vector<1x48xf32> to vector<1x1x48xf32>
    %50 = vector.broadcast %49 : vector<1x1x48xf32> to vector<4x4x48xf32>
    %51 = arith.mulf %47, %50 : vector<4x4x48xf32>
    %52 = arith.addf %46, %51 : vector<4x4x48xf32>
    %c1_52 = arith.constant 1 : index
    %c0_53 = arith.constant 0 : index
    %c0_54 = arith.constant 0 : index
    %53 = vector.load %arg9[%c1_52, %c0_53, %c0_54] : memref<5x5x48xf32, #tpu.memory_space<vmem>>, vector<4x4x48xf32>
    %c6 = arith.constant 6 : index
    %c0_55 = arith.constant 0 : index
    %54 = vector.load %arg5[%c6, %c0_55] : memref<9x48xf32, #tpu.memory_space<vmem>>, vector<1x48xf32>
    %55 = vector.shape_cast %54 : vector<1x48xf32> to vector<1x1x48xf32>
    %56 = vector.broadcast %55 : vector<1x1x48xf32> to vector<4x4x48xf32>
    %57 = arith.mulf %53, %56 : vector<4x4x48xf32>
    %58 = arith.addf %52, %57 : vector<4x4x48xf32>
    %c1_56 = arith.constant 1 : index
    %c0_57 = arith.constant 0 : index
    %c0_58 = arith.constant 0 : index
    %59 = vector.load %arg10[%c1_56, %c0_57, %c0_58] : memref<5x5x48xf32, #tpu.memory_space<vmem>>, vector<4x4x48xf32>
    %c7 = arith.constant 7 : index
    %c0_59 = arith.constant 0 : index
    %60 = vector.load %arg5[%c7, %c0_59] : memref<9x48xf32, #tpu.memory_space<vmem>>, vector<1x48xf32>
    %61 = vector.shape_cast %60 : vector<1x48xf32> to vector<1x1x48xf32>
    %62 = vector.broadcast %61 : vector<1x1x48xf32> to vector<4x4x48xf32>
    %63 = arith.mulf %59, %62 : vector<4x4x48xf32>
    %64 = arith.addf %58, %63 : vector<4x4x48xf32>
    %c1_60 = arith.constant 1 : index
    %c1_61 = arith.constant 1 : index
    %c0_62 = arith.constant 0 : index
    %65 = vector.load %arg9[%c1_60, %c1_61, %c0_62] : memref<5x5x48xf32, #tpu.memory_space<vmem>>, vector<4x4x48xf32>
    %c8 = arith.constant 8 : index
    %c0_63 = arith.constant 0 : index
    %66 = vector.load %arg5[%c8, %c0_63] : memref<9x48xf32, #tpu.memory_space<vmem>>, vector<1x48xf32>
    %67 = vector.shape_cast %66 : vector<1x48xf32> to vector<1x1x48xf32>
    %68 = vector.broadcast %67 : vector<1x1x48xf32> to vector<4x4x48xf32>
    %69 = arith.mulf %65, %68 : vector<4x4x48xf32>
    %70 = arith.addf %64, %69 : vector<4x4x48xf32>
    %c0_64 = arith.constant 0 : index
    %c0_65 = arith.constant 0 : index
    %71 = vector.load %arg6[%c0_64, %c0_65] : memref<1x48xf32, #tpu.memory_space<vmem>>, vector<1x48xf32>
    %72 = vector.shape_cast %71 : vector<1x48xf32> to vector<1x1x48xf32>
    %73 = vector.broadcast %72 : vector<1x1x48xf32> to vector<4x4x48xf32>
    %74 = arith.mulf %70, %73 : vector<4x4x48xf32>
    %c0_66 = arith.constant 0 : index
    %c0_67 = arith.constant 0 : index
    %75 = vector.load %arg7[%c0_66, %c0_67] : memref<1x48xf32, #tpu.memory_space<vmem>>, vector<1x48xf32>
    %76 = vector.shape_cast %75 : vector<1x48xf32> to vector<1x1x48xf32>
    %77 = vector.broadcast %76 : vector<1x1x48xf32> to vector<4x4x48xf32>
    %78 = arith.addf %74, %77 : vector<4x4x48xf32>
    %79 = arith.truncf %78 : vector<4x4x48xf32> to vector<4x4x48xbf16>
    %c0_68 = arith.constant 0 : index
    %c0_69 = arith.constant 0 : index
    %c0_70 = arith.constant 0 : index
    %c0_71 = arith.constant 0 : index
    %80 = vector.load %arg8[%c0_68, %c0_69, %c0_70, %c0_71] : memref<1x4x4x48xbf16, #tpu.memory_space<vmem>>, vector<1x4x4x48xbf16>
    %81 = vector.shape_cast %80 : vector<1x4x4x48xbf16> to vector<4x4x48xbf16>
    %82 = vector.shape_cast %79 : vector<4x4x48xbf16> to vector<1x4x4x48xbf16>
    tpu.vector_store %arg8[%c0_68, %c0_69, %c0_70, %c0_71], %82 {strides = array<i32>} : memref<1x4x4x48xbf16, #tpu.memory_space<vmem>>, vector<1x4x4x48xbf16>,
    return
  }
  func.func @transform_0(%arg0: i32) -> (i32, i32, i32, i32) {
    %c0_i32 = arith.constant 0 : i32
    %c0_i32_0 = arith.constant 0 : i32
    %c0_i32_1 = arith.constant 0 : i32
    %c0_i32_2 = arith.constant 0 : i32
    return %arg0, %c0_i32, %c0_i32_0, %c0_i32_1 : i32, i32, i32, i32
  }
  func.func @transform_1(%arg0: i32) -> (i32, i32, i32, i32) {
    %c0_i32 = arith.constant 0 : i32
    %c0_i32_0 = arith.constant 0 : i32
    %c0_i32_1 = arith.constant 0 : i32
    %c0_i32_2 = arith.constant 0 : i32
    return %arg0, %c0_i32, %c0_i32_0, %c0_i32_1 : i32, i32, i32, i32
  }
  func.func @transform_2(%arg0: i32) -> (i32, i32, i32, i32) {
    %c0_i32 = arith.constant 0 : i32
    %c0_i32_0 = arith.constant 0 : i32
    %c0_i32_1 = arith.constant 0 : i32
    %c0_i32_2 = arith.constant 0 : i32
    return %arg0, %c0_i32, %c0_i32_0, %c0_i32_1 : i32, i32, i32, i32
  }
  func.func @transform_3(%arg0: i32) -> (i32, i32, i32, i32) {
    %c0_i32 = arith.constant 0 : i32
    %c0_i32_0 = arith.constant 0 : i32
    %c0_i32_1 = arith.constant 0 : i32
    %c0_i32_2 = arith.constant 0 : i32
    return %arg0, %c0_i32, %c0_i32_0, %c0_i32_1 : i32, i32, i32, i32
  }
  func.func @transform_4(%arg0: i32) -> (i32, i32) {
    %c0_i32 = arith.constant 0 : i32
    %c0_i32_0 = arith.constant 0 : i32
    %c0_i32_1 = arith.constant 0 : i32
    return %c0_i32, %c0_i32_0 : i32, i32
  }
  func.func @transform_5(%arg0: i32) -> (i32, i32) {
    %c0_i32 = arith.constant 0 : i32
    %c0_i32_0 = arith.constant 0 : i32
    %c0_i32_1 = arith.constant 0 : i32
    return %c0_i32, %c0_i32_0 : i32, i32
  }
  func.func @transform_6(%arg0: i32) -> (i32, i32) {
    %c0_i32 = arith.constant 0 : i32
    %c0_i32_0 = arith.constant 0 : i32
    %c0_i32_1 = arith.constant 0 : i32
    return %c0_i32, %c0_i32_0 : i32, i32
  }
  func.func @transform_7(%arg0: i32) -> (i32, i32, i32, i32) {
    %c0_i32 = arith.constant 0 : i32
    %c0_i32_0 = arith.constant 0 : i32
    %c0_i32_1 = arith.constant 0 : i32
    %c0_i32_2 = arith.constant 0 : i32
    return %arg0, %c0_i32, %c0_i32_0, %c0_i32_1 : i32, i32, i32, i32
  }
}

module attributes {stable_mosaic.version = 11 : i64} {
  func.func @_ghost_kernel(%arg0: i32, %arg1: memref<1x16x24xbf16, #tpu.memory_space<vmem>>, %arg2: memref<16x1xi32, #tpu.memory_space<vmem>>, %arg3: memref<24x72xbf16, #tpu.memory_space<vmem>>, %arg4: memref<1x72xf32, #tpu.memory_space<vmem>>, %arg5: memref<1x72xf32, #tpu.memory_space<vmem>>, %arg6: memref<9x72xf32, #tpu.memory_space<vmem>>, %arg7: memref<1x72xf32, #tpu.memory_space<vmem>>, %arg8: memref<1x72xf32, #tpu.memory_space<vmem>>, %arg9: memref<1x16x72xbf16, #tpu.memory_space<vmem>>, %arg10: memref<26x72xf32, #tpu.memory_space<vmem>>) attributes {dimension_semantics = [#tpu.dimension_semantics<parallel>], iteration_bounds = array<i64: 2>, scalar_prefetch = 0 : i64, scratch_operands = 1 : i64, tpu.core_type = #tpu.core_type<tc>, window_params = [{transform_indices = @transform_0, window_bounds = array<i64: 1, 16, 24>}, {pipeline_mode = #tpu.pipeline_mode<synchronous>, transform_indices = @transform_1, window_bounds = array<i64: 16, 1>}, {pipeline_mode = #tpu.pipeline_mode<synchronous>, transform_indices = @transform_2, window_bounds = array<i64: 24, 72>}, {pipeline_mode = #tpu.pipeline_mode<synchronous>, transform_indices = @transform_3, window_bounds = array<i64: 1, 72>}, {pipeline_mode = #tpu.pipeline_mode<synchronous>, transform_indices = @transform_4, window_bounds = array<i64: 1, 72>}, {pipeline_mode = #tpu.pipeline_mode<synchronous>, transform_indices = @transform_5, window_bounds = array<i64: 9, 72>}, {pipeline_mode = #tpu.pipeline_mode<synchronous>, transform_indices = @transform_6, window_bounds = array<i64: 1, 72>}, {pipeline_mode = #tpu.pipeline_mode<synchronous>, transform_indices = @transform_7, window_bounds = array<i64: 1, 72>}, {transform_indices = @transform_8, window_bounds = array<i64: 1, 16, 72>}]} {
    %c0 = arith.constant 0 : index
    %c0_0 = arith.constant 0 : index
    %c0_1 = arith.constant 0 : index
    %0 = vector.load %arg1[%c0, %c0_0, %c0_1] : memref<1x16x24xbf16, #tpu.memory_space<vmem>>, vector<1x16x24xbf16>
    %1 = vector.shape_cast %0 : vector<1x16x24xbf16> to vector<16x24xbf16>
    %c0_2 = arith.constant 0 : index
    %c0_3 = arith.constant 0 : index
    %2 = vector.load %arg3[%c0_2, %c0_3] : memref<24x72xbf16, #tpu.memory_space<vmem>>, vector<24x72xbf16>
    %cst = arith.constant dense<0.000000e+00> : vector<16x72xf32>
    %3 = tpu.matmul %1, %2, %cst {dimension_numbers = #tpu.dot_dimension_numbers<[1], [0], [0], [1], [0, 0, 1, 1], [], []>} : vector<16x24xbf16>, vector<24x72xbf16>, vector<16x72xf32> -> vector<16x72xf32>
    %c0_4 = arith.constant 0 : index
    %c0_5 = arith.constant 0 : index
    %4 = vector.load %arg4[%c0_4, %c0_5] : memref<1x72xf32, #tpu.memory_space<vmem>>, vector<1x72xf32>
    %5 = vector.broadcast %4 : vector<1x72xf32> to vector<16x72xf32>
    %6 = arith.mulf %3, %5 : vector<16x72xf32>
    %c0_6 = arith.constant 0 : index
    %c0_7 = arith.constant 0 : index
    %7 = vector.load %arg5[%c0_6, %c0_7] : memref<1x72xf32, #tpu.memory_space<vmem>>, vector<1x72xf32>
    %8 = vector.broadcast %7 : vector<1x72xf32> to vector<16x72xf32>
    %9 = arith.addf %6, %8 : vector<16x72xf32>
    %cst_8 = arith.constant 0.000000e+00 : f32
    %10 = vector.broadcast %cst_8 : f32 to vector<16x72xf32>
    %11 = arith.maximumf %9, %10 : vector<16x72xf32>
    %cst_9 = arith.constant 0.000000e+00 : f32
    %12 = vector.broadcast %cst_9 : f32 to vector<5x72xf32>
    %c0_10 = arith.constant 0 : index
    %c0_11 = arith.constant 0 : index
    %13 = vector.load %arg10[%c0_10, %c0_11] : memref<26x72xf32, #tpu.memory_space<vmem>>, vector<5x72xf32>
    tpu.vector_store %arg10[%c0_10, %c0_11], %12 {strides = array<i32>} : memref<26x72xf32, #tpu.memory_space<vmem>>, vector<5x72xf32>,
    %cst_12 = arith.constant 0.000000e+00 : f32
    %14 = vector.broadcast %cst_12 : f32 to vector<5x72xf32>
    %c21 = arith.constant 21 : index
    %c0_13 = arith.constant 0 : index
    %15 = vector.load %arg10[%c21, %c0_13] : memref<26x72xf32, #tpu.memory_space<vmem>>, vector<5x72xf32>
    tpu.vector_store %arg10[%c21, %c0_13], %14 {strides = array<i32>} : memref<26x72xf32, #tpu.memory_space<vmem>>, vector<5x72xf32>,
    %c5 = arith.constant 5 : index
    %c0_14 = arith.constant 0 : index
    %16 = vector.load %arg10[%c5, %c0_14] : memref<26x72xf32, #tpu.memory_space<vmem>>, vector<16x72xf32>
    tpu.vector_store %arg10[%c5, %c0_14], %11 {strides = array<i32>} : memref<26x72xf32, #tpu.memory_space<vmem>>, vector<16x72xf32>,
    %c0_15 = arith.constant 0 : index
    %c0_16 = arith.constant 0 : index
    %17 = vector.load %arg2[%c0_15, %c0_16] : memref<16x1xi32, #tpu.memory_space<vmem>>, vector<16x1xi32>
    %cst_17 = arith.constant 0.000000e+00 : f32
    %18 = vector.broadcast %cst_17 : f32 to vector<16x72xf32>
    %c0_18 = arith.constant 0 : index
    %c0_19 = arith.constant 0 : index
    %19 = vector.load %arg10[%c0_18, %c0_19] : memref<26x72xf32, #tpu.memory_space<vmem>>, vector<16x72xf32>
    %c0_i32 = arith.constant 0 : i32
    %20 = vector.broadcast %c0_i32 : i32 to vector<16x1xi32>
    %21 = arith.cmpi sgt, %17, %20 : vector<16x1xi32>
    %cst_20 = arith.constant 0.000000e+00 : f32
    %22 = vector.shape_cast %21 : vector<16x1xi1> to vector<16x1xi1>
    %23 = vector.broadcast %22 : vector<16x1xi1> to vector<16x72xi1>
    %24 = vector.broadcast %cst_20 : f32 to vector<16x72xf32>
    %25 = arith.select %23, %19, %24 : vector<16x72xi1>, vector<16x72xf32>
    %c0_21 = arith.constant 0 : index
    %c0_22 = arith.constant 0 : index
    %26 = vector.load %arg6[%c0_21, %c0_22] : memref<9x72xf32, #tpu.memory_space<vmem>>, vector<1x72xf32>
    %27 = vector.broadcast %26 : vector<1x72xf32> to vector<16x72xf32>
    %28 = arith.mulf %25, %27 : vector<16x72xf32>
    %29 = arith.addf %18, %28 : vector<16x72xf32>
    %c1 = arith.constant 1 : index
    %c0_23 = arith.constant 0 : index
    %30 = vector.load %arg10[%c1, %c0_23] : memref<26x72xf32, #tpu.memory_space<vmem>>, vector<16x72xf32>
    %c1_24 = arith.constant 1 : index
    %c0_25 = arith.constant 0 : index
    %31 = vector.load %arg6[%c1_24, %c0_25] : memref<9x72xf32, #tpu.memory_space<vmem>>, vector<1x72xf32>
    %32 = vector.broadcast %31 : vector<1x72xf32> to vector<16x72xf32>
    %33 = arith.mulf %30, %32 : vector<16x72xf32>
    %34 = arith.addf %29, %33 : vector<16x72xf32>
    %c2 = arith.constant 2 : index
    %c0_26 = arith.constant 0 : index
    %35 = vector.load %arg10[%c2, %c0_26] : memref<26x72xf32, #tpu.memory_space<vmem>>, vector<16x72xf32>
    %c3_i32 = arith.constant 3 : i32
    %36 = vector.broadcast %c3_i32 : i32 to vector<16x1xi32>
    %37 = arith.cmpi slt, %17, %36 : vector<16x1xi32>
    %cst_27 = arith.constant 0.000000e+00 : f32
    %38 = vector.shape_cast %37 : vector<16x1xi1> to vector<16x1xi1>
    %39 = vector.broadcast %38 : vector<16x1xi1> to vector<16x72xi1>
    %40 = vector.broadcast %cst_27 : f32 to vector<16x72xf32>
    %41 = arith.select %39, %35, %40 : vector<16x72xi1>, vector<16x72xf32>
    %c2_28 = arith.constant 2 : index
    %c0_29 = arith.constant 0 : index
    %42 = vector.load %arg6[%c2_28, %c0_29] : memref<9x72xf32, #tpu.memory_space<vmem>>, vector<1x72xf32>
    %43 = vector.broadcast %42 : vector<1x72xf32> to vector<16x72xf32>
    %44 = arith.mulf %41, %43 : vector<16x72xf32>
    %45 = arith.addf %34, %44 : vector<16x72xf32>
    %c4 = arith.constant 4 : index
    %c0_30 = arith.constant 0 : index
    %46 = vector.load %arg10[%c4, %c0_30] : memref<26x72xf32, #tpu.memory_space<vmem>>, vector<16x72xf32>
    %c0_i32_31 = arith.constant 0 : i32
    %47 = vector.broadcast %c0_i32_31 : i32 to vector<16x1xi32>
    %48 = arith.cmpi sgt, %17, %47 : vector<16x1xi32>
    %cst_32 = arith.constant 0.000000e+00 : f32
    %49 = vector.shape_cast %48 : vector<16x1xi1> to vector<16x1xi1>
    %50 = vector.broadcast %49 : vector<16x1xi1> to vector<16x72xi1>
    %51 = vector.broadcast %cst_32 : f32 to vector<16x72xf32>
    %52 = arith.select %50, %46, %51 : vector<16x72xi1>, vector<16x72xf32>
    %c3 = arith.constant 3 : index
    %c0_33 = arith.constant 0 : index
    %53 = vector.load %arg6[%c3, %c0_33] : memref<9x72xf32, #tpu.memory_space<vmem>>, vector<1x72xf32>
    %54 = vector.broadcast %53 : vector<1x72xf32> to vector<16x72xf32>
    %55 = arith.mulf %52, %54 : vector<16x72xf32>
    %56 = arith.addf %45, %55 : vector<16x72xf32>
    %c5_34 = arith.constant 5 : index
    %c0_35 = arith.constant 0 : index
    %57 = vector.load %arg10[%c5_34, %c0_35] : memref<26x72xf32, #tpu.memory_space<vmem>>, vector<16x72xf32>
    %c4_36 = arith.constant 4 : index
    %c0_37 = arith.constant 0 : index
    %58 = vector.load %arg6[%c4_36, %c0_37] : memref<9x72xf32, #tpu.memory_space<vmem>>, vector<1x72xf32>
    %59 = vector.broadcast %58 : vector<1x72xf32> to vector<16x72xf32>
    %60 = arith.mulf %57, %59 : vector<16x72xf32>
    %61 = arith.addf %56, %60 : vector<16x72xf32>
    %c6 = arith.constant 6 : index
    %c0_38 = arith.constant 0 : index
    %62 = vector.load %arg10[%c6, %c0_38] : memref<26x72xf32, #tpu.memory_space<vmem>>, vector<16x72xf32>
    %c3_i32_39 = arith.constant 3 : i32
    %63 = vector.broadcast %c3_i32_39 : i32 to vector<16x1xi32>
    %64 = arith.cmpi slt, %17, %63 : vector<16x1xi32>
    %cst_40 = arith.constant 0.000000e+00 : f32
    %65 = vector.shape_cast %64 : vector<16x1xi1> to vector<16x1xi1>
    %66 = vector.broadcast %65 : vector<16x1xi1> to vector<16x72xi1>
    %67 = vector.broadcast %cst_40 : f32 to vector<16x72xf32>
    %68 = arith.select %66, %62, %67 : vector<16x72xi1>, vector<16x72xf32>
    %c5_41 = arith.constant 5 : index
    %c0_42 = arith.constant 0 : index
    %69 = vector.load %arg6[%c5_41, %c0_42] : memref<9x72xf32, #tpu.memory_space<vmem>>, vector<1x72xf32>
    %70 = vector.broadcast %69 : vector<1x72xf32> to vector<16x72xf32>
    %71 = arith.mulf %68, %70 : vector<16x72xf32>
    %72 = arith.addf %61, %71 : vector<16x72xf32>
    %c8 = arith.constant 8 : index
    %c0_43 = arith.constant 0 : index
    %73 = vector.load %arg10[%c8, %c0_43] : memref<26x72xf32, #tpu.memory_space<vmem>>, vector<16x72xf32>
    %c0_i32_44 = arith.constant 0 : i32
    %74 = vector.broadcast %c0_i32_44 : i32 to vector<16x1xi32>
    %75 = arith.cmpi sgt, %17, %74 : vector<16x1xi32>
    %cst_45 = arith.constant 0.000000e+00 : f32
    %76 = vector.shape_cast %75 : vector<16x1xi1> to vector<16x1xi1>
    %77 = vector.broadcast %76 : vector<16x1xi1> to vector<16x72xi1>
    %78 = vector.broadcast %cst_45 : f32 to vector<16x72xf32>
    %79 = arith.select %77, %73, %78 : vector<16x72xi1>, vector<16x72xf32>
    %c6_46 = arith.constant 6 : index
    %c0_47 = arith.constant 0 : index
    %80 = vector.load %arg6[%c6_46, %c0_47] : memref<9x72xf32, #tpu.memory_space<vmem>>, vector<1x72xf32>
    %81 = vector.broadcast %80 : vector<1x72xf32> to vector<16x72xf32>
    %82 = arith.mulf %79, %81 : vector<16x72xf32>
    %83 = arith.addf %72, %82 : vector<16x72xf32>
    %c9 = arith.constant 9 : index
    %c0_48 = arith.constant 0 : index
    %84 = vector.load %arg10[%c9, %c0_48] : memref<26x72xf32, #tpu.memory_space<vmem>>, vector<16x72xf32>
    %c7 = arith.constant 7 : index
    %c0_49 = arith.constant 0 : index
    %85 = vector.load %arg6[%c7, %c0_49] : memref<9x72xf32, #tpu.memory_space<vmem>>, vector<1x72xf32>
    %86 = vector.broadcast %85 : vector<1x72xf32> to vector<16x72xf32>
    %87 = arith.mulf %84, %86 : vector<16x72xf32>
    %88 = arith.addf %83, %87 : vector<16x72xf32>
    %c10 = arith.constant 10 : index
    %c0_50 = arith.constant 0 : index
    %89 = vector.load %arg10[%c10, %c0_50] : memref<26x72xf32, #tpu.memory_space<vmem>>, vector<16x72xf32>
    %c3_i32_51 = arith.constant 3 : i32
    %90 = vector.broadcast %c3_i32_51 : i32 to vector<16x1xi32>
    %91 = arith.cmpi slt, %17, %90 : vector<16x1xi32>
    %cst_52 = arith.constant 0.000000e+00 : f32
    %92 = vector.shape_cast %91 : vector<16x1xi1> to vector<16x1xi1>
    %93 = vector.broadcast %92 : vector<16x1xi1> to vector<16x72xi1>
    %94 = vector.broadcast %cst_52 : f32 to vector<16x72xf32>
    %95 = arith.select %93, %89, %94 : vector<16x72xi1>, vector<16x72xf32>
    %c8_53 = arith.constant 8 : index
    %c0_54 = arith.constant 0 : index
    %96 = vector.load %arg6[%c8_53, %c0_54] : memref<9x72xf32, #tpu.memory_space<vmem>>, vector<1x72xf32>
    %97 = vector.broadcast %96 : vector<1x72xf32> to vector<16x72xf32>
    %98 = arith.mulf %95, %97 : vector<16x72xf32>
    %99 = arith.addf %88, %98 : vector<16x72xf32>
    %c0_55 = arith.constant 0 : index
    %c0_56 = arith.constant 0 : index
    %100 = vector.load %arg7[%c0_55, %c0_56] : memref<1x72xf32, #tpu.memory_space<vmem>>, vector<1x72xf32>
    %101 = vector.broadcast %100 : vector<1x72xf32> to vector<16x72xf32>
    %102 = arith.mulf %99, %101 : vector<16x72xf32>
    %c0_57 = arith.constant 0 : index
    %c0_58 = arith.constant 0 : index
    %103 = vector.load %arg8[%c0_57, %c0_58] : memref<1x72xf32, #tpu.memory_space<vmem>>, vector<1x72xf32>
    %104 = vector.broadcast %103 : vector<1x72xf32> to vector<16x72xf32>
    %105 = arith.addf %102, %104 : vector<16x72xf32>
    %cst_59 = arith.constant 0.000000e+00 : f32
    %106 = vector.broadcast %cst_59 : f32 to vector<16x72xf32>
    %107 = arith.maximumf %105, %106 : vector<16x72xf32>
    %108 = tpu.iota {dimensions = array<i32: 1>} : vector<1x72xi32>
    %c36_i32 = arith.constant 36 : i32
    %109 = vector.broadcast %c36_i32 : i32 to vector<1x72xi32>
    %110 = arith.cmpi slt, %108, %109 : vector<1x72xi32>
    %cst_60 = arith.constant 0.000000e+00 : f32
    %111 = vector.shape_cast %110 : vector<1x72xi1> to vector<1x72xi1>
    %112 = vector.broadcast %111 : vector<1x72xi1> to vector<16x72xi1>
    %113 = vector.broadcast %cst_60 : f32 to vector<16x72xf32>
    %114 = arith.select %112, %11, %113 : vector<16x72xi1>, vector<16x72xf32>
    %115 = arith.addf %114, %107 : vector<16x72xf32>
    %116 = arith.truncf %115 : vector<16x72xf32> to vector<16x72xbf16>
    %c0_61 = arith.constant 0 : index
    %c0_62 = arith.constant 0 : index
    %c0_63 = arith.constant 0 : index
    %117 = vector.load %arg9[%c0_61, %c0_62, %c0_63] : memref<1x16x72xbf16, #tpu.memory_space<vmem>>, vector<1x16x72xbf16>
    %118 = vector.shape_cast %117 : vector<1x16x72xbf16> to vector<16x72xbf16>
    %119 = vector.shape_cast %116 : vector<16x72xbf16> to vector<1x16x72xbf16>
    tpu.vector_store %arg9[%c0_61, %c0_62, %c0_63], %119 {strides = array<i32>} : memref<1x16x72xbf16, #tpu.memory_space<vmem>>, vector<1x16x72xbf16>,
    return
  }
  func.func @transform_0(%arg0: i32) -> (i32, i32, i32) {
    %c0_i32 = arith.constant 0 : i32
    %c0_i32_0 = arith.constant 0 : i32
    %c0_i32_1 = arith.constant 0 : i32
    return %arg0, %c0_i32, %c0_i32_0 : i32, i32, i32
  }
  func.func @transform_1(%arg0: i32) -> (i32, i32) {
    %c0_i32 = arith.constant 0 : i32
    %c0_i32_0 = arith.constant 0 : i32
    %c0_i32_1 = arith.constant 0 : i32
    return %c0_i32, %c0_i32_0 : i32, i32
  }
  func.func @transform_2(%arg0: i32) -> (i32, i32) {
    %c0_i32 = arith.constant 0 : i32
    %c0_i32_0 = arith.constant 0 : i32
    %c0_i32_1 = arith.constant 0 : i32
    return %c0_i32, %c0_i32_0 : i32, i32
  }
  func.func @transform_3(%arg0: i32) -> (i32, i32) {
    %c0_i32 = arith.constant 0 : i32
    %c0_i32_0 = arith.constant 0 : i32
    %c0_i32_1 = arith.constant 0 : i32
    return %c0_i32, %c0_i32_0 : i32, i32
  }
  func.func @transform_4(%arg0: i32) -> (i32, i32) {
    %c0_i32 = arith.constant 0 : i32
    %c0_i32_0 = arith.constant 0 : i32
    %c0_i32_1 = arith.constant 0 : i32
    return %c0_i32, %c0_i32_0 : i32, i32
  }
  func.func @transform_5(%arg0: i32) -> (i32, i32) {
    %c0_i32 = arith.constant 0 : i32
    %c0_i32_0 = arith.constant 0 : i32
    %c0_i32_1 = arith.constant 0 : i32
    return %c0_i32, %c0_i32_0 : i32, i32
  }
  func.func @transform_6(%arg0: i32) -> (i32, i32) {
    %c0_i32 = arith.constant 0 : i32
    %c0_i32_0 = arith.constant 0 : i32
    %c0_i32_1 = arith.constant 0 : i32
    return %c0_i32, %c0_i32_0 : i32, i32
  }
  func.func @transform_7(%arg0: i32) -> (i32, i32) {
    %c0_i32 = arith.constant 0 : i32
    %c0_i32_0 = arith.constant 0 : i32
    %c0_i32_1 = arith.constant 0 : i32
    return %c0_i32, %c0_i32_0 : i32, i32
  }
  func.func @transform_8(%arg0: i32) -> (i32, i32, i32) {
    %c0_i32 = arith.constant 0 : i32
    %c0_i32_0 = arith.constant 0 : i32
    %c0_i32_1 = arith.constant 0 : i32
    return %arg0, %c0_i32, %c0_i32_0 : i32, i32, i32
  }
}

module attributes {stable_mosaic.version = 11 : i64} {
  func.func @_ghost_kernel(%arg0: i32, %arg1: memref<1x16x72xbf16, #tpu.memory_space<vmem>>, %arg2: memref<16x1xi32, #tpu.memory_space<vmem>>, %arg3: memref<72x24xbf16, #tpu.memory_space<vmem>>, %arg4: memref<1x24xf32, #tpu.memory_space<vmem>>, %arg5: memref<1x24xf32, #tpu.memory_space<vmem>>, %arg6: memref<9x24xf32, #tpu.memory_space<vmem>>, %arg7: memref<1x24xf32, #tpu.memory_space<vmem>>, %arg8: memref<1x24xf32, #tpu.memory_space<vmem>>, %arg9: memref<1x16x24xbf16, #tpu.memory_space<vmem>>, %arg10: memref<1x16x24xbf16, #tpu.memory_space<vmem>>, %arg11: memref<26x24xf32, #tpu.memory_space<vmem>>) attributes {dimension_semantics = [#tpu.dimension_semantics<parallel>], iteration_bounds = array<i64: 2>, scalar_prefetch = 0 : i64, scratch_operands = 1 : i64, tpu.core_type = #tpu.core_type<tc>, window_params = [{transform_indices = @transform_0, window_bounds = array<i64: 1, 16, 72>}, {pipeline_mode = #tpu.pipeline_mode<synchronous>, transform_indices = @transform_1, window_bounds = array<i64: 16, 1>}, {pipeline_mode = #tpu.pipeline_mode<synchronous>, transform_indices = @transform_2, window_bounds = array<i64: 72, 24>}, {pipeline_mode = #tpu.pipeline_mode<synchronous>, transform_indices = @transform_3, window_bounds = array<i64: 1, 24>}, {pipeline_mode = #tpu.pipeline_mode<synchronous>, transform_indices = @transform_4, window_bounds = array<i64: 1, 24>}, {pipeline_mode = #tpu.pipeline_mode<synchronous>, transform_indices = @transform_5, window_bounds = array<i64: 9, 24>}, {pipeline_mode = #tpu.pipeline_mode<synchronous>, transform_indices = @transform_6, window_bounds = array<i64: 1, 24>}, {pipeline_mode = #tpu.pipeline_mode<synchronous>, transform_indices = @transform_7, window_bounds = array<i64: 1, 24>}, {transform_indices = @transform_8, window_bounds = array<i64: 1, 16, 24>}, {transform_indices = @transform_9, window_bounds = array<i64: 1, 16, 24>}]} {
    %c0 = arith.constant 0 : index
    %c0_0 = arith.constant 0 : index
    %c0_1 = arith.constant 0 : index
    %0 = vector.load %arg1[%c0, %c0_0, %c0_1] : memref<1x16x72xbf16, #tpu.memory_space<vmem>>, vector<1x16x72xbf16>
    %1 = vector.shape_cast %0 : vector<1x16x72xbf16> to vector<16x72xbf16>
    %c0_2 = arith.constant 0 : index
    %c0_3 = arith.constant 0 : index
    %2 = vector.load %arg3[%c0_2, %c0_3] : memref<72x24xbf16, #tpu.memory_space<vmem>>, vector<72x24xbf16>
    %cst = arith.constant dense<0.000000e+00> : vector<16x24xf32>
    %3 = tpu.matmul %1, %2, %cst {dimension_numbers = #tpu.dot_dimension_numbers<[1], [0], [0], [1], [0, 0, 1, 1], [], []>} : vector<16x72xbf16>, vector<72x24xbf16>, vector<16x24xf32> -> vector<16x24xf32>
    %c0_4 = arith.constant 0 : index
    %c0_5 = arith.constant 0 : index
    %4 = vector.load %arg4[%c0_4, %c0_5] : memref<1x24xf32, #tpu.memory_space<vmem>>, vector<1x24xf32>
    %5 = vector.broadcast %4 : vector<1x24xf32> to vector<16x24xf32>
    %6 = arith.mulf %3, %5 : vector<16x24xf32>
    %c0_6 = arith.constant 0 : index
    %c0_7 = arith.constant 0 : index
    %7 = vector.load %arg5[%c0_6, %c0_7] : memref<1x24xf32, #tpu.memory_space<vmem>>, vector<1x24xf32>
    %8 = vector.broadcast %7 : vector<1x24xf32> to vector<16x24xf32>
    %9 = arith.addf %6, %8 : vector<16x24xf32>
    %cst_8 = arith.constant 0.000000e+00 : f32
    %10 = vector.broadcast %cst_8 : f32 to vector<5x24xf32>
    %c0_9 = arith.constant 0 : index
    %c0_10 = arith.constant 0 : index
    %11 = vector.load %arg11[%c0_9, %c0_10] : memref<26x24xf32, #tpu.memory_space<vmem>>, vector<5x24xf32>
    tpu.vector_store %arg11[%c0_9, %c0_10], %10 {strides = array<i32>} : memref<26x24xf32, #tpu.memory_space<vmem>>, vector<5x24xf32>,
    %cst_11 = arith.constant 0.000000e+00 : f32
    %12 = vector.broadcast %cst_11 : f32 to vector<5x24xf32>
    %c21 = arith.constant 21 : index
    %c0_12 = arith.constant 0 : index
    %13 = vector.load %arg11[%c21, %c0_12] : memref<26x24xf32, #tpu.memory_space<vmem>>, vector<5x24xf32>
    tpu.vector_store %arg11[%c21, %c0_12], %12 {strides = array<i32>} : memref<26x24xf32, #tpu.memory_space<vmem>>, vector<5x24xf32>,
    %c5 = arith.constant 5 : index
    %c0_13 = arith.constant 0 : index
    %14 = vector.load %arg11[%c5, %c0_13] : memref<26x24xf32, #tpu.memory_space<vmem>>, vector<16x24xf32>
    tpu.vector_store %arg11[%c5, %c0_13], %9 {strides = array<i32>} : memref<26x24xf32, #tpu.memory_space<vmem>>, vector<16x24xf32>,
    %c0_14 = arith.constant 0 : index
    %c0_15 = arith.constant 0 : index
    %15 = vector.load %arg2[%c0_14, %c0_15] : memref<16x1xi32, #tpu.memory_space<vmem>>, vector<16x1xi32>
    %cst_16 = arith.constant 0.000000e+00 : f32
    %16 = vector.broadcast %cst_16 : f32 to vector<16x24xf32>
    %c0_17 = arith.constant 0 : index
    %c0_18 = arith.constant 0 : index
    %17 = vector.load %arg11[%c0_17, %c0_18] : memref<26x24xf32, #tpu.memory_space<vmem>>, vector<16x24xf32>
    %c0_i32 = arith.constant 0 : i32
    %18 = vector.broadcast %c0_i32 : i32 to vector<16x1xi32>
    %19 = arith.cmpi sgt, %15, %18 : vector<16x1xi32>
    %cst_19 = arith.constant 0.000000e+00 : f32
    %20 = vector.shape_cast %19 : vector<16x1xi1> to vector<16x1xi1>
    %21 = vector.broadcast %20 : vector<16x1xi1> to vector<16x24xi1>
    %22 = vector.broadcast %cst_19 : f32 to vector<16x24xf32>
    %23 = arith.select %21, %17, %22 : vector<16x24xi1>, vector<16x24xf32>
    %c0_20 = arith.constant 0 : index
    %c0_21 = arith.constant 0 : index
    %24 = vector.load %arg6[%c0_20, %c0_21] : memref<9x24xf32, #tpu.memory_space<vmem>>, vector<1x24xf32>
    %25 = vector.broadcast %24 : vector<1x24xf32> to vector<16x24xf32>
    %26 = arith.mulf %23, %25 : vector<16x24xf32>
    %27 = arith.addf %16, %26 : vector<16x24xf32>
    %c1 = arith.constant 1 : index
    %c0_22 = arith.constant 0 : index
    %28 = vector.load %arg11[%c1, %c0_22] : memref<26x24xf32, #tpu.memory_space<vmem>>, vector<16x24xf32>
    %c1_23 = arith.constant 1 : index
    %c0_24 = arith.constant 0 : index
    %29 = vector.load %arg6[%c1_23, %c0_24] : memref<9x24xf32, #tpu.memory_space<vmem>>, vector<1x24xf32>
    %30 = vector.broadcast %29 : vector<1x24xf32> to vector<16x24xf32>
    %31 = arith.mulf %28, %30 : vector<16x24xf32>
    %32 = arith.addf %27, %31 : vector<16x24xf32>
    %c2 = arith.constant 2 : index
    %c0_25 = arith.constant 0 : index
    %33 = vector.load %arg11[%c2, %c0_25] : memref<26x24xf32, #tpu.memory_space<vmem>>, vector<16x24xf32>
    %c3_i32 = arith.constant 3 : i32
    %34 = vector.broadcast %c3_i32 : i32 to vector<16x1xi32>
    %35 = arith.cmpi slt, %15, %34 : vector<16x1xi32>
    %cst_26 = arith.constant 0.000000e+00 : f32
    %36 = vector.shape_cast %35 : vector<16x1xi1> to vector<16x1xi1>
    %37 = vector.broadcast %36 : vector<16x1xi1> to vector<16x24xi1>
    %38 = vector.broadcast %cst_26 : f32 to vector<16x24xf32>
    %39 = arith.select %37, %33, %38 : vector<16x24xi1>, vector<16x24xf32>
    %c2_27 = arith.constant 2 : index
    %c0_28 = arith.constant 0 : index
    %40 = vector.load %arg6[%c2_27, %c0_28] : memref<9x24xf32, #tpu.memory_space<vmem>>, vector<1x24xf32>
    %41 = vector.broadcast %40 : vector<1x24xf32> to vector<16x24xf32>
    %42 = arith.mulf %39, %41 : vector<16x24xf32>
    %43 = arith.addf %32, %42 : vector<16x24xf32>
    %c4 = arith.constant 4 : index
    %c0_29 = arith.constant 0 : index
    %44 = vector.load %arg11[%c4, %c0_29] : memref<26x24xf32, #tpu.memory_space<vmem>>, vector<16x24xf32>
    %c0_i32_30 = arith.constant 0 : i32
    %45 = vector.broadcast %c0_i32_30 : i32 to vector<16x1xi32>
    %46 = arith.cmpi sgt, %15, %45 : vector<16x1xi32>
    %cst_31 = arith.constant 0.000000e+00 : f32
    %47 = vector.shape_cast %46 : vector<16x1xi1> to vector<16x1xi1>
    %48 = vector.broadcast %47 : vector<16x1xi1> to vector<16x24xi1>
    %49 = vector.broadcast %cst_31 : f32 to vector<16x24xf32>
    %50 = arith.select %48, %44, %49 : vector<16x24xi1>, vector<16x24xf32>
    %c3 = arith.constant 3 : index
    %c0_32 = arith.constant 0 : index
    %51 = vector.load %arg6[%c3, %c0_32] : memref<9x24xf32, #tpu.memory_space<vmem>>, vector<1x24xf32>
    %52 = vector.broadcast %51 : vector<1x24xf32> to vector<16x24xf32>
    %53 = arith.mulf %50, %52 : vector<16x24xf32>
    %54 = arith.addf %43, %53 : vector<16x24xf32>
    %c5_33 = arith.constant 5 : index
    %c0_34 = arith.constant 0 : index
    %55 = vector.load %arg11[%c5_33, %c0_34] : memref<26x24xf32, #tpu.memory_space<vmem>>, vector<16x24xf32>
    %c4_35 = arith.constant 4 : index
    %c0_36 = arith.constant 0 : index
    %56 = vector.load %arg6[%c4_35, %c0_36] : memref<9x24xf32, #tpu.memory_space<vmem>>, vector<1x24xf32>
    %57 = vector.broadcast %56 : vector<1x24xf32> to vector<16x24xf32>
    %58 = arith.mulf %55, %57 : vector<16x24xf32>
    %59 = arith.addf %54, %58 : vector<16x24xf32>
    %c6 = arith.constant 6 : index
    %c0_37 = arith.constant 0 : index
    %60 = vector.load %arg11[%c6, %c0_37] : memref<26x24xf32, #tpu.memory_space<vmem>>, vector<16x24xf32>
    %c3_i32_38 = arith.constant 3 : i32
    %61 = vector.broadcast %c3_i32_38 : i32 to vector<16x1xi32>
    %62 = arith.cmpi slt, %15, %61 : vector<16x1xi32>
    %cst_39 = arith.constant 0.000000e+00 : f32
    %63 = vector.shape_cast %62 : vector<16x1xi1> to vector<16x1xi1>
    %64 = vector.broadcast %63 : vector<16x1xi1> to vector<16x24xi1>
    %65 = vector.broadcast %cst_39 : f32 to vector<16x24xf32>
    %66 = arith.select %64, %60, %65 : vector<16x24xi1>, vector<16x24xf32>
    %c5_40 = arith.constant 5 : index
    %c0_41 = arith.constant 0 : index
    %67 = vector.load %arg6[%c5_40, %c0_41] : memref<9x24xf32, #tpu.memory_space<vmem>>, vector<1x24xf32>
    %68 = vector.broadcast %67 : vector<1x24xf32> to vector<16x24xf32>
    %69 = arith.mulf %66, %68 : vector<16x24xf32>
    %70 = arith.addf %59, %69 : vector<16x24xf32>
    %c8 = arith.constant 8 : index
    %c0_42 = arith.constant 0 : index
    %71 = vector.load %arg11[%c8, %c0_42] : memref<26x24xf32, #tpu.memory_space<vmem>>, vector<16x24xf32>
    %c0_i32_43 = arith.constant 0 : i32
    %72 = vector.broadcast %c0_i32_43 : i32 to vector<16x1xi32>
    %73 = arith.cmpi sgt, %15, %72 : vector<16x1xi32>
    %cst_44 = arith.constant 0.000000e+00 : f32
    %74 = vector.shape_cast %73 : vector<16x1xi1> to vector<16x1xi1>
    %75 = vector.broadcast %74 : vector<16x1xi1> to vector<16x24xi1>
    %76 = vector.broadcast %cst_44 : f32 to vector<16x24xf32>
    %77 = arith.select %75, %71, %76 : vector<16x24xi1>, vector<16x24xf32>
    %c6_45 = arith.constant 6 : index
    %c0_46 = arith.constant 0 : index
    %78 = vector.load %arg6[%c6_45, %c0_46] : memref<9x24xf32, #tpu.memory_space<vmem>>, vector<1x24xf32>
    %79 = vector.broadcast %78 : vector<1x24xf32> to vector<16x24xf32>
    %80 = arith.mulf %77, %79 : vector<16x24xf32>
    %81 = arith.addf %70, %80 : vector<16x24xf32>
    %c9 = arith.constant 9 : index
    %c0_47 = arith.constant 0 : index
    %82 = vector.load %arg11[%c9, %c0_47] : memref<26x24xf32, #tpu.memory_space<vmem>>, vector<16x24xf32>
    %c7 = arith.constant 7 : index
    %c0_48 = arith.constant 0 : index
    %83 = vector.load %arg6[%c7, %c0_48] : memref<9x24xf32, #tpu.memory_space<vmem>>, vector<1x24xf32>
    %84 = vector.broadcast %83 : vector<1x24xf32> to vector<16x24xf32>
    %85 = arith.mulf %82, %84 : vector<16x24xf32>
    %86 = arith.addf %81, %85 : vector<16x24xf32>
    %c10 = arith.constant 10 : index
    %c0_49 = arith.constant 0 : index
    %87 = vector.load %arg11[%c10, %c0_49] : memref<26x24xf32, #tpu.memory_space<vmem>>, vector<16x24xf32>
    %c3_i32_50 = arith.constant 3 : i32
    %88 = vector.broadcast %c3_i32_50 : i32 to vector<16x1xi32>
    %89 = arith.cmpi slt, %15, %88 : vector<16x1xi32>
    %cst_51 = arith.constant 0.000000e+00 : f32
    %90 = vector.shape_cast %89 : vector<16x1xi1> to vector<16x1xi1>
    %91 = vector.broadcast %90 : vector<16x1xi1> to vector<16x24xi1>
    %92 = vector.broadcast %cst_51 : f32 to vector<16x24xf32>
    %93 = arith.select %91, %87, %92 : vector<16x24xi1>, vector<16x24xf32>
    %c8_52 = arith.constant 8 : index
    %c0_53 = arith.constant 0 : index
    %94 = vector.load %arg6[%c8_52, %c0_53] : memref<9x24xf32, #tpu.memory_space<vmem>>, vector<1x24xf32>
    %95 = vector.broadcast %94 : vector<1x24xf32> to vector<16x24xf32>
    %96 = arith.mulf %93, %95 : vector<16x24xf32>
    %97 = arith.addf %86, %96 : vector<16x24xf32>
    %c0_54 = arith.constant 0 : index
    %c0_55 = arith.constant 0 : index
    %98 = vector.load %arg7[%c0_54, %c0_55] : memref<1x24xf32, #tpu.memory_space<vmem>>, vector<1x24xf32>
    %99 = vector.broadcast %98 : vector<1x24xf32> to vector<16x24xf32>
    %100 = arith.mulf %97, %99 : vector<16x24xf32>
    %c0_56 = arith.constant 0 : index
    %c0_57 = arith.constant 0 : index
    %101 = vector.load %arg8[%c0_56, %c0_57] : memref<1x24xf32, #tpu.memory_space<vmem>>, vector<1x24xf32>
    %102 = vector.broadcast %101 : vector<1x24xf32> to vector<16x24xf32>
    %103 = arith.addf %100, %102 : vector<16x24xf32>
    %104 = tpu.iota {dimensions = array<i32: 1>} : vector<1x24xi32>
    %c12_i32 = arith.constant 12 : i32
    %105 = vector.broadcast %c12_i32 : i32 to vector<1x24xi32>
    %106 = arith.cmpi slt, %104, %105 : vector<1x24xi32>
    %cst_58 = arith.constant 0.000000e+00 : f32
    %107 = vector.shape_cast %106 : vector<1x24xi1> to vector<1x24xi1>
    %108 = vector.broadcast %107 : vector<1x24xi1> to vector<16x24xi1>
    %109 = vector.broadcast %cst_58 : f32 to vector<16x24xf32>
    %110 = arith.select %108, %9, %109 : vector<16x24xi1>, vector<16x24xf32>
    %111 = arith.addf %110, %103 : vector<16x24xf32>
    %c0_59 = arith.constant 0 : index
    %c0_60 = arith.constant 0 : index
    %c0_61 = arith.constant 0 : index
    %112 = vector.load %arg9[%c0_59, %c0_60, %c0_61] : memref<1x16x24xbf16, #tpu.memory_space<vmem>>, vector<1x16x24xbf16>
    %113 = vector.shape_cast %112 : vector<1x16x24xbf16> to vector<16x24xbf16>
    %114 = arith.extf %113 : vector<16x24xbf16> to vector<16x24xf32>
    %115 = arith.addf %111, %114 : vector<16x24xf32>
    %116 = arith.truncf %115 : vector<16x24xf32> to vector<16x24xbf16>
    %c0_62 = arith.constant 0 : index
    %c0_63 = arith.constant 0 : index
    %c0_64 = arith.constant 0 : index
    %117 = vector.load %arg10[%c0_62, %c0_63, %c0_64] : memref<1x16x24xbf16, #tpu.memory_space<vmem>>, vector<1x16x24xbf16>
    %118 = vector.shape_cast %117 : vector<1x16x24xbf16> to vector<16x24xbf16>
    %119 = vector.shape_cast %116 : vector<16x24xbf16> to vector<1x16x24xbf16>
    tpu.vector_store %arg10[%c0_62, %c0_63, %c0_64], %119 {strides = array<i32>} : memref<1x16x24xbf16, #tpu.memory_space<vmem>>, vector<1x16x24xbf16>,
    return
  }
  func.func @transform_0(%arg0: i32) -> (i32, i32, i32) {
    %c0_i32 = arith.constant 0 : i32
    %c0_i32_0 = arith.constant 0 : i32
    %c0_i32_1 = arith.constant 0 : i32
    return %arg0, %c0_i32, %c0_i32_0 : i32, i32, i32
  }
  func.func @transform_1(%arg0: i32) -> (i32, i32) {
    %c0_i32 = arith.constant 0 : i32
    %c0_i32_0 = arith.constant 0 : i32
    %c0_i32_1 = arith.constant 0 : i32
    return %c0_i32, %c0_i32_0 : i32, i32
  }
  func.func @transform_2(%arg0: i32) -> (i32, i32) {
    %c0_i32 = arith.constant 0 : i32
    %c0_i32_0 = arith.constant 0 : i32
    %c0_i32_1 = arith.constant 0 : i32
    return %c0_i32, %c0_i32_0 : i32, i32
  }
  func.func @transform_3(%arg0: i32) -> (i32, i32) {
    %c0_i32 = arith.constant 0 : i32
    %c0_i32_0 = arith.constant 0 : i32
    %c0_i32_1 = arith.constant 0 : i32
    return %c0_i32, %c0_i32_0 : i32, i32
  }
  func.func @transform_4(%arg0: i32) -> (i32, i32) {
    %c0_i32 = arith.constant 0 : i32
    %c0_i32_0 = arith.constant 0 : i32
    %c0_i32_1 = arith.constant 0 : i32
    return %c0_i32, %c0_i32_0 : i32, i32
  }
  func.func @transform_5(%arg0: i32) -> (i32, i32) {
    %c0_i32 = arith.constant 0 : i32
    %c0_i32_0 = arith.constant 0 : i32
    %c0_i32_1 = arith.constant 0 : i32
    return %c0_i32, %c0_i32_0 : i32, i32
  }
  func.func @transform_6(%arg0: i32) -> (i32, i32) {
    %c0_i32 = arith.constant 0 : i32
    %c0_i32_0 = arith.constant 0 : i32
    %c0_i32_1 = arith.constant 0 : i32
    return %c0_i32, %c0_i32_0 : i32, i32
  }
  func.func @transform_7(%arg0: i32) -> (i32, i32) {
    %c0_i32 = arith.constant 0 : i32
    %c0_i32_0 = arith.constant 0 : i32
    %c0_i32_1 = arith.constant 0 : i32
    return %c0_i32, %c0_i32_0 : i32, i32
  }
  func.func @transform_8(%arg0: i32) -> (i32, i32, i32) {
    %c0_i32 = arith.constant 0 : i32
    %c0_i32_0 = arith.constant 0 : i32
    %c0_i32_1 = arith.constant 0 : i32
    return %arg0, %c0_i32, %c0_i32_0 : i32, i32, i32
  }
  func.func @transform_9(%arg0: i32) -> (i32, i32, i32) {
    %c0_i32 = arith.constant 0 : i32
    %c0_i32_0 = arith.constant 0 : i32
    %c0_i32_1 = arith.constant 0 : i32
    return %arg0, %c0_i32, %c0_i32_0 : i32, i32, i32
  }
}

module attributes {stable_mosaic.version = 11 : i64} {
  func.func @_dw_phases_kernel(%arg0: i32, %arg1: memref<1x4x4x24xbf16, #tpu.memory_space<vmem>>, %arg2: memref<1x4x4x24xbf16, #tpu.memory_space<vmem>>, %arg3: memref<1x4x4x24xbf16, #tpu.memory_space<vmem>>, %arg4: memref<1x4x4x24xbf16, #tpu.memory_space<vmem>>, %arg5: memref<25x24xf32, #tpu.memory_space<vmem>>, %arg6: memref<1x24xf32, #tpu.memory_space<vmem>>, %arg7: memref<1x24xf32, #tpu.memory_space<vmem>>, %arg8: memref<1x2x2x24xbf16, #tpu.memory_space<vmem>>, %arg9: memref<4x4x24xf32, #tpu.memory_space<vmem>>, %arg10: memref<4x4x24xf32, #tpu.memory_space<vmem>>, %arg11: memref<4x4x24xf32, #tpu.memory_space<vmem>>, %arg12: memref<4x4x24xf32, #tpu.memory_space<vmem>>) attributes {dimension_semantics = [#tpu.dimension_semantics<parallel>], iteration_bounds = array<i64: 2>, scalar_prefetch = 0 : i64, scratch_operands = 4 : i64, tpu.core_type = #tpu.core_type<tc>, window_params = [{transform_indices = @transform_0, window_bounds = array<i64: 1, 4, 4, 24>}, {transform_indices = @transform_1, window_bounds = array<i64: 1, 4, 4, 24>}, {transform_indices = @transform_2, window_bounds = array<i64: 1, 4, 4, 24>}, {transform_indices = @transform_3, window_bounds = array<i64: 1, 4, 4, 24>}, {pipeline_mode = #tpu.pipeline_mode<synchronous>, transform_indices = @transform_4, window_bounds = array<i64: 25, 24>}, {pipeline_mode = #tpu.pipeline_mode<synchronous>, transform_indices = @transform_5, window_bounds = array<i64: 1, 24>}, {pipeline_mode = #tpu.pipeline_mode<synchronous>, transform_indices = @transform_6, window_bounds = array<i64: 1, 24>}, {transform_indices = @transform_7, window_bounds = array<i64: 1, 2, 2, 24>}]} {
    %c0 = arith.constant 0 : index
    %c0_0 = arith.constant 0 : index
    %c0_1 = arith.constant 0 : index
    %c0_2 = arith.constant 0 : index
    %0 = vector.load %arg1[%c0, %c0_0, %c0_1, %c0_2] : memref<1x4x4x24xbf16, #tpu.memory_space<vmem>>, vector<1x4x4x24xbf16>
    %1 = vector.shape_cast %0 : vector<1x4x4x24xbf16> to vector<4x4x24xbf16>
    %2 = arith.extf %1 : vector<4x4x24xbf16> to vector<4x4x24xf32>
    %c0_3 = arith.constant 0 : index
    %c0_4 = arith.constant 0 : index
    %c0_5 = arith.constant 0 : index
    %3 = vector.load %arg9[%c0_3, %c0_4, %c0_5] : memref<4x4x24xf32, #tpu.memory_space<vmem>>, vector<4x4x24xf32>
    tpu.vector_store %arg9[%c0_3, %c0_4, %c0_5], %2 {strides = array<i32>} : memref<4x4x24xf32, #tpu.memory_space<vmem>>, vector<4x4x24xf32>,
    %c0_6 = arith.constant 0 : index
    %c0_7 = arith.constant 0 : index
    %c0_8 = arith.constant 0 : index
    %c0_9 = arith.constant 0 : index
    %4 = vector.load %arg2[%c0_6, %c0_7, %c0_8, %c0_9] : memref<1x4x4x24xbf16, #tpu.memory_space<vmem>>, vector<1x4x4x24xbf16>
    %5 = vector.shape_cast %4 : vector<1x4x4x24xbf16> to vector<4x4x24xbf16>
    %6 = arith.extf %5 : vector<4x4x24xbf16> to vector<4x4x24xf32>
    %c0_10 = arith.constant 0 : index
    %c0_11 = arith.constant 0 : index
    %c0_12 = arith.constant 0 : index
    %7 = vector.load %arg10[%c0_10, %c0_11, %c0_12] : memref<4x4x24xf32, #tpu.memory_space<vmem>>, vector<4x4x24xf32>
    tpu.vector_store %arg10[%c0_10, %c0_11, %c0_12], %6 {strides = array<i32>} : memref<4x4x24xf32, #tpu.memory_space<vmem>>, vector<4x4x24xf32>,
    %c0_13 = arith.constant 0 : index
    %c0_14 = arith.constant 0 : index
    %c0_15 = arith.constant 0 : index
    %c0_16 = arith.constant 0 : index
    %8 = vector.load %arg3[%c0_13, %c0_14, %c0_15, %c0_16] : memref<1x4x4x24xbf16, #tpu.memory_space<vmem>>, vector<1x4x4x24xbf16>
    %9 = vector.shape_cast %8 : vector<1x4x4x24xbf16> to vector<4x4x24xbf16>
    %10 = arith.extf %9 : vector<4x4x24xbf16> to vector<4x4x24xf32>
    %c0_17 = arith.constant 0 : index
    %c0_18 = arith.constant 0 : index
    %c0_19 = arith.constant 0 : index
    %11 = vector.load %arg11[%c0_17, %c0_18, %c0_19] : memref<4x4x24xf32, #tpu.memory_space<vmem>>, vector<4x4x24xf32>
    tpu.vector_store %arg11[%c0_17, %c0_18, %c0_19], %10 {strides = array<i32>} : memref<4x4x24xf32, #tpu.memory_space<vmem>>, vector<4x4x24xf32>,
    %c0_20 = arith.constant 0 : index
    %c0_21 = arith.constant 0 : index
    %c0_22 = arith.constant 0 : index
    %c0_23 = arith.constant 0 : index
    %12 = vector.load %arg4[%c0_20, %c0_21, %c0_22, %c0_23] : memref<1x4x4x24xbf16, #tpu.memory_space<vmem>>, vector<1x4x4x24xbf16>
    %13 = vector.shape_cast %12 : vector<1x4x4x24xbf16> to vector<4x4x24xbf16>
    %14 = arith.extf %13 : vector<4x4x24xbf16> to vector<4x4x24xf32>
    %c0_24 = arith.constant 0 : index
    %c0_25 = arith.constant 0 : index
    %c0_26 = arith.constant 0 : index
    %15 = vector.load %arg12[%c0_24, %c0_25, %c0_26] : memref<4x4x24xf32, #tpu.memory_space<vmem>>, vector<4x4x24xf32>
    tpu.vector_store %arg12[%c0_24, %c0_25, %c0_26], %14 {strides = array<i32>} : memref<4x4x24xf32, #tpu.memory_space<vmem>>, vector<4x4x24xf32>,
    %cst = arith.constant 0.000000e+00 : f32
    %16 = vector.broadcast %cst : f32 to vector<2x2x24xf32>
    %c0_27 = arith.constant 0 : index
    %c0_28 = arith.constant 0 : index
    %c0_29 = arith.constant 0 : index
    %17 = vector.load %arg9[%c0_27, %c0_28, %c0_29] : memref<4x4x24xf32, #tpu.memory_space<vmem>>, vector<2x2x24xf32>
    %c0_30 = arith.constant 0 : index
    %c0_31 = arith.constant 0 : index
    %18 = vector.load %arg5[%c0_30, %c0_31] : memref<25x24xf32, #tpu.memory_space<vmem>>, vector<1x24xf32>
    %19 = vector.shape_cast %18 : vector<1x24xf32> to vector<1x1x24xf32>
    %20 = vector.broadcast %19 : vector<1x1x24xf32> to vector<2x2x24xf32>
    %21 = arith.mulf %17, %20 : vector<2x2x24xf32>
    %22 = arith.addf %16, %21 : vector<2x2x24xf32>
    %c0_32 = arith.constant 0 : index
    %c0_33 = arith.constant 0 : index
    %c0_34 = arith.constant 0 : index
    %23 = vector.load %arg10[%c0_32, %c0_33, %c0_34] : memref<4x4x24xf32, #tpu.memory_space<vmem>>, vector<2x2x24xf32>
    %c1 = arith.constant 1 : index
    %c0_35 = arith.constant 0 : index
    %24 = vector.load %arg5[%c1, %c0_35] : memref<25x24xf32, #tpu.memory_space<vmem>>, vector<1x24xf32>
    %25 = vector.shape_cast %24 : vector<1x24xf32> to vector<1x1x24xf32>
    %26 = vector.broadcast %25 : vector<1x1x24xf32> to vector<2x2x24xf32>
    %27 = arith.mulf %23, %26 : vector<2x2x24xf32>
    %28 = arith.addf %22, %27 : vector<2x2x24xf32>
    %c0_36 = arith.constant 0 : index
    %c1_37 = arith.constant 1 : index
    %c0_38 = arith.constant 0 : index
    %29 = vector.load %arg9[%c0_36, %c1_37, %c0_38] : memref<4x4x24xf32, #tpu.memory_space<vmem>>, vector<2x2x24xf32>
    %c2 = arith.constant 2 : index
    %c0_39 = arith.constant 0 : index
    %30 = vector.load %arg5[%c2, %c0_39] : memref<25x24xf32, #tpu.memory_space<vmem>>, vector<1x24xf32>
    %31 = vector.shape_cast %30 : vector<1x24xf32> to vector<1x1x24xf32>
    %32 = vector.broadcast %31 : vector<1x1x24xf32> to vector<2x2x24xf32>
    %33 = arith.mulf %29, %32 : vector<2x2x24xf32>
    %34 = arith.addf %28, %33 : vector<2x2x24xf32>
    %c0_40 = arith.constant 0 : index
    %c1_41 = arith.constant 1 : index
    %c0_42 = arith.constant 0 : index
    %35 = vector.load %arg10[%c0_40, %c1_41, %c0_42] : memref<4x4x24xf32, #tpu.memory_space<vmem>>, vector<2x2x24xf32>
    %c3 = arith.constant 3 : index
    %c0_43 = arith.constant 0 : index
    %36 = vector.load %arg5[%c3, %c0_43] : memref<25x24xf32, #tpu.memory_space<vmem>>, vector<1x24xf32>
    %37 = vector.shape_cast %36 : vector<1x24xf32> to vector<1x1x24xf32>
    %38 = vector.broadcast %37 : vector<1x1x24xf32> to vector<2x2x24xf32>
    %39 = arith.mulf %35, %38 : vector<2x2x24xf32>
    %40 = arith.addf %34, %39 : vector<2x2x24xf32>
    %c0_44 = arith.constant 0 : index
    %c2_45 = arith.constant 2 : index
    %c0_46 = arith.constant 0 : index
    %41 = vector.load %arg9[%c0_44, %c2_45, %c0_46] : memref<4x4x24xf32, #tpu.memory_space<vmem>>, vector<2x2x24xf32>
    %c4 = arith.constant 4 : index
    %c0_47 = arith.constant 0 : index
    %42 = vector.load %arg5[%c4, %c0_47] : memref<25x24xf32, #tpu.memory_space<vmem>>, vector<1x24xf32>
    %43 = vector.shape_cast %42 : vector<1x24xf32> to vector<1x1x24xf32>
    %44 = vector.broadcast %43 : vector<1x1x24xf32> to vector<2x2x24xf32>
    %45 = arith.mulf %41, %44 : vector<2x2x24xf32>
    %46 = arith.addf %40, %45 : vector<2x2x24xf32>
    %c0_48 = arith.constant 0 : index
    %c0_49 = arith.constant 0 : index
    %c0_50 = arith.constant 0 : index
    %47 = vector.load %arg11[%c0_48, %c0_49, %c0_50] : memref<4x4x24xf32, #tpu.memory_space<vmem>>, vector<2x2x24xf32>
    %c5 = arith.constant 5 : index
    %c0_51 = arith.constant 0 : index
    %48 = vector.load %arg5[%c5, %c0_51] : memref<25x24xf32, #tpu.memory_space<vmem>>, vector<1x24xf32>
    %49 = vector.shape_cast %48 : vector<1x24xf32> to vector<1x1x24xf32>
    %50 = vector.broadcast %49 : vector<1x1x24xf32> to vector<2x2x24xf32>
    %51 = arith.mulf %47, %50 : vector<2x2x24xf32>
    %52 = arith.addf %46, %51 : vector<2x2x24xf32>
    %c0_52 = arith.constant 0 : index
    %c0_53 = arith.constant 0 : index
    %c0_54 = arith.constant 0 : index
    %53 = vector.load %arg12[%c0_52, %c0_53, %c0_54] : memref<4x4x24xf32, #tpu.memory_space<vmem>>, vector<2x2x24xf32>
    %c6 = arith.constant 6 : index
    %c0_55 = arith.constant 0 : index
    %54 = vector.load %arg5[%c6, %c0_55] : memref<25x24xf32, #tpu.memory_space<vmem>>, vector<1x24xf32>
    %55 = vector.shape_cast %54 : vector<1x24xf32> to vector<1x1x24xf32>
    %56 = vector.broadcast %55 : vector<1x1x24xf32> to vector<2x2x24xf32>
    %57 = arith.mulf %53, %56 : vector<2x2x24xf32>
    %58 = arith.addf %52, %57 : vector<2x2x24xf32>
    %c0_56 = arith.constant 0 : index
    %c1_57 = arith.constant 1 : index
    %c0_58 = arith.constant 0 : index
    %59 = vector.load %arg11[%c0_56, %c1_57, %c0_58] : memref<4x4x24xf32, #tpu.memory_space<vmem>>, vector<2x2x24xf32>
    %c7 = arith.constant 7 : index
    %c0_59 = arith.constant 0 : index
    %60 = vector.load %arg5[%c7, %c0_59] : memref<25x24xf32, #tpu.memory_space<vmem>>, vector<1x24xf32>
    %61 = vector.shape_cast %60 : vector<1x24xf32> to vector<1x1x24xf32>
    %62 = vector.broadcast %61 : vector<1x1x24xf32> to vector<2x2x24xf32>
    %63 = arith.mulf %59, %62 : vector<2x2x24xf32>
    %64 = arith.addf %58, %63 : vector<2x2x24xf32>
    %c0_60 = arith.constant 0 : index
    %c1_61 = arith.constant 1 : index
    %c0_62 = arith.constant 0 : index
    %65 = vector.load %arg12[%c0_60, %c1_61, %c0_62] : memref<4x4x24xf32, #tpu.memory_space<vmem>>, vector<2x2x24xf32>
    %c8 = arith.constant 8 : index
    %c0_63 = arith.constant 0 : index
    %66 = vector.load %arg5[%c8, %c0_63] : memref<25x24xf32, #tpu.memory_space<vmem>>, vector<1x24xf32>
    %67 = vector.shape_cast %66 : vector<1x24xf32> to vector<1x1x24xf32>
    %68 = vector.broadcast %67 : vector<1x1x24xf32> to vector<2x2x24xf32>
    %69 = arith.mulf %65, %68 : vector<2x2x24xf32>
    %70 = arith.addf %64, %69 : vector<2x2x24xf32>
    %c0_64 = arith.constant 0 : index
    %c2_65 = arith.constant 2 : index
    %c0_66 = arith.constant 0 : index
    %71 = vector.load %arg11[%c0_64, %c2_65, %c0_66] : memref<4x4x24xf32, #tpu.memory_space<vmem>>, vector<2x2x24xf32>
    %c9 = arith.constant 9 : index
    %c0_67 = arith.constant 0 : index
    %72 = vector.load %arg5[%c9, %c0_67] : memref<25x24xf32, #tpu.memory_space<vmem>>, vector<1x24xf32>
    %73 = vector.shape_cast %72 : vector<1x24xf32> to vector<1x1x24xf32>
    %74 = vector.broadcast %73 : vector<1x1x24xf32> to vector<2x2x24xf32>
    %75 = arith.mulf %71, %74 : vector<2x2x24xf32>
    %76 = arith.addf %70, %75 : vector<2x2x24xf32>
    %c1_68 = arith.constant 1 : index
    %c0_69 = arith.constant 0 : index
    %c0_70 = arith.constant 0 : index
    %77 = vector.load %arg9[%c1_68, %c0_69, %c0_70] : memref<4x4x24xf32, #tpu.memory_space<vmem>>, vector<2x2x24xf32>
    %c10 = arith.constant 10 : index
    %c0_71 = arith.constant 0 : index
    %78 = vector.load %arg5[%c10, %c0_71] : memref<25x24xf32, #tpu.memory_space<vmem>>, vector<1x24xf32>
    %79 = vector.shape_cast %78 : vector<1x24xf32> to vector<1x1x24xf32>
    %80 = vector.broadcast %79 : vector<1x1x24xf32> to vector<2x2x24xf32>
    %81 = arith.mulf %77, %80 : vector<2x2x24xf32>
    %82 = arith.addf %76, %81 : vector<2x2x24xf32>
    %c1_72 = arith.constant 1 : index
    %c0_73 = arith.constant 0 : index
    %c0_74 = arith.constant 0 : index
    %83 = vector.load %arg10[%c1_72, %c0_73, %c0_74] : memref<4x4x24xf32, #tpu.memory_space<vmem>>, vector<2x2x24xf32>
    %c11 = arith.constant 11 : index
    %c0_75 = arith.constant 0 : index
    %84 = vector.load %arg5[%c11, %c0_75] : memref<25x24xf32, #tpu.memory_space<vmem>>, vector<1x24xf32>
    %85 = vector.shape_cast %84 : vector<1x24xf32> to vector<1x1x24xf32>
    %86 = vector.broadcast %85 : vector<1x1x24xf32> to vector<2x2x24xf32>
    %87 = arith.mulf %83, %86 : vector<2x2x24xf32>
    %88 = arith.addf %82, %87 : vector<2x2x24xf32>
    %c1_76 = arith.constant 1 : index
    %c1_77 = arith.constant 1 : index
    %c0_78 = arith.constant 0 : index
    %89 = vector.load %arg9[%c1_76, %c1_77, %c0_78] : memref<4x4x24xf32, #tpu.memory_space<vmem>>, vector<2x2x24xf32>
    %c12 = arith.constant 12 : index
    %c0_79 = arith.constant 0 : index
    %90 = vector.load %arg5[%c12, %c0_79] : memref<25x24xf32, #tpu.memory_space<vmem>>, vector<1x24xf32>
    %91 = vector.shape_cast %90 : vector<1x24xf32> to vector<1x1x24xf32>
    %92 = vector.broadcast %91 : vector<1x1x24xf32> to vector<2x2x24xf32>
    %93 = arith.mulf %89, %92 : vector<2x2x24xf32>
    %94 = arith.addf %88, %93 : vector<2x2x24xf32>
    %c1_80 = arith.constant 1 : index
    %c1_81 = arith.constant 1 : index
    %c0_82 = arith.constant 0 : index
    %95 = vector.load %arg10[%c1_80, %c1_81, %c0_82] : memref<4x4x24xf32, #tpu.memory_space<vmem>>, vector<2x2x24xf32>
    %c13 = arith.constant 13 : index
    %c0_83 = arith.constant 0 : index
    %96 = vector.load %arg5[%c13, %c0_83] : memref<25x24xf32, #tpu.memory_space<vmem>>, vector<1x24xf32>
    %97 = vector.shape_cast %96 : vector<1x24xf32> to vector<1x1x24xf32>
    %98 = vector.broadcast %97 : vector<1x1x24xf32> to vector<2x2x24xf32>
    %99 = arith.mulf %95, %98 : vector<2x2x24xf32>
    %100 = arith.addf %94, %99 : vector<2x2x24xf32>
    %c1_84 = arith.constant 1 : index
    %c2_85 = arith.constant 2 : index
    %c0_86 = arith.constant 0 : index
    %101 = vector.load %arg9[%c1_84, %c2_85, %c0_86] : memref<4x4x24xf32, #tpu.memory_space<vmem>>, vector<2x2x24xf32>
    %c14 = arith.constant 14 : index
    %c0_87 = arith.constant 0 : index
    %102 = vector.load %arg5[%c14, %c0_87] : memref<25x24xf32, #tpu.memory_space<vmem>>, vector<1x24xf32>
    %103 = vector.shape_cast %102 : vector<1x24xf32> to vector<1x1x24xf32>
    %104 = vector.broadcast %103 : vector<1x1x24xf32> to vector<2x2x24xf32>
    %105 = arith.mulf %101, %104 : vector<2x2x24xf32>
    %106 = arith.addf %100, %105 : vector<2x2x24xf32>
    %c1_88 = arith.constant 1 : index
    %c0_89 = arith.constant 0 : index
    %c0_90 = arith.constant 0 : index
    %107 = vector.load %arg11[%c1_88, %c0_89, %c0_90] : memref<4x4x24xf32, #tpu.memory_space<vmem>>, vector<2x2x24xf32>
    %c15 = arith.constant 15 : index
    %c0_91 = arith.constant 0 : index
    %108 = vector.load %arg5[%c15, %c0_91] : memref<25x24xf32, #tpu.memory_space<vmem>>, vector<1x24xf32>
    %109 = vector.shape_cast %108 : vector<1x24xf32> to vector<1x1x24xf32>
    %110 = vector.broadcast %109 : vector<1x1x24xf32> to vector<2x2x24xf32>
    %111 = arith.mulf %107, %110 : vector<2x2x24xf32>
    %112 = arith.addf %106, %111 : vector<2x2x24xf32>
    %c1_92 = arith.constant 1 : index
    %c0_93 = arith.constant 0 : index
    %c0_94 = arith.constant 0 : index
    %113 = vector.load %arg12[%c1_92, %c0_93, %c0_94] : memref<4x4x24xf32, #tpu.memory_space<vmem>>, vector<2x2x24xf32>
    %c16 = arith.constant 16 : index
    %c0_95 = arith.constant 0 : index
    %114 = vector.load %arg5[%c16, %c0_95] : memref<25x24xf32, #tpu.memory_space<vmem>>, vector<1x24xf32>
    %115 = vector.shape_cast %114 : vector<1x24xf32> to vector<1x1x24xf32>
    %116 = vector.broadcast %115 : vector<1x1x24xf32> to vector<2x2x24xf32>
    %117 = arith.mulf %113, %116 : vector<2x2x24xf32>
    %118 = arith.addf %112, %117 : vector<2x2x24xf32>
    %c1_96 = arith.constant 1 : index
    %c1_97 = arith.constant 1 : index
    %c0_98 = arith.constant 0 : index
    %119 = vector.load %arg11[%c1_96, %c1_97, %c0_98] : memref<4x4x24xf32, #tpu.memory_space<vmem>>, vector<2x2x24xf32>
    %c17 = arith.constant 17 : index
    %c0_99 = arith.constant 0 : index
    %120 = vector.load %arg5[%c17, %c0_99] : memref<25x24xf32, #tpu.memory_space<vmem>>, vector<1x24xf32>
    %121 = vector.shape_cast %120 : vector<1x24xf32> to vector<1x1x24xf32>
    %122 = vector.broadcast %121 : vector<1x1x24xf32> to vector<2x2x24xf32>
    %123 = arith.mulf %119, %122 : vector<2x2x24xf32>
    %124 = arith.addf %118, %123 : vector<2x2x24xf32>
    %c1_100 = arith.constant 1 : index
    %c1_101 = arith.constant 1 : index
    %c0_102 = arith.constant 0 : index
    %125 = vector.load %arg12[%c1_100, %c1_101, %c0_102] : memref<4x4x24xf32, #tpu.memory_space<vmem>>, vector<2x2x24xf32>
    %c18 = arith.constant 18 : index
    %c0_103 = arith.constant 0 : index
    %126 = vector.load %arg5[%c18, %c0_103] : memref<25x24xf32, #tpu.memory_space<vmem>>, vector<1x24xf32>
    %127 = vector.shape_cast %126 : vector<1x24xf32> to vector<1x1x24xf32>
    %128 = vector.broadcast %127 : vector<1x1x24xf32> to vector<2x2x24xf32>
    %129 = arith.mulf %125, %128 : vector<2x2x24xf32>
    %130 = arith.addf %124, %129 : vector<2x2x24xf32>
    %c1_104 = arith.constant 1 : index
    %c2_105 = arith.constant 2 : index
    %c0_106 = arith.constant 0 : index
    %131 = vector.load %arg11[%c1_104, %c2_105, %c0_106] : memref<4x4x24xf32, #tpu.memory_space<vmem>>, vector<2x2x24xf32>
    %c19 = arith.constant 19 : index
    %c0_107 = arith.constant 0 : index
    %132 = vector.load %arg5[%c19, %c0_107] : memref<25x24xf32, #tpu.memory_space<vmem>>, vector<1x24xf32>
    %133 = vector.shape_cast %132 : vector<1x24xf32> to vector<1x1x24xf32>
    %134 = vector.broadcast %133 : vector<1x1x24xf32> to vector<2x2x24xf32>
    %135 = arith.mulf %131, %134 : vector<2x2x24xf32>
    %136 = arith.addf %130, %135 : vector<2x2x24xf32>
    %c2_108 = arith.constant 2 : index
    %c0_109 = arith.constant 0 : index
    %c0_110 = arith.constant 0 : index
    %137 = vector.load %arg9[%c2_108, %c0_109, %c0_110] : memref<4x4x24xf32, #tpu.memory_space<vmem>>, vector<2x2x24xf32>
    %c20 = arith.constant 20 : index
    %c0_111 = arith.constant 0 : index
    %138 = vector.load %arg5[%c20, %c0_111] : memref<25x24xf32, #tpu.memory_space<vmem>>, vector<1x24xf32>
    %139 = vector.shape_cast %138 : vector<1x24xf32> to vector<1x1x24xf32>
    %140 = vector.broadcast %139 : vector<1x1x24xf32> to vector<2x2x24xf32>
    %141 = arith.mulf %137, %140 : vector<2x2x24xf32>
    %142 = arith.addf %136, %141 : vector<2x2x24xf32>
    %c2_112 = arith.constant 2 : index
    %c0_113 = arith.constant 0 : index
    %c0_114 = arith.constant 0 : index
    %143 = vector.load %arg10[%c2_112, %c0_113, %c0_114] : memref<4x4x24xf32, #tpu.memory_space<vmem>>, vector<2x2x24xf32>
    %c21 = arith.constant 21 : index
    %c0_115 = arith.constant 0 : index
    %144 = vector.load %arg5[%c21, %c0_115] : memref<25x24xf32, #tpu.memory_space<vmem>>, vector<1x24xf32>
    %145 = vector.shape_cast %144 : vector<1x24xf32> to vector<1x1x24xf32>
    %146 = vector.broadcast %145 : vector<1x1x24xf32> to vector<2x2x24xf32>
    %147 = arith.mulf %143, %146 : vector<2x2x24xf32>
    %148 = arith.addf %142, %147 : vector<2x2x24xf32>
    %c2_116 = arith.constant 2 : index
    %c1_117 = arith.constant 1 : index
    %c0_118 = arith.constant 0 : index
    %149 = vector.load %arg9[%c2_116, %c1_117, %c0_118] : memref<4x4x24xf32, #tpu.memory_space<vmem>>, vector<2x2x24xf32>
    %c22 = arith.constant 22 : index
    %c0_119 = arith.constant 0 : index
    %150 = vector.load %arg5[%c22, %c0_119] : memref<25x24xf32, #tpu.memory_space<vmem>>, vector<1x24xf32>
    %151 = vector.shape_cast %150 : vector<1x24xf32> to vector<1x1x24xf32>
    %152 = vector.broadcast %151 : vector<1x1x24xf32> to vector<2x2x24xf32>
    %153 = arith.mulf %149, %152 : vector<2x2x24xf32>
    %154 = arith.addf %148, %153 : vector<2x2x24xf32>
    %c2_120 = arith.constant 2 : index
    %c1_121 = arith.constant 1 : index
    %c0_122 = arith.constant 0 : index
    %155 = vector.load %arg10[%c2_120, %c1_121, %c0_122] : memref<4x4x24xf32, #tpu.memory_space<vmem>>, vector<2x2x24xf32>
    %c23 = arith.constant 23 : index
    %c0_123 = arith.constant 0 : index
    %156 = vector.load %arg5[%c23, %c0_123] : memref<25x24xf32, #tpu.memory_space<vmem>>, vector<1x24xf32>
    %157 = vector.shape_cast %156 : vector<1x24xf32> to vector<1x1x24xf32>
    %158 = vector.broadcast %157 : vector<1x1x24xf32> to vector<2x2x24xf32>
    %159 = arith.mulf %155, %158 : vector<2x2x24xf32>
    %160 = arith.addf %154, %159 : vector<2x2x24xf32>
    %c2_124 = arith.constant 2 : index
    %c2_125 = arith.constant 2 : index
    %c0_126 = arith.constant 0 : index
    %161 = vector.load %arg9[%c2_124, %c2_125, %c0_126] : memref<4x4x24xf32, #tpu.memory_space<vmem>>, vector<2x2x24xf32>
    %c24 = arith.constant 24 : index
    %c0_127 = arith.constant 0 : index
    %162 = vector.load %arg5[%c24, %c0_127] : memref<25x24xf32, #tpu.memory_space<vmem>>, vector<1x24xf32>
    %163 = vector.shape_cast %162 : vector<1x24xf32> to vector<1x1x24xf32>
    %164 = vector.broadcast %163 : vector<1x1x24xf32> to vector<2x2x24xf32>
    %165 = arith.mulf %161, %164 : vector<2x2x24xf32>
    %166 = arith.addf %160, %165 : vector<2x2x24xf32>
    %c0_128 = arith.constant 0 : index
    %c0_129 = arith.constant 0 : index
    %167 = vector.load %arg6[%c0_128, %c0_129] : memref<1x24xf32, #tpu.memory_space<vmem>>, vector<1x24xf32>
    %168 = vector.shape_cast %167 : vector<1x24xf32> to vector<1x1x24xf32>
    %169 = vector.broadcast %168 : vector<1x1x24xf32> to vector<2x2x24xf32>
    %170 = arith.mulf %166, %169 : vector<2x2x24xf32>
    %c0_130 = arith.constant 0 : index
    %c0_131 = arith.constant 0 : index
    %171 = vector.load %arg7[%c0_130, %c0_131] : memref<1x24xf32, #tpu.memory_space<vmem>>, vector<1x24xf32>
    %172 = vector.shape_cast %171 : vector<1x24xf32> to vector<1x1x24xf32>
    %173 = vector.broadcast %172 : vector<1x1x24xf32> to vector<2x2x24xf32>
    %174 = arith.addf %170, %173 : vector<2x2x24xf32>
    %175 = arith.truncf %174 : vector<2x2x24xf32> to vector<2x2x24xbf16>
    %c0_132 = arith.constant 0 : index
    %c0_133 = arith.constant 0 : index
    %c0_134 = arith.constant 0 : index
    %c0_135 = arith.constant 0 : index
    %176 = vector.load %arg8[%c0_132, %c0_133, %c0_134, %c0_135] : memref<1x2x2x24xbf16, #tpu.memory_space<vmem>>, vector<1x2x2x24xbf16>
    %177 = vector.shape_cast %176 : vector<1x2x2x24xbf16> to vector<2x2x24xbf16>
    %178 = vector.shape_cast %175 : vector<2x2x24xbf16> to vector<1x2x2x24xbf16>
    tpu.vector_store %arg8[%c0_132, %c0_133, %c0_134, %c0_135], %178 {strides = array<i32>} : memref<1x2x2x24xbf16, #tpu.memory_space<vmem>>, vector<1x2x2x24xbf16>,
    return
  }
  func.func @transform_0(%arg0: i32) -> (i32, i32, i32, i32) {
    %c0_i32 = arith.constant 0 : i32
    %c0_i32_0 = arith.constant 0 : i32
    %c0_i32_1 = arith.constant 0 : i32
    %c0_i32_2 = arith.constant 0 : i32
    return %arg0, %c0_i32, %c0_i32_0, %c0_i32_1 : i32, i32, i32, i32
  }
  func.func @transform_1(%arg0: i32) -> (i32, i32, i32, i32) {
    %c0_i32 = arith.constant 0 : i32
    %c0_i32_0 = arith.constant 0 : i32
    %c0_i32_1 = arith.constant 0 : i32
    %c0_i32_2 = arith.constant 0 : i32
    return %arg0, %c0_i32, %c0_i32_0, %c0_i32_1 : i32, i32, i32, i32
  }
  func.func @transform_2(%arg0: i32) -> (i32, i32, i32, i32) {
    %c0_i32 = arith.constant 0 : i32
    %c0_i32_0 = arith.constant 0 : i32
    %c0_i32_1 = arith.constant 0 : i32
    %c0_i32_2 = arith.constant 0 : i32
    return %arg0, %c0_i32, %c0_i32_0, %c0_i32_1 : i32, i32, i32, i32
  }
  func.func @transform_3(%arg0: i32) -> (i32, i32, i32, i32) {
    %c0_i32 = arith.constant 0 : i32
    %c0_i32_0 = arith.constant 0 : i32
    %c0_i32_1 = arith.constant 0 : i32
    %c0_i32_2 = arith.constant 0 : i32
    return %arg0, %c0_i32, %c0_i32_0, %c0_i32_1 : i32, i32, i32, i32
  }
  func.func @transform_4(%arg0: i32) -> (i32, i32) {
    %c0_i32 = arith.constant 0 : i32
    %c0_i32_0 = arith.constant 0 : i32
    %c0_i32_1 = arith.constant 0 : i32
    return %c0_i32, %c0_i32_0 : i32, i32
  }
  func.func @transform_5(%arg0: i32) -> (i32, i32) {
    %c0_i32 = arith.constant 0 : i32
    %c0_i32_0 = arith.constant 0 : i32
    %c0_i32_1 = arith.constant 0 : i32
    return %c0_i32, %c0_i32_0 : i32, i32
  }
  func.func @transform_6(%arg0: i32) -> (i32, i32) {
    %c0_i32 = arith.constant 0 : i32
    %c0_i32_0 = arith.constant 0 : i32
    %c0_i32_1 = arith.constant 0 : i32
    return %c0_i32, %c0_i32_0 : i32, i32
  }
  func.func @transform_7(%arg0: i32) -> (i32, i32, i32, i32) {
    %c0_i32 = arith.constant 0 : i32
    %c0_i32_0 = arith.constant 0 : i32
    %c0_i32_1 = arith.constant 0 : i32
    %c0_i32_2 = arith.constant 0 : i32
    return %arg0, %c0_i32, %c0_i32_0, %c0_i32_1 : i32, i32, i32, i32
  }
}

module attributes {stable_mosaic.version = 11 : i64} {
  func.func @_ghost_kernel(%arg0: i32, %arg1: memref<1x4x72xbf16, #tpu.memory_space<vmem>>, %arg2: memref<4x1xi32, #tpu.memory_space<vmem>>, %arg3: memref<72x40xbf16, #tpu.memory_space<vmem>>, %arg4: memref<1x40xf32, #tpu.memory_space<vmem>>, %arg5: memref<1x40xf32, #tpu.memory_space<vmem>>, %arg6: memref<9x40xf32, #tpu.memory_space<vmem>>, %arg7: memref<1x40xf32, #tpu.memory_space<vmem>>, %arg8: memref<1x40xf32, #tpu.memory_space<vmem>>, %arg9: memref<1x4x24xbf16, #tpu.memory_space<vmem>>, %arg10: memref<24x40xbf16, #tpu.memory_space<vmem>>, %arg11: memref<1x40xf32, #tpu.memory_space<vmem>>, %arg12: memref<1x40xf32, #tpu.memory_space<vmem>>, %arg13: memref<1x4x40xbf16, #tpu.memory_space<vmem>>, %arg14: memref<10x40xf32, #tpu.memory_space<vmem>>) attributes {dimension_semantics = [#tpu.dimension_semantics<parallel>], iteration_bounds = array<i64: 2>, scalar_prefetch = 0 : i64, scratch_operands = 1 : i64, tpu.core_type = #tpu.core_type<tc>, window_params = [{transform_indices = @transform_0, window_bounds = array<i64: 1, 4, 72>}, {pipeline_mode = #tpu.pipeline_mode<synchronous>, transform_indices = @transform_1, window_bounds = array<i64: 4, 1>}, {pipeline_mode = #tpu.pipeline_mode<synchronous>, transform_indices = @transform_2, window_bounds = array<i64: 72, 40>}, {pipeline_mode = #tpu.pipeline_mode<synchronous>, transform_indices = @transform_3, window_bounds = array<i64: 1, 40>}, {pipeline_mode = #tpu.pipeline_mode<synchronous>, transform_indices = @transform_4, window_bounds = array<i64: 1, 40>}, {pipeline_mode = #tpu.pipeline_mode<synchronous>, transform_indices = @transform_5, window_bounds = array<i64: 9, 40>}, {pipeline_mode = #tpu.pipeline_mode<synchronous>, transform_indices = @transform_6, window_bounds = array<i64: 1, 40>}, {pipeline_mode = #tpu.pipeline_mode<synchronous>, transform_indices = @transform_7, window_bounds = array<i64: 1, 40>}, {transform_indices = @transform_8, window_bounds = array<i64: 1, 4, 24>}, {pipeline_mode = #tpu.pipeline_mode<synchronous>, transform_indices = @transform_9, window_bounds = array<i64: 24, 40>}, {pipeline_mode = #tpu.pipeline_mode<synchronous>, transform_indices = @transform_10, window_bounds = array<i64: 1, 40>}, {pipeline_mode = #tpu.pipeline_mode<synchronous>, transform_indices = @transform_11, window_bounds = array<i64: 1, 40>}, {transform_indices = @transform_12, window_bounds = array<i64: 1, 4, 40>}]} {
    %c0 = arith.constant 0 : index
    %c0_0 = arith.constant 0 : index
    %c0_1 = arith.constant 0 : index
    %0 = vector.load %arg1[%c0, %c0_0, %c0_1] : memref<1x4x72xbf16, #tpu.memory_space<vmem>>, vector<1x4x72xbf16>
    %1 = vector.shape_cast %0 : vector<1x4x72xbf16> to vector<4x72xbf16>
    %c0_2 = arith.constant 0 : index
    %c0_3 = arith.constant 0 : index
    %2 = vector.load %arg3[%c0_2, %c0_3] : memref<72x40xbf16, #tpu.memory_space<vmem>>, vector<72x40xbf16>
    %cst = arith.constant dense<0.000000e+00> : vector<4x40xf32>
    %3 = tpu.matmul %1, %2, %cst {dimension_numbers = #tpu.dot_dimension_numbers<[1], [0], [0], [1], [0, 0, 1, 1], [], []>} : vector<4x72xbf16>, vector<72x40xbf16>, vector<4x40xf32> -> vector<4x40xf32>
    %c0_4 = arith.constant 0 : index
    %c0_5 = arith.constant 0 : index
    %4 = vector.load %arg4[%c0_4, %c0_5] : memref<1x40xf32, #tpu.memory_space<vmem>>, vector<1x40xf32>
    %5 = vector.broadcast %4 : vector<1x40xf32> to vector<4x40xf32>
    %6 = arith.mulf %3, %5 : vector<4x40xf32>
    %c0_6 = arith.constant 0 : index
    %c0_7 = arith.constant 0 : index
    %7 = vector.load %arg5[%c0_6, %c0_7] : memref<1x40xf32, #tpu.memory_space<vmem>>, vector<1x40xf32>
    %8 = vector.broadcast %7 : vector<1x40xf32> to vector<4x40xf32>
    %9 = arith.addf %6, %8 : vector<4x40xf32>
    %cst_8 = arith.constant 0.000000e+00 : f32
    %10 = vector.broadcast %cst_8 : f32 to vector<3x40xf32>
    %c0_9 = arith.constant 0 : index
    %c0_10 = arith.constant 0 : index
    %11 = vector.load %arg14[%c0_9, %c0_10] : memref<10x40xf32, #tpu.memory_space<vmem>>, vector<3x40xf32>
    tpu.vector_store %arg14[%c0_9, %c0_10], %10 {strides = array<i32>} : memref<10x40xf32, #tpu.memory_space<vmem>>, vector<3x40xf32>,
    %cst_11 = arith.constant 0.000000e+00 : f32
    %12 = vector.broadcast %cst_11 : f32 to vector<3x40xf32>
    %c7 = arith.constant 7 : index
    %c0_12 = arith.constant 0 : index
    %13 = vector.load %arg14[%c7, %c0_12] : memref<10x40xf32, #tpu.memory_space<vmem>>, vector<3x40xf32>
    tpu.vector_store %arg14[%c7, %c0_12], %12 {strides = array<i32>} : memref<10x40xf32, #tpu.memory_space<vmem>>, vector<3x40xf32>,
    %c3 = arith.constant 3 : index
    %c0_13 = arith.constant 0 : index
    %14 = vector.load %arg14[%c3, %c0_13] : memref<10x40xf32, #tpu.memory_space<vmem>>, vector<4x40xf32>
    tpu.vector_store %arg14[%c3, %c0_13], %9 {strides = array<i32>} : memref<10x40xf32, #tpu.memory_space<vmem>>, vector<4x40xf32>,
    %c0_14 = arith.constant 0 : index
    %c0_15 = arith.constant 0 : index
    %15 = vector.load %arg2[%c0_14, %c0_15] : memref<4x1xi32, #tpu.memory_space<vmem>>, vector<4x1xi32>
    %cst_16 = arith.constant 0.000000e+00 : f32
    %16 = vector.broadcast %cst_16 : f32 to vector<4x40xf32>
    %c0_17 = arith.constant 0 : index
    %c0_18 = arith.constant 0 : index
    %17 = vector.load %arg14[%c0_17, %c0_18] : memref<10x40xf32, #tpu.memory_space<vmem>>, vector<4x40xf32>
    %c0_i32 = arith.constant 0 : i32
    %18 = vector.broadcast %c0_i32 : i32 to vector<4x1xi32>
    %19 = arith.cmpi sgt, %15, %18 : vector<4x1xi32>
    %cst_19 = arith.constant 0.000000e+00 : f32
    %20 = vector.shape_cast %19 : vector<4x1xi1> to vector<4x1xi1>
    %21 = vector.broadcast %20 : vector<4x1xi1> to vector<4x40xi1>
    %22 = vector.broadcast %cst_19 : f32 to vector<4x40xf32>
    %23 = arith.select %21, %17, %22 : vector<4x40xi1>, vector<4x40xf32>
    %c0_20 = arith.constant 0 : index
    %c0_21 = arith.constant 0 : index
    %24 = vector.load %arg6[%c0_20, %c0_21] : memref<9x40xf32, #tpu.memory_space<vmem>>, vector<1x40xf32>
    %25 = vector.broadcast %24 : vector<1x40xf32> to vector<4x40xf32>
    %26 = arith.mulf %23, %25 : vector<4x40xf32>
    %27 = arith.addf %16, %26 : vector<4x40xf32>
    %c1 = arith.constant 1 : index
    %c0_22 = arith.constant 0 : index
    %28 = vector.load %arg14[%c1, %c0_22] : memref<10x40xf32, #tpu.memory_space<vmem>>, vector<4x40xf32>
    %c1_23 = arith.constant 1 : index
    %c0_24 = arith.constant 0 : index
    %29 = vector.load %arg6[%c1_23, %c0_24] : memref<9x40xf32, #tpu.memory_space<vmem>>, vector<1x40xf32>
    %30 = vector.broadcast %29 : vector<1x40xf32> to vector<4x40xf32>
    %31 = arith.mulf %28, %30 : vector<4x40xf32>
    %32 = arith.addf %27, %31 : vector<4x40xf32>
    %c2 = arith.constant 2 : index
    %c0_25 = arith.constant 0 : index
    %33 = vector.load %arg14[%c2, %c0_25] : memref<10x40xf32, #tpu.memory_space<vmem>>, vector<4x40xf32>
    %c1_i32 = arith.constant 1 : i32
    %34 = vector.broadcast %c1_i32 : i32 to vector<4x1xi32>
    %35 = arith.cmpi slt, %15, %34 : vector<4x1xi32>
    %cst_26 = arith.constant 0.000000e+00 : f32
    %36 = vector.shape_cast %35 : vector<4x1xi1> to vector<4x1xi1>
    %37 = vector.broadcast %36 : vector<4x1xi1> to vector<4x40xi1>
    %38 = vector.broadcast %cst_26 : f32 to vector<4x40xf32>
    %39 = arith.select %37, %33, %38 : vector<4x40xi1>, vector<4x40xf32>
    %c2_27 = arith.constant 2 : index
    %c0_28 = arith.constant 0 : index
    %40 = vector.load %arg6[%c2_27, %c0_28] : memref<9x40xf32, #tpu.memory_space<vmem>>, vector<1x40xf32>
    %41 = vector.broadcast %40 : vector<1x40xf32> to vector<4x40xf32>
    %42 = arith.mulf %39, %41 : vector<4x40xf32>
    %43 = arith.addf %32, %42 : vector<4x40xf32>
    %c2_29 = arith.constant 2 : index
    %c0_30 = arith.constant 0 : index
    %44 = vector.load %arg14[%c2_29, %c0_30] : memref<10x40xf32, #tpu.memory_space<vmem>>, vector<4x40xf32>
    %c0_i32_31 = arith.constant 0 : i32
    %45 = vector.broadcast %c0_i32_31 : i32 to vector<4x1xi32>
    %46 = arith.cmpi sgt, %15, %45 : vector<4x1xi32>
    %cst_32 = arith.constant 0.000000e+00 : f32
    %47 = vector.shape_cast %46 : vector<4x1xi1> to vector<4x1xi1>
    %48 = vector.broadcast %47 : vector<4x1xi1> to vector<4x40xi1>
    %49 = vector.broadcast %cst_32 : f32 to vector<4x40xf32>
    %50 = arith.select %48, %44, %49 : vector<4x40xi1>, vector<4x40xf32>
    %c3_33 = arith.constant 3 : index
    %c0_34 = arith.constant 0 : index
    %51 = vector.load %arg6[%c3_33, %c0_34] : memref<9x40xf32, #tpu.memory_space<vmem>>, vector<1x40xf32>
    %52 = vector.broadcast %51 : vector<1x40xf32> to vector<4x40xf32>
    %53 = arith.mulf %50, %52 : vector<4x40xf32>
    %54 = arith.addf %43, %53 : vector<4x40xf32>
    %c3_35 = arith.constant 3 : index
    %c0_36 = arith.constant 0 : index
    %55 = vector.load %arg14[%c3_35, %c0_36] : memref<10x40xf32, #tpu.memory_space<vmem>>, vector<4x40xf32>
    %c4 = arith.constant 4 : index
    %c0_37 = arith.constant 0 : index
    %56 = vector.load %arg6[%c4, %c0_37] : memref<9x40xf32, #tpu.memory_space<vmem>>, vector<1x40xf32>
    %57 = vector.broadcast %56 : vector<1x40xf32> to vector<4x40xf32>
    %58 = arith.mulf %55, %57 : vector<4x40xf32>
    %59 = arith.addf %54, %58 : vector<4x40xf32>
    %c4_38 = arith.constant 4 : index
    %c0_39 = arith.constant 0 : index
    %60 = vector.load %arg14[%c4_38, %c0_39] : memref<10x40xf32, #tpu.memory_space<vmem>>, vector<4x40xf32>
    %c1_i32_40 = arith.constant 1 : i32
    %61 = vector.broadcast %c1_i32_40 : i32 to vector<4x1xi32>
    %62 = arith.cmpi slt, %15, %61 : vector<4x1xi32>
    %cst_41 = arith.constant 0.000000e+00 : f32
    %63 = vector.shape_cast %62 : vector<4x1xi1> to vector<4x1xi1>
    %64 = vector.broadcast %63 : vector<4x1xi1> to vector<4x40xi1>
    %65 = vector.broadcast %cst_41 : f32 to vector<4x40xf32>
    %66 = arith.select %64, %60, %65 : vector<4x40xi1>, vector<4x40xf32>
    %c5 = arith.constant 5 : index
    %c0_42 = arith.constant 0 : index
    %67 = vector.load %arg6[%c5, %c0_42] : memref<9x40xf32, #tpu.memory_space<vmem>>, vector<1x40xf32>
    %68 = vector.broadcast %67 : vector<1x40xf32> to vector<4x40xf32>
    %69 = arith.mulf %66, %68 : vector<4x40xf32>
    %70 = arith.addf %59, %69 : vector<4x40xf32>
    %c4_43 = arith.constant 4 : index
    %c0_44 = arith.constant 0 : index
    %71 = vector.load %arg14[%c4_43, %c0_44] : memref<10x40xf32, #tpu.memory_space<vmem>>, vector<4x40xf32>
    %c0_i32_45 = arith.constant 0 : i32
    %72 = vector.broadcast %c0_i32_45 : i32 to vector<4x1xi32>
    %73 = arith.cmpi sgt, %15, %72 : vector<4x1xi32>
    %cst_46 = arith.constant 0.000000e+00 : f32
    %74 = vector.shape_cast %73 : vector<4x1xi1> to vector<4x1xi1>
    %75 = vector.broadcast %74 : vector<4x1xi1> to vector<4x40xi1>
    %76 = vector.broadcast %cst_46 : f32 to vector<4x40xf32>
    %77 = arith.select %75, %71, %76 : vector<4x40xi1>, vector<4x40xf32>
    %c6 = arith.constant 6 : index
    %c0_47 = arith.constant 0 : index
    %78 = vector.load %arg6[%c6, %c0_47] : memref<9x40xf32, #tpu.memory_space<vmem>>, vector<1x40xf32>
    %79 = vector.broadcast %78 : vector<1x40xf32> to vector<4x40xf32>
    %80 = arith.mulf %77, %79 : vector<4x40xf32>
    %81 = arith.addf %70, %80 : vector<4x40xf32>
    %c5_48 = arith.constant 5 : index
    %c0_49 = arith.constant 0 : index
    %82 = vector.load %arg14[%c5_48, %c0_49] : memref<10x40xf32, #tpu.memory_space<vmem>>, vector<4x40xf32>
    %c7_50 = arith.constant 7 : index
    %c0_51 = arith.constant 0 : index
    %83 = vector.load %arg6[%c7_50, %c0_51] : memref<9x40xf32, #tpu.memory_space<vmem>>, vector<1x40xf32>
    %84 = vector.broadcast %83 : vector<1x40xf32> to vector<4x40xf32>
    %85 = arith.mulf %82, %84 : vector<4x40xf32>
    %86 = arith.addf %81, %85 : vector<4x40xf32>
    %c6_52 = arith.constant 6 : index
    %c0_53 = arith.constant 0 : index
    %87 = vector.load %arg14[%c6_52, %c0_53] : memref<10x40xf32, #tpu.memory_space<vmem>>, vector<4x40xf32>
    %c1_i32_54 = arith.constant 1 : i32
    %88 = vector.broadcast %c1_i32_54 : i32 to vector<4x1xi32>
    %89 = arith.cmpi slt, %15, %88 : vector<4x1xi32>
    %cst_55 = arith.constant 0.000000e+00 : f32
    %90 = vector.shape_cast %89 : vector<4x1xi1> to vector<4x1xi1>
    %91 = vector.broadcast %90 : vector<4x1xi1> to vector<4x40xi1>
    %92 = vector.broadcast %cst_55 : f32 to vector<4x40xf32>
    %93 = arith.select %91, %87, %92 : vector<4x40xi1>, vector<4x40xf32>
    %c8 = arith.constant 8 : index
    %c0_56 = arith.constant 0 : index
    %94 = vector.load %arg6[%c8, %c0_56] : memref<9x40xf32, #tpu.memory_space<vmem>>, vector<1x40xf32>
    %95 = vector.broadcast %94 : vector<1x40xf32> to vector<4x40xf32>
    %96 = arith.mulf %93, %95 : vector<4x40xf32>
    %97 = arith.addf %86, %96 : vector<4x40xf32>
    %c0_57 = arith.constant 0 : index
    %c0_58 = arith.constant 0 : index
    %98 = vector.load %arg7[%c0_57, %c0_58] : memref<1x40xf32, #tpu.memory_space<vmem>>, vector<1x40xf32>
    %99 = vector.broadcast %98 : vector<1x40xf32> to vector<4x40xf32>
    %100 = arith.mulf %97, %99 : vector<4x40xf32>
    %c0_59 = arith.constant 0 : index
    %c0_60 = arith.constant 0 : index
    %101 = vector.load %arg8[%c0_59, %c0_60] : memref<1x40xf32, #tpu.memory_space<vmem>>, vector<1x40xf32>
    %102 = vector.broadcast %101 : vector<1x40xf32> to vector<4x40xf32>
    %103 = arith.addf %100, %102 : vector<4x40xf32>
    %104 = tpu.iota {dimensions = array<i32: 1>} : vector<1x40xi32>
    %c20_i32 = arith.constant 20 : i32
    %105 = vector.broadcast %c20_i32 : i32 to vector<1x40xi32>
    %106 = arith.cmpi slt, %104, %105 : vector<1x40xi32>
    %cst_61 = arith.constant 0.000000e+00 : f32
    %107 = vector.shape_cast %106 : vector<1x40xi1> to vector<1x40xi1>
    %108 = vector.broadcast %107 : vector<1x40xi1> to vector<4x40xi1>
    %109 = vector.broadcast %cst_61 : f32 to vector<4x40xf32>
    %110 = arith.select %108, %9, %109 : vector<4x40xi1>, vector<4x40xf32>
    %111 = arith.addf %110, %103 : vector<4x40xf32>
    %c0_62 = arith.constant 0 : index
    %c0_63 = arith.constant 0 : index
    %c0_64 = arith.constant 0 : index
    %112 = vector.load %arg9[%c0_62, %c0_63, %c0_64] : memref<1x4x24xbf16, #tpu.memory_space<vmem>>, vector<1x4x24xbf16>
    %113 = vector.shape_cast %112 : vector<1x4x24xbf16> to vector<4x24xbf16>
    %c0_65 = arith.constant 0 : index
    %c0_66 = arith.constant 0 : index
    %114 = vector.load %arg10[%c0_65, %c0_66] : memref<24x40xbf16, #tpu.memory_space<vmem>>, vector<24x40xbf16>
    %cst_67 = arith.constant dense<0.000000e+00> : vector<4x40xf32>
    %115 = tpu.matmul %113, %114, %cst_67 {dimension_numbers = #tpu.dot_dimension_numbers<[1], [0], [0], [1], [0, 0, 1, 1], [], []>} : vector<4x24xbf16>, vector<24x40xbf16>, vector<4x40xf32> -> vector<4x40xf32>
    %c0_68 = arith.constant 0 : index
    %c0_69 = arith.constant 0 : index
    %116 = vector.load %arg11[%c0_68, %c0_69] : memref<1x40xf32, #tpu.memory_space<vmem>>, vector<1x40xf32>
    %117 = vector.broadcast %116 : vector<1x40xf32> to vector<4x40xf32>
    %118 = arith.mulf %115, %117 : vector<4x40xf32>
    %c0_70 = arith.constant 0 : index
    %c0_71 = arith.constant 0 : index
    %119 = vector.load %arg12[%c0_70, %c0_71] : memref<1x40xf32, #tpu.memory_space<vmem>>, vector<1x40xf32>
    %120 = vector.broadcast %119 : vector<1x40xf32> to vector<4x40xf32>
    %121 = arith.addf %118, %120 : vector<4x40xf32>
    %122 = arith.addf %111, %121 : vector<4x40xf32>
    %123 = arith.truncf %122 : vector<4x40xf32> to vector<4x40xbf16>
    %c0_72 = arith.constant 0 : index
    %c0_73 = arith.constant 0 : index
    %c0_74 = arith.constant 0 : index
    %124 = vector.load %arg13[%c0_72, %c0_73, %c0_74] : memref<1x4x40xbf16, #tpu.memory_space<vmem>>, vector<1x4x40xbf16>
    %125 = vector.shape_cast %124 : vector<1x4x40xbf16> to vector<4x40xbf16>
    %126 = vector.shape_cast %123 : vector<4x40xbf16> to vector<1x4x40xbf16>
    tpu.vector_store %arg13[%c0_72, %c0_73, %c0_74], %126 {strides = array<i32>} : memref<1x4x40xbf16, #tpu.memory_space<vmem>>, vector<1x4x40xbf16>,
    return
  }
  func.func @transform_0(%arg0: i32) -> (i32, i32, i32) {
    %c0_i32 = arith.constant 0 : i32
    %c0_i32_0 = arith.constant 0 : i32
    %c0_i32_1 = arith.constant 0 : i32
    return %arg0, %c0_i32, %c0_i32_0 : i32, i32, i32
  }
  func.func @transform_1(%arg0: i32) -> (i32, i32) {
    %c0_i32 = arith.constant 0 : i32
    %c0_i32_0 = arith.constant 0 : i32
    %c0_i32_1 = arith.constant 0 : i32
    return %c0_i32, %c0_i32_0 : i32, i32
  }
  func.func @transform_2(%arg0: i32) -> (i32, i32) {
    %c0_i32 = arith.constant 0 : i32
    %c0_i32_0 = arith.constant 0 : i32
    %c0_i32_1 = arith.constant 0 : i32
    return %c0_i32, %c0_i32_0 : i32, i32
  }
  func.func @transform_3(%arg0: i32) -> (i32, i32) {
    %c0_i32 = arith.constant 0 : i32
    %c0_i32_0 = arith.constant 0 : i32
    %c0_i32_1 = arith.constant 0 : i32
    return %c0_i32, %c0_i32_0 : i32, i32
  }
  func.func @transform_4(%arg0: i32) -> (i32, i32) {
    %c0_i32 = arith.constant 0 : i32
    %c0_i32_0 = arith.constant 0 : i32
    %c0_i32_1 = arith.constant 0 : i32
    return %c0_i32, %c0_i32_0 : i32, i32
  }
  func.func @transform_5(%arg0: i32) -> (i32, i32) {
    %c0_i32 = arith.constant 0 : i32
    %c0_i32_0 = arith.constant 0 : i32
    %c0_i32_1 = arith.constant 0 : i32
    return %c0_i32, %c0_i32_0 : i32, i32
  }
  func.func @transform_6(%arg0: i32) -> (i32, i32) {
    %c0_i32 = arith.constant 0 : i32
    %c0_i32_0 = arith.constant 0 : i32
    %c0_i32_1 = arith.constant 0 : i32
    return %c0_i32, %c0_i32_0 : i32, i32
  }
  func.func @transform_7(%arg0: i32) -> (i32, i32) {
    %c0_i32 = arith.constant 0 : i32
    %c0_i32_0 = arith.constant 0 : i32
    %c0_i32_1 = arith.constant 0 : i32
    return %c0_i32, %c0_i32_0 : i32, i32
  }
  func.func @transform_8(%arg0: i32) -> (i32, i32, i32) {
    %c0_i32 = arith.constant 0 : i32
    %c0_i32_0 = arith.constant 0 : i32
    %c0_i32_1 = arith.constant 0 : i32
    return %arg0, %c0_i32, %c0_i32_0 : i32, i32, i32
  }
  func.func @transform_9(%arg0: i32) -> (i32, i32) {
    %c0_i32 = arith.constant 0 : i32
    %c0_i32_0 = arith.constant 0 : i32
    %c0_i32_1 = arith.constant 0 : i32
    return %c0_i32, %c0_i32_0 : i32, i32
  }
  func.func @transform_10(%arg0: i32) -> (i32, i32) {
    %c0_i32 = arith.constant 0 : i32
    %c0_i32_0 = arith.constant 0 : i32
    %c0_i32_1 = arith.constant 0 : i32
    return %c0_i32, %c0_i32_0 : i32, i32
  }
  func.func @transform_11(%arg0: i32) -> (i32, i32) {
    %c0_i32 = arith.constant 0 : i32
    %c0_i32_0 = arith.constant 0 : i32
    %c0_i32_1 = arith.constant 0 : i32
    return %c0_i32, %c0_i32_0 : i32, i32
  }
  func.func @transform_12(%arg0: i32) -> (i32, i32, i32) {
    %c0_i32 = arith.constant 0 : i32
    %c0_i32_0 = arith.constant 0 : i32
    %c0_i32_1 = arith.constant 0 : i32
    return %arg0, %c0_i32, %c0_i32_0 : i32, i32, i32
  }
}

module attributes {stable_mosaic.version = 11 : i64} {
  func.func @_matmul_kernel(%arg0: i32, %arg1: memref<8x40xbf16, #tpu.memory_space<vmem>>, %arg2: memref<40x72xbf16, #tpu.memory_space<vmem>>, %arg3: memref<1x72xf32, #tpu.memory_space<vmem>>, %arg4: memref<1x72xf32, #tpu.memory_space<vmem>>, %arg5: memref<8x72xbf16, #tpu.memory_space<vmem>>) attributes {dimension_semantics = [#tpu.dimension_semantics<parallel>], iteration_bounds = array<i64: 1>, scalar_prefetch = 0 : i64, scratch_operands = 0 : i64, tpu.core_type = #tpu.core_type<tc>, window_params = [{transform_indices = @transform_0, window_bounds = array<i64: 8, 40>}, {pipeline_mode = #tpu.pipeline_mode<synchronous>, transform_indices = @transform_1, window_bounds = array<i64: 40, 72>}, {pipeline_mode = #tpu.pipeline_mode<synchronous>, transform_indices = @transform_2, window_bounds = array<i64: 1, 72>}, {pipeline_mode = #tpu.pipeline_mode<synchronous>, transform_indices = @transform_3, window_bounds = array<i64: 1, 72>}, {transform_indices = @transform_4, window_bounds = array<i64: 8, 72>}]} {
    %c0 = arith.constant 0 : index
    %c0_0 = arith.constant 0 : index
    %0 = vector.load %arg1[%c0, %c0_0] : memref<8x40xbf16, #tpu.memory_space<vmem>>, vector<8x40xbf16>
    %c0_1 = arith.constant 0 : index
    %c0_2 = arith.constant 0 : index
    %1 = vector.load %arg2[%c0_1, %c0_2] : memref<40x72xbf16, #tpu.memory_space<vmem>>, vector<40x72xbf16>
    %cst = arith.constant dense<0.000000e+00> : vector<8x72xf32>
    %2 = tpu.matmul %0, %1, %cst {dimension_numbers = #tpu.dot_dimension_numbers<[1], [0], [0], [1], [0, 0, 1, 1], [], []>} : vector<8x40xbf16>, vector<40x72xbf16>, vector<8x72xf32> -> vector<8x72xf32>
    %c0_3 = arith.constant 0 : index
    %c0_4 = arith.constant 0 : index
    %3 = vector.load %arg3[%c0_3, %c0_4] : memref<1x72xf32, #tpu.memory_space<vmem>>, vector<1x72xf32>
    %4 = vector.broadcast %3 : vector<1x72xf32> to vector<8x72xf32>
    %5 = arith.mulf %2, %4 : vector<8x72xf32>
    %c0_5 = arith.constant 0 : index
    %c0_6 = arith.constant 0 : index
    %6 = vector.load %arg4[%c0_5, %c0_6] : memref<1x72xf32, #tpu.memory_space<vmem>>, vector<1x72xf32>
    %7 = vector.broadcast %6 : vector<1x72xf32> to vector<8x72xf32>
    %8 = arith.addf %5, %7 : vector<8x72xf32>
    %cst_7 = arith.constant 0.000000e+00 : f32
    %9 = vector.broadcast %cst_7 : f32 to vector<8x72xf32>
    %10 = arith.maximumf %8, %9 : vector<8x72xf32>
    %11 = arith.truncf %10 : vector<8x72xf32> to vector<8x72xbf16>
    %c0_8 = arith.constant 0 : index
    %c0_9 = arith.constant 0 : index
    %12 = vector.load %arg5[%c0_8, %c0_9] : memref<8x72xbf16, #tpu.memory_space<vmem>>, vector<8x72xbf16>
    tpu.vector_store %arg5[%c0_8, %c0_9], %11 {strides = array<i32>} : memref<8x72xbf16, #tpu.memory_space<vmem>>, vector<8x72xbf16>,
    return
  }
  func.func @transform_0(%arg0: i32) -> (i32, i32) {
    %c0_i32 = arith.constant 0 : i32
    %c0_i32_0 = arith.constant 0 : i32
    return %arg0, %c0_i32 : i32, i32
  }
  func.func @transform_1(%arg0: i32) -> (i32, i32) {
    %c0_i32 = arith.constant 0 : i32
    %c0_i32_0 = arith.constant 0 : i32
    %c0_i32_1 = arith.constant 0 : i32
    return %c0_i32, %c0_i32_0 : i32, i32
  }
  func.func @transform_2(%arg0: i32) -> (i32, i32) {
    %c0_i32 = arith.constant 0 : i32
    %c0_i32_0 = arith.constant 0 : i32
    %c0_i32_1 = arith.constant 0 : i32
    return %c0_i32, %c0_i32_0 : i32, i32
  }
  func.func @transform_3(%arg0: i32) -> (i32, i32) {
    %c0_i32 = arith.constant 0 : i32
    %c0_i32_0 = arith.constant 0 : i32
    %c0_i32_1 = arith.constant 0 : i32
    return %c0_i32, %c0_i32_0 : i32, i32
  }
  func.func @transform_4(%arg0: i32) -> (i32, i32) {
    %c0_i32 = arith.constant 0 : i32
    %c0_i32_0 = arith.constant 0 : i32
    return %arg0, %c0_i32 : i32, i32
  }
}

module attributes {stable_mosaic.version = 11 : i64} {
  func.func @_dw_phases_kernel(%arg0: i32, %arg1: memref<1x4x4x72xbf16, #tpu.memory_space<vmem>>, %arg2: memref<1x4x4x72xbf16, #tpu.memory_space<vmem>>, %arg3: memref<1x4x4x72xbf16, #tpu.memory_space<vmem>>, %arg4: memref<1x4x4x72xbf16, #tpu.memory_space<vmem>>, %arg5: memref<25x72xf32, #tpu.memory_space<vmem>>, %arg6: memref<1x72xf32, #tpu.memory_space<vmem>>, %arg7: memref<1x72xf32, #tpu.memory_space<vmem>>, %arg8: memref<1x2x2x72xbf16, #tpu.memory_space<vmem>>, %arg9: memref<4x4x72xf32, #tpu.memory_space<vmem>>, %arg10: memref<4x4x72xf32, #tpu.memory_space<vmem>>, %arg11: memref<4x4x72xf32, #tpu.memory_space<vmem>>, %arg12: memref<4x4x72xf32, #tpu.memory_space<vmem>>) attributes {dimension_semantics = [#tpu.dimension_semantics<parallel>], iteration_bounds = array<i64: 2>, scalar_prefetch = 0 : i64, scratch_operands = 4 : i64, tpu.core_type = #tpu.core_type<tc>, window_params = [{transform_indices = @transform_0, window_bounds = array<i64: 1, 4, 4, 72>}, {transform_indices = @transform_1, window_bounds = array<i64: 1, 4, 4, 72>}, {transform_indices = @transform_2, window_bounds = array<i64: 1, 4, 4, 72>}, {transform_indices = @transform_3, window_bounds = array<i64: 1, 4, 4, 72>}, {pipeline_mode = #tpu.pipeline_mode<synchronous>, transform_indices = @transform_4, window_bounds = array<i64: 25, 72>}, {pipeline_mode = #tpu.pipeline_mode<synchronous>, transform_indices = @transform_5, window_bounds = array<i64: 1, 72>}, {pipeline_mode = #tpu.pipeline_mode<synchronous>, transform_indices = @transform_6, window_bounds = array<i64: 1, 72>}, {transform_indices = @transform_7, window_bounds = array<i64: 1, 2, 2, 72>}]} {
    %c0 = arith.constant 0 : index
    %c0_0 = arith.constant 0 : index
    %c0_1 = arith.constant 0 : index
    %c0_2 = arith.constant 0 : index
    %0 = vector.load %arg1[%c0, %c0_0, %c0_1, %c0_2] : memref<1x4x4x72xbf16, #tpu.memory_space<vmem>>, vector<1x4x4x72xbf16>
    %1 = vector.shape_cast %0 : vector<1x4x4x72xbf16> to vector<4x4x72xbf16>
    %2 = arith.extf %1 : vector<4x4x72xbf16> to vector<4x4x72xf32>
    %c0_3 = arith.constant 0 : index
    %c0_4 = arith.constant 0 : index
    %c0_5 = arith.constant 0 : index
    %3 = vector.load %arg9[%c0_3, %c0_4, %c0_5] : memref<4x4x72xf32, #tpu.memory_space<vmem>>, vector<4x4x72xf32>
    tpu.vector_store %arg9[%c0_3, %c0_4, %c0_5], %2 {strides = array<i32>} : memref<4x4x72xf32, #tpu.memory_space<vmem>>, vector<4x4x72xf32>,
    %c0_6 = arith.constant 0 : index
    %c0_7 = arith.constant 0 : index
    %c0_8 = arith.constant 0 : index
    %c0_9 = arith.constant 0 : index
    %4 = vector.load %arg2[%c0_6, %c0_7, %c0_8, %c0_9] : memref<1x4x4x72xbf16, #tpu.memory_space<vmem>>, vector<1x4x4x72xbf16>
    %5 = vector.shape_cast %4 : vector<1x4x4x72xbf16> to vector<4x4x72xbf16>
    %6 = arith.extf %5 : vector<4x4x72xbf16> to vector<4x4x72xf32>
    %c0_10 = arith.constant 0 : index
    %c0_11 = arith.constant 0 : index
    %c0_12 = arith.constant 0 : index
    %7 = vector.load %arg10[%c0_10, %c0_11, %c0_12] : memref<4x4x72xf32, #tpu.memory_space<vmem>>, vector<4x4x72xf32>
    tpu.vector_store %arg10[%c0_10, %c0_11, %c0_12], %6 {strides = array<i32>} : memref<4x4x72xf32, #tpu.memory_space<vmem>>, vector<4x4x72xf32>,
    %c0_13 = arith.constant 0 : index
    %c0_14 = arith.constant 0 : index
    %c0_15 = arith.constant 0 : index
    %c0_16 = arith.constant 0 : index
    %8 = vector.load %arg3[%c0_13, %c0_14, %c0_15, %c0_16] : memref<1x4x4x72xbf16, #tpu.memory_space<vmem>>, vector<1x4x4x72xbf16>
    %9 = vector.shape_cast %8 : vector<1x4x4x72xbf16> to vector<4x4x72xbf16>
    %10 = arith.extf %9 : vector<4x4x72xbf16> to vector<4x4x72xf32>
    %c0_17 = arith.constant 0 : index
    %c0_18 = arith.constant 0 : index
    %c0_19 = arith.constant 0 : index
    %11 = vector.load %arg11[%c0_17, %c0_18, %c0_19] : memref<4x4x72xf32, #tpu.memory_space<vmem>>, vector<4x4x72xf32>
    tpu.vector_store %arg11[%c0_17, %c0_18, %c0_19], %10 {strides = array<i32>} : memref<4x4x72xf32, #tpu.memory_space<vmem>>, vector<4x4x72xf32>,
    %c0_20 = arith.constant 0 : index
    %c0_21 = arith.constant 0 : index
    %c0_22 = arith.constant 0 : index
    %c0_23 = arith.constant 0 : index
    %12 = vector.load %arg4[%c0_20, %c0_21, %c0_22, %c0_23] : memref<1x4x4x72xbf16, #tpu.memory_space<vmem>>, vector<1x4x4x72xbf16>
    %13 = vector.shape_cast %12 : vector<1x4x4x72xbf16> to vector<4x4x72xbf16>
    %14 = arith.extf %13 : vector<4x4x72xbf16> to vector<4x4x72xf32>
    %c0_24 = arith.constant 0 : index
    %c0_25 = arith.constant 0 : index
    %c0_26 = arith.constant 0 : index
    %15 = vector.load %arg12[%c0_24, %c0_25, %c0_26] : memref<4x4x72xf32, #tpu.memory_space<vmem>>, vector<4x4x72xf32>
    tpu.vector_store %arg12[%c0_24, %c0_25, %c0_26], %14 {strides = array<i32>} : memref<4x4x72xf32, #tpu.memory_space<vmem>>, vector<4x4x72xf32>,
    %cst = arith.constant 0.000000e+00 : f32
    %16 = vector.broadcast %cst : f32 to vector<2x2x72xf32>
    %c0_27 = arith.constant 0 : index
    %c0_28 = arith.constant 0 : index
    %c0_29 = arith.constant 0 : index
    %17 = vector.load %arg9[%c0_27, %c0_28, %c0_29] : memref<4x4x72xf32, #tpu.memory_space<vmem>>, vector<2x2x72xf32>
    %c0_30 = arith.constant 0 : index
    %c0_31 = arith.constant 0 : index
    %18 = vector.load %arg5[%c0_30, %c0_31] : memref<25x72xf32, #tpu.memory_space<vmem>>, vector<1x72xf32>
    %19 = vector.shape_cast %18 : vector<1x72xf32> to vector<1x1x72xf32>
    %20 = vector.broadcast %19 : vector<1x1x72xf32> to vector<2x2x72xf32>
    %21 = arith.mulf %17, %20 : vector<2x2x72xf32>
    %22 = arith.addf %16, %21 : vector<2x2x72xf32>
    %c0_32 = arith.constant 0 : index
    %c0_33 = arith.constant 0 : index
    %c0_34 = arith.constant 0 : index
    %23 = vector.load %arg10[%c0_32, %c0_33, %c0_34] : memref<4x4x72xf32, #tpu.memory_space<vmem>>, vector<2x2x72xf32>
    %c1 = arith.constant 1 : index
    %c0_35 = arith.constant 0 : index
    %24 = vector.load %arg5[%c1, %c0_35] : memref<25x72xf32, #tpu.memory_space<vmem>>, vector<1x72xf32>
    %25 = vector.shape_cast %24 : vector<1x72xf32> to vector<1x1x72xf32>
    %26 = vector.broadcast %25 : vector<1x1x72xf32> to vector<2x2x72xf32>
    %27 = arith.mulf %23, %26 : vector<2x2x72xf32>
    %28 = arith.addf %22, %27 : vector<2x2x72xf32>
    %c0_36 = arith.constant 0 : index
    %c1_37 = arith.constant 1 : index
    %c0_38 = arith.constant 0 : index
    %29 = vector.load %arg9[%c0_36, %c1_37, %c0_38] : memref<4x4x72xf32, #tpu.memory_space<vmem>>, vector<2x2x72xf32>
    %c2 = arith.constant 2 : index
    %c0_39 = arith.constant 0 : index
    %30 = vector.load %arg5[%c2, %c0_39] : memref<25x72xf32, #tpu.memory_space<vmem>>, vector<1x72xf32>
    %31 = vector.shape_cast %30 : vector<1x72xf32> to vector<1x1x72xf32>
    %32 = vector.broadcast %31 : vector<1x1x72xf32> to vector<2x2x72xf32>
    %33 = arith.mulf %29, %32 : vector<2x2x72xf32>
    %34 = arith.addf %28, %33 : vector<2x2x72xf32>
    %c0_40 = arith.constant 0 : index
    %c1_41 = arith.constant 1 : index
    %c0_42 = arith.constant 0 : index
    %35 = vector.load %arg10[%c0_40, %c1_41, %c0_42] : memref<4x4x72xf32, #tpu.memory_space<vmem>>, vector<2x2x72xf32>
    %c3 = arith.constant 3 : index
    %c0_43 = arith.constant 0 : index
    %36 = vector.load %arg5[%c3, %c0_43] : memref<25x72xf32, #tpu.memory_space<vmem>>, vector<1x72xf32>
    %37 = vector.shape_cast %36 : vector<1x72xf32> to vector<1x1x72xf32>
    %38 = vector.broadcast %37 : vector<1x1x72xf32> to vector<2x2x72xf32>
    %39 = arith.mulf %35, %38 : vector<2x2x72xf32>
    %40 = arith.addf %34, %39 : vector<2x2x72xf32>
    %c0_44 = arith.constant 0 : index
    %c2_45 = arith.constant 2 : index
    %c0_46 = arith.constant 0 : index
    %41 = vector.load %arg9[%c0_44, %c2_45, %c0_46] : memref<4x4x72xf32, #tpu.memory_space<vmem>>, vector<2x2x72xf32>
    %c4 = arith.constant 4 : index
    %c0_47 = arith.constant 0 : index
    %42 = vector.load %arg5[%c4, %c0_47] : memref<25x72xf32, #tpu.memory_space<vmem>>, vector<1x72xf32>
    %43 = vector.shape_cast %42 : vector<1x72xf32> to vector<1x1x72xf32>
    %44 = vector.broadcast %43 : vector<1x1x72xf32> to vector<2x2x72xf32>
    %45 = arith.mulf %41, %44 : vector<2x2x72xf32>
    %46 = arith.addf %40, %45 : vector<2x2x72xf32>
    %c0_48 = arith.constant 0 : index
    %c0_49 = arith.constant 0 : index
    %c0_50 = arith.constant 0 : index
    %47 = vector.load %arg11[%c0_48, %c0_49, %c0_50] : memref<4x4x72xf32, #tpu.memory_space<vmem>>, vector<2x2x72xf32>
    %c5 = arith.constant 5 : index
    %c0_51 = arith.constant 0 : index
    %48 = vector.load %arg5[%c5, %c0_51] : memref<25x72xf32, #tpu.memory_space<vmem>>, vector<1x72xf32>
    %49 = vector.shape_cast %48 : vector<1x72xf32> to vector<1x1x72xf32>
    %50 = vector.broadcast %49 : vector<1x1x72xf32> to vector<2x2x72xf32>
    %51 = arith.mulf %47, %50 : vector<2x2x72xf32>
    %52 = arith.addf %46, %51 : vector<2x2x72xf32>
    %c0_52 = arith.constant 0 : index
    %c0_53 = arith.constant 0 : index
    %c0_54 = arith.constant 0 : index
    %53 = vector.load %arg12[%c0_52, %c0_53, %c0_54] : memref<4x4x72xf32, #tpu.memory_space<vmem>>, vector<2x2x72xf32>
    %c6 = arith.constant 6 : index
    %c0_55 = arith.constant 0 : index
    %54 = vector.load %arg5[%c6, %c0_55] : memref<25x72xf32, #tpu.memory_space<vmem>>, vector<1x72xf32>
    %55 = vector.shape_cast %54 : vector<1x72xf32> to vector<1x1x72xf32>
    %56 = vector.broadcast %55 : vector<1x1x72xf32> to vector<2x2x72xf32>
    %57 = arith.mulf %53, %56 : vector<2x2x72xf32>
    %58 = arith.addf %52, %57 : vector<2x2x72xf32>
    %c0_56 = arith.constant 0 : index
    %c1_57 = arith.constant 1 : index
    %c0_58 = arith.constant 0 : index
    %59 = vector.load %arg11[%c0_56, %c1_57, %c0_58] : memref<4x4x72xf32, #tpu.memory_space<vmem>>, vector<2x2x72xf32>
    %c7 = arith.constant 7 : index
    %c0_59 = arith.constant 0 : index
    %60 = vector.load %arg5[%c7, %c0_59] : memref<25x72xf32, #tpu.memory_space<vmem>>, vector<1x72xf32>
    %61 = vector.shape_cast %60 : vector<1x72xf32> to vector<1x1x72xf32>
    %62 = vector.broadcast %61 : vector<1x1x72xf32> to vector<2x2x72xf32>
    %63 = arith.mulf %59, %62 : vector<2x2x72xf32>
    %64 = arith.addf %58, %63 : vector<2x2x72xf32>
    %c0_60 = arith.constant 0 : index
    %c1_61 = arith.constant 1 : index
    %c0_62 = arith.constant 0 : index
    %65 = vector.load %arg12[%c0_60, %c1_61, %c0_62] : memref<4x4x72xf32, #tpu.memory_space<vmem>>, vector<2x2x72xf32>
    %c8 = arith.constant 8 : index
    %c0_63 = arith.constant 0 : index
    %66 = vector.load %arg5[%c8, %c0_63] : memref<25x72xf32, #tpu.memory_space<vmem>>, vector<1x72xf32>
    %67 = vector.shape_cast %66 : vector<1x72xf32> to vector<1x1x72xf32>
    %68 = vector.broadcast %67 : vector<1x1x72xf32> to vector<2x2x72xf32>
    %69 = arith.mulf %65, %68 : vector<2x2x72xf32>
    %70 = arith.addf %64, %69 : vector<2x2x72xf32>
    %c0_64 = arith.constant 0 : index
    %c2_65 = arith.constant 2 : index
    %c0_66 = arith.constant 0 : index
    %71 = vector.load %arg11[%c0_64, %c2_65, %c0_66] : memref<4x4x72xf32, #tpu.memory_space<vmem>>, vector<2x2x72xf32>
    %c9 = arith.constant 9 : index
    %c0_67 = arith.constant 0 : index
    %72 = vector.load %arg5[%c9, %c0_67] : memref<25x72xf32, #tpu.memory_space<vmem>>, vector<1x72xf32>
    %73 = vector.shape_cast %72 : vector<1x72xf32> to vector<1x1x72xf32>
    %74 = vector.broadcast %73 : vector<1x1x72xf32> to vector<2x2x72xf32>
    %75 = arith.mulf %71, %74 : vector<2x2x72xf32>
    %76 = arith.addf %70, %75 : vector<2x2x72xf32>
    %c1_68 = arith.constant 1 : index
    %c0_69 = arith.constant 0 : index
    %c0_70 = arith.constant 0 : index
    %77 = vector.load %arg9[%c1_68, %c0_69, %c0_70] : memref<4x4x72xf32, #tpu.memory_space<vmem>>, vector<2x2x72xf32>
    %c10 = arith.constant 10 : index
    %c0_71 = arith.constant 0 : index
    %78 = vector.load %arg5[%c10, %c0_71] : memref<25x72xf32, #tpu.memory_space<vmem>>, vector<1x72xf32>
    %79 = vector.shape_cast %78 : vector<1x72xf32> to vector<1x1x72xf32>
    %80 = vector.broadcast %79 : vector<1x1x72xf32> to vector<2x2x72xf32>
    %81 = arith.mulf %77, %80 : vector<2x2x72xf32>
    %82 = arith.addf %76, %81 : vector<2x2x72xf32>
    %c1_72 = arith.constant 1 : index
    %c0_73 = arith.constant 0 : index
    %c0_74 = arith.constant 0 : index
    %83 = vector.load %arg10[%c1_72, %c0_73, %c0_74] : memref<4x4x72xf32, #tpu.memory_space<vmem>>, vector<2x2x72xf32>
    %c11 = arith.constant 11 : index
    %c0_75 = arith.constant 0 : index
    %84 = vector.load %arg5[%c11, %c0_75] : memref<25x72xf32, #tpu.memory_space<vmem>>, vector<1x72xf32>
    %85 = vector.shape_cast %84 : vector<1x72xf32> to vector<1x1x72xf32>
    %86 = vector.broadcast %85 : vector<1x1x72xf32> to vector<2x2x72xf32>
    %87 = arith.mulf %83, %86 : vector<2x2x72xf32>
    %88 = arith.addf %82, %87 : vector<2x2x72xf32>
    %c1_76 = arith.constant 1 : index
    %c1_77 = arith.constant 1 : index
    %c0_78 = arith.constant 0 : index
    %89 = vector.load %arg9[%c1_76, %c1_77, %c0_78] : memref<4x4x72xf32, #tpu.memory_space<vmem>>, vector<2x2x72xf32>
    %c12 = arith.constant 12 : index
    %c0_79 = arith.constant 0 : index
    %90 = vector.load %arg5[%c12, %c0_79] : memref<25x72xf32, #tpu.memory_space<vmem>>, vector<1x72xf32>
    %91 = vector.shape_cast %90 : vector<1x72xf32> to vector<1x1x72xf32>
    %92 = vector.broadcast %91 : vector<1x1x72xf32> to vector<2x2x72xf32>
    %93 = arith.mulf %89, %92 : vector<2x2x72xf32>
    %94 = arith.addf %88, %93 : vector<2x2x72xf32>
    %c1_80 = arith.constant 1 : index
    %c1_81 = arith.constant 1 : index
    %c0_82 = arith.constant 0 : index
    %95 = vector.load %arg10[%c1_80, %c1_81, %c0_82] : memref<4x4x72xf32, #tpu.memory_space<vmem>>, vector<2x2x72xf32>
    %c13 = arith.constant 13 : index
    %c0_83 = arith.constant 0 : index
    %96 = vector.load %arg5[%c13, %c0_83] : memref<25x72xf32, #tpu.memory_space<vmem>>, vector<1x72xf32>
    %97 = vector.shape_cast %96 : vector<1x72xf32> to vector<1x1x72xf32>
    %98 = vector.broadcast %97 : vector<1x1x72xf32> to vector<2x2x72xf32>
    %99 = arith.mulf %95, %98 : vector<2x2x72xf32>
    %100 = arith.addf %94, %99 : vector<2x2x72xf32>
    %c1_84 = arith.constant 1 : index
    %c2_85 = arith.constant 2 : index
    %c0_86 = arith.constant 0 : index
    %101 = vector.load %arg9[%c1_84, %c2_85, %c0_86] : memref<4x4x72xf32, #tpu.memory_space<vmem>>, vector<2x2x72xf32>
    %c14 = arith.constant 14 : index
    %c0_87 = arith.constant 0 : index
    %102 = vector.load %arg5[%c14, %c0_87] : memref<25x72xf32, #tpu.memory_space<vmem>>, vector<1x72xf32>
    %103 = vector.shape_cast %102 : vector<1x72xf32> to vector<1x1x72xf32>
    %104 = vector.broadcast %103 : vector<1x1x72xf32> to vector<2x2x72xf32>
    %105 = arith.mulf %101, %104 : vector<2x2x72xf32>
    %106 = arith.addf %100, %105 : vector<2x2x72xf32>
    %c1_88 = arith.constant 1 : index
    %c0_89 = arith.constant 0 : index
    %c0_90 = arith.constant 0 : index
    %107 = vector.load %arg11[%c1_88, %c0_89, %c0_90] : memref<4x4x72xf32, #tpu.memory_space<vmem>>, vector<2x2x72xf32>
    %c15 = arith.constant 15 : index
    %c0_91 = arith.constant 0 : index
    %108 = vector.load %arg5[%c15, %c0_91] : memref<25x72xf32, #tpu.memory_space<vmem>>, vector<1x72xf32>
    %109 = vector.shape_cast %108 : vector<1x72xf32> to vector<1x1x72xf32>
    %110 = vector.broadcast %109 : vector<1x1x72xf32> to vector<2x2x72xf32>
    %111 = arith.mulf %107, %110 : vector<2x2x72xf32>
    %112 = arith.addf %106, %111 : vector<2x2x72xf32>
    %c1_92 = arith.constant 1 : index
    %c0_93 = arith.constant 0 : index
    %c0_94 = arith.constant 0 : index
    %113 = vector.load %arg12[%c1_92, %c0_93, %c0_94] : memref<4x4x72xf32, #tpu.memory_space<vmem>>, vector<2x2x72xf32>
    %c16 = arith.constant 16 : index
    %c0_95 = arith.constant 0 : index
    %114 = vector.load %arg5[%c16, %c0_95] : memref<25x72xf32, #tpu.memory_space<vmem>>, vector<1x72xf32>
    %115 = vector.shape_cast %114 : vector<1x72xf32> to vector<1x1x72xf32>
    %116 = vector.broadcast %115 : vector<1x1x72xf32> to vector<2x2x72xf32>
    %117 = arith.mulf %113, %116 : vector<2x2x72xf32>
    %118 = arith.addf %112, %117 : vector<2x2x72xf32>
    %c1_96 = arith.constant 1 : index
    %c1_97 = arith.constant 1 : index
    %c0_98 = arith.constant 0 : index
    %119 = vector.load %arg11[%c1_96, %c1_97, %c0_98] : memref<4x4x72xf32, #tpu.memory_space<vmem>>, vector<2x2x72xf32>
    %c17 = arith.constant 17 : index
    %c0_99 = arith.constant 0 : index
    %120 = vector.load %arg5[%c17, %c0_99] : memref<25x72xf32, #tpu.memory_space<vmem>>, vector<1x72xf32>
    %121 = vector.shape_cast %120 : vector<1x72xf32> to vector<1x1x72xf32>
    %122 = vector.broadcast %121 : vector<1x1x72xf32> to vector<2x2x72xf32>
    %123 = arith.mulf %119, %122 : vector<2x2x72xf32>
    %124 = arith.addf %118, %123 : vector<2x2x72xf32>
    %c1_100 = arith.constant 1 : index
    %c1_101 = arith.constant 1 : index
    %c0_102 = arith.constant 0 : index
    %125 = vector.load %arg12[%c1_100, %c1_101, %c0_102] : memref<4x4x72xf32, #tpu.memory_space<vmem>>, vector<2x2x72xf32>
    %c18 = arith.constant 18 : index
    %c0_103 = arith.constant 0 : index
    %126 = vector.load %arg5[%c18, %c0_103] : memref<25x72xf32, #tpu.memory_space<vmem>>, vector<1x72xf32>
    %127 = vector.shape_cast %126 : vector<1x72xf32> to vector<1x1x72xf32>
    %128 = vector.broadcast %127 : vector<1x1x72xf32> to vector<2x2x72xf32>
    %129 = arith.mulf %125, %128 : vector<2x2x72xf32>
    %130 = arith.addf %124, %129 : vector<2x2x72xf32>
    %c1_104 = arith.constant 1 : index
    %c2_105 = arith.constant 2 : index
    %c0_106 = arith.constant 0 : index
    %131 = vector.load %arg11[%c1_104, %c2_105, %c0_106] : memref<4x4x72xf32, #tpu.memory_space<vmem>>, vector<2x2x72xf32>
    %c19 = arith.constant 19 : index
    %c0_107 = arith.constant 0 : index
    %132 = vector.load %arg5[%c19, %c0_107] : memref<25x72xf32, #tpu.memory_space<vmem>>, vector<1x72xf32>
    %133 = vector.shape_cast %132 : vector<1x72xf32> to vector<1x1x72xf32>
    %134 = vector.broadcast %133 : vector<1x1x72xf32> to vector<2x2x72xf32>
    %135 = arith.mulf %131, %134 : vector<2x2x72xf32>
    %136 = arith.addf %130, %135 : vector<2x2x72xf32>
    %c2_108 = arith.constant 2 : index
    %c0_109 = arith.constant 0 : index
    %c0_110 = arith.constant 0 : index
    %137 = vector.load %arg9[%c2_108, %c0_109, %c0_110] : memref<4x4x72xf32, #tpu.memory_space<vmem>>, vector<2x2x72xf32>
    %c20 = arith.constant 20 : index
    %c0_111 = arith.constant 0 : index
    %138 = vector.load %arg5[%c20, %c0_111] : memref<25x72xf32, #tpu.memory_space<vmem>>, vector<1x72xf32>
    %139 = vector.shape_cast %138 : vector<1x72xf32> to vector<1x1x72xf32>
    %140 = vector.broadcast %139 : vector<1x1x72xf32> to vector<2x2x72xf32>
    %141 = arith.mulf %137, %140 : vector<2x2x72xf32>
    %142 = arith.addf %136, %141 : vector<2x2x72xf32>
    %c2_112 = arith.constant 2 : index
    %c0_113 = arith.constant 0 : index
    %c0_114 = arith.constant 0 : index
    %143 = vector.load %arg10[%c2_112, %c0_113, %c0_114] : memref<4x4x72xf32, #tpu.memory_space<vmem>>, vector<2x2x72xf32>
    %c21 = arith.constant 21 : index
    %c0_115 = arith.constant 0 : index
    %144 = vector.load %arg5[%c21, %c0_115] : memref<25x72xf32, #tpu.memory_space<vmem>>, vector<1x72xf32>
    %145 = vector.shape_cast %144 : vector<1x72xf32> to vector<1x1x72xf32>
    %146 = vector.broadcast %145 : vector<1x1x72xf32> to vector<2x2x72xf32>
    %147 = arith.mulf %143, %146 : vector<2x2x72xf32>
    %148 = arith.addf %142, %147 : vector<2x2x72xf32>
    %c2_116 = arith.constant 2 : index
    %c1_117 = arith.constant 1 : index
    %c0_118 = arith.constant 0 : index
    %149 = vector.load %arg9[%c2_116, %c1_117, %c0_118] : memref<4x4x72xf32, #tpu.memory_space<vmem>>, vector<2x2x72xf32>
    %c22 = arith.constant 22 : index
    %c0_119 = arith.constant 0 : index
    %150 = vector.load %arg5[%c22, %c0_119] : memref<25x72xf32, #tpu.memory_space<vmem>>, vector<1x72xf32>
    %151 = vector.shape_cast %150 : vector<1x72xf32> to vector<1x1x72xf32>
    %152 = vector.broadcast %151 : vector<1x1x72xf32> to vector<2x2x72xf32>
    %153 = arith.mulf %149, %152 : vector<2x2x72xf32>
    %154 = arith.addf %148, %153 : vector<2x2x72xf32>
    %c2_120 = arith.constant 2 : index
    %c1_121 = arith.constant 1 : index
    %c0_122 = arith.constant 0 : index
    %155 = vector.load %arg10[%c2_120, %c1_121, %c0_122] : memref<4x4x72xf32, #tpu.memory_space<vmem>>, vector<2x2x72xf32>
    %c23 = arith.constant 23 : index
    %c0_123 = arith.constant 0 : index
    %156 = vector.load %arg5[%c23, %c0_123] : memref<25x72xf32, #tpu.memory_space<vmem>>, vector<1x72xf32>
    %157 = vector.shape_cast %156 : vector<1x72xf32> to vector<1x1x72xf32>
    %158 = vector.broadcast %157 : vector<1x1x72xf32> to vector<2x2x72xf32>
    %159 = arith.mulf %155, %158 : vector<2x2x72xf32>
    %160 = arith.addf %154, %159 : vector<2x2x72xf32>
    %c2_124 = arith.constant 2 : index
    %c2_125 = arith.constant 2 : index
    %c0_126 = arith.constant 0 : index
    %161 = vector.load %arg9[%c2_124, %c2_125, %c0_126] : memref<4x4x72xf32, #tpu.memory_space<vmem>>, vector<2x2x72xf32>
    %c24 = arith.constant 24 : index
    %c0_127 = arith.constant 0 : index
    %162 = vector.load %arg5[%c24, %c0_127] : memref<25x72xf32, #tpu.memory_space<vmem>>, vector<1x72xf32>
    %163 = vector.shape_cast %162 : vector<1x72xf32> to vector<1x1x72xf32>
    %164 = vector.broadcast %163 : vector<1x1x72xf32> to vector<2x2x72xf32>
    %165 = arith.mulf %161, %164 : vector<2x2x72xf32>
    %166 = arith.addf %160, %165 : vector<2x2x72xf32>
    %c0_128 = arith.constant 0 : index
    %c0_129 = arith.constant 0 : index
    %167 = vector.load %arg6[%c0_128, %c0_129] : memref<1x72xf32, #tpu.memory_space<vmem>>, vector<1x72xf32>
    %168 = vector.shape_cast %167 : vector<1x72xf32> to vector<1x1x72xf32>
    %169 = vector.broadcast %168 : vector<1x1x72xf32> to vector<2x2x72xf32>
    %170 = arith.mulf %166, %169 : vector<2x2x72xf32>
    %c0_130 = arith.constant 0 : index
    %c0_131 = arith.constant 0 : index
    %171 = vector.load %arg7[%c0_130, %c0_131] : memref<1x72xf32, #tpu.memory_space<vmem>>, vector<1x72xf32>
    %172 = vector.shape_cast %171 : vector<1x72xf32> to vector<1x1x72xf32>
    %173 = vector.broadcast %172 : vector<1x1x72xf32> to vector<2x2x72xf32>
    %174 = arith.addf %170, %173 : vector<2x2x72xf32>
    %175 = arith.truncf %174 : vector<2x2x72xf32> to vector<2x2x72xbf16>
    %c0_132 = arith.constant 0 : index
    %c0_133 = arith.constant 0 : index
    %c0_134 = arith.constant 0 : index
    %c0_135 = arith.constant 0 : index
    %176 = vector.load %arg8[%c0_132, %c0_133, %c0_134, %c0_135] : memref<1x2x2x72xbf16, #tpu.memory_space<vmem>>, vector<1x2x2x72xbf16>
    %177 = vector.shape_cast %176 : vector<1x2x2x72xbf16> to vector<2x2x72xbf16>
    %178 = vector.shape_cast %175 : vector<2x2x72xbf16> to vector<1x2x2x72xbf16>
    tpu.vector_store %arg8[%c0_132, %c0_133, %c0_134, %c0_135], %178 {strides = array<i32>} : memref<1x2x2x72xbf16, #tpu.memory_space<vmem>>, vector<1x2x2x72xbf16>,
    return
  }
  func.func @transform_0(%arg0: i32) -> (i32, i32, i32, i32) {
    %c0_i32 = arith.constant 0 : i32
    %c0_i32_0 = arith.constant 0 : i32
    %c0_i32_1 = arith.constant 0 : i32
    %c0_i32_2 = arith.constant 0 : i32
    return %arg0, %c0_i32, %c0_i32_0, %c0_i32_1 : i32, i32, i32, i32
  }
  func.func @transform_1(%arg0: i32) -> (i32, i32, i32, i32) {
    %c0_i32 = arith.constant 0 : i32
    %c0_i32_0 = arith.constant 0 : i32
    %c0_i32_1 = arith.constant 0 : i32
    %c0_i32_2 = arith.constant 0 : i32
    return %arg0, %c0_i32, %c0_i32_0, %c0_i32_1 : i32, i32, i32, i32
  }
  func.func @transform_2(%arg0: i32) -> (i32, i32, i32, i32) {
    %c0_i32 = arith.constant 0 : i32
    %c0_i32_0 = arith.constant 0 : i32
    %c0_i32_1 = arith.constant 0 : i32
    %c0_i32_2 = arith.constant 0 : i32
    return %arg0, %c0_i32, %c0_i32_0, %c0_i32_1 : i32, i32, i32, i32
  }
  func.func @transform_3(%arg0: i32) -> (i32, i32, i32, i32) {
    %c0_i32 = arith.constant 0 : i32
    %c0_i32_0 = arith.constant 0 : i32
    %c0_i32_1 = arith.constant 0 : i32
    %c0_i32_2 = arith.constant 0 : i32
    return %arg0, %c0_i32, %c0_i32_0, %c0_i32_1 : i32, i32, i32, i32
  }
  func.func @transform_4(%arg0: i32) -> (i32, i32) {
    %c0_i32 = arith.constant 0 : i32
    %c0_i32_0 = arith.constant 0 : i32
    %c0_i32_1 = arith.constant 0 : i32
    return %c0_i32, %c0_i32_0 : i32, i32
  }
  func.func @transform_5(%arg0: i32) -> (i32, i32) {
    %c0_i32 = arith.constant 0 : i32
    %c0_i32_0 = arith.constant 0 : i32
    %c0_i32_1 = arith.constant 0 : i32
    return %c0_i32, %c0_i32_0 : i32, i32
  }
  func.func @transform_6(%arg0: i32) -> (i32, i32) {
    %c0_i32 = arith.constant 0 : i32
    %c0_i32_0 = arith.constant 0 : i32
    %c0_i32_1 = arith.constant 0 : i32
    return %c0_i32, %c0_i32_0 : i32, i32
  }
  func.func @transform_7(%arg0: i32) -> (i32, i32, i32, i32) {
    %c0_i32 = arith.constant 0 : i32
    %c0_i32_0 = arith.constant 0 : i32
    %c0_i32_1 = arith.constant 0 : i32
    %c0_i32_2 = arith.constant 0 : i32
    return %arg0, %c0_i32, %c0_i32_0, %c0_i32_1 : i32, i32, i32, i32
  }
}

module attributes {stable_mosaic.version = 11 : i64} {
  func.func @_head_kernel(%arg0: i32, %arg1: memref<2x4x72xbf16, #tpu.memory_space<vmem>>, %arg2: memref<72x1280xbf16, #tpu.memory_space<vmem>>, %arg3: memref<1x1280xf32, #tpu.memory_space<vmem>>, %arg4: memref<1x1280xf32, #tpu.memory_space<vmem>>, %arg5: memref<1280x10xbf16, #tpu.memory_space<vmem>>, %arg6: memref<1x10xf32, #tpu.memory_space<vmem>>, %arg7: memref<2x10xf32, #tpu.memory_space<vmem>>) attributes {dimension_semantics = [#tpu.dimension_semantics<arbitrary>], iteration_bounds = array<i64: 1>, scalar_prefetch = 0 : i64, scratch_operands = 0 : i64, tpu.core_type = #tpu.core_type<tc>, window_params = [{pipeline_mode = #tpu.pipeline_mode<synchronous>, transform_indices = @transform_0, window_bounds = array<i64: 2, 4, 72>}, {pipeline_mode = #tpu.pipeline_mode<synchronous>, transform_indices = @transform_1, window_bounds = array<i64: 72, 1280>}, {pipeline_mode = #tpu.pipeline_mode<synchronous>, transform_indices = @transform_2, window_bounds = array<i64: 1, 1280>}, {pipeline_mode = #tpu.pipeline_mode<synchronous>, transform_indices = @transform_3, window_bounds = array<i64: 1, 1280>}, {pipeline_mode = #tpu.pipeline_mode<synchronous>, transform_indices = @transform_4, window_bounds = array<i64: 1280, 10>}, {pipeline_mode = #tpu.pipeline_mode<synchronous>, transform_indices = @transform_5, window_bounds = array<i64: 1, 10>}, {pipeline_mode = #tpu.pipeline_mode<synchronous>, transform_indices = @transform_6, window_bounds = array<i64: 2, 10>}]} {
    %c0 = arith.constant 0 : index
    %c0_0 = arith.constant 0 : index
    %c0_1 = arith.constant 0 : index
    %0 = vector.load %arg1[%c0, %c0_0, %c0_1] : memref<2x4x72xbf16, #tpu.memory_space<vmem>>, vector<2x4x72xbf16>
    %1 = arith.extf %0 : vector<2x4x72xbf16> to vector<2x4x72xf32>
    %cst = arith.constant dense<0.000000e+00> : vector<2x72xf32>
    %2 = vector.multi_reduction <add>, %1, %cst [1] : vector<2x4x72xf32> to vector<2x72xf32>
    %cst_2 = arith.constant 4.000000e+00 : f32
    %3 = vector.broadcast %cst_2 : f32 to vector<2x72xf32>
    %4 = arith.divf %2, %3 : vector<2x72xf32>
    %5 = arith.truncf %4 : vector<2x72xf32> to vector<2x72xbf16>
    %c0_3 = arith.constant 0 : index
    %c0_4 = arith.constant 0 : index
    %6 = vector.load %arg2[%c0_3, %c0_4] : memref<72x1280xbf16, #tpu.memory_space<vmem>>, vector<72x1280xbf16>
    %cst_5 = arith.constant dense<0.000000e+00> : vector<2x1280xf32>
    %7 = tpu.matmul %5, %6, %cst_5 {dimension_numbers = #tpu.dot_dimension_numbers<[1], [0], [0], [1], [0, 0, 1, 1], [], []>} : vector<2x72xbf16>, vector<72x1280xbf16>, vector<2x1280xf32> -> vector<2x1280xf32>
    %c0_6 = arith.constant 0 : index
    %c0_7 = arith.constant 0 : index
    %8 = vector.load %arg3[%c0_6, %c0_7] : memref<1x1280xf32, #tpu.memory_space<vmem>>, vector<1x1280xf32>
    %9 = vector.broadcast %8 : vector<1x1280xf32> to vector<2x1280xf32>
    %10 = arith.mulf %7, %9 : vector<2x1280xf32>
    %c0_8 = arith.constant 0 : index
    %c0_9 = arith.constant 0 : index
    %11 = vector.load %arg4[%c0_8, %c0_9] : memref<1x1280xf32, #tpu.memory_space<vmem>>, vector<1x1280xf32>
    %12 = vector.broadcast %11 : vector<1x1280xf32> to vector<2x1280xf32>
    %13 = arith.addf %10, %12 : vector<2x1280xf32>
    %cst_10 = arith.constant 0.000000e+00 : f32
    %14 = vector.broadcast %cst_10 : f32 to vector<2x1280xf32>
    %15 = arith.maximumf %13, %14 : vector<2x1280xf32>
    %16 = arith.truncf %15 : vector<2x1280xf32> to vector<2x1280xbf16>
    %c0_11 = arith.constant 0 : index
    %c0_12 = arith.constant 0 : index
    %17 = vector.load %arg5[%c0_11, %c0_12] : memref<1280x10xbf16, #tpu.memory_space<vmem>>, vector<1280x10xbf16>
    %cst_13 = arith.constant dense<0.000000e+00> : vector<2x10xf32>
    %18 = tpu.matmul %16, %17, %cst_13 {dimension_numbers = #tpu.dot_dimension_numbers<[1], [0], [0], [1], [0, 0, 1, 1], [], []>} : vector<2x1280xbf16>, vector<1280x10xbf16>, vector<2x10xf32> -> vector<2x10xf32>
    %c0_14 = arith.constant 0 : index
    %c0_15 = arith.constant 0 : index
    %19 = vector.load %arg6[%c0_14, %c0_15] : memref<1x10xf32, #tpu.memory_space<vmem>>, vector<1x10xf32>
    %20 = vector.broadcast %19 : vector<1x10xf32> to vector<2x10xf32>
    %21 = arith.addf %18, %20 : vector<2x10xf32>
    %c0_16 = arith.constant 0 : index
    %c0_17 = arith.constant 0 : index
    %22 = vector.load %arg7[%c0_16, %c0_17] : memref<2x10xf32, #tpu.memory_space<vmem>>, vector<2x10xf32>
    tpu.vector_store %arg7[%c0_16, %c0_17], %21 {strides = array<i32>} : memref<2x10xf32, #tpu.memory_space<vmem>>, vector<2x10xf32>,
    return
  }
  func.func @transform_0(%arg0: i32) -> (i32, i32, i32) {
    %c0_i32 = arith.constant 0 : i32
    %c0_i32_0 = arith.constant 0 : i32
    %c0_i32_1 = arith.constant 0 : i32
    %c0_i32_2 = arith.constant 0 : i32
    return %c0_i32, %c0_i32_0, %c0_i32_1 : i32, i32, i32
  }
  func.func @transform_1(%arg0: i32) -> (i32, i32) {
    %c0_i32 = arith.constant 0 : i32
    %c0_i32_0 = arith.constant 0 : i32
    %c0_i32_1 = arith.constant 0 : i32
    return %c0_i32, %c0_i32_0 : i32, i32
  }
  func.func @transform_2(%arg0: i32) -> (i32, i32) {
    %c0_i32 = arith.constant 0 : i32
    %c0_i32_0 = arith.constant 0 : i32
    %c0_i32_1 = arith.constant 0 : i32
    return %c0_i32, %c0_i32_0 : i32, i32
  }
  func.func @transform_3(%arg0: i32) -> (i32, i32) {
    %c0_i32 = arith.constant 0 : i32
    %c0_i32_0 = arith.constant 0 : i32
    %c0_i32_1 = arith.constant 0 : i32
    return %c0_i32, %c0_i32_0 : i32, i32
  }
  func.func @transform_4(%arg0: i32) -> (i32, i32) {
    %c0_i32 = arith.constant 0 : i32
    %c0_i32_0 = arith.constant 0 : i32
    %c0_i32_1 = arith.constant 0 : i32
    return %c0_i32, %c0_i32_0 : i32, i32
  }
  func.func @transform_5(%arg0: i32) -> (i32, i32) {
    %c0_i32 = arith.constant 0 : i32
    %c0_i32_0 = arith.constant 0 : i32
    %c0_i32_1 = arith.constant 0 : i32
    return %c0_i32, %c0_i32_0 : i32, i32
  }
  func.func @transform_6(%arg0: i32) -> (i32, i32) {
    %c0_i32 = arith.constant 0 : i32
    %c0_i32_0 = arith.constant 0 : i32
    %c0_i32_1 = arith.constant 0 : i32
    return %c0_i32, %c0_i32_0 : i32, i32
  }
}

</mosaic_0001>

<bundles_post_ra>
// kernel: _lambda_.15
= control target key start
LH: loop header
LB: loop body
LE: loop exit
PB: predicated region body
PF: predicated region fallthrough
CT: control target
= control target key end

     0   :  { %vm114_vm0 = vcmask 1044480   ;;  %vm115_vm1 = vcmask 1045504   ;;  %v462_v1 = vmov 65535   ;;  %vm89_vm2 = vcmask 220160   ;;  %s632_s1 = inlined_call_operand.vmem [shape: bf16[27,16], index: 1, kind: input, shape index: {}]   ;;  %s633_s0 = inlined_call_operand.vmem [shape: bf16[128,27], index: 0, kind: input, shape index: {}]   ;;  %s634_s2 = inlined_call_operand.vmem [shape: f32[1,16], index: 2, kind: input, shape index: {}]   ;;  %s635_s3 = inlined_call_operand.vmem [shape: f32[1,16], index: 3, kind: input, shape index: {}]   ;;  %s636_s4 = inlined_call_operand.vmem [shape: bf16[128,16], index: 4, kind: output, shape index: {}]  }
   0x1   :  { %v452_v0 = vld [vmem:[%s632_s1 + $0x8] sm:$0x3f]   ;;  %v116_v2 = vsel %vm114_vm0, 4294967295, %v462_v1  ;;  %v454_v4 = vld [vmem:[%s633_s0] sm:$0xff]   ;;  %v458_v10 = vld [vmem:[%s633_s0 + $0x10] sm:$0xff]   ;;  %vm344_vm3 = vcmask 125952  }
   0x2   :  { %v117_v3 = vsel %vm115_vm1, %v116_v2, 0  ;;  %v453_v6 = vld [vmem:[%s632_s1] sm:$0xff]   ;;  %431 = vmatprep.mubr.msk.bf16.mxu0 %vm89_vm2, %v454_v4  ;;  %v456_v8 = vld [vmem:[%s633_s0 + $0x8] sm:$0xff]   ;;  %v459_v11 = vld [vmem:[%s633_s0 + $0x30] sm:$0xff]  }
   0x3   :  { %v119_v5 = vand.u32 %v452_v0, %v117_v3  ;;  %v455_v7 = vld [vmem:[%s633_s0 + $0x20] sm:$0xff]   ;;  %v457_v9 = vld [vmem:[%s633_s0 + $0x28] sm:$0xff]   ;;  %v460_v12 = vld [vmem:[%s633_s0 + $0x18] sm:$0xff]  }
   0x4   :  { %439 = vmatprep.mubr.msk.bf16.mxu1 %vm89_vm2, %v455_v7  ;;  %v461_v13 = vld [vmem:[%s633_s0 + $0x38] sm:$0xff]   ;;  %v529_v14 = vld [vmem:[%s634_s2] ss:$0 sm:$0xff] }
   0x5   :  { %427 = vmatprep.subr.bf16.mxu0 %v119_v5  ;;  %447 = vmatprep.subr.bf16.mxu1 %v119_v5  ;;  %v534_v16 = vld [vmem:[%s635_s3] ss:$0 sm:$0xff] }
   0x6   :  { %428 = vmatpush3.bf16.msra.mxu0 %v119_v5  ;;  %449 = vmatpush3.bf16.msra.mxu1 %v119_v5 }
   0x7   :  { %429 = vmatprep.subr.bf16.mxu0 %v453_v6  ;;  %448 = vmatprep.subr.bf16.mxu1 %v453_v6 }
   0xa   :  { %430 = vmatpush3.bf16.msra.mxu0 %v453_v6  ;;  %450 = vmatpush3.bf16.msra.mxu1 %v453_v6 }
   0xd   :  { %432 = vmatmul.mubr.msk.bf16.vlgmr.msra.gmra.mxu0 %vm89_vm2, %v456_v8  ;;  %440 = vmatmul.mubr.msk.bf16.vlgmr.msra.gmra.mxu1 %vm89_vm2, %v457_v9 }
   0xe   :  { %435 = vmatprep.mubr.msk.bf16.mxu0 %vm89_vm2, %v458_v10  ;;  %443 = vmatprep.mubr.msk.bf16.mxu1 %vm89_vm2, %v459_v11 }
  0x15   :  { %436 = vmatmul.mubr.msk.bf16.gmra.mxu0 %vm89_vm2, %v460_v12  ;;  %444 = vmatmul.mubr.msk.bf16.gmra.mxu1 %vm89_vm2, %v461_v13 }
  0xcd   :  { %v433_v15 = vpop.f32.mrf.mxu0  ;;  %v441_v17 = vpop.f32.mrf.mxu1 }
  0xce   :  { %v227_v18 = vmul.f32 %v433_v15, %v529_v14  ;;  %v235_v19 = vmul.f32 %v441_v17, %v529_v14 }
  0xcf   :  { %v155_v20 = vpop.f32.mrf.mxu0  ;;  %v187_v21 = vpop.f32.mrf.mxu1 }
  0xd0   :  { %v250_v22 = vadd.f32 %v534_v16, %v227_v18  ;;  %v258_v23 = vadd.f32 %v534_v16, %v235_v19  ;;  %v225_v24 = vmul.f32 %v529_v14, %v155_v20  ;;  %v233_v25 = vmul.f32 %v529_v14, %v187_v21 }
  0xd1   :  { %v434_v26 = vpop.f32.mrf.mxu0  ;;  %v442_v27 = vpop.f32.mrf.mxu1 }
  0xd2   :  { %v266_v28 = vmax.f32 %v250_v22, 0.0  ;;  %v274_v29 = vmax.f32 %v258_v23, 0.0  ;;  %v248_v30 = vadd.f32 %v534_v16, %v225_v24  ;;  %v256_v31 = vadd.f32 %v534_v16, %v233_v25 }
  0xd3   :  { %v228_v32 = vmul.f32 %v434_v26, %v529_v14  ;;  %v236_v33 = vmul.f32 %v442_v27, %v529_v14  ;;  %v158_v34 = vpop.f32.mrf.mxu0  ;;  %v190_v35 = vpop.f32.mrf.mxu1 }
  0xd4   :  { %v403_v36 = vpack.c.bf16 %v266_v28, %v266_v28  ;;  %v411_v37 = vpack.c.bf16 %v274_v29, %v274_v29  ;;  %v264_v38 = vmax.f32 %v248_v30, 0.0  ;;  %v272_v39 = vmax.f32 %v256_v31, 0.0 }
  0xd5   :  { %v251_v40 = vadd.f32 %v534_v16, %v228_v32  ;;  %v259_v41 = vadd.f32 %v534_v16, %v236_v33  ;;  %v226_v42 = vmul.f32 %v529_v14, %v158_v34  ;;  %v234_v43 = vmul.f32 %v529_v14, %v190_v35  ;;  %v437_v44 = vpop.f32.mrf.mxu0  ;;  %v445_v45 = vpop.f32.mrf.mxu1 }
  0xd6   :  { %347 = vst.msk [vmem:[%s636_s4 + $0x8] sm:$0xf] %vm344_vm3, %v403_v36  ;;  %355 = vst.msk [vmem:[%s636_s4 + $0x28] sm:$0xf] %vm344_vm3, %v411_v37  ;;  %v401_v46 = vpack.c.bf16 %v264_v38, %v264_v38  ;;  %v409_v47 = vpack.c.bf16 %v272_v39, %v272_v39  ;;  %v231_v48 = vmul.f32 %v437_v44, %v529_v14 }
  0xd7   :  { %v239_v49 = vmul.f32 %v445_v45, %v529_v14  ;;  %v267_v50 = vmax.f32 %v251_v40, 0.0  ;;  %v275_v51 = vmax.f32 %v259_v41, 0.0  ;;  %v249_v52 = vadd.f32 %v534_v16, %v226_v42  ;;  %v171_v54 = vpop.f32.mrf.mxu0  ;;  %v203_v55 = vpop.f32.mrf.mxu1 }
  0xd8   :  { %v257_v53 = vadd.f32 %v534_v16, %v234_v43  ;;  %345 = vst.msk [vmem:[%s636_s4] sm:$0xf] %vm344_vm3, %v401_v46  ;;  %353 = vst.msk [vmem:[%s636_s4 + $0x20] sm:$0xf] %vm344_vm3, %v409_v47  ;;  %v254_v56 = vadd.f32 %v534_v16, %v231_v48  ;;  %v229_v58 = vmul.f32 %v529_v14, %v171_v54 }
  0xd9   :  { %v262_v57 = vadd.f32 %v534_v16, %v239_v49  ;;  %v237_v59 = vmul.f32 %v529_v14, %v203_v55  ;;  %v404_v60 = vpack.c.bf16 %v267_v50, %v267_v50  ;;  %v412_v61 = vpack.c.bf16 %v275_v51, %v275_v51  ;;  %v438_v0 = vpop.f32.mrf.mxu0  ;;  %v446_v1 = vpop.f32.mrf.mxu1 }
  0xda   :  { %v265_v62 = vmax.f32 %v249_v52, 0.0  ;;  %v273_v63 = vmax.f32 %v257_v53, 0.0  ;;  %v270_v2 = vmax.f32 %v254_v56, 0.0  ;;  %v252_v4 = vadd.f32 %v534_v16, %v229_v58 }
  0xdb   :  { %v278_v3 = vmax.f32 %v262_v57, 0.0  ;;  %v260_v5 = vadd.f32 %v534_v16, %v237_v59  ;;  %348 = vst.msk [vmem:[%s636_s4 + $0xc] sm:$0xf] %vm344_vm3, %v404_v60  ;;  %356 = vst.msk [vmem:[%s636_s4 + $0x2c] sm:$0xf] %vm344_vm3, %v412_v61  ;;  %v232_v8 = vmul.f32 %v438_v0, %v529_v14  ;;  %v240_v9 = vmul.f32 %v446_v1, %v529_v14  ;;  %v174_v10 = vpop.f32.mrf.mxu0  ;;  %v206_v11 = vpop.f32.mrf.mxu1 }
  0xdc   :  { %v402_v6 = vpack.c.bf16 %v265_v62, %v265_v62  ;;  %v410_v7 = vpack.c.bf16 %v273_v63, %v273_v63  ;;  %v407_v12 = vpack.c.bf16 %v270_v2, %v270_v2  ;;  %v268_v15 = vmax.f32 %v252_v4, 0.0 }
  0xdd   :  { %v415_v13 = vpack.c.bf16 %v278_v3, %v278_v3  ;;  %v276_v17 = vmax.f32 %v260_v5, 0.0  ;;  %v255_v18 = vadd.f32 %v534_v16, %v232_v8  ;;  %v263_v19 = vadd.f32 %v534_v16, %v240_v9 }
  0xde   :  { %346 = vst.msk [vmem:[%s636_s4 + $0x4] sm:$0xf] %vm344_vm3, %v402_v6  ;;  %354 = vst.msk [vmem:[%s636_s4 + $0x24] sm:$0xf] %vm344_vm3, %v410_v7  ;;  %v230_v20 = vmul.f32 %v529_v14, %v174_v10  ;;  %v238_v21 = vmul.f32 %v529_v14, %v206_v11  ;;  %v405_v22 = vpack.c.bf16 %v268_v15, %v268_v15 }
  0xdf   :  { %351 = vst.msk [vmem:[%s636_s4 + $0x18] sm:$0xf] %vm344_vm3, %v407_v12  ;;  %359 = vst.msk [vmem:[%s636_s4 + $0x38] sm:$0xf] %vm344_vm3, %v415_v13  ;;  %v413_v23 = vpack.c.bf16 %v276_v17, %v276_v17  ;;  %v271_v24 = vmax.f32 %v255_v18, 0.0  ;;  %v279_v25 = vmax.f32 %v263_v19, 0.0 }
  0xe0   :  { %v253_v26 = vadd.f32 %v534_v16, %v230_v20  ;;  %v261_v27 = vadd.f32 %v534_v16, %v238_v21  ;;  %349 = vst.msk [vmem:[%s636_s4 + $0x10] sm:$0xf] %vm344_vm3, %v405_v22 }
  0xe1   :  { %357 = vst.msk [vmem:[%s636_s4 + $0x30] sm:$0xf] %vm344_vm3, %v413_v23  ;;  %v408_v14 = vpack.c.bf16 %v271_v24, %v271_v24  ;;  %v416_v28 = vpack.c.bf16 %v279_v25, %v279_v25 }
  0xe2   :  { %v269_v29 = vmax.f32 %v253_v26, 0.0  ;;  %v277_v30 = vmax.f32 %v261_v27, 0.0 }
  0xe3   :  { %352 = vst.msk [vmem:[%s636_s4 + $0x1c] sm:$0xf] %vm344_vm3, %v408_v14  ;;  %360 = vst.msk [vmem:[%s636_s4 + $0x3c] sm:$0xf] %vm344_vm3, %v416_v28 }
  0xe4   :  { %v406_v16 = vpack.c.bf16 %v269_v29, %v269_v29  ;;  %v414_v31 = vpack.c.bf16 %v277_v30, %v277_v30 }
  0xe6   :  { %350 = vst.msk [vmem:[%s636_s4 + $0x14] sm:$0xf] %vm344_vm3, %v406_v16  ;;  %358 = vst.msk [vmem:[%s636_s4 + $0x34] sm:$0xf] %vm344_vm3, %v414_v31 }

// kernel: _lambda_.17
= control target key start
LH: loop header
LB: loop body
LE: loop exit
PB: predicated region body
PF: predicated region fallthrough
CT: control target
= control target key end

     0   :  { %s1253_s30 = smov 0   ;;  %s1800_s0 = inlined_call_operand.vmem [shape: bf16[2,64,16], index: 0, kind: input, shape index: {}]   ;;  %s1801_s1 = inlined_call_operand.vmem [shape: s32[64,1], index: 1, kind: input, shape index: {}]   ;;  %s1802_s2 = inlined_call_operand.vmem [shape: bf16[16,16], index: 2, kind: input, shape index: {}]   ;;  %s1803_s3 = inlined_call_operand.vmem [shape: f32[1,16], index: 3, kind: input, shape index: {}]   ;;  %s1804_s4 = inlined_call_operand.vmem [shape: f32[1,16], index: 4, kind: input, shape index: {}]   ;;  %s1805_s5 = inlined_call_operand.vmem [shape: f32[9,16], index: 5, kind: input, shape index: {}]   ;;  %s1806_s6 = inlined_call_operand.vmem [shape: f32[1,16], index: 6, kind: input, shape index: {}]   ;;  %s1807_s7 = inlined_call_operand.vmem [shape: f32[1,16], index: 7, kind: input, shape index: {}]   ;;  %s1808_s8 = inlined_call_operand.vmem [shape: bf16[2,64,16], index: 8, kind: input, shape index: {}]   ;;  %s1809_s9 = inlined_call_operand.vmem [shape: bf16[2,64,16], index: 9, kind: output, shape index: {}]  }
   0x1 LB: > { %s1086_s10 = sadd.s32 4294967295, %s1199_s30   ;;  %p1090_p0 = scmp.ge.s32.totalorder %s1199_s30, 1  ;;  %s1199_s30 = sphi %s1253_s30, %s19_s30  }
   0x2   : > { %p297_p1 = scmp.lt.s32.totalorder %s1199_s30, 3 }
   0x4   : > { %p298_p2 = pnand %p1090_p0, %p297_p1 }
   0x6   : > { %301 = sbr.rel (%p298_p2) target bundleno = 288 (0x120), region = 56 }
   0xb   : > { %v1188_v0 = vld [vmem:[%s1802_s2] sm:$0xff]   ;;  %p338_p3 = scmp.lt.s32.totalorder %s1086_s10, 1  ;;  %vm390_vm0 = vcmask 130048   ;;  %v1267_v1 = vld [vmem:[%s1801_s1 + $0x10] sm:$0xff]  ;;  %v1275_v3 = vld [vmem:[%s1801_s1 + $0x18] sm:$0xff]  ;;  %v1201_v5 = vmov 0.0   ;;  %v933_v46 = vlaneseq }
   0xc   : > { %v511_v2 = vld [vmem:[%s1801_s1] sm:$0xff]  ;;  %1164 = vmatprep.subr.bf16.mxu0 %v1188_v0  ;;  %1174 = vmatprep.subr.bf16.mxu1 %v1188_v0  ;;  %vm529_vm1 = vcmp.gt.s32.totalorder %v1267_v1, 0  ;;  %vm530_vm3 = vcmp.gt.s32.totalorder %v1275_v3, 0  ;;  %v512_v4 = vld [vmem:[%s1801_s1 + $0x8] sm:$0xff]  ;;  %498 = vst.msk [vmem:[#allocation2] sm:$0xff] %vm390_vm0, %v1201_v5  ;;  %501 = vst.msk [vmem:[#allocation2 + $0x49] sm:$0xff] %vm390_vm0, %v1201_v5 }
   0xd   : > { %s1848_s10 = smov (!%p338_p3, %s1086_s10), 1  ;;  %vm527_vm2 = vcmp.gt.s32.totalorder %v511_v2, 0  ;;  %1165 = vmatpush3.bf16.msra.mxu0 %v1188_v0  ;;  %1175 = vmatpush3.bf16.msra.mxu1 %v1188_v0  ;;  %v1202_v6 = vmov 0   ;;  %vm528_vm4 = vcmp.gt.s32.totalorder %v512_v4, 0  ;;  %v516_v9 = vld [vmem:[%s1801_s1 + $0x28] sm:$0xff]  ;;  %v515_v11 = vld [vmem:[%s1801_s1 + $0x20] sm:$0xff] }
   0xe   : > { %v537_v7 = vsel %vm529_vm1, 1, %v1202_v6  ;;  %v535_v8 = vsel %vm527_vm2, 1, %v1202_v6  ;;  %s1284_s21 = sshll.u32 %s1848_s10, 5  ;;  %1187 = vset.pattern.permute.xlu1 %v1202_v6  ;;  %1186 = vset.pattern.permute.xlu0 %v1202_v6  ;;  %v538_v10 = vsel %vm530_vm3, 1, %v1202_v6  ;;  %v536_v13 = vsel %vm528_vm4, 1, %v1202_v6  ;;  %v518_v14 = vld [vmem:[%s1801_s1 + $0x38] sm:$0xff] }
   0xf   : > { %s342_s26 = scalar_lea.vmem %s1800_s0, %s1284_s21  ;;  %550 = vperm.xlu1 %1187, %v537_v7   ;;  %544 = vperm.xlu0 %1186, %v535_v8   ;;  %vm532_vm5 = vcmp.gt.s32.totalorder %v516_v9, 0  ;;  %v517_v16 = vld [vmem:[%s1801_s1 + $0x30] sm:$0xff]  ;;  %vm531_vm6 = vcmp.gt.s32.totalorder %v515_v11, 0  ;;  %vm534_vm7 = vcmp.gt.s32.totalorder %v518_v14, 0  ;;  %vm499_vm9 = vcmask 122880   ;;  %s1348_s22 = scalar_lea.vmem %s1808_s8, %s1284_s21 }
  0x10   : > { %v1189_v12 = vld [vmem:[%s342_s26] sm:$0xff]   ;;  %v1190_v15 = vld [vmem:[%s342_s26 + $0x10] sm:$0xff]   ;;  %v1191_v17 = vld [vmem:[%s342_s26 + $0x8] sm:$0xff]   ;;  %v540_v19 = vsel %vm532_vm5, 1, %v1202_v6  ;;  %v539_v20 = vsel %vm531_vm6, 1, %v1202_v6  ;;  %vm533_vm8 = vcmp.gt.s32.totalorder %v517_v16, 0  ;;  %s1678_s27 = scalar_lea.vmem %s1809_s9, %s1284_s21 }
  0x11   : > { %1166 = vmatprep.mubr.msk.bf16.mxu0 %vm390_vm0, %v1189_v12  ;;  %1170 = vmatprep.mubr.msk.bf16.mxu1 %vm390_vm0, %v1190_v15  ;;  %v1192_v18 = vld [vmem:[%s342_s26 + $0x18] sm:$0xff]   ;;  %500 = vst.msk [vmem:[#allocation2 + $0x8] sm:$0x1] %vm499_vm9, %v1201_v5  ;;  %502 = vst.msk [vmem:[#allocation2 + $0x51] sm:$0x1] %vm499_vm9, %v1201_v5  ;;  %v542_v21 = vsel %vm534_vm7, 1, %v1202_v6 }
  0x12   : > { %1167 = vmatmul.mubr.msk.bf16.vlgmr.msra.gmra.mxu0 %vm390_vm0, %v1191_v17  ;;  %1171 = vmatmul.mubr.msk.bf16.vlgmr.msra.gmra.mxu1 %vm390_vm0, %v1192_v18  ;;  %v541_v22 = vsel %vm533_vm8, 1, %v1202_v6  ;;  %vm642_vm10 = vcmp.lt.s32.totalorder %v512_v4, 7  ;;  %vm641_vm11 = vcmp.lt.s32.totalorder %v511_v2, 7  ;;  %vm644_vm12 = vcmp.lt.s32.totalorder %v1275_v3, 7  ;;  %v1106_v41 = vld [vmem:[%s1803_s3] ss:$0 sm:$0xff] }
  0x13   : > { %553 = vperm.xlu1 %1187, %v538_v10   ;;  %547 = vperm.xlu0 %1186, %v536_v13   ;;  %v650_v23 = vsel %vm642_vm10, 1, %v1202_v6  ;;  %v649_v24 = vsel %vm641_vm11, 1, %v1202_v6  ;;  %vm643_vm13 = vcmp.lt.s32.totalorder %v1267_v1, 7  ;;  %v652_v25 = vsel %vm644_vm12, 1, %v1202_v6  ;;  %v519_v43 = vld [vmem:[#allocation2] sm:$0xff]  ;;  %v1377_v10 = vld [vmem:[%s1348_s22 + $0x8] sm:$0xff]  }
  0x14   : > { %v651_v26 = vsel %vm643_vm13, 1, %v1202_v6  ;;  %vm646_vm14 = vcmp.lt.s32.totalorder %v516_v9, 7  ;;  %vm645_vm15 = vcmp.lt.s32.totalorder %v515_v11, 7  ;;  %vm648_vm1 = vcmp.lt.s32.totalorder %v518_v14, 7  ;;  %v1107_v45 = vld [vmem:[%s1804_s4] ss:$0 sm:$0xff] }
  0x15   : > { %v654_v27 = vsel %vm646_vm14, 1, %v1202_v6  ;;  %v653_v28 = vsel %vm645_vm15, 1, %v1202_v6  ;;  %vm647_vm2 = vcmp.lt.s32.totalorder %v517_v16, 7  ;;  %v656_v29 = vsel %vm648_vm1, 1, %v1202_v6  ;;  %v1342_v49 = vld [vmem:[%s1805_s5 + $0x1] ss:$0 sm:$0xff] }
  0x16   : > { %v655_v30 = vsel %vm647_vm2, 1, %v1202_v6  ;;  %v1353_v53 = vld [vmem:[%s1805_s5] ss:$0 sm:$0xff]  ;;  %v1359_v59 = vand.u32 127, %v933_v46  ;;  %1824 = vst [vmem:[#allocation7_spill] sm:$0xff] %v1377_v10  ;;  %v851_v14 = vld [vmem:[#allocation2 + $0x49] sm:$0xff] }
  0x17   : > { %559 = vperm.xlu1 %1187, %v540_v19   ;;  %556 = vperm.xlu0 %1186, %v539_v20   ;;  %v1368_v4 = vld [vmem:[%s1348_s22] sm:$0xff]   ;;  %v1391_v18 = vld [vmem:[%s1805_s5 + $0x8] ss:$0 sm:$0xff] }
  0x18   : > { %v604_v50 = vld [vmem:[#allocation2 + $0x1] sm:$0xff]  ;;  %1821 = vst [vmem:[#allocation4_spill] sm:$0xff] %v1359_v59  ;;  %v873_v6 = vld [vmem:[#allocation2 + $0x4a] sm:$0xff]  ;;  %vm935_vm5 = vcmp.lt.s32.totalorder %v1359_v59, 8 }
  0x19   : > { %v617_v63 = vmul.f32 %v1342_v49, %v604_v50  ;;  %v1449_v46 = vld [vmem:[%s1805_s5 + $0x3] ss:$0 sm:$0xff] }
  0x1b   : > { %565 = vperm.xlu1 %1187, %v542_v21   ;;  %562 = vperm.xlu0 %1186, %v541_v22   ;;  %v1400_v21 = vld [vmem:[%s1805_s5 + $0x7] ss:$0 sm:$0xff] }
  0x1f   : > { %661 = vperm.xlu1 %1187, %v650_v23   ;;  %658 = vperm.xlu0 %1186, %v649_v24  }
  0x23   : > { %667 = vperm.xlu1 %1187, %v652_v25   ;;  %664 = vperm.xlu0 %1186, %v651_v26   ;;  %v1411_v25 = vld [vmem:[%s1805_s5 + $0x4] ss:$0 sm:$0xff] }
  0x27   : > { %673 = vperm.xlu1 %1187, %v654_v27   ;;  %670 = vperm.xlu0 %1186, %v653_v28   ;;  %v1416_v27 = vmul.f32 %v1400_v21, %v851_v14 }
  0x29   : > { %1828 = vst [vmem:[#allocation11_spill] sm:$0xff] %v1416_v27 }
  0x2b   : > { %679 = vperm.xlu1 %1187, %v656_v29   ;;  %676 = vperm.xlu0 %1186, %v655_v30  }
  0x8a   : > { %v1310_v31 = vpop.permute.xlu1 %550  ;;  %v1318_v35 = vpop.permute.xlu0 %544 }
  0x8b   : > { %vm567_vm3 = vcmp.eq.s32.totalorder %v1318_v35, 1  ;;  %vm569_vm6 = vcmp.eq.s32.totalorder %v1310_v31, 1 }
  0x8c   : > { %v575_v54 = vsel %vm567_vm3, %v519_v43, 0.0  ;;  %v1437_v43 = vld [vmem:[%s1805_s5 + $0x2] ss:$0 sm:$0xff] }
  0x8d   : > { %v588_v5 = vmul.f32 %v1353_v53, %v575_v54 }
  0x8e   : > { %v1312_v32 = vpop.permute.xlu1 %553  ;;  %v1322_v37 = vpop.permute.xlu0 %547 }
  0x8f   : > { %v625_v24 = vadd.f32 %v617_v63, %v588_v5  ;;  %vm570_vm7 = vcmp.eq.s32.totalorder %v1312_v32, 1  ;;  %vm568_vm8 = vcmp.eq.s32.totalorder %v1322_v37, 1 }
  0x92   : > { %v1314_v33 = vpop.permute.xlu1 %559  ;;  %v1326_v39 = vpop.permute.xlu0 %556 }
  0x93   : > { %vm571_vm9 = vcmp.eq.s32.totalorder %v1326_v39, 1 }
  0x96   : > { %v1316_v34 = vpop.permute.xlu1 %565  ;;  %v1333_v42 = vpop.permute.xlu0 %562 }
  0x97   : > { %vm573_vm14 = vcmp.eq.s32.totalorder %v1333_v42, 1  ;;  %vm574_vm15 = vcmp.eq.s32.totalorder %v1316_v34, 1 }
  0x9a   : > { %v1320_v36 = vpop.permute.xlu1 %661  ;;  %v1364_v0 = vpop.permute.xlu0 %658 }
  0x9b   : > { %vm682_vm10 = vcmp.eq.s32.totalorder %v1320_v36, 1  ;;  %vm681_vm11 = vcmp.eq.s32.totalorder %v1364_v0, 1  ;;  %v1604_v36 = vld [vmem:[%s1806_s6] ss:$0 sm:$0xff] }
  0x9e   : > { %v1324_v38 = vpop.permute.xlu1 %667  ;;  %v1422_v28 = vpop.permute.xlu0 %664 }
  0x9f   : > { %1820 = vst [vmem:[#allocation3_spill] sm:$0xff] %v1324_v38  ;;  %vm684_vm12 = vcmp.eq.s32.totalorder %v1324_v38, 1  ;;  %vm683_vm13 = vcmp.eq.s32.totalorder %v1422_v28, 1 }
  0xa2   : > { %v1328_v40 = vpop.permute.xlu1 %673 }
  0xa3   : > { %vm686_vm2 = vcmp.eq.s32.totalorder %v1328_v40, 1 }
  0xa6   : > { %v1357_v55 = vpop.permute.xlu1 %679 }
  0xa7   : > { %vm688_vm4 = vcmp.eq.s32.totalorder %v1357_v55, 1 }
  0xa8   : > { %v881_v19 = vsel %vm688_vm4, %v873_v6, 0.0 }
  0xa9   : > { %v1428_v29 = vmul.f32 %v1391_v18, %v881_v19 }
  0xab   : > { %1829 = vst [vmem:[#allocation12_spill] sm:$0xff] %v1428_v29 }
  0xd2   : > { %v1168_v44 = vpop.f32.mrf.mxu0  ;;  %v1172_v48 = vpop.f32.mrf.mxu1 }
  0xd3   : > { %v477_v47 = vmul.f32 %v1168_v44, %v1106_v41  ;;  %v481_v51 = vmul.f32 %v1172_v48, %v1106_v41 }
  0xd4   : > { %v437_v52 = vpop.f32.mrf.mxu0  ;;  %v453_v58 = vpop.f32.mrf.mxu1 }
  0xd5   : > { %v492_v56 = vadd.f32 %v1107_v45, %v477_v47  ;;  %v475_v57 = vmul.f32 %v1106_v41, %v437_v52  ;;  %v1361_v60 = vadd.f32 %v1107_v45, %v481_v51  ;;  %v479_v61 = vmul.f32 %v1106_v41, %v453_v58 }
  0xd6   : > { %v1169_v62 = vpop.f32.mrf.mxu0  ;;  %v1173_v3 = vpop.f32.mrf.mxu1 }
  0xd7   : > { %1822 = vst [vmem:[#allocation5_spill] sm:$0xff] %v1361_v60  ;;  %505 = vst.msk [vmem:[#allocation2 + $0x19] sm:$0xff] %vm390_vm0, %v492_v56  ;;  %v490_v1 = vadd.f32 %v1107_v45, %v475_v57  ;;  %v478_v2 = vmul.f32 %v1169_v62, %v1106_v41  ;;  %v1374_v7 = vadd.f32 %v1107_v45, %v479_v61  ;;  %v1432_v30 = vsel %vm935_vm5, %v492_v56, 0.0 }
  0xd8   : > { %509 = vst.msk [vmem:[#allocation2 + $0x39] sm:$0xff] %vm390_vm0, %v1361_v60  ;;  %v482_v8 = vmul.f32 %v1173_v3, %v1106_v41  ;;  %v440_v9 = vpop.f32.mrf.mxu0  ;;  %v456_v13 = vpop.f32.mrf.mxu1 }
  0xd9   : > { %1823 = vst [vmem:[#allocation6_spill] sm:$0xff] %v1374_v7  ;;  %503 = vst.msk [vmem:[#allocation2 + $0x9] sm:$0xff] %vm390_vm0, %v490_v1  ;;  %v1380_v11 = vadd.f32 %v1107_v45, %v478_v2  ;;  %v476_v12 = vmul.f32 %v1106_v41, %v440_v9  ;;  %v480_v17 = vmul.f32 %v1106_v41, %v456_v13  ;;  %v1443_v44 = vsel %vm935_vm5, %v490_v1, 0.0  ;;  %v1527_v60 = vpop.permute.xlu0 %670 }
  0xda   : > { %507 = vst.msk [vmem:[#allocation2 + $0x29] sm:$0xff] %vm390_vm0, %v1374_v7  ;;  %v1385_v15 = vadd.f32 %v1107_v45, %v482_v8  ;;  %vm685_vm1 = vcmp.eq.s32.totalorder %v1527_v60, 1 }
  0xdb   : > { %1825 = vst [vmem:[#allocation8_spill] sm:$0xff] %v1380_v11  ;;  %506 = vst.msk [vmem:[#allocation2 + $0x21] sm:$0xff] %vm390_vm0, %v1380_v11  ;;  %v491_v20 = vadd.f32 %v1107_v45, %v476_v12  ;;  %v1413_v26 = vadd.f32 %v1107_v45, %v480_v17 }
  0xdc   : > { %1826 = vst [vmem:[#allocation9_spill] sm:$0xff] %v1385_v15  ;;  %510 = vst.msk [vmem:[#allocation2 + $0x41] sm:$0xff] %vm390_vm0, %v1385_v15 }
  0xdd   : > { %1827 = vst [vmem:[#allocation10_spill] sm:$0xff] %v1413_v26  ;;  %504 = vst.msk [vmem:[#allocation2 + $0x11] sm:$0xff] %vm390_vm0, %v491_v20  ;;  %v1456_v48 = vsel %vm935_vm5, %v491_v20, 0.0 }
  0xde   : > { %v607_v41 = vld [vmem:[#allocation2 + $0x19] sm:$0xff]  ;;  %508 = vst.msk [vmem:[#allocation2 + $0x31] sm:$0xff] %vm390_vm0, %v1413_v26  ;;  %vm572_vm0 = vcmp.eq.s32.totalorder %v1314_v33, 1 }
  0xdf   : > { %v620_v45 = vmul.f32 %v1342_v49, %v607_v41  ;;  %v1452_v47 = vmul.f32 %v1411_v25, %v607_v41  ;;  %v611_v50 = vld [vmem:[#allocation2 + $0x39] sm:$0xff]  ;;  %v1459_v56 = vmul.f32 %v1400_v21, %v607_v41 }
  0xe0   : > { %v633_v51 = vld [vmem:[#allocation2 + $0x2] sm:$0xff]  ;;  %v1462_v57 = vmul.f32 %v1342_v49, %v611_v50  ;;  %v1465_v58 = vmul.f32 %v1411_v25, %v611_v50  ;;  %v1468_v61 = vmul.f32 %v1400_v21, %v611_v50 }
  0xe1   : > { %v520_v52 = vld [vmem:[#allocation2 + $0x8] sm:$0xff]  ;;  %v689_v1 = vsel %vm681_vm11, %v633_v51, 0.0 }
  0xe2   : > { %v605_v54 = vld [vmem:[#allocation2 + $0x9] sm:$0xff]  ;;  %1830 = vst [vmem:[#allocation13_spill] sm:$0xff] %v1465_v58  ;;  %1831 = vst [vmem:[#allocation14_spill] sm:$0xff] %v1468_v61  ;;  %v576_v62 = vsel %vm568_vm8, %v520_v52, 0.0  ;;  %v726_v2 = vsel %vm567_vm3, %v520_v52, 0.0  ;;  %v1477_v3 = vld [vmem:[#allocation2 + $0x20] sm:$0xff]  ;;  %v702_v9 = vmul.f32 %v1437_v43, %v689_v1 }
  0xe3   : > { %v618_v63 = vmul.f32 %v1342_v49, %v605_v54  ;;  %v1479_v5 = vld [vmem:[#allocation2 + $0x21] sm:$0xff]  ;;  %v589_v8 = vmul.f32 %v1353_v53, %v576_v62  ;;  %v739_v12 = vmul.f32 %v1449_v46, %v726_v2  ;;  %v768_v13 = vmul.f32 %v1411_v25, %v605_v54 }
  0xe4   : > { %v1481_v6 = vld [vmem:[#allocation2 + $0x22] sm:$0xff]  ;;  %v1490_v14 = vsel %vm571_vm9, %v1477_v3, 0.0  ;;  %v1492_v17 = vld [vmem:[#allocation2 + $0x1a] sm:$0xff]  ;;  %v729_v19 = vsel %vm570_vm7, %v1477_v3, 0.0  ;;  %v771_v20 = vmul.f32 %v1411_v25, %v1479_v5  ;;  %v521_v50 = vld [vmem:[#allocation2 + $0x10] sm:$0xff]  ;;  %v710_v1 = vadd.f32 %v702_v9, %v625_v24 }
  0xe5   : > { %v795_v41 = vsel %vm684_vm12, %v1481_v6, 0.0  ;;  %v522_v51 = vld [vmem:[#allocation2 + $0x18] sm:$0xff]  ;;  %v626_v54 = vadd.f32 %v618_v63, %v589_v8  ;;  %v692_v62 = vsel %vm684_vm12, %v1492_v17, 0.0  ;;  %v742_v2 = vmul.f32 %v1449_v46, %v729_v19  ;;  %v634_v26 = vld [vmem:[#allocation2 + $0xa] sm:$0xff]  ;;  %v1538_v58 = vld [vmem:[%s1805_s5 + $0x5] ss:$0 sm:$0xff] }
  0xe6   : > { %v1502_v52 = vld [vmem:[#allocation2 + $0x11] sm:$0xff]  ;;  %v577_v23 = vsel %vm569_vm6, %v521_v50, 0.0  ;;  %v578_v22 = vsel %vm570_vm7, %v522_v51, 0.0  ;;  %v705_v63 = vmul.f32 %v1437_v43, %v692_v62  ;;  %v690_v24 = vsel %vm682_vm10, %v634_v26, 0.0 }
  0xe7   : > { %v619_v16 = vmul.f32 %v1342_v49, %v1502_v52  ;;  %v635_v15 = vld [vmem:[#allocation2 + $0x12] sm:$0xff]  ;;  %v590_v8 = vmul.f32 %v1353_v53, %v577_v23  ;;  %v591_v11 = vmul.f32 %v1353_v53, %v578_v22  ;;  %v703_v19 = vmul.f32 %v1437_v43, %v690_v24 }
  0xe8   : > { %v691_v9 = vsel %vm683_vm13, %v635_v15, 0.0  ;;  %v727_v59 = vsel %vm568_vm8, %v521_v50, 0.0  ;;  %v728_v62 = vsel %vm569_vm6, %v522_v51, 0.0  ;;  %v747_v38 = vadd.f32 %v739_v12, %v710_v1 }
  0xe9   : > { %v704_v7 = vmul.f32 %v1437_v43, %v691_v9  ;;  %v627_v23 = vadd.f32 %v619_v16, %v590_v8  ;;  %v628_v22 = vadd.f32 %v620_v45, %v591_v11  ;;  %v740_v29 = vmul.f32 %v1449_v46, %v727_v59  ;;  %v1547_v45 = vld [vmem:[#allocation2 + $0x28] sm:$0xff] }
  0xea   : > { %v741_v27 = vmul.f32 %v1449_v46, %v728_v62  ;;  %v711_v61 = vadd.f32 %v703_v19, %v626_v54  ;;  %v769_v24 = vmul.f32 %v1411_v25, %v1502_v52  ;;  %v792_v9 = vsel %vm681_vm11, %v634_v26, 0.0  ;;  %v1557_v62 = vld [vmem:[%s1805_s5 + $0x6] ss:$0 sm:$0xff] }
  0xeb   : > { %v712_v10 = vadd.f32 %v704_v7, %v627_v23  ;;  %v713_v16 = vadd.f32 %v705_v63, %v628_v22  ;;  %v793_v59 = vsel %vm682_vm10, %v635_v15, 0.0  ;;  %v794_v11 = vsel %vm683_vm13, %v1492_v17, 0.0 }
  0xec   : > { %v748_v26 = vadd.f32 %v740_v29, %v711_v61  ;;  %v776_v12 = vadd.f32 %v768_v13, %v747_v38  ;;  %v805_v54 = vmul.f32 %v1538_v58, %v792_v9  ;;  %v806_v7 = vmul.f32 %v1538_v58, %v793_v59  ;;  %v1563_v13 = vpop.permute.xlu0 %676 }
  0xed   : > { %v749_v1 = vadd.f32 %v741_v27, %v712_v10  ;;  %v750_v63 = vadd.f32 %v742_v2, %v713_v16  ;;  %v807_v8 = vmul.f32 %v1538_v58, %v794_v11  ;;  %v808_v19 = vmul.f32 %v1538_v58, %v795_v41  ;;  %v1585_v16 = vld [vmem:[#allocation2 + $0x30] sm:$0xff] }
  0xee   : > { %v777_v23 = vadd.f32 %v769_v24, %v748_v26  ;;  %v813_v29 = vadd.f32 %v805_v54, %v776_v12  ;;  %v822_v38 = vsel %vm567_vm3, %v521_v50, 0.0  ;;  %v823_v61 = vsel %vm568_vm8, %v522_v51, 0.0  ;;  %v1595_v12 = vld [vmem:[#allocation2 + $0x38] sm:$0xff] }
  0xef   : > { %v778_v10 = vadd.f32 %v1452_v47, %v749_v1  ;;  %v779_v27 = vadd.f32 %v771_v20, %v750_v63  ;;  %v824_v41 = vsel %vm569_vm6, %v1477_v3, 0.0  ;;  %v825_v2 = vsel %vm570_vm7, %v1547_v45, 0.0 }
  0xf0   : > { %v814_v35 = vadd.f32 %v806_v7, %v777_v23  ;;  %v835_v50 = vmul.f32 %v1557_v62, %v822_v38  ;;  %v836_v37 = vmul.f32 %v1557_v62, %v823_v61  ;;  %v837_v51 = vmul.f32 %v1557_v62, %v824_v41  ;;  %v1619_v38 = vld [vmem:[#allocation2 + $0x31] sm:$0xff] }
  0xf1   : > { %v815_v22 = vadd.f32 %v807_v8, %v778_v10  ;;  %v816_v47 = vadd.f32 %v808_v19, %v779_v27  ;;  %v838_v20 = vmul.f32 %v1557_v62, %v825_v2  ;;  %v857_v31 = vmul.f32 %v1400_v21, %v1502_v52  ;;  %v1624_v10 = vld [vmem:[%s1807_s7] ss:$0 sm:$0xff] }
  0xf2   : > { %vm687_vm3 = vcmp.eq.s32.totalorder %v1563_v13, 1  ;;  %v843_v32 = vadd.f32 %v835_v50, %v813_v29  ;;  %v844_v3 = vadd.f32 %v836_v37, %v814_v35  ;;  %v859_v24 = vmul.f32 %v1400_v21, %v1479_v5 }
  0xf3   : > { %v874_v9 = vsel %vm681_vm11, %v635_v15, 0.0  ;;  %v845_v59 = vadd.f32 %v837_v51, %v815_v22  ;;  %v1587_v11 = vadd.f32 %v838_v20, %v816_v47  ;;  %v875_v52 = vsel %vm682_vm10, %v1492_v17, 0.0  ;;  %v1612_v17 = vld [vmem:[#allocation2 + $0x29] sm:$0xff]  ;;  %v1637_v22 = vld [vmem:[#allocation2 + $0x32] sm:$0xff] }
  0xf4   : > { %v876_v26 = vsel %vm683_vm13, %v1481_v6, 0.0  ;;  %v865_v54 = vadd.f32 %v857_v31, %v843_v32  ;;  %v866_v7 = vadd.f32 %v1459_v56, %v844_v3  ;;  %v887_v0 = vmul.f32 %v1391_v18, %v874_v9  ;;  %v1635_v51 = vld [vmem:[#allocation2 + $0x2a] sm:$0xff]  ;;  %v1643_v31 = vld [vmem:[#allocation2 + $0x3a] sm:$0xff] }
  0xf5   : > { %v888_v15 = vmul.f32 %v1391_v18, %v875_v52  ;;  %v867_v1 = vadd.f32 %v859_v24, %v845_v59  ;;  %v889_v63 = vmul.f32 %v1391_v18, %v876_v26  ;;  %v580_v28 = vsel %vm572_vm0, %v1547_v45, 0.0 }
  0xf6   : > { %v581_v56 = vsel %vm573_vm14, %v1585_v16, 0.0  ;;  %v895_v8 = vadd.f32 %v887_v0, %v865_v54  ;;  %v582_v23 = vsel %vm574_vm15, %v1595_v12, 0.0  ;;  %v592_v29 = vmul.f32 %v1353_v53, %v1490_v14 }
  0xf7   : > { %v896_v19 = vadd.f32 %v888_v15, %v866_v7  ;;  %v897_v61 = vadd.f32 %v889_v63, %v867_v1  ;;  %vm1010_vm6 = vcmask 125952   ;;  %v593_v27 = vmul.f32 %v1353_v53, %v580_v28 }
  0xf8   : > { %v594_v41 = vmul.f32 %v1353_v53, %v581_v56  ;;  %v595_v2 = vmul.f32 %v1353_v53, %v582_v23  ;;  %v910_v35 = vmul.f32 %v1604_v36, %v895_v8  ;;  %v621_v14 = vmul.f32 %v1342_v49, %v1479_v5 }
  0xf9   : > { %v911_v50 = vmul.f32 %v1604_v36, %v896_v19  ;;  %v622_v37 = vmul.f32 %v1342_v49, %v1612_v17  ;;  %v912_v47 = vmul.f32 %v1604_v36, %v897_v61  ;;  %v623_v20 = vmul.f32 %v1342_v49, %v1619_v38  ;;  %v725_v19 = vld [vmem:[#allocation2 + $0x40] sm:$0xff] }
  0xfa   : > { %v632_v53 = vadd.f32 %v1462_v57, %v595_v2  ;;  %v693_v5 = vsel %vm685_vm1, %v1481_v6, 0.0  ;;  %v925_v32 = vadd.f32 %v1624_v10, %v910_v35  ;;  %v629_v24 = vadd.f32 %v621_v14, %v592_v29 }
  0xfb   : > { %v926_v3 = vadd.f32 %v1624_v10, %v911_v50  ;;  %v630_v9 = vadd.f32 %v622_v37, %v593_v27  ;;  %v927_v59 = vadd.f32 %v1624_v10, %v912_v47  ;;  %v631_v52 = vadd.f32 %v623_v20, %v594_v41  ;;  %v762_v50 = vld [vmem:[#allocation2 + $0x41] sm:$0xff] }
  0xfc   : > { %v694_v49 = vsel %vm686_vm2, %v1635_v51, 0.0  ;;  %v695_v57 = vsel %vm687_vm3, %v1637_v22, 0.0  ;;  %v946_v6 = vadd.f32 %v1443_v44, %v925_v32  ;;  %v696_v54 = vsel %vm688_vm4, %v1643_v31, 0.0 }
  0xfd   : > { %v947_v26 = vadd.f32 %v1456_v48, %v926_v3  ;;  %v706_v7 = vmul.f32 %v1437_v43, %v693_v5  ;;  %v948_v0 = vadd.f32 %v1432_v30, %v927_v59  ;;  %v707_v15 = vmul.f32 %v1437_v43, %v694_v49  ;;  %v1834_v30 = vld [vmem:[#allocation7_spill] sm:$0xff] }
  0xfe   : > { %v708_v1 = vmul.f32 %v1437_v43, %v695_v57  ;;  %v709_v63 = vmul.f32 %v1437_v43, %v696_v54  ;;  %v1832_v28 = vunpack.c.l.bf16 %v1368_v4  ;;  %v1833_v44 = vunpack.c.h.bf16 %v1368_v4  ;;  %v821_v54 = vld [vmem:[#allocation2 + $0x48] sm:$0xff] }
  0xff   : > { %v714_v8 = vadd.f32 %v706_v7, %v629_v24  ;;  %v730_v23 = vsel %vm571_vm9, %v1547_v45, 0.0  ;;  %v1835_v29 = vunpack.c.l.bf16 %v1834_v30  ;;  %v715_v61 = vadd.f32 %v707_v15, %v630_v9  ;;  %v791_v24 = vld [vmem:[#allocation2 + $0x42] sm:$0xff] }
 0x100   : > { %v970_v56 = vadd.f32 %v1832_v28, %v946_v6  ;;  %v971_v48 = vadd.f32 %v1833_v44, %v947_v26  ;;  %v716_v27 = vadd.f32 %v708_v1, %v631_v52  ;;  %v717_v4 = vadd.f32 %v709_v63, %v632_v53  ;;  %v1836_v1 = vld [vmem:[#allocation13_spill] sm:$0xff] }
 0x101   : > { %v972_v43 = vadd.f32 %v1835_v29, %v948_v0  ;;  %v731_v45 = vsel %vm572_vm0, %v1585_v16, 0.0  ;;  %v732_v35 = vsel %vm573_vm14, %v1595_v12, 0.0  ;;  %v733_v37 = vsel %vm574_vm15, %v725_v19, 0.0 }
 0x102   : > { %v1132_v41 = vpack.c.bf16 %v970_v56, %v970_v56  ;;  %v1133_v2 = vpack.c.bf16 %v971_v48, %v971_v48  ;;  %v743_v47 = vmul.f32 %v1449_v46, %v730_v23  ;;  %v744_v20 = vmul.f32 %v1449_v46, %v731_v45 }
 0x103   : > { %v1134_v14 = vpack.c.bf16 %v972_v43, %v972_v43  ;;  %v745_v53 = vmul.f32 %v1449_v46, %v732_v35  ;;  %v746_v5 = vmul.f32 %v1449_v46, %v733_v37  ;;  %v772_v32 = vmul.f32 %v1411_v25, %v1612_v17 }
 0x104   : > { %1011 = vst.msk [vmem:[%s1678_s27] sm:$0xf] %vm1010_vm6, %v1132_v41  ;;  %1012 = vst.msk [vmem:[%s1678_s27 + $0x4] sm:$0xf] %vm1010_vm6, %v1133_v2  ;;  %v773_v3 = vmul.f32 %v1411_v25, %v1619_v38  ;;  %v751_v9 = vadd.f32 %v743_v47, %v714_v8  ;;  %v752_v59 = vadd.f32 %v744_v20, %v715_v61  ;;  %v796_v49 = vsel %vm685_vm1, %v1635_v51, 0.0 }
 0x105   : > { %1013 = vst.msk [vmem:[%s1678_s27 + $0x8] sm:$0xf] %vm1010_vm6, %v1134_v14  ;;  %v775_v52 = vmul.f32 %v1411_v25, %v762_v50  ;;  %v753_v57 = vadd.f32 %v745_v53, %v716_v27  ;;  %v754_v6 = vadd.f32 %v746_v5, %v717_v4  ;;  %v797_v46 = vsel %vm686_vm2, %v1637_v22, 0.0  ;;  %v1158_v53 = vld [vmem:[%s1348_s22 + $0x18] sm:$0xff]  }
 0x106   : > { %v798_v26 = vsel %vm687_vm3, %v1643_v31, 0.0  ;;  %v780_v7 = vadd.f32 %v772_v32, %v751_v9  ;;  %v781_v0 = vadd.f32 %v773_v3, %v752_v59  ;;  %v799_v25 = vsel %vm688_vm4, %v791_v24, 0.0 }
 0x107   : > { %v809_v15 = vmul.f32 %v1538_v58, %v796_v49  ;;  %v782_v63 = vadd.f32 %v1836_v1, %v753_v57  ;;  %v783_v28 = vadd.f32 %v775_v52, %v754_v6  ;;  %v810_v56 = vmul.f32 %v1538_v58, %v797_v46  ;;  %v1840_v52 = vld [vmem:[#allocation12_spill] sm:$0xff] }
 0x108   : > { %v811_v44 = vmul.f32 %v1538_v58, %v798_v26  ;;  %v812_v48 = vmul.f32 %v1538_v58, %v799_v25  ;;  %v826_v23 = vsel %vm571_vm9, %v1585_v16, 0.0  ;;  %v827_v55 = vsel %vm572_vm0, %v1595_v12, 0.0  ;;  %v1843_v25 = vld [vmem:[#allocation6_spill] sm:$0xff] }
 0x109   : > { %v817_v8 = vadd.f32 %v809_v15, %v780_v7  ;;  %v818_v29 = vadd.f32 %v810_v56, %v781_v0  ;;  %v828_v61 = vsel %vm573_vm14, %v725_v19, 0.0  ;;  %v829_v27 = vsel %vm574_vm15, %v821_v54, 0.0 }
 0x10a   : > { %v819_v43 = vadd.f32 %v811_v44, %v782_v63  ;;  %v820_v4 = vadd.f32 %v812_v48, %v783_v28  ;;  %v839_v58 = vmul.f32 %v1557_v62, %v826_v23  ;;  %v840_v41 = vmul.f32 %v1557_v62, %v827_v55  ;;  %v1845_v55 = vld [vmem:[#allocation9_spill] sm:$0xff] }
 0x10b   : > { %v841_v39 = vmul.f32 %v1557_v62, %v828_v61  ;;  %v842_v16 = vmul.f32 %v1557_v62, %v829_v27  ;;  %v860_v33 = vmul.f32 %v1400_v21, %v1612_v17  ;;  %v861_v42 = vmul.f32 %v1400_v21, %v1619_v38 }
 0x10c   : > { %v863_v12 = vmul.f32 %v1400_v21, %v762_v50  ;;  %v847_v34 = vadd.f32 %v839_v58, %v817_v8  ;;  %v848_v19 = vadd.f32 %v840_v41, %v818_v29  ;;  %v877_v35 = vsel %vm684_vm12, %v1635_v51, 0.0  ;;  %v1838_v50 = vld [vmem:[#allocation14_spill] sm:$0xff]  ;;  %v1839_v51 = vld [vmem:[#allocation11_spill] sm:$0xff]  ;;  %v1844_v8 = vld [vmem:[#allocation8_spill] sm:$0xff] }
 0x10d   : > { %v849_v2 = vadd.f32 %v841_v39, %v819_v43  ;;  %v850_v14 = vadd.f32 %v842_v16, %v820_v4  ;;  %v868_v62 = vadd.f32 %v860_v33, %v1587_v11  ;;  %v878_v17 = vsel %vm685_vm1, %v1637_v22, 0.0  ;;  %v1157_v22 = vld [vmem:[%s1348_s22 + $0x10] sm:$0xff]  }
 0x10e   : > { %v879_v38 = vsel %vm686_vm2, %v1643_v31, 0.0  ;;  %v869_v21 = vadd.f32 %v861_v42, %v847_v34  ;;  %v870_v37 = vadd.f32 %v1838_v50, %v848_v19  ;;  %v880_v20 = vsel %vm687_vm3, %v791_v24, 0.0 }
 0x10f   : > { %v871_v47 = vadd.f32 %v863_v12, %v849_v2  ;;  %v872_v5 = vadd.f32 %v1839_v51, %v850_v14  ;;  %v890_v11 = vmul.f32 %v1391_v18, %v877_v35  ;;  %v891_v32 = vmul.f32 %v1391_v18, %v878_v17 }
 0x110   : > { %v892_v60 = vmul.f32 %v1391_v18, %v879_v38  ;;  %v1147_v40 = vunpack.c.h.bf16 %v1834_v30  ;;  %v893_v31 = vmul.f32 %v1391_v18, %v880_v20  ;;  %v1154_v24 = vunpack.c.l.bf16 %v1158_v53  ;;  %v1841_v30 = vld [vmem:[#allocation5_spill] sm:$0xff] }
 0x111   : > { %v898_v3 = vadd.f32 %v890_v11, %v868_v62  ;;  %v899_v9 = vadd.f32 %v891_v32, %v869_v21  ;;  %v902_v13 = vadd.f32 %v1840_v52, %v872_v5  ;;  %v1155_v49 = vunpack.c.h.bf16 %v1158_v53 }
 0x112   : > { %v900_v59 = vadd.f32 %v892_v60, %v870_v37  ;;  %v901_v57 = vadd.f32 %v893_v31, %v871_v47  ;;  %v1150_v6 = vunpack.c.l.bf16 %v1157_v22  ;;  %v944_v18 = vsel %vm935_vm5, %v1841_v30, 0.0 }
 0x113   : > { %v913_v46 = vmul.f32 %v1604_v36, %v898_v3  ;;  %v914_v26 = vmul.f32 %v1604_v36, %v899_v9  ;;  %v917_v7 = vmul.f32 %v1604_v36, %v902_v13  ;;  %v942_v15 = vsel %vm935_vm5, %v1843_v25, 0.0 }
 0x114   : > { %v915_v54 = vmul.f32 %v1604_v36, %v900_v59  ;;  %v916_v1 = vmul.f32 %v1604_v36, %v901_v57  ;;  %v1151_v63 = vunpack.c.h.bf16 %v1157_v22  ;;  %v941_v23 = vsel %vm935_vm5, %v1844_v8, 0.0  ;;  %v1846_v36 = vld [vmem:[#allocation10_spill] sm:$0xff] }
 0x115   : > { %v928_v28 = vadd.f32 %v1624_v10, %v913_v46  ;;  %v929_v56 = vadd.f32 %v1624_v10, %v914_v26  ;;  %v932_v48 = vadd.f32 %v1624_v10, %v917_v7  ;;  %v945_v29 = vsel %vm935_vm5, %v1845_v55, 0.0 }
 0x116   : > { %v930_v44 = vadd.f32 %v1624_v10, %v915_v54  ;;  %v931_v43 = vadd.f32 %v1624_v10, %v916_v1  ;;  %v943_v61 = vsel %vm935_vm5, %v1846_v36, 0.0 }
 0x117   : > { %v949_v27 = vadd.f32 %v941_v23, %v928_v28  ;;  %v950_v4 = vadd.f32 %v942_v15, %v929_v56  ;;  %v953_v41 = vadd.f32 %v945_v29, %v932_v48 }
 0x118   : > { %v951_v58 = vadd.f32 %v943_v61, %v930_v44  ;;  %v952_v39 = vadd.f32 %v944_v18, %v931_v43 }
 0x119   : > { %v973_v16 = vadd.f32 %v1147_v40, %v949_v27  ;;  %v974_v33 = vadd.f32 %v1150_v6, %v950_v4  ;;  %v977_v12 = vadd.f32 %v1155_v49, %v953_v41 }
 0x11a   : > { %v975_v42 = vadd.f32 %v1151_v63, %v951_v58  ;;  %v976_v34 = vadd.f32 %v1154_v24, %v952_v39 }
 0x11b   : > { %v1135_v10 = vpack.c.bf16 %v973_v16, %v973_v16  ;;  %v1136_v19 = vpack.c.bf16 %v974_v33, %v974_v33  ;;  %v1139_v45 = vpack.c.bf16 %v977_v12, %v977_v12 }
 0x11c   : > { %v1137_v2 = vpack.c.bf16 %v975_v42, %v975_v42  ;;  %v1138_v35 = vpack.c.bf16 %v976_v34, %v976_v34 }
 0x11d   : > { %1014 = vst.msk [vmem:[%s1678_s27 + $0xc] sm:$0xf] %vm1010_vm6, %v1135_v10  ;;  %1015 = vst.msk [vmem:[%s1678_s27 + $0x10] sm:$0xf] %vm1010_vm6, %v1136_v19 }
 0x11e   : > { %1016 = vst.msk [vmem:[%s1678_s27 + $0x14] sm:$0xf] %vm1010_vm6, %v1137_v2  ;;  %1018 = vst.msk [vmem:[%s1678_s27 + $0x1c] sm:$0xf] %vm1010_vm6, %v1139_v45 }
 0x11f   : > { %1017 = vst.msk [vmem:[%s1678_s27 + $0x18] sm:$0xf] %vm1010_vm6, %v1138_v35 }
 0x120 PF: > { %s19_s30 = sadd.s32 1, %s1199_s30  }
 0x121   : > { %p16_p4 = scmp.ge.s32.totalorder %s19_s30, 4  }
 0x123   :  { %18 = sbr.rel (!%p16_p4) target bundleno = 1 (0x1), region = 89 }

// kernel: _lambda_.16
= control target key start
LH: loop header
LB: loop body
LE: loop exit
PB: predicated region body
PF: predicated region fallthrough
CT: control target
= control target key end

     0   :  { %s1159_s27 = smov 0   ;;  %s1709_s0 = inlined_call_operand.vmem [shape: bf16[2,64,16], index: 0, kind: input, shape index: {}]   ;;  %s1710_s1 = inlined_call_operand.vmem [shape: s32[64,1], index: 1, kind: input, shape index: {}]   ;;  %s1711_s2 = inlined_call_operand.vmem [shape: bf16[16,16], index: 2, kind: input, shape index: {}]   ;;  %s1712_s3 = inlined_call_operand.vmem [shape: f32[1,16], index: 3, kind: input, shape index: {}]   ;;  %s1713_s4 = inlined_call_operand.vmem [shape: f32[1,16], index: 4, kind: input, shape index: {}]   ;;  %s1714_s5 = inlined_call_operand.vmem [shape: f32[9,16], index: 5, kind: input, shape index: {}]   ;;  %s1715_s6 = inlined_call_operand.vmem [shape: f32[1,16], index: 6, kind: input, shape index: {}]   ;;  %s1716_s7 = inlined_call_operand.vmem [shape: f32[1,16], index: 7, kind: input, shape index: {}]   ;;  %s1717_s8 = inlined_call_operand.vmem [shape: bf16[2,64,16], index: 8, kind: output, shape index: {}]  }
   0x1 LB: > { %s1019_s28 = sadd.s32 4294967295, %s1110_s27   ;;  %p1023_p0 = scmp.ge.s32.totalorder %s1110_s27, 1  ;;  %s1110_s27 = sphi %s1159_s27, %s18_s27  }
   0x2   : > { %p262_p1 = scmp.lt.s32.totalorder %s1110_s27, 3 }
   0x4   : > { %p263_p2 = pnand %p1023_p0, %p262_p1 }
   0x6   : > { %266 = sbr.rel (%p263_p2) target bundleno = 289 (0x121), region = 52 }
   0xb   : > { %v1099_v0 = vld [vmem:[%s1711_s2] sm:$0xff]   ;;  %p296_p3 = scmp.lt.s32.totalorder %s1019_s28, 1  ;;  %vm343_vm0 = vcmask 130048   ;;  %v1173_v1 = vld [vmem:[%s1710_s1 + $0x10] sm:$0xff]  ;;  %v1181_v3 = vld [vmem:[%s1710_s1 + $0x18] sm:$0xff]  ;;  %v1112_v5 = vmov 0.0   ;;  %v902_v51 = vlaneseq }
   0xc   : > { %v472_v2 = vld [vmem:[%s1710_s1] sm:$0xff]  ;;  %1075 = vmatprep.subr.bf16.mxu0 %v1099_v0  ;;  %1085 = vmatprep.subr.bf16.mxu1 %v1099_v0  ;;  %vm490_vm1 = vcmp.gt.s32.totalorder %v1173_v1, 0  ;;  %vm491_vm3 = vcmp.gt.s32.totalorder %v1181_v3, 0  ;;  %v473_v4 = vld [vmem:[%s1710_s1 + $0x8] sm:$0xff]  ;;  %459 = vst.msk [vmem:[#allocation2] sm:$0xff] %vm343_vm0, %v1112_v5  ;;  %462 = vst.msk [vmem:[#allocation2 + $0x49] sm:$0xff] %vm343_vm0, %v1112_v5 }
   0xd   : > { %s1760_s28 = smov (!%p296_p3, %s1019_s28), 1  ;;  %vm488_vm2 = vcmp.gt.s32.totalorder %v472_v2, 0  ;;  %1076 = vmatpush3.bf16.msra.mxu0 %v1099_v0  ;;  %1086 = vmatpush3.bf16.msra.mxu1 %v1099_v0  ;;  %v1113_v6 = vmov 0   ;;  %vm489_vm4 = vcmp.gt.s32.totalorder %v473_v4, 0  ;;  %v477_v9 = vld [vmem:[%s1710_s1 + $0x28] sm:$0xff]  ;;  %v476_v11 = vld [vmem:[%s1710_s1 + $0x20] sm:$0xff] }
   0xe   : > { %v498_v7 = vsel %vm490_vm1, 1, %v1113_v6  ;;  %v496_v8 = vsel %vm488_vm2, 1, %v1113_v6  ;;  %s1060_s17 = sshll.u32 %s1760_s28, 5  ;;  %1098 = vset.pattern.permute.xlu1 %v1113_v6  ;;  %1097 = vset.pattern.permute.xlu0 %v1113_v6  ;;  %v499_v10 = vsel %vm491_vm3, 1, %v1113_v6  ;;  %v497_v13 = vsel %vm489_vm4, 1, %v1113_v6  ;;  %v479_v14 = vld [vmem:[%s1710_s1 + $0x38] sm:$0xff] }
   0xf   : > { %s300_s22 = scalar_lea.vmem %s1709_s0, %s1060_s17  ;;  %511 = vperm.xlu1 %1098, %v498_v7   ;;  %505 = vperm.xlu0 %1097, %v496_v8   ;;  %vm493_vm5 = vcmp.gt.s32.totalorder %v477_v9, 0  ;;  %v478_v16 = vld [vmem:[%s1710_s1 + $0x30] sm:$0xff]  ;;  %vm492_vm6 = vcmp.gt.s32.totalorder %v476_v11, 0  ;;  %vm495_vm7 = vcmp.gt.s32.totalorder %v479_v14, 0  ;;  %vm460_vm9 = vcmask 122880   ;;  %s1589_s19 = scalar_lea.vmem %s1717_s8, %s1060_s17 }
  0x10   : > { %v1100_v12 = vld [vmem:[%s300_s22] sm:$0xff]   ;;  %v1101_v15 = vld [vmem:[%s300_s22 + $0x10] sm:$0xff]   ;;  %v1102_v17 = vld [vmem:[%s300_s22 + $0x8] sm:$0xff]   ;;  %v501_v19 = vsel %vm493_vm5, 1, %v1113_v6  ;;  %v500_v20 = vsel %vm492_vm6, 1, %v1113_v6  ;;  %vm494_vm8 = vcmp.gt.s32.totalorder %v478_v16, 0 }
  0x11   : > { %1077 = vmatprep.mubr.msk.bf16.mxu0 %vm343_vm0, %v1100_v12  ;;  %1081 = vmatprep.mubr.msk.bf16.mxu1 %vm343_vm0, %v1101_v15  ;;  %v1103_v18 = vld [vmem:[%s300_s22 + $0x18] sm:$0xff]   ;;  %461 = vst.msk [vmem:[#allocation2 + $0x8] sm:$0x1] %vm460_vm9, %v1112_v5  ;;  %463 = vst.msk [vmem:[#allocation2 + $0x51] sm:$0x1] %vm460_vm9, %v1112_v5  ;;  %v503_v21 = vsel %vm495_vm7, 1, %v1113_v6 }
  0x12   : > { %1078 = vmatmul.mubr.msk.bf16.vlgmr.msra.gmra.mxu0 %vm343_vm0, %v1102_v17  ;;  %1082 = vmatmul.mubr.msk.bf16.vlgmr.msra.gmra.mxu1 %vm343_vm0, %v1103_v18  ;;  %v502_v22 = vsel %vm494_vm8, 1, %v1113_v6  ;;  %vm603_vm10 = vcmp.lt.s32.totalorder %v473_v4, 7  ;;  %vm602_vm11 = vcmp.lt.s32.totalorder %v472_v2, 7  ;;  %vm605_vm12 = vcmp.lt.s32.totalorder %v1181_v3, 7  ;;  %v1037_v41 = vld [vmem:[%s1712_s3] ss:$0 sm:$0xff] }
  0x13   : > { %514 = vperm.xlu1 %1098, %v499_v10   ;;  %508 = vperm.xlu0 %1097, %v497_v13   ;;  %v611_v23 = vsel %vm603_vm10, 1, %v1113_v6  ;;  %v610_v24 = vsel %vm602_vm11, 1, %v1113_v6  ;;  %vm604_vm13 = vcmp.lt.s32.totalorder %v1173_v1, 7  ;;  %v613_v25 = vsel %vm605_vm12, 1, %v1113_v6  ;;  %v1038_v44 = vld [vmem:[%s1713_s4] ss:$0 sm:$0xff] }
  0x14   : > { %v612_v26 = vsel %vm604_vm13, 1, %v1113_v6  ;;  %vm607_vm14 = vcmp.lt.s32.totalorder %v477_v9, 7  ;;  %vm606_vm15 = vcmp.lt.s32.totalorder %v476_v11, 7  ;;  %vm609_vm1 = vcmp.lt.s32.totalorder %v479_v14, 7  ;;  %v480_v45 = vld [vmem:[#allocation2] sm:$0xff] }
  0x15   : > { %v615_v27 = vsel %vm607_vm14, 1, %v1113_v6  ;;  %v614_v28 = vsel %vm606_vm15, 1, %v1113_v6  ;;  %vm608_vm2 = vcmp.lt.s32.totalorder %v478_v16, 7  ;;  %v617_v29 = vsel %vm609_vm1, 1, %v1113_v6  ;;  %v1252_v49 = vld [vmem:[%s1714_s5 + $0x1] ss:$0 sm:$0xff] }
  0x16   : > { %v616_v30 = vsel %vm608_vm2, 1, %v1113_v6  ;;  %v1259_v57 = vld [vmem:[%s1714_s5] ss:$0 sm:$0xff]  ;;  %v1269_v4 = vand.u32 127, %v902_v51 }
  0x17   : > { %520 = vperm.xlu1 %1098, %v501_v19   ;;  %517 = vperm.xlu0 %1097, %v500_v20  }
  0x18   : > { %v565_v50 = vld [vmem:[#allocation2 + $0x1] sm:$0xff]  ;;  %1733 = vst [vmem:[#allocation4_spill] sm:$0xff] %v1269_v4  ;;  %v834_v15 = vld [vmem:[#allocation2 + $0x4a] sm:$0xff]  ;;  %vm904_vm5 = vcmp.lt.s32.totalorder %v1269_v4, 8 }
  0x19   : > { %v578_v62 = vmul.f32 %v1252_v49, %v565_v50 }
  0x1b   : > { %526 = vperm.xlu1 %1098, %v503_v21   ;;  %523 = vperm.xlu0 %1097, %v502_v22   ;;  %v812_v21 = vld [vmem:[#allocation2 + $0x49] sm:$0xff]  ;;  %v1292_v22 = vld [vmem:[%s1714_s5 + $0x8] ss:$0 sm:$0xff] }
  0x1f   : > { %622 = vperm.xlu1 %1098, %v611_v23   ;;  %619 = vperm.xlu0 %1097, %v610_v24  }
  0x23   : > { %628 = vperm.xlu1 %1098, %v613_v25   ;;  %625 = vperm.xlu0 %1097, %v612_v26  }
  0x27   : > { %634 = vperm.xlu1 %1098, %v615_v27   ;;  %631 = vperm.xlu0 %1097, %v614_v28   ;;  %v1309_v28 = vld [vmem:[%s1714_s5 + $0x7] ss:$0 sm:$0xff] }
  0x2b   : > { %640 = vperm.xlu1 %1098, %v617_v29   ;;  %637 = vperm.xlu0 %1097, %v616_v30   ;;  %v1320_v29 = vld [vmem:[%s1714_s5 + $0x4] ss:$0 sm:$0xff] }
  0x8a   : > { %v1218_v31 = vpop.permute.xlu1 %511  ;;  %v1224_v34 = vpop.permute.xlu0 %505 }
  0x8b   : > { %vm528_vm3 = vcmp.eq.s32.totalorder %v1224_v34, 1  ;;  %vm530_vm6 = vcmp.eq.s32.totalorder %v1218_v31, 1 }
  0x8c   : > { %v536_v58 = vsel %vm528_vm3, %v480_v45, 0.0 }
  0x8d   : > { %v549_v9 = vmul.f32 %v1259_v57, %v536_v58 }
  0x8e   : > { %v1220_v32 = vpop.permute.xlu1 %514  ;;  %v1228_v36 = vpop.permute.xlu0 %508 }
  0x8f   : > { %v586_v25 = vadd.f32 %v578_v62, %v549_v9  ;;  %vm531_vm7 = vcmp.eq.s32.totalorder %v1220_v32, 1  ;;  %vm529_vm8 = vcmp.eq.s32.totalorder %v1228_v36, 1 }
  0x92   : > { %v1222_v33 = vpop.permute.xlu1 %520  ;;  %v1232_v38 = vpop.permute.xlu0 %517 }
  0x93   : > { %vm532_vm9 = vcmp.eq.s32.totalorder %v1232_v38, 1 }
  0x96   : > { %v1226_v35 = vpop.permute.xlu1 %526  ;;  %v1236_v40 = vpop.permute.xlu0 %523 }
  0x97   : > { %vm535_vm15 = vcmp.eq.s32.totalorder %v1226_v35, 1  ;;  %vm534_vm1 = vcmp.eq.s32.totalorder %v1236_v40, 1 }
  0x9a   : > { %v1230_v37 = vpop.permute.xlu1 %622  ;;  %v1247_v46 = vpop.permute.xlu0 %619 }
  0x9b   : > { %vm643_vm10 = vcmp.eq.s32.totalorder %v1230_v37, 1  ;;  %vm642_vm11 = vcmp.eq.s32.totalorder %v1247_v46, 1 }
  0x9e   : > { %v1234_v39 = vpop.permute.xlu1 %628  ;;  %v1275_v10 = vpop.permute.xlu0 %625 }
  0x9f   : > { %vm645_vm12 = vcmp.eq.s32.totalorder %v1234_v39, 1  ;;  %vm644_vm13 = vcmp.eq.s32.totalorder %v1275_v10, 1 }
  0xa2   : > { %v1241_v42 = vpop.permute.xlu1 %634 }
  0xa3   : > { %vm647_vm2 = vcmp.eq.s32.totalorder %v1241_v42, 1 }
  0xa6   : > { %v1266_v63 = vpop.permute.xlu1 %640 }
  0xa7   : > { %vm649_vm4 = vcmp.eq.s32.totalorder %v1266_v63, 1 }
  0xa8   : > { %v842_v26 = vsel %vm649_vm4, %v834_v15, 0.0 }
  0xd2   : > { %v1079_v43 = vpop.f32.mrf.mxu0  ;;  %v1083_v48 = vpop.f32.mrf.mxu1 }
  0xd3   : > { %v430_v47 = vmul.f32 %v1079_v43, %v1037_v41  ;;  %v434_v52 = vmul.f32 %v1083_v48, %v1037_v41  ;;  %v1330_v43 = vpop.permute.xlu0 %631  ;;  %v1345_v48 = vld [vmem:[%s1714_s5 + $0x2] ss:$0 sm:$0xff] }
  0xd4   : > { %v390_v53 = vpop.f32.mrf.mxu0  ;;  %v406_v56 = vpop.f32.mrf.mxu1  ;;  %1739 = vst [vmem:[#allocation10_spill] sm:$0xff] %v1330_v43  ;;  %vm646_vm14 = vcmp.eq.s32.totalorder %v1330_v43, 1 }
  0xd5   : > { %v1254_v54 = vadd.f32 %v1038_v44, %v430_v47  ;;  %v428_v55 = vmul.f32 %v1037_v41, %v390_v53  ;;  %v1263_v59 = vadd.f32 %v1038_v44, %v434_v52  ;;  %v432_v60 = vmul.f32 %v1037_v41, %v406_v56  ;;  %v1358_v53 = vld [vmem:[%s1714_s5 + $0x3] ss:$0 sm:$0xff] }
  0xd6   : > { %v1080_v61 = vpop.f32.mrf.mxu0  ;;  %v1084_v3 = vpop.f32.mrf.mxu1 }
  0xd7   : > { %1732 = vst [vmem:[#allocation3_spill] sm:$0xff] %v1263_v59  ;;  %v453_v0 = vmax.f32 %v1254_v54, 0.0  ;;  %v443_v1 = vadd.f32 %v1038_v44, %v428_v55  ;;  %v431_v2 = vmul.f32 %v1080_v61, %v1037_v41  ;;  %v1722_v5 = vmax.f32 %v1263_v59, 0.0 }
  0xd8   : > { %v1272_v6 = vadd.f32 %v1038_v44, %v432_v60  ;;  %v435_v7 = vmul.f32 %v1084_v3, %v1037_v41  ;;  %v393_v8 = vpop.f32.mrf.mxu0  ;;  %v409_v14 = vpop.f32.mrf.mxu1 }
  0xd9   : > { %466 = vst.msk [vmem:[#allocation2 + $0x19] sm:$0xff] %vm343_vm0, %v453_v0  ;;  %v451_v11 = vmax.f32 %v443_v1, 0.0  ;;  %v1278_v12 = vadd.f32 %v1038_v44, %v431_v2  ;;  %v429_v13 = vmul.f32 %v1037_v41, %v393_v8  ;;  %470 = vst.msk [vmem:[#allocation2 + $0x39] sm:$0xff] %vm343_vm0, %v1722_v5  ;;  %v433_v18 = vmul.f32 %v1037_v41, %v409_v14 }
  0xda   : > { %1734 = vst [vmem:[#allocation5_spill] sm:$0xff] %v1272_v6  ;;  %v1721_v16 = vmax.f32 %v1272_v6, 0.0  ;;  %v1285_v17 = vadd.f32 %v1038_v44, %v435_v7  ;;  %v1324_v41 = vmul.f32 %v1309_v28, %v812_v21  ;;  %v1340_v47 = vsel %vm904_vm5, %v453_v0, 0.0 }
  0xdb   : > { %1735 = vst [vmem:[#allocation6_spill] sm:$0xff] %v1278_v12  ;;  %464 = vst.msk [vmem:[#allocation2 + $0x9] sm:$0xff] %vm343_vm0, %v451_v11  ;;  %v1720_v19 = vmax.f32 %v1278_v12, 0.0  ;;  %v444_v20 = vadd.f32 %v1038_v44, %v429_v13  ;;  %v1298_v24 = vadd.f32 %v1038_v44, %v433_v18  ;;  %v1336_v44 = vmul.f32 %v1292_v22, %v842_v26 }
  0xdc   : > { %1736 = vst [vmem:[#allocation7_spill] sm:$0xff] %v1285_v17  ;;  %468 = vst.msk [vmem:[#allocation2 + $0x29] sm:$0xff] %vm343_vm0, %v1721_v16  ;;  %v1719_v23 = vmax.f32 %v1285_v17, 0.0  ;;  %v1352_v51 = vsel %vm904_vm5, %v451_v11, 0.0 }
  0xdd   : > { %1737 = vst [vmem:[#allocation8_spill] sm:$0xff] %v1298_v24  ;;  %467 = vst.msk [vmem:[#allocation2 + $0x21] sm:$0xff] %vm343_vm0, %v1720_v19  ;;  %v452_v27 = vmax.f32 %v444_v20, 0.0  ;;  %v1718_v30 = vmax.f32 %v1298_v24, 0.0 }
  0xde   : > { %471 = vst.msk [vmem:[#allocation2 + $0x41] sm:$0xff] %vm343_vm0, %v1719_v23  ;;  %1738 = vst [vmem:[#allocation9_spill] sm:$0xff] %v1324_v41 }
  0xdf   : > { %465 = vst.msk [vmem:[#allocation2 + $0x11] sm:$0xff] %vm343_vm0, %v452_v27  ;;  %1740 = vst [vmem:[#allocation11_spill] sm:$0xff] %v1336_v44  ;;  %v1365_v55 = vsel %vm904_vm5, %v452_v27, 0.0 }
  0xe0   : > { %v568_v45 = vld [vmem:[#allocation2 + $0x19] sm:$0xff]  ;;  %469 = vst.msk [vmem:[#allocation2 + $0x31] sm:$0xff] %vm343_vm0, %v1718_v30  ;;  %vm533_vm0 = vcmp.eq.s32.totalorder %v1222_v33, 1 }
  0xe1   : > { %v572_v50 = vld [vmem:[#allocation2 + $0x39] sm:$0xff]  ;;  %v581_v52 = vmul.f32 %v1252_v49, %v568_v45  ;;  %v1361_v54 = vmul.f32 %v1320_v29, %v568_v45  ;;  %v1368_v61 = vmul.f32 %v1309_v28, %v568_v45 }
  0xe2   : > { %v594_v56 = vld [vmem:[#allocation2 + $0x2] sm:$0xff]  ;;  %v1371_v62 = vmul.f32 %v1252_v49, %v572_v50  ;;  %v1374_v0 = vmul.f32 %v1320_v29, %v572_v50  ;;  %v1377_v1 = vmul.f32 %v1309_v28, %v572_v50 }
  0xe3   : > { %v679_v58 = vld [vmem:[#allocation2 + $0x8] sm:$0xff]  ;;  %v650_v2 = vsel %vm642_vm11, %v594_v56, 0.0 }
  0xe4   : > { %v566_v60 = vld [vmem:[#allocation2 + $0x9] sm:$0xff]  ;;  %1741 = vst [vmem:[#allocation12_spill] sm:$0xff] %v1374_v0  ;;  %1742 = vst [vmem:[#allocation13_spill] sm:$0xff] %v1377_v1  ;;  %v537_v3 = vsel %vm529_vm8, %v679_v58, 0.0  ;;  %v687_v8 = vsel %vm528_vm3, %v679_v58, 0.0  ;;  %v1386_v9 = vld [vmem:[#allocation2 + $0x20] sm:$0xff]  ;;  %v663_v15 = vmul.f32 %v1345_v48, %v650_v2 }
  0xe5   : > { %v579_v7 = vmul.f32 %v1252_v49, %v566_v60  ;;  %v1388_v11 = vld [vmem:[#allocation2 + $0x21] sm:$0xff]  ;;  %v550_v14 = vmul.f32 %v1259_v57, %v537_v3  ;;  %v700_v18 = vmul.f32 %v1358_v53, %v687_v8  ;;  %v729_v20 = vmul.f32 %v1320_v29, %v566_v60 }
  0xe6   : > { %v1390_v13 = vld [vmem:[#allocation2 + $0x22] sm:$0xff]  ;;  %v540_v21 = vsel %vm532_vm9, %v1386_v9, 0.0  ;;  %v1401_v26 = vmul.f32 %v1252_v49, %v1388_v11  ;;  %v1408_v45 = vld [vmem:[#allocation2 + $0x1a] sm:$0xff]  ;;  %v690_v50 = vsel %vm531_vm7, %v1386_v9, 0.0  ;;  %v482_v58 = vld [vmem:[#allocation2 + $0x10] sm:$0xff]  ;;  %v671_v30 = vadd.f32 %v663_v15, %v586_v25 }
  0xe7   : > { %v1406_v27 = vsel %vm646_vm14, %v1390_v13, 0.0  ;;  %v1414_v56 = vmul.f32 %v1259_v57, %v540_v21  ;;  %v483_v60 = vld [vmem:[#allocation2 + $0x18] sm:$0xff]  ;;  %v587_v3 = vadd.f32 %v579_v7, %v550_v14  ;;  %v653_v8 = vsel %vm645_vm12, %v1408_v45, 0.0  ;;  %v595_v16 = vld [vmem:[#allocation2 + $0xa] sm:$0xff] }
  0xe8   : > { %v1416_v2 = vld [vmem:[#allocation2 + $0x11] sm:$0xff]  ;;  %v538_v23 = vsel %vm530_vm6, %v482_v58, 0.0  ;;  %v539_v19 = vsel %vm531_vm7, %v483_v60, 0.0  ;;  %v666_v24 = vmul.f32 %v1345_v48, %v653_v8  ;;  %v651_v25 = vsel %vm643_vm10, %v595_v16, 0.0  ;;  %v1746_v39 = vld [vmem:[#allocation9_spill] sm:$0xff] }
  0xe9   : > { %v580_v21 = vmul.f32 %v1252_v49, %v1416_v2  ;;  %v596_v5 = vld [vmem:[#allocation2 + $0x12] sm:$0xff]  ;;  %v551_v7 = vmul.f32 %v1259_v57, %v538_v23  ;;  %v552_v14 = vmul.f32 %v1259_v57, %v539_v19  ;;  %v664_v17 = vmul.f32 %v1345_v48, %v651_v25 }
  0xea   : > { %v652_v15 = vsel %vm644_vm13, %v596_v5, 0.0  ;;  %v688_v6 = vsel %vm529_vm8, %v482_v58, 0.0  ;;  %v689_v8 = vsel %vm530_vm6, %v483_v60, 0.0  ;;  %v703_v41 = vmul.f32 %v1358_v53, %v690_v50 }
  0xeb   : > { %v665_v12 = vmul.f32 %v1345_v48, %v652_v15  ;;  %v588_v4 = vadd.f32 %v580_v21, %v551_v7  ;;  %v589_v23 = vadd.f32 %v581_v52, %v552_v14  ;;  %v701_v19 = vmul.f32 %v1358_v53, %v688_v6  ;;  %v1452_v6 = vld [vmem:[%s1714_s5 + $0x5] ss:$0 sm:$0xff]  ;;  %v1471_v7 = vpop.permute.xlu0 %637 }
  0xec   : > { %v702_v59 = vmul.f32 %v1358_v53, %v689_v8  ;;  %v672_v44 = vadd.f32 %v664_v17, %v587_v3  ;;  %v708_v1 = vadd.f32 %v700_v18, %v671_v30  ;;  %v730_v25 = vmul.f32 %v1320_v29, %v1416_v2 }
  0xed   : > { %v673_v15 = vadd.f32 %v665_v12, %v588_v4  ;;  %v674_v0 = vadd.f32 %v666_v24, %v589_v23  ;;  %v732_v43 = vmul.f32 %v1320_v29, %v1388_v11  ;;  %v753_v21 = vsel %vm642_vm11, %v595_v16, 0.0  ;;  %v1462_v12 = vld [vmem:[#allocation2 + $0x28] sm:$0xff] }
  0xee   : > { %v709_v17 = vadd.f32 %v701_v19, %v672_v44  ;;  %v737_v52 = vadd.f32 %v729_v20, %v708_v1  ;;  %v754_v30 = vsel %vm643_vm10, %v596_v5, 0.0  ;;  %v755_v4 = vsel %vm644_vm13, %v1408_v45, 0.0 }
  0xef   : > { %v710_v16 = vadd.f32 %v702_v59, %v673_v15  ;;  %v711_v24 = vadd.f32 %v703_v41, %v674_v0  ;;  %v756_v44 = vsel %vm645_vm12, %v1390_v13, 0.0  ;;  %v766_v1 = vmul.f32 %v1452_v6, %v753_v21  ;;  %v1479_v0 = vld [vmem:[%s1714_s5 + $0x6] ss:$0 sm:$0xff] }
  0xf0   : > { %v738_v18 = vadd.f32 %v730_v25, %v709_v17  ;;  %v767_v20 = vmul.f32 %v1452_v6, %v754_v30  ;;  %v768_v50 = vmul.f32 %v1452_v6, %v755_v4  ;;  %v769_v3 = vmul.f32 %v1452_v6, %v756_v44  ;;  %v1504_v30 = vld [vmem:[#allocation2 + $0x30] sm:$0xff]  ;;  %v1506_v4 = vld [vmem:[#allocation2 + $0x38] sm:$0xff] }
  0xf1   : > { %v739_v14 = vadd.f32 %v1361_v54, %v710_v16  ;;  %v740_v8 = vadd.f32 %v732_v43, %v711_v24  ;;  %v774_v59 = vadd.f32 %v766_v1, %v737_v52  ;;  %v783_v41 = vsel %vm528_vm3, %v482_v58, 0.0  ;;  %v1519_v1 = vld [vmem:[#allocation2 + $0x31] sm:$0xff] }
  0xf2   : > { %v775_v23 = vadd.f32 %v767_v20, %v738_v18  ;;  %v784_v19 = vsel %vm529_vm8, %v483_v60, 0.0  ;;  %v785_v54 = vsel %vm530_vm6, %v1386_v9, 0.0  ;;  %v786_v34 = vsel %vm531_vm7, %v1462_v12, 0.0  ;;  %v1524_v20 = vld [vmem:[%s1715_s6] ss:$0 sm:$0xff] }
  0xf3   : > { %v776_v43 = vadd.f32 %v768_v50, %v739_v14  ;;  %v777_v58 = vadd.f32 %v769_v3, %v740_v8  ;;  %v796_v25 = vmul.f32 %v1479_v0, %v783_v41  ;;  %v797_v15 = vmul.f32 %v1479_v0, %v784_v19  ;;  %v1535_v50 = vld [vmem:[#allocation2 + $0x2a] sm:$0xff] }
  0xf4   : > { %vm648_vm3 = vcmp.eq.s32.totalorder %v1471_v7, 1  ;;  %v798_v21 = vmul.f32 %v1479_v0, %v785_v54  ;;  %v799_v36 = vmul.f32 %v1479_v0, %v786_v34  ;;  %v818_v31 = vmul.f32 %v1309_v28, %v1416_v2 }
  0xf5   : > { %v820_v9 = vmul.f32 %v1309_v28, %v1388_v11  ;;  %v804_v32 = vadd.f32 %v796_v25, %v774_v59  ;;  %v805_v60 = vadd.f32 %v797_v15, %v775_v23  ;;  %v835_v17 = vsel %vm642_vm11, %v596_v5, 0.0  ;;  %v1542_v23 = vld [vmem:[%s1716_s7] ss:$0 sm:$0xff] }
  0xf6   : > { %v836_v52 = vsel %vm643_vm10, %v1408_v45, 0.0  ;;  %v806_v16 = vadd.f32 %v798_v21, %v776_v43  ;;  %v1508_v24 = vadd.f32 %v799_v36, %v777_v58  ;;  %v837_v11 = vsel %vm644_vm13, %v1390_v13, 0.0  ;;  %v1517_v45 = vld [vmem:[#allocation2 + $0x29] sm:$0xff]  ;;  %v1549_v43 = vld [vmem:[#allocation2 + $0x32] sm:$0xff]  ;;  %v1551_v58 = vld [vmem:[#allocation2 + $0x3a] sm:$0xff] }
  0xf7   : > { %v848_v2 = vmul.f32 %v1292_v22, %v835_v17  ;;  %v826_v44 = vadd.f32 %v818_v31, %v804_v32  ;;  %v827_v46 = vadd.f32 %v1368_v61, %v805_v60  ;;  %v849_v5 = vmul.f32 %v1292_v22, %v836_v52 }
  0xf8   : > { %v850_v37 = vmul.f32 %v1292_v22, %v837_v11  ;;  %v828_v18 = vadd.f32 %v820_v9, %v806_v16  ;;  %v541_v10 = vsel %vm533_vm0, %v1462_v12, 0.0  ;;  %v542_v61 = vsel %vm534_vm1, %v1504_v30, 0.0 }
  0xf9   : > { %v543_v13 = vsel %vm535_vm15, %v1506_v4, 0.0  ;;  %v856_v3 = vadd.f32 %v848_v2, %v826_v44  ;;  %v857_v14 = vadd.f32 %v849_v5, %v827_v46  ;;  %v554_v8 = vmul.f32 %v1259_v57, %v541_v10  ;;  %v686_v46 = vld [vmem:[#allocation2 + $0x40] sm:$0xff] }
  0xfa   : > { %v555_v59 = vmul.f32 %v1259_v57, %v542_v61  ;;  %v858_v41 = vadd.f32 %v850_v37, %v828_v18  ;;  %vm955_vm6 = vcmask 125952   ;;  %v556_v19 = vmul.f32 %v1259_v57, %v543_v13 }
  0xfb   : > { %v583_v54 = vmul.f32 %v1252_v49, %v1517_v45  ;;  %v584_v34 = vmul.f32 %v1252_v49, %v1519_v1  ;;  %v871_v25 = vmul.f32 %v1524_v20, %v856_v3  ;;  %v872_v15 = vmul.f32 %v1524_v20, %v857_v14 }
  0xfc   : > { %v590_v21 = vadd.f32 %v1401_v26, %v1414_v56  ;;  %v655_v57 = vsel %vm647_vm2, %v1535_v50, 0.0  ;;  %v873_v36 = vmul.f32 %v1524_v20, %v858_v41  ;;  %v593_v49 = vadd.f32 %v1371_v62, %v556_v19 }
  0xfd   : > { %v591_v31 = vadd.f32 %v583_v54, %v554_v8  ;;  %v592_v9 = vadd.f32 %v584_v34, %v555_v59  ;;  %v886_v32 = vadd.f32 %v1542_v23, %v871_v25  ;;  %v887_v60 = vadd.f32 %v1542_v23, %v872_v15  ;;  %v723_v8 = vld [vmem:[#allocation2 + $0x41] sm:$0xff] }
  0xfe   : > { %v656_v17 = vsel %vm648_vm3, %v1549_v43, 0.0  ;;  %v657_v26 = vsel %vm649_vm4, %v1551_v58, 0.0  ;;  %v888_v56 = vadd.f32 %v1542_v23, %v873_v36  ;;  %v667_v52 = vmul.f32 %v1345_v48, %v1406_v27 }
  0xff   : > { %v668_v62 = vmul.f32 %v1345_v48, %v655_v57  ;;  %v669_v16 = vmul.f32 %v1345_v48, %v656_v17  ;;  %v894_v11 = vmax.f32 %v886_v32, 0.0  ;;  %v895_v2 = vmax.f32 %v887_v60, 0.0 }
 0x100   : > { %v670_v44 = vmul.f32 %v1345_v48, %v657_v26  ;;  %v691_v5 = vsel %vm532_vm9, %v1462_v12, 0.0  ;;  %v896_v37 = vmax.f32 %v888_v56, 0.0  ;;  %v675_v18 = vadd.f32 %v667_v52, %v590_v21  ;;  %v752_v21 = vld [vmem:[#allocation2 + $0x42] sm:$0xff] }
 0x101   : > { %v676_v10 = vadd.f32 %v668_v62, %v591_v31  ;;  %v677_v61 = vadd.f32 %v669_v16, %v592_v9  ;;  %v915_v27 = vadd.f32 %v1352_v51, %v894_v11  ;;  %v916_v13 = vadd.f32 %v1365_v55, %v895_v2  ;;  %v782_v26 = vld [vmem:[#allocation2 + $0x48] sm:$0xff]  ;;  %v1744_v52 = vld [vmem:[#allocation12_spill] sm:$0xff] }
 0x102   : > { %v678_v3 = vadd.f32 %v670_v44, %v593_v49  ;;  %v692_v14 = vsel %vm533_vm0, %v1504_v30, 0.0  ;;  %v917_v48 = vadd.f32 %v1340_v47, %v896_v37  ;;  %v693_v51 = vsel %vm534_vm1, %v1506_v4, 0.0 }
 0x103   : > { %v694_v55 = vsel %vm535_vm15, %v686_v46, 0.0  ;;  %v704_v12 = vmul.f32 %v1358_v53, %v691_v5  ;;  %v1062_v59 = vpack.c.bf16 %v915_v27, %v915_v27  ;;  %v1063_v41 = vpack.c.bf16 %v916_v13, %v916_v13 }
 0x104   : > { %v705_v19 = vmul.f32 %v1358_v53, %v692_v14  ;;  %v706_v54 = vmul.f32 %v1358_v53, %v693_v51  ;;  %v1064_v34 = vpack.c.bf16 %v917_v48, %v917_v48  ;;  %v707_v47 = vmul.f32 %v1358_v53, %v694_v55 }
 0x105   : > { %v712_v25 = vadd.f32 %v704_v12, %v675_v18  ;;  %v733_v15 = vmul.f32 %v1320_v29, %v1517_v45  ;;  %956 = vst.msk [vmem:[%s1589_s19] sm:$0xf] %vm955_vm6, %v1062_v59  ;;  %957 = vst.msk [vmem:[%s1589_s19 + $0x4] sm:$0xf] %vm955_vm6, %v1063_v41  ;;  %v734_v31 = vmul.f32 %v1320_v29, %v1519_v1  ;;  %v757_v60 = vsel %vm646_vm14, %v1535_v50, 0.0 }
 0x106   : > { %v713_v57 = vadd.f32 %v705_v19, %v676_v10  ;;  %v714_v36 = vadd.f32 %v706_v54, %v677_v61  ;;  %v736_v9 = vmul.f32 %v1320_v29, %v723_v8  ;;  %958 = vst.msk [vmem:[%s1589_s19 + $0x8] sm:$0xf] %vm955_vm6, %v1064_v34  ;;  %v715_v49 = vadd.f32 %v707_v47, %v678_v3 }
 0x107   : > { %v741_v53 = vadd.f32 %v733_v15, %v712_v25  ;;  %v758_v17 = vsel %vm647_vm2, %v1549_v43, 0.0  ;;  %v759_v29 = vsel %vm648_vm3, %v1551_v58, 0.0  ;;  %v760_v16 = vsel %vm649_vm4, %v752_v21, 0.0  ;;  %v1747_v25 = vld [vmem:[#allocation11_spill] sm:$0xff] }
 0x108   : > { %v742_v56 = vadd.f32 %v734_v31, %v713_v57  ;;  %v743_v62 = vadd.f32 %v1744_v52, %v714_v36  ;;  %v744_v11 = vadd.f32 %v736_v9, %v715_v49  ;;  %v770_v2 = vmul.f32 %v1452_v6, %v757_v60  ;;  %v1748_v60 = vld [vmem:[#allocation3_spill] sm:$0xff]  ;;  %v1751_v52 = vld [vmem:[#allocation5_spill] sm:$0xff] }
 0x109   : > { %v771_v44 = vmul.f32 %v1452_v6, %v758_v17  ;;  %v772_v5 = vmul.f32 %v1452_v6, %v759_v29  ;;  %v773_v37 = vmul.f32 %v1452_v6, %v760_v16  ;;  %v787_v18 = vsel %vm532_vm9, %v1504_v30, 0.0 }
 0x10a   : > { %v788_v10 = vsel %vm533_vm0, %v1506_v4, 0.0  ;;  %v789_v63 = vsel %vm534_vm1, %v686_v46, 0.0  ;;  %v778_v61 = vadd.f32 %v770_v2, %v741_v53  ;;  %v790_v3 = vsel %vm535_vm15, %v782_v26, 0.0 }
 0x10b   : > { %v779_v27 = vadd.f32 %v771_v44, %v742_v56  ;;  %v780_v13 = vadd.f32 %v772_v5, %v743_v62  ;;  %v781_v14 = vadd.f32 %v773_v37, %v744_v11  ;;  %v800_v6 = vmul.f32 %v1479_v0, %v787_v18  ;;  %v1753_v5 = vld [vmem:[#allocation6_spill] sm:$0xff] }
 0x10c   : > { %v801_v48 = vmul.f32 %v1479_v0, %v788_v10  ;;  %v802_v38 = vmul.f32 %v1479_v0, %v789_v63  ;;  %v803_v30 = vmul.f32 %v1479_v0, %v790_v3  ;;  %v821_v33 = vmul.f32 %v1309_v28, %v1517_v45  ;;  %v1755_v10 = vld [vmem:[#allocation7_spill] sm:$0xff] }
 0x10d   : > { %v822_v40 = vmul.f32 %v1309_v28, %v1519_v1  ;;  %v824_v4 = vmul.f32 %v1309_v28, %v723_v8  ;;  %v808_v46 = vadd.f32 %v800_v6, %v778_v61  ;;  %v838_v55 = vsel %vm645_vm12, %v1535_v50, 0.0  ;;  %v1745_v28 = vld [vmem:[#allocation13_spill] sm:$0xff] }
 0x10e   : > { %v809_v35 = vadd.f32 %v801_v48, %v779_v27  ;;  %v810_v51 = vadd.f32 %v802_v38, %v780_v13  ;;  %v811_v12 = vadd.f32 %v803_v30, %v781_v14  ;;  %v829_v59 = vadd.f32 %v821_v33, %v1508_v24 }
 0x10f   : > { %v839_v0 = vsel %vm646_vm14, %v1549_v43, 0.0  ;;  %v840_v45 = vsel %vm647_vm2, %v1551_v58, 0.0  ;;  %v830_v1 = vadd.f32 %v822_v40, %v808_v46  ;;  %v841_v19 = vsel %vm648_vm3, %v752_v21, 0.0 }
 0x110   : > { %v831_v8 = vadd.f32 %v1745_v28, %v809_v35  ;;  %v832_v41 = vadd.f32 %v824_v4, %v810_v51  ;;  %v833_v50 = vadd.f32 %v1746_v39, %v811_v12  ;;  %v851_v54 = vmul.f32 %v1292_v22, %v838_v55 }
 0x111   : > { %v852_v24 = vmul.f32 %v1292_v22, %v839_v0  ;;  %v853_v34 = vmul.f32 %v1292_v22, %v840_v45  ;;  %v854_v43 = vmul.f32 %v1292_v22, %v841_v19  ;;  %v1749_v17 = vmax.f32 %v1748_v60, 0.0 }
 0x112   : > { %v859_v47 = vadd.f32 %v851_v54, %v829_v59  ;;  %v863_v15 = vadd.f32 %v1747_v25, %v833_v50  ;;  %v1752_v62 = vmax.f32 %v1751_v52, 0.0  ;;  %v1754_v37 = vmax.f32 %v1753_v5, 0.0 }
 0x113   : > { %v860_v42 = vadd.f32 %v852_v24, %v830_v1  ;;  %v861_v58 = vadd.f32 %v853_v34, %v831_v8  ;;  %v862_v57 = vadd.f32 %v854_v43, %v832_v41  ;;  %v913_v56 = vsel %vm904_vm5, %v1749_v17, 0.0 }
 0x114   : > { %v874_v36 = vmul.f32 %v1524_v20, %v859_v47  ;;  %v878_v31 = vmul.f32 %v1524_v20, %v863_v15  ;;  %v911_v29 = vsel %vm904_vm5, %v1752_v62, 0.0  ;;  %v910_v18 = vsel %vm904_vm5, %v1754_v37, 0.0 }
 0x115   : > { %v875_v7 = vmul.f32 %v1524_v20, %v860_v42  ;;  %v876_v21 = vmul.f32 %v1524_v20, %v861_v58  ;;  %v877_v9 = vmul.f32 %v1524_v20, %v862_v57  ;;  %v1756_v63 = vmax.f32 %v1755_v10, 0.0 }
 0x116   : > { %v889_v49 = vadd.f32 %v1542_v23, %v874_v36  ;;  %v893_v32 = vadd.f32 %v1542_v23, %v878_v31 }
 0x117   : > { %v890_v22 = vadd.f32 %v1542_v23, %v875_v7  ;;  %v891_v53 = vadd.f32 %v1542_v23, %v876_v21  ;;  %v892_v20 = vadd.f32 %v1542_v23, %v877_v9  ;;  %v914_v61 = vsel %vm904_vm5, %v1756_v63, 0.0  ;;  %v1757_v23 = vld [vmem:[#allocation8_spill] sm:$0xff] }
 0x118   : > { %v897_v16 = vmax.f32 %v889_v49, 0.0  ;;  %v901_v44 = vmax.f32 %v893_v32, 0.0  ;;  %v1758_v13 = vmax.f32 %v1757_v23, 0.0 }
 0x119   : > { %v898_v11 = vmax.f32 %v890_v22, 0.0  ;;  %v899_v2 = vmax.f32 %v891_v53, 0.0  ;;  %v900_v27 = vmax.f32 %v892_v20, 0.0 }
 0x11a   : > { %v912_v3 = vsel %vm904_vm5, %v1758_v13, 0.0  ;;  %v918_v14 = vadd.f32 %v910_v18, %v897_v16  ;;  %v922_v38 = vadd.f32 %v914_v61, %v901_v44 }
 0x11b   : > { %v919_v6 = vadd.f32 %v911_v29, %v898_v11  ;;  %v920_v48 = vadd.f32 %v912_v3, %v899_v2  ;;  %v921_v30 = vadd.f32 %v913_v56, %v900_v27 }
 0x11c   : > { %v1065_v33 = vpack.c.bf16 %v918_v14, %v918_v14  ;;  %v1069_v46 = vpack.c.bf16 %v922_v38, %v922_v38 }
 0x11d   : > { %v1066_v40 = vpack.c.bf16 %v919_v6, %v919_v6  ;;  %v1067_v4 = vpack.c.bf16 %v920_v48, %v920_v48  ;;  %v1068_v35 = vpack.c.bf16 %v921_v30, %v921_v30 }
 0x11e   : > { %959 = vst.msk [vmem:[%s1589_s19 + $0xc] sm:$0xf] %vm955_vm6, %v1065_v33  ;;  %963 = vst.msk [vmem:[%s1589_s19 + $0x1c] sm:$0xf] %vm955_vm6, %v1069_v46 }
 0x11f   : > { %960 = vst.msk [vmem:[%s1589_s19 + $0x10] sm:$0xf] %vm955_vm6, %v1066_v40  ;;  %961 = vst.msk [vmem:[%s1589_s19 + $0x14] sm:$0xf] %vm955_vm6, %v1067_v4 }
 0x120   : > { %962 = vst.msk [vmem:[%s1589_s19 + $0x18] sm:$0xf] %vm955_vm6, %v1068_v35 }
 0x121 PF: > { %s18_s27 = sadd.s32 1, %s1110_s27  }
 0x122   : > { %p15_p4 = scmp.ge.s32.totalorder %s18_s27, 4  }
 0x124   :  { %17 = sbr.rel (!%p15_p4) target bundleno = 1 (0x1), region = 82 }

// kernel: _lambda_.20
= control target key start
LH: loop header
LB: loop body
LE: loop exit
PB: predicated region body
PF: predicated region fallthrough
CT: control target
= control target key end

     0   :  { %s759_s24 = smov 0   ;;  %s894_s0 = inlined_call_operand.vmem [shape: bf16[2,5,5,16], index: 0, kind: input, shape index: {}]   ;;  %s895_s1 = inlined_call_operand.vmem [shape: bf16[2,5,5,16], index: 1, kind: input, shape index: {}]   ;;  %s896_s2 = inlined_call_operand.vmem [shape: bf16[2,5,5,16], index: 2, kind: input, shape index: {}]   ;;  %s897_s3 = inlined_call_operand.vmem [shape: bf16[2,5,5,16], index: 3, kind: input, shape index: {}]   ;;  %s898_s4 = inlined_call_operand.vmem [shape: f32[9,16], index: 4, kind: input, shape index: {}]   ;;  %s899_s5 = inlined_call_operand.vmem [shape: f32[1,16], index: 5, kind: input, shape index: {}]   ;;  %s900_s6 = inlined_call_operand.vmem [shape: f32[1,16], index: 6, kind: input, shape index: {}]   ;;  %s901_s7 = inlined_call_operand.vmem [shape: bf16[2,4,4,16], index: 7, kind: output, shape index: {}]  }
   0x1 LB: > { %s677_s25 = sadd.s32 4294967295, %s717_s24   ;;  %p681_p0 = scmp.ge.s32.totalorder %s717_s24, 1  ;;  %s717_s24 = sphi %s759_s24, %s17_s24  }
   0x2   : > { %p267_p1 = scmp.lt.s32.totalorder %s717_s24, 3 }
   0x4   : > { %p268_p2 = pnand %p681_p0, %p267_p1 }
   0x5   : > { %p314_p3 = scmp.lt.s32.totalorder (!%p268_p2), %s677_s25, 1 }
   0x6   : > { %271 = sbr.rel (%p268_p2) target bundleno = 60 (0x3c), region = 48 }
   0xb   : > { %s903_s25 = smov (!%p314_p3, %s677_s25), 1  ;;  %vm349_vm0 = vcmask 126976   ;;  %v688_v36 = vld [vmem:[%s898_s4] ss:$0 sm:$0xff]  ;;  %v689_v37 = vld [vmem:[%s898_s4 + $0x1] ss:$0 sm:$0xff] }
   0xc   : > { %s702_s26 = smul.u32 20, %s903_s25  ;;  %v829_v39 = vld [vmem:[%s898_s4 + $0x2] ss:$0 sm:$0xff]  ;;  %v834_v43 = vld [vmem:[%s898_s4 + $0x3] ss:$0 sm:$0xff]  ;;  %s701_s17 = sshll.u32 %s903_s25, 3 }
   0xd   : > { %v839_v46 = vld [vmem:[%s898_s4 + $0x4] ss:$0 sm:$0xff]  ;;  %s338_s20 = scalar_lea.vmem %s901_s7, %s701_s17  ;;  %vm581_vm1 = vcmask 123904  }
   0xe   : > { %s773_s29 = scalar_lea.vmem %s894_s0, %s702_s26  ;;  %s778_s9 = scalar_lea.vmem %s895_s1, %s702_s26 }
   0xf   : > { %v339_v0 = vld [vmem:[%s773_s29] sm:$0x7]  ;;  %v340_v1 = vld [vmem:[%s773_s29 + $0x4] sm:$0x7]  ;;  %v341_v2 = vld [vmem:[%s773_s29 + $0x8] sm:$0x7]  ;;  %s328_s12 = scalar_lea.vmem %s896_s2, %s702_s26  ;;  %s792_s15 = scalar_lea.vmem %s897_s3, %s702_s26 }
  0x10   : > { %v344_v3 = vunpack.c.l.bf16 %v339_v0  ;;  %v345_v4 = vunpack.c.l.bf16 %v340_v1  ;;  %v346_v5 = vunpack.c.l.bf16 %v341_v2  ;;  %v342_v6 = vld [vmem:[%s773_s29 + $0xc] sm:$0x7]  ;;  %v355_v7 = vld [vmem:[%s778_s9] sm:$0x7]  ;;  %v356_v8 = vld [vmem:[%s778_s9 + $0x4] sm:$0x7] }
  0x11   : > { %v347_v9 = vunpack.c.l.bf16 %v342_v6  ;;  %v360_v10 = vunpack.c.l.bf16 %v355_v7  ;;  %v361_v11 = vunpack.c.l.bf16 %v356_v8  ;;  %v357_v12 = vld [vmem:[%s778_s9 + $0x8] sm:$0x7]  ;;  %v358_v13 = vld [vmem:[%s778_s9 + $0xc] sm:$0x7]  ;;  %v370_v14 = vld [vmem:[%s328_s12] sm:$0x7] }
  0x12   : > { %350 = vst.msk [vmem:[#allocation2] sm:$0x1f] %vm349_vm0, %v344_v3  ;;  %351 = vst.msk [vmem:[#allocation2 + $0x8] sm:$0x1f] %vm349_vm0, %v345_v4  ;;  %v362_v15 = vunpack.c.l.bf16 %v357_v12  ;;  %v363_v16 = vunpack.c.l.bf16 %v358_v13  ;;  %v375_v17 = vunpack.c.l.bf16 %v370_v14  ;;  %v371_v18 = vld [vmem:[%s328_s12 + $0x4] sm:$0x7] }
  0x13   : > { %352 = vst.msk [vmem:[#allocation2 + $0x10] sm:$0x1f] %vm349_vm0, %v346_v5  ;;  %v372_v19 = vld [vmem:[%s328_s12 + $0x8] sm:$0x7]  ;;  %v373_v20 = vld [vmem:[%s328_s12 + $0xc] sm:$0x7]  ;;  %v376_v21 = vunpack.c.l.bf16 %v371_v18 }
  0x14   : > { %353 = vst.msk [vmem:[#allocation2 + $0x18] sm:$0x1f] %vm349_vm0, %v347_v9  ;;  %365 = vst.msk [vmem:[#allocation3] sm:$0x1f] %vm349_vm0, %v360_v10  ;;  %v377_v22 = vunpack.c.l.bf16 %v372_v19  ;;  %v378_v23 = vunpack.c.l.bf16 %v373_v20  ;;  %v385_v24 = vld [vmem:[%s792_s15] sm:$0x7] }
  0x15   : > { %366 = vst.msk [vmem:[#allocation3 + $0x8] sm:$0x1f] %vm349_vm0, %v361_v11  ;;  %v386_v25 = vld [vmem:[%s792_s15 + $0x4] sm:$0x7]  ;;  %v387_v26 = vld [vmem:[%s792_s15 + $0x8] sm:$0x7]  ;;  %v390_v27 = vunpack.c.l.bf16 %v385_v24 }
  0x16   : > { %367 = vst.msk [vmem:[#allocation3 + $0x10] sm:$0x1f] %vm349_vm0, %v362_v15  ;;  %368 = vst.msk [vmem:[#allocation3 + $0x18] sm:$0x1f] %vm349_vm0, %v363_v16  ;;  %v391_v28 = vunpack.c.l.bf16 %v386_v25  ;;  %v392_v29 = vunpack.c.l.bf16 %v387_v26  ;;  %v388_v30 = vld [vmem:[%s792_s15 + $0xc] sm:$0x7] }
  0x17   : > { %380 = vst.msk [vmem:[#allocation4] sm:$0x1f] %vm349_vm0, %v375_v17  ;;  %v343_v31 = vld [vmem:[%s773_s29 + $0x10] sm:$0x7]  ;;  %381 = vst.msk [vmem:[#allocation4 + $0x8] sm:$0x1f] %vm349_vm0, %v376_v21  ;;  %v393_v33 = vunpack.c.l.bf16 %v388_v30 }
  0x18   : > { %v359_v32 = vld [vmem:[%s778_s9 + $0x10] sm:$0x7]  ;;  %382 = vst.msk [vmem:[#allocation4 + $0x10] sm:$0x1f] %vm349_vm0, %v377_v22  ;;  %383 = vst.msk [vmem:[#allocation4 + $0x18] sm:$0x1f] %vm349_vm0, %v378_v23  ;;  %v348_v34 = vunpack.c.l.bf16 %v343_v31 }
  0x19   : > { %v364_v35 = vunpack.c.l.bf16 %v359_v32  ;;  %395 = vst.msk [vmem:[#allocation5] sm:$0x1f] %vm349_vm0, %v390_v27  ;;  %396 = vst.msk [vmem:[#allocation5 + $0x8] sm:$0x1f] %vm349_vm0, %v391_v28  ;;  %v400_v38 = vld [vmem:[#allocation2] sm:$0xf] }
  0x1a   : > { %397 = vst.msk [vmem:[#allocation5 + $0x10] sm:$0x1f] %vm349_vm0, %v392_v29  ;;  %398 = vst.msk [vmem:[#allocation5 + $0x18] sm:$0x1f] %vm349_vm0, %v393_v33  ;;  %v409_v40 = vmul.f32 %v688_v36, %v400_v38  ;;  %v434_v42 = vld [vmem:[#allocation2 + $0x1] sm:$0xf] }
  0x1b   : > { %354 = vst.msk [vmem:[#allocation2 + $0x20] sm:$0x1f] %vm349_vm0, %v348_v34  ;;  %369 = vst.msk [vmem:[#allocation3 + $0x20] sm:$0x1f] %vm349_vm0, %v364_v35  ;;  %v417_v41 = vld [vmem:[#allocation3] sm:$0xf]  ;;  %v443_v53 = vmul.f32 %v829_v39, %v434_v42 }
  0x1c   : > { %v426_v44 = vmul.f32 %v689_v37, %v417_v41  ;;  %v401_v47 = vld [vmem:[#allocation2 + $0x8] sm:$0xf]  ;;  %v418_v49 = vld [vmem:[#allocation3 + $0x8] sm:$0xf]  ;;  %v849_v3 = vld [vmem:[%s898_s4 + $0x5] ss:$0 sm:$0xff] }
  0x1d   : > { %v410_v48 = vmul.f32 %v688_v36, %v401_v47  ;;  %v435_v50 = vld [vmem:[#allocation2 + $0x9] sm:$0xf]  ;;  %v427_v56 = vmul.f32 %v689_v37, %v418_v49  ;;  %v402_v63 = vld [vmem:[#allocation2 + $0x10] sm:$0xf]  ;;  %v419_v0 = vld [vmem:[#allocation3 + $0x10] sm:$0xf] }
  0x1e   : > { %v451_v45 = vld [vmem:[#allocation4] sm:$0xf]  ;;  %v452_v51 = vld [vmem:[#allocation4 + $0x8] sm:$0xf]  ;;  %v430_v52 = vadd.f32 %v426_v44, %v409_v40  ;;  %v444_v57 = vmul.f32 %v829_v39, %v435_v50  ;;  %v411_v4 = vmul.f32 %v688_v36, %v402_v63  ;;  %v428_v5 = vmul.f32 %v689_v37, %v419_v0  ;;  %v503_v8 = vld [vmem:[#allocation2 + $0x8] sm:$0xf] }
  0x1f   : > { %v460_v54 = vmul.f32 %v834_v43, %v451_v45  ;;  %v431_v61 = vadd.f32 %v427_v56, %v410_v48  ;;  %v461_v62 = vmul.f32 %v834_v43, %v452_v51  ;;  %v436_v1 = vld [vmem:[#allocation2 + $0x11] sm:$0xf]  ;;  %v453_v6 = vld [vmem:[#allocation4 + $0x10] sm:$0xf]  ;;  %v854_v9 = vld [vmem:[%s898_s4 + $0x6] ss:$0 sm:$0xff] }
  0x20   : > { %v468_v55 = vld [vmem:[#allocation5] sm:$0xf]  ;;  %v469_v58 = vld [vmem:[#allocation5 + $0x8] sm:$0xf]  ;;  %v447_v59 = vadd.f32 %v443_v53, %v430_v52  ;;  %v485_v2 = vld [vmem:[#allocation4 + $0x1] sm:$0xf]  ;;  %v432_v14 = vadd.f32 %v428_v5, %v411_v4  ;;  %v445_v15 = vmul.f32 %v829_v39, %v436_v1  ;;  %v462_v16 = vmul.f32 %v834_v43, %v453_v6 }
  0x21   : > { %v477_v60 = vmul.f32 %v839_v46, %v468_v55  ;;  %v448_v10 = vadd.f32 %v444_v57, %v431_v61  ;;  %v478_v11 = vmul.f32 %v839_v46, %v469_v58  ;;  %v470_v12 = vld [vmem:[#allocation5 + $0x10] sm:$0xf]  ;;  %v486_v13 = vld [vmem:[#allocation4 + $0x9] sm:$0xf]  ;;  %v420_v18 = vld [vmem:[#allocation3 + $0x18] sm:$0xf]  ;;  %v494_v20 = vmul.f32 %v849_v3, %v485_v2 }
  0x22   : > { %v464_v7 = vadd.f32 %v460_v54, %v447_v59  ;;  %v403_v17 = vld [vmem:[#allocation2 + $0x18] sm:$0xf]  ;;  %v454_v24 = vld [vmem:[#allocation4 + $0x18] sm:$0xf]  ;;  %v521_v25 = vld [vmem:[#allocation3 + $0x8] sm:$0xf]  ;;  %v449_v28 = vadd.f32 %v445_v15, %v432_v14  ;;  %v479_v29 = vmul.f32 %v839_v46, %v470_v12  ;;  %v429_v30 = vmul.f32 %v689_v37, %v420_v18 }
  0x23   : > { %v465_v21 = vadd.f32 %v461_v62, %v448_v10  ;;  %v412_v22 = vmul.f32 %v688_v36, %v403_v17  ;;  %v437_v23 = vld [vmem:[#allocation2 + $0x19] sm:$0xf]  ;;  %v695_v26 = vld [vmem:[%s898_s4 + $0x7] ss:$0 sm:$0xff]  ;;  %v504_v27 = vld [vmem:[#allocation2 + $0x10] sm:$0xf]  ;;  %v512_v32 = vmul.f32 %v854_v9, %v503_v8  ;;  %v495_v34 = vmul.f32 %v849_v3, %v486_v13 }
  0x24   : > { %v481_v19 = vadd.f32 %v477_v60, %v464_v7  ;;  %v487_v35 = vld [vmem:[#allocation4 + $0x11] sm:$0xf]  ;;  %v471_v36 = vld [vmem:[#allocation5 + $0x18] sm:$0xf]  ;;  %v538_v38 = vld [vmem:[#allocation2 + $0x9] sm:$0xf]  ;;  %v466_v42 = vadd.f32 %v462_v16, %v449_v28  ;;  %v446_v45 = vmul.f32 %v829_v39, %v437_v23  ;;  %v463_v37 = vmul.f32 %v834_v43, %v454_v24 }
  0x25   : > { %v482_v33 = vadd.f32 %v478_v11, %v465_v21  ;;  %v696_v40 = vld [vmem:[%s898_s4 + $0x8] ss:$0 sm:$0xff]  ;;  %v522_v41 = vld [vmem:[#allocation3 + $0x10] sm:$0xf]  ;;  %v433_v44 = vadd.f32 %v429_v30, %v412_v22  ;;  %v530_v48 = vmul.f32 %v695_v26, %v521_v25  ;;  %v513_v50 = vmul.f32 %v854_v9, %v504_v27  ;;  %v539_v52 = vld [vmem:[#allocation2 + $0x11] sm:$0xf] }
  0x26   : > { %v498_v31 = vadd.f32 %v494_v20, %v481_v19  ;;  %v505_v51 = vld [vmem:[#allocation2 + $0x18] sm:$0xf]  ;;  %v483_v53 = vadd.f32 %v479_v29, %v466_v42  ;;  %v496_v54 = vmul.f32 %v849_v3, %v487_v35  ;;  %v523_v55 = vld [vmem:[#allocation3 + $0x18] sm:$0xf]  ;;  %v480_v57 = vmul.f32 %v839_v46, %v471_v36  ;;  %v488_v61 = vld [vmem:[#allocation4 + $0x19] sm:$0xf] }
  0x27   : > { %v499_v49 = vadd.f32 %v495_v34, %v482_v33  ;;  %v450_v56 = vadd.f32 %v446_v45, %v433_v44  ;;  %v547_v59 = vmul.f32 %v696_v40, %v538_v38  ;;  %v531_v39 = vmul.f32 %v695_v26, %v522_v41  ;;  %v506_v43 = vld [vmem:[#allocation2 + $0x20] sm:$0xf]  ;;  %v540_v46 = vld [vmem:[#allocation2 + $0x19] sm:$0xf]  ;;  %v524_v7 = vld [vmem:[#allocation3 + $0x20] sm:$0xf] }
  0x28   : > { %v516_v47 = vadd.f32 %v512_v32, %v498_v31  ;;  %v697_v62 = vld [vmem:[%s899_s5] ss:$0 sm:$0xff]  ;;  %v500_v63 = vadd.f32 %v496_v54, %v483_v53  ;;  %v514_v0 = vmul.f32 %v854_v9, %v505_v51  ;;  %v548_v5 = vmul.f32 %v696_v40, %v539_v52  ;;  %v541_v22 = vld [vmem:[#allocation2 + $0x21] sm:$0xf] }
  0x29   : > { %v517_v60 = vadd.f32 %v513_v50, %v499_v49  ;;  %v467_v1 = vadd.f32 %v463_v37, %v450_v56  ;;  %v532_v6 = vmul.f32 %v695_v26, %v523_v55  ;;  %v698_v8 = vld [vmem:[%s900_s6] ss:$0 sm:$0xff]  ;;  %v497_v12 = vmul.f32 %v849_v3, %v488_v61 }
  0x2a   : > { %v534_v58 = vadd.f32 %v530_v48, %v516_v47  ;;  %v518_v10 = vadd.f32 %v514_v0, %v500_v63  ;;  %v515_v13 = vmul.f32 %v854_v9, %v506_v43  ;;  %v549_v17 = vmul.f32 %v696_v40, %v540_v46 }
  0x2b   : > { %v535_v4 = vadd.f32 %v531_v39, %v517_v60  ;;  %v484_v11 = vadd.f32 %v480_v57, %v467_v1  ;;  %v533_v19 = vmul.f32 %v695_v26, %v524_v7  ;;  %v550_v28 = vmul.f32 %v696_v40, %v541_v22 }
  0x2c   : > { %v551_v2 = vadd.f32 %v547_v59, %v534_v58  ;;  %v536_v16 = vadd.f32 %v532_v6, %v518_v10 }
  0x2d   : > { %v552_v15 = vadd.f32 %v548_v5, %v535_v4  ;;  %v501_v18 = vadd.f32 %v497_v12, %v484_v11 }
  0x2e   : > { %v562_v14 = vmul.f32 %v697_v62, %v551_v2  ;;  %v553_v23 = vadd.f32 %v549_v17, %v536_v16 }
  0x2f   : > { %v563_v21 = vmul.f32 %v697_v62, %v552_v15  ;;  %v519_v24 = vadd.f32 %v515_v13, %v501_v18 }
  0x30   : > { %v573_v20 = vadd.f32 %v698_v8, %v562_v14  ;;  %v564_v9 = vmul.f32 %v697_v62, %v553_v23 }
  0x31   : > { %v574_v25 = vadd.f32 %v698_v8, %v563_v21  ;;  %v537_v27 = vadd.f32 %v533_v19, %v519_v24 }
  0x32   : > { %v577_v3 = vpack.c.bf16 %v573_v20, %v573_v20  ;;  %v575_v30 = vadd.f32 %v698_v8, %v564_v9 }
  0x33   : > { %v578_v29 = vpack.c.bf16 %v574_v25, %v574_v25  ;;  %v554_v26 = vadd.f32 %v550_v28, %v537_v27 }
  0x34   : > { %582 = vst.msk [vmem:[%s338_s20] sm:$0x3] %vm581_vm1, %v577_v3  ;;  %v579_v31 = vpack.c.bf16 %v575_v30, %v575_v30 }
  0x35   : > { %583 = vst.msk [vmem:[%s338_s20 + $0x2] sm:$0x3] %vm581_vm1, %v578_v29  ;;  %v565_v32 = vmul.f32 %v697_v62, %v554_v26 }
  0x36   : > { %584 = vst.msk [vmem:[%s338_s20 + $0x4] sm:$0x3] %vm581_vm1, %v579_v31 }
  0x37   : > { %v576_v33 = vadd.f32 %v698_v8, %v565_v32 }
  0x39   : > { %v580_v34 = vpack.c.bf16 %v576_v33, %v576_v33 }
  0x3b   : > { %585 = vst.msk [vmem:[%s338_s20 + $0x6] sm:$0x3] %vm581_vm1, %v580_v34 }
  0x3c PF: > { %s17_s24 = sadd.s32 1, %s717_s24  }
  0x3d   : > { %p14_p4 = scmp.ge.s32.totalorder %s17_s24, 4  }
  0x3f   :  { %16 = sbr.rel (!%p14_p4) target bundleno = 1 (0x1), region = 89 }

// kernel: _lambda_.18
= control target key start
LH: loop header
LB: loop body
LE: loop exit
PB: predicated region body
PF: predicated region fallthrough
CT: control target
= control target key end

     0   :  { %s1160_s27 = smov 0   ;;  %s1728_s0 = inlined_call_operand.vmem [shape: bf16[2,64,16], index: 0, kind: input, shape index: {}]   ;;  %s1729_s1 = inlined_call_operand.vmem [shape: s32[64,1], index: 1, kind: input, shape index: {}]   ;;  %s1730_s2 = inlined_call_operand.vmem [shape: bf16[16,48], index: 2, kind: input, shape index: {}]   ;;  %s1731_s3 = inlined_call_operand.vmem [shape: f32[1,48], index: 3, kind: input, shape index: {}]   ;;  %s1732_s4 = inlined_call_operand.vmem [shape: f32[1,48], index: 4, kind: input, shape index: {}]   ;;  %s1733_s5 = inlined_call_operand.vmem [shape: f32[9,48], index: 5, kind: input, shape index: {}]   ;;  %s1734_s6 = inlined_call_operand.vmem [shape: f32[1,48], index: 6, kind: input, shape index: {}]   ;;  %s1735_s7 = inlined_call_operand.vmem [shape: f32[1,48], index: 7, kind: input, shape index: {}]   ;;  %s1736_s8 = inlined_call_operand.vmem [shape: bf16[2,64,48], index: 8, kind: output, shape index: {}]  }
   0x1 LB: > { %s1020_s28 = sadd.s32 4294967295, %s1111_s27   ;;  %p1024_p0 = scmp.ge.s32.totalorder %s1111_s27, 1  ;;  %s1111_s27 = sphi %s1160_s27, %s18_s27  }
   0x2   : > { %p262_p1 = scmp.lt.s32.totalorder %s1111_s27, 3 }
   0x4   : > { %p263_p2 = pnand %p1024_p0, %p262_p1 }
   0x6   : > { %266 = sbr.rel (%p263_p2) target bundleno = 289 (0x121), region = 52 }
   0xb   : > { %v1100_v0 = vld [vmem:[%s1730_s2] sm:$0xff]   ;;  %p296_p3 = scmp.lt.s32.totalorder %s1020_s28, 1  ;;  %v1174_v1 = vld [vmem:[%s1729_s1 + $0x10] sm:$0xff]  ;;  %v1182_v3 = vld [vmem:[%s1729_s1 + $0x18] sm:$0xff]  ;;  %v1113_v5 = vmov 0   ;;  %vm343_vm4 = vcmask 130048   ;;  %v903_v51 = vlaneseq }
   0xc   : > { %v473_v2 = vld [vmem:[%s1729_s1] sm:$0xff]  ;;  %1076 = vmatprep.subr.bf16.mxu0 %v1100_v0  ;;  %1086 = vmatprep.subr.bf16.mxu1 %v1100_v0  ;;  %vm491_vm0 = vcmp.gt.s32.totalorder %v1174_v1, 0  ;;  %vm492_vm2 = vcmp.gt.s32.totalorder %v1182_v3, 0  ;;  %v474_v4 = vld [vmem:[%s1729_s1 + $0x8] sm:$0xff]  ;;  %v480_v13 = vld [vmem:[%s1729_s1 + $0x38] sm:$0xff]  ;;  %vm459_vm7 = vcmask 392192  }
   0xd   : > { %s1779_s28 = smov (!%p296_p3, %s1020_s28), 1  ;;  %vm489_vm1 = vcmp.gt.s32.totalorder %v473_v2, 0  ;;  %1077 = vmatpush3.bf16.msra.mxu0 %v1100_v0  ;;  %1087 = vmatpush3.bf16.msra.mxu1 %v1100_v0  ;;  %v499_v6 = vsel %vm491_vm0, 1, %v1113_v5  ;;  %vm490_vm3 = vcmp.gt.s32.totalorder %v474_v4, 0  ;;  %v478_v8 = vld [vmem:[%s1729_s1 + $0x28] sm:$0xff]  ;;  %v500_v9 = vsel %vm492_vm2, 1, %v1113_v5 }
   0xe   : > { %v497_v7 = vsel %vm489_vm1, 1, %v1113_v5  ;;  %s1061_s17 = sshll.u32 %s1779_s28, 5  ;;  %1099 = vset.pattern.permute.xlu1 %v1113_v5  ;;  %1098 = vset.pattern.permute.xlu0 %v1113_v5  ;;  %v477_v10 = vld [vmem:[%s1729_s1 + $0x20] sm:$0xff]  ;;  %v498_v12 = vsel %vm490_vm3, 1, %v1113_v5  ;;  %vm494_vm5 = vcmp.gt.s32.totalorder %v478_v8, 0  ;;  %v479_v15 = vld [vmem:[%s1729_s1 + $0x30] sm:$0xff] }
   0xf   : > { %s300_s22 = scalar_lea.vmem %s1728_s0, %s1061_s17  ;;  %512 = vperm.xlu1 %1099, %v499_v6   ;;  %506 = vperm.xlu0 %1098, %v497_v7   ;;  %vm493_vm6 = vcmp.gt.s32.totalorder %v477_v10, 0  ;;  %v502_v18 = vsel %vm494_vm5, 1, %v1113_v5  ;;  %vm496_vm8 = vcmp.gt.s32.totalorder %v480_v13, 0  ;;  %vm495_vm9 = vcmp.gt.s32.totalorder %v479_v15, 0  ;;  %v1038_v41 = vld [vmem:[%s1731_s3] ss:$0 sm:$0xff]  ;;  %s1608_s19 = scalar_lea.vmem %s1736_s8, %s1061_s17 }
  0x10   : > { %v1101_v11 = vld [vmem:[%s300_s22] sm:$0xff]   ;;  %v1102_v14 = vld [vmem:[%s300_s22 + $0x10] sm:$0xff]   ;;  %v1103_v16 = vld [vmem:[%s300_s22 + $0x8] sm:$0xff]   ;;  %v501_v19 = vsel %vm493_vm6, 1, %v1113_v5  ;;  %v1114_v20 = vmov 0.0   ;;  %vm461_vm10 = vcmask 385024  }
  0x11   : > { %1078 = vmatprep.mubr.msk.bf16.mxu0 %vm343_vm4, %v1101_v11  ;;  %1082 = vmatprep.mubr.msk.bf16.mxu1 %vm343_vm4, %v1102_v14  ;;  %v1104_v17 = vld [vmem:[%s300_s22 + $0x18] sm:$0xff]   ;;  %460 = vst.msk [vmem:[#allocation2] sm:$0xff] %vm459_vm7, %v1114_v20  ;;  %463 = vst.msk [vmem:[#allocation2 + $0x49] sm:$0xff] %vm459_vm7, %v1114_v20  ;;  %v504_v21 = vsel %vm496_vm8, 1, %v1113_v5  ;;  %v503_v22 = vsel %vm495_vm9, 1, %v1113_v5  ;;  %vm604_vm11 = vcmp.lt.s32.totalorder %v474_v4, 7 }
  0x12   : > { %1079 = vmatmul.mubr.msk.bf16.vlgmr.msra.gmra.mxu0 %vm343_vm4, %v1103_v16  ;;  %1083 = vmatmul.mubr.msk.bf16.vlgmr.msra.gmra.mxu1 %vm343_vm4, %v1104_v17  ;;  %462 = vst.msk [vmem:[#allocation2 + $0x8] sm:$0x1] %vm461_vm10, %v1114_v20  ;;  %464 = vst.msk [vmem:[#allocation2 + $0x51] sm:$0x1] %vm461_vm10, %v1114_v20  ;;  %vm603_vm12 = vcmp.lt.s32.totalorder %v473_v2, 7  ;;  %v612_v23 = vsel %vm604_vm11, 1, %v1113_v5 }
  0x13   : > { %515 = vperm.xlu1 %1099, %v500_v9   ;;  %509 = vperm.xlu0 %1098, %v498_v12   ;;  %v611_v24 = vsel %vm603_vm12, 1, %v1113_v5  ;;  %vm606_vm13 = vcmp.lt.s32.totalorder %v1182_v3, 7  ;;  %vm605_vm14 = vcmp.lt.s32.totalorder %v1174_v1, 7  ;;  %vm608_vm15 = vcmp.lt.s32.totalorder %v478_v8, 7  ;;  %v1039_v44 = vld [vmem:[%s1732_s4] ss:$0 sm:$0xff] }
  0x14   : > { %v614_v25 = vsel %vm606_vm13, 1, %v1113_v5  ;;  %v613_v26 = vsel %vm605_vm14, 1, %v1113_v5  ;;  %vm607_vm0 = vcmp.lt.s32.totalorder %v477_v10, 7  ;;  %v616_v27 = vsel %vm608_vm15, 1, %v1113_v5  ;;  %v1271_v49 = vld [vmem:[%s1733_s5 + $0x1] ss:$0 sm:$0xff] }
  0x15   : > { %v615_v28 = vsel %vm607_vm0, 1, %v1113_v5  ;;  %vm610_vm1 = vcmp.lt.s32.totalorder %v480_v13, 7  ;;  %vm609_vm2 = vcmp.lt.s32.totalorder %v479_v15, 7  ;;  %v1278_v57 = vld [vmem:[%s1733_s5] ss:$0 sm:$0xff]  ;;  %v1288_v4 = vand.u32 127, %v903_v51 }
  0x16   : > { %v618_v29 = vsel %vm610_vm1, 1, %v1113_v5  ;;  %v617_v30 = vsel %vm609_vm2, 1, %v1113_v5 }
  0x17   : > { %521 = vperm.xlu1 %1099, %v502_v18   ;;  %518 = vperm.xlu0 %1098, %v501_v19   ;;  %1752 = vst [vmem:[#allocation4_spill] sm:$0xff] %v1288_v4  ;;  %vm905_vm5 = vcmp.lt.s32.totalorder %v1288_v4, 24 }
  0x18   : > { %v481_v45 = vld [vmem:[#allocation2] sm:$0xff] }
  0x19   : > { %v566_v50 = vld [vmem:[#allocation2 + $0x1] sm:$0xff]  ;;  %v835_v15 = vld [vmem:[#allocation2 + $0x4a] sm:$0xff] }
  0x1a   : > { %v579_v62 = vmul.f32 %v1271_v49, %v566_v50 }
  0x1b   : > { %527 = vperm.xlu1 %1099, %v504_v21   ;;  %524 = vperm.xlu0 %1098, %v503_v22   ;;  %v813_v21 = vld [vmem:[#allocation2 + $0x49] sm:$0xff]  ;;  %v1311_v22 = vld [vmem:[%s1733_s5 + $0x8] ss:$0 sm:$0xff] }
  0x1f   : > { %623 = vperm.xlu1 %1099, %v612_v23   ;;  %620 = vperm.xlu0 %1098, %v611_v24  }
  0x23   : > { %629 = vperm.xlu1 %1099, %v614_v25   ;;  %626 = vperm.xlu0 %1098, %v613_v26  }
  0x27   : > { %635 = vperm.xlu1 %1099, %v616_v27   ;;  %632 = vperm.xlu0 %1098, %v615_v28   ;;  %v1328_v28 = vld [vmem:[%s1733_s5 + $0x7] ss:$0 sm:$0xff] }
  0x2b   : > { %641 = vperm.xlu1 %1099, %v618_v29   ;;  %638 = vperm.xlu0 %1098, %v617_v30   ;;  %v1339_v29 = vld [vmem:[%s1733_s5 + $0x4] ss:$0 sm:$0xff] }
  0x8a   : > { %v1237_v31 = vpop.permute.xlu1 %512  ;;  %v1243_v34 = vpop.permute.xlu0 %506 }
  0x8b   : > { %vm529_vm3 = vcmp.eq.s32.totalorder %v1243_v34, 1  ;;  %vm531_vm6 = vcmp.eq.s32.totalorder %v1237_v31, 1 }
  0x8c   : > { %v537_v58 = vsel %vm529_vm3, %v481_v45, 0.0 }
  0x8d   : > { %v550_v9 = vmul.f32 %v1278_v57, %v537_v58 }
  0x8e   : > { %v1239_v32 = vpop.permute.xlu1 %515  ;;  %v1247_v36 = vpop.permute.xlu0 %509 }
  0x8f   : > { %v587_v25 = vadd.f32 %v579_v62, %v550_v9  ;;  %vm532_vm8 = vcmp.eq.s32.totalorder %v1239_v32, 1  ;;  %vm530_vm9 = vcmp.eq.s32.totalorder %v1247_v36, 1 }
  0x92   : > { %v1241_v33 = vpop.permute.xlu1 %521  ;;  %v1251_v38 = vpop.permute.xlu0 %518 }
  0x93   : > { %vm533_vm10 = vcmp.eq.s32.totalorder %v1251_v38, 1 }
  0x96   : > { %v1245_v35 = vpop.permute.xlu1 %527  ;;  %v1255_v40 = vpop.permute.xlu0 %524 }
  0x97   : > { %vm536_vm0 = vcmp.eq.s32.totalorder %v1245_v35, 1  ;;  %vm535_vm1 = vcmp.eq.s32.totalorder %v1255_v40, 1 }
  0x9a   : > { %v1249_v37 = vpop.permute.xlu1 %623  ;;  %v1266_v46 = vpop.permute.xlu0 %620 }
  0x9b   : > { %vm644_vm11 = vcmp.eq.s32.totalorder %v1249_v37, 1  ;;  %vm643_vm12 = vcmp.eq.s32.totalorder %v1266_v46, 1 }
  0x9e   : > { %v1253_v39 = vpop.permute.xlu1 %629  ;;  %v1294_v10 = vpop.permute.xlu0 %626 }
  0x9f   : > { %vm646_vm13 = vcmp.eq.s32.totalorder %v1253_v39, 1  ;;  %vm645_vm14 = vcmp.eq.s32.totalorder %v1294_v10, 1 }
  0xa2   : > { %v1260_v42 = vpop.permute.xlu1 %635 }
  0xa3   : > { %vm648_vm2 = vcmp.eq.s32.totalorder %v1260_v42, 1 }
  0xa6   : > { %v1285_v63 = vpop.permute.xlu1 %641 }
  0xa7   : > { %vm650_vm4 = vcmp.eq.s32.totalorder %v1285_v63, 1 }
  0xa8   : > { %v843_v26 = vsel %vm650_vm4, %v835_v15, 0.0 }
  0xd2   : > { %v1080_v43 = vpop.f32.mrf.mxu0  ;;  %v1084_v48 = vpop.f32.mrf.mxu1 }
  0xd3   : > { %v430_v47 = vmul.f32 %v1080_v43, %v1038_v41  ;;  %v434_v52 = vmul.f32 %v1084_v48, %v1038_v41  ;;  %v1349_v43 = vpop.permute.xlu0 %632  ;;  %v1364_v48 = vld [vmem:[%s1733_s5 + $0x2] ss:$0 sm:$0xff] }
  0xd4   : > { %v390_v53 = vpop.f32.mrf.mxu0  ;;  %v406_v56 = vpop.f32.mrf.mxu1  ;;  %1758 = vst [vmem:[#allocation10_spill] sm:$0xff] %v1349_v43  ;;  %vm647_vm15 = vcmp.eq.s32.totalorder %v1349_v43, 1 }
  0xd5   : > { %v1273_v54 = vadd.f32 %v1039_v44, %v430_v47  ;;  %v428_v55 = vmul.f32 %v1038_v41, %v390_v53  ;;  %v1282_v59 = vadd.f32 %v1039_v44, %v434_v52  ;;  %v432_v60 = vmul.f32 %v1038_v41, %v406_v56  ;;  %v1377_v53 = vld [vmem:[%s1733_s5 + $0x3] ss:$0 sm:$0xff] }
  0xd6   : > { %v1081_v61 = vpop.f32.mrf.mxu0  ;;  %v1085_v3 = vpop.f32.mrf.mxu1 }
  0xd7   : > { %1751 = vst [vmem:[#allocation3_spill] sm:$0xff] %v1282_v59  ;;  %v453_v0 = vmax.f32 %v1273_v54, 0.0  ;;  %v443_v1 = vadd.f32 %v1039_v44, %v428_v55  ;;  %v431_v2 = vmul.f32 %v1081_v61, %v1038_v41  ;;  %v1741_v5 = vmax.f32 %v1282_v59, 0.0 }
  0xd8   : > { %v1291_v6 = vadd.f32 %v1039_v44, %v432_v60  ;;  %v435_v7 = vmul.f32 %v1085_v3, %v1038_v41  ;;  %v393_v8 = vpop.f32.mrf.mxu0  ;;  %v409_v14 = vpop.f32.mrf.mxu1 }
  0xd9   : > { %467 = vst.msk [vmem:[#allocation2 + $0x19] sm:$0xff] %vm459_vm7, %v453_v0  ;;  %v451_v11 = vmax.f32 %v443_v1, 0.0  ;;  %v1297_v12 = vadd.f32 %v1039_v44, %v431_v2  ;;  %v429_v13 = vmul.f32 %v1038_v41, %v393_v8  ;;  %471 = vst.msk [vmem:[#allocation2 + $0x39] sm:$0xff] %vm459_vm7, %v1741_v5  ;;  %v433_v18 = vmul.f32 %v1038_v41, %v409_v14 }
  0xda   : > { %1753 = vst [vmem:[#allocation5_spill] sm:$0xff] %v1291_v6  ;;  %v1740_v16 = vmax.f32 %v1291_v6, 0.0  ;;  %v1304_v17 = vadd.f32 %v1039_v44, %v435_v7  ;;  %v1343_v41 = vmul.f32 %v1328_v28, %v813_v21  ;;  %v1359_v47 = vsel %vm905_vm5, %v453_v0, 0.0 }
  0xdb   : > { %1754 = vst [vmem:[#allocation6_spill] sm:$0xff] %v1297_v12  ;;  %465 = vst.msk [vmem:[#allocation2 + $0x9] sm:$0xff] %vm459_vm7, %v451_v11  ;;  %v1739_v19 = vmax.f32 %v1297_v12, 0.0  ;;  %v444_v20 = vadd.f32 %v1039_v44, %v429_v13  ;;  %v1317_v24 = vadd.f32 %v1039_v44, %v433_v18  ;;  %v1355_v44 = vmul.f32 %v1311_v22, %v843_v26 }
  0xdc   : > { %1755 = vst [vmem:[#allocation7_spill] sm:$0xff] %v1304_v17  ;;  %469 = vst.msk [vmem:[#allocation2 + $0x29] sm:$0xff] %vm459_vm7, %v1740_v16  ;;  %v1738_v23 = vmax.f32 %v1304_v17, 0.0  ;;  %v1371_v51 = vsel %vm905_vm5, %v451_v11, 0.0 }
  0xdd   : > { %1756 = vst [vmem:[#allocation8_spill] sm:$0xff] %v1317_v24  ;;  %468 = vst.msk [vmem:[#allocation2 + $0x21] sm:$0xff] %vm459_vm7, %v1739_v19  ;;  %v452_v27 = vmax.f32 %v444_v20, 0.0  ;;  %v1737_v30 = vmax.f32 %v1317_v24, 0.0 }
  0xde   : > { %472 = vst.msk [vmem:[#allocation2 + $0x41] sm:$0xff] %vm459_vm7, %v1738_v23  ;;  %1757 = vst [vmem:[#allocation9_spill] sm:$0xff] %v1343_v41 }
  0xdf   : > { %466 = vst.msk [vmem:[#allocation2 + $0x11] sm:$0xff] %vm459_vm7, %v452_v27  ;;  %1759 = vst [vmem:[#allocation11_spill] sm:$0xff] %v1355_v44  ;;  %v1384_v55 = vsel %vm905_vm5, %v452_v27, 0.0 }
  0xe0   : > { %v569_v45 = vld [vmem:[#allocation2 + $0x19] sm:$0xff]  ;;  %470 = vst.msk [vmem:[#allocation2 + $0x31] sm:$0xff] %vm459_vm7, %v1737_v30  ;;  %vm534_vm7 = vcmp.eq.s32.totalorder %v1241_v33, 1 }
  0xe1   : > { %v573_v50 = vld [vmem:[#allocation2 + $0x39] sm:$0xff]  ;;  %v582_v52 = vmul.f32 %v1271_v49, %v569_v45  ;;  %v1380_v54 = vmul.f32 %v1339_v29, %v569_v45  ;;  %v1387_v61 = vmul.f32 %v1328_v28, %v569_v45 }
  0xe2   : > { %v595_v56 = vld [vmem:[#allocation2 + $0x2] sm:$0xff]  ;;  %v1390_v62 = vmul.f32 %v1271_v49, %v573_v50  ;;  %v1393_v0 = vmul.f32 %v1339_v29, %v573_v50  ;;  %v1396_v1 = vmul.f32 %v1328_v28, %v573_v50 }
  0xe3   : > { %v680_v58 = vld [vmem:[#allocation2 + $0x8] sm:$0xff]  ;;  %v651_v2 = vsel %vm643_vm12, %v595_v56, 0.0 }
  0xe4   : > { %v567_v60 = vld [vmem:[#allocation2 + $0x9] sm:$0xff]  ;;  %1760 = vst [vmem:[#allocation12_spill] sm:$0xff] %v1393_v0  ;;  %1761 = vst [vmem:[#allocation13_spill] sm:$0xff] %v1396_v1  ;;  %v538_v3 = vsel %vm530_vm9, %v680_v58, 0.0  ;;  %v688_v8 = vsel %vm529_vm3, %v680_v58, 0.0  ;;  %v1405_v9 = vld [vmem:[#allocation2 + $0x20] sm:$0xff]  ;;  %v664_v15 = vmul.f32 %v1364_v48, %v651_v2 }
  0xe5   : > { %v580_v7 = vmul.f32 %v1271_v49, %v567_v60  ;;  %v1407_v11 = vld [vmem:[#allocation2 + $0x21] sm:$0xff]  ;;  %v551_v14 = vmul.f32 %v1278_v57, %v538_v3  ;;  %v701_v18 = vmul.f32 %v1377_v53, %v688_v8  ;;  %v730_v20 = vmul.f32 %v1339_v29, %v567_v60 }
  0xe6   : > { %v1409_v13 = vld [vmem:[#allocation2 + $0x22] sm:$0xff]  ;;  %v541_v21 = vsel %vm533_vm10, %v1405_v9, 0.0  ;;  %v1420_v26 = vmul.f32 %v1271_v49, %v1407_v11  ;;  %v1427_v45 = vld [vmem:[#allocation2 + $0x1a] sm:$0xff]  ;;  %v691_v50 = vsel %vm532_vm8, %v1405_v9, 0.0  ;;  %v483_v58 = vld [vmem:[#allocation2 + $0x10] sm:$0xff]  ;;  %v672_v30 = vadd.f32 %v664_v15, %v587_v25 }
  0xe7   : > { %v1425_v27 = vsel %vm647_vm15, %v1409_v13, 0.0  ;;  %v1433_v56 = vmul.f32 %v1278_v57, %v541_v21  ;;  %v484_v60 = vld [vmem:[#allocation2 + $0x18] sm:$0xff]  ;;  %v588_v3 = vadd.f32 %v580_v7, %v551_v14  ;;  %v654_v8 = vsel %vm646_vm13, %v1427_v45, 0.0  ;;  %v596_v16 = vld [vmem:[#allocation2 + $0xa] sm:$0xff] }
  0xe8   : > { %v1435_v2 = vld [vmem:[#allocation2 + $0x11] sm:$0xff]  ;;  %v539_v23 = vsel %vm531_vm6, %v483_v58, 0.0  ;;  %v540_v19 = vsel %vm532_vm8, %v484_v60, 0.0  ;;  %v667_v24 = vmul.f32 %v1364_v48, %v654_v8  ;;  %v652_v25 = vsel %vm644_vm11, %v596_v16, 0.0  ;;  %v1765_v39 = vld [vmem:[#allocation9_spill] sm:$0xff] }
  0xe9   : > { %v581_v21 = vmul.f32 %v1271_v49, %v1435_v2  ;;  %v597_v5 = vld [vmem:[#allocation2 + $0x12] sm:$0xff]  ;;  %v552_v7 = vmul.f32 %v1278_v57, %v539_v23  ;;  %v553_v14 = vmul.f32 %v1278_v57, %v540_v19  ;;  %v665_v17 = vmul.f32 %v1364_v48, %v652_v25 }
  0xea   : > { %v653_v15 = vsel %vm645_vm14, %v597_v5, 0.0  ;;  %v689_v6 = vsel %vm530_vm9, %v483_v58, 0.0  ;;  %v690_v8 = vsel %vm531_vm6, %v484_v60, 0.0  ;;  %v704_v41 = vmul.f32 %v1377_v53, %v691_v50 }
  0xeb   : > { %v666_v12 = vmul.f32 %v1364_v48, %v653_v15  ;;  %v589_v4 = vadd.f32 %v581_v21, %v552_v7  ;;  %v590_v23 = vadd.f32 %v582_v52, %v553_v14  ;;  %v702_v19 = vmul.f32 %v1377_v53, %v689_v6  ;;  %v1471_v6 = vld [vmem:[%s1733_s5 + $0x5] ss:$0 sm:$0xff]  ;;  %v1490_v7 = vpop.permute.xlu0 %638 }
  0xec   : > { %v703_v59 = vmul.f32 %v1377_v53, %v690_v8  ;;  %v673_v44 = vadd.f32 %v665_v17, %v588_v3  ;;  %v709_v1 = vadd.f32 %v701_v18, %v672_v30  ;;  %v731_v25 = vmul.f32 %v1339_v29, %v1435_v2 }
  0xed   : > { %v674_v15 = vadd.f32 %v666_v12, %v589_v4  ;;  %v675_v0 = vadd.f32 %v667_v24, %v590_v23  ;;  %v733_v43 = vmul.f32 %v1339_v29, %v1407_v11  ;;  %v754_v21 = vsel %vm643_vm12, %v596_v16, 0.0  ;;  %v1481_v12 = vld [vmem:[#allocation2 + $0x28] sm:$0xff] }
  0xee   : > { %v710_v17 = vadd.f32 %v702_v19, %v673_v44  ;;  %v738_v52 = vadd.f32 %v730_v20, %v709_v1  ;;  %v755_v30 = vsel %vm644_vm11, %v597_v5, 0.0  ;;  %v756_v4 = vsel %vm645_vm14, %v1427_v45, 0.0 }
  0xef   : > { %v711_v16 = vadd.f32 %v703_v59, %v674_v15  ;;  %v712_v24 = vadd.f32 %v704_v41, %v675_v0  ;;  %v757_v44 = vsel %vm646_vm13, %v1409_v13, 0.0  ;;  %v767_v1 = vmul.f32 %v1471_v6, %v754_v21  ;;  %v1498_v0 = vld [vmem:[%s1733_s5 + $0x6] ss:$0 sm:$0xff] }
  0xf0   : > { %v739_v18 = vadd.f32 %v731_v25, %v710_v17  ;;  %v768_v20 = vmul.f32 %v1471_v6, %v755_v30  ;;  %v769_v50 = vmul.f32 %v1471_v6, %v756_v4  ;;  %v770_v3 = vmul.f32 %v1471_v6, %v757_v44  ;;  %v1523_v30 = vld [vmem:[#allocation2 + $0x30] sm:$0xff]  ;;  %v1525_v4 = vld [vmem:[#allocation2 + $0x38] sm:$0xff] }
  0xf1   : > { %v740_v14 = vadd.f32 %v1380_v54, %v711_v16  ;;  %v741_v8 = vadd.f32 %v733_v43, %v712_v24  ;;  %v775_v59 = vadd.f32 %v767_v1, %v738_v52  ;;  %v784_v41 = vsel %vm529_vm3, %v483_v58, 0.0  ;;  %v1538_v1 = vld [vmem:[#allocation2 + $0x31] sm:$0xff] }
  0xf2   : > { %v776_v23 = vadd.f32 %v768_v20, %v739_v18  ;;  %v785_v19 = vsel %vm530_vm9, %v484_v60, 0.0  ;;  %v786_v54 = vsel %vm531_vm6, %v1405_v9, 0.0  ;;  %v787_v34 = vsel %vm532_vm8, %v1481_v12, 0.0  ;;  %v1543_v20 = vld [vmem:[%s1734_s6] ss:$0 sm:$0xff] }
  0xf3   : > { %v777_v43 = vadd.f32 %v769_v50, %v740_v14  ;;  %v778_v58 = vadd.f32 %v770_v3, %v741_v8  ;;  %v797_v25 = vmul.f32 %v1498_v0, %v784_v41  ;;  %v798_v15 = vmul.f32 %v1498_v0, %v785_v19  ;;  %v1554_v50 = vld [vmem:[#allocation2 + $0x2a] sm:$0xff] }
  0xf4   : > { %vm649_vm3 = vcmp.eq.s32.totalorder %v1490_v7, 1  ;;  %v799_v21 = vmul.f32 %v1498_v0, %v786_v54  ;;  %v800_v36 = vmul.f32 %v1498_v0, %v787_v34  ;;  %v819_v31 = vmul.f32 %v1328_v28, %v1435_v2 }
  0xf5   : > { %v821_v9 = vmul.f32 %v1328_v28, %v1407_v11  ;;  %v805_v32 = vadd.f32 %v797_v25, %v775_v59  ;;  %v806_v60 = vadd.f32 %v798_v15, %v776_v23  ;;  %v836_v17 = vsel %vm643_vm12, %v597_v5, 0.0  ;;  %v1561_v23 = vld [vmem:[%s1735_s7] ss:$0 sm:$0xff] }
  0xf6   : > { %v837_v52 = vsel %vm644_vm11, %v1427_v45, 0.0  ;;  %v807_v16 = vadd.f32 %v799_v21, %v777_v43  ;;  %v1527_v24 = vadd.f32 %v800_v36, %v778_v58  ;;  %v838_v11 = vsel %vm645_vm14, %v1409_v13, 0.0  ;;  %v1536_v45 = vld [vmem:[#allocation2 + $0x29] sm:$0xff]  ;;  %v1568_v43 = vld [vmem:[#allocation2 + $0x32] sm:$0xff]  ;;  %v1570_v58 = vld [vmem:[#allocation2 + $0x3a] sm:$0xff] }
  0xf7   : > { %v849_v2 = vmul.f32 %v1311_v22, %v836_v17  ;;  %v827_v44 = vadd.f32 %v819_v31, %v805_v32  ;;  %v828_v46 = vadd.f32 %v1387_v61, %v806_v60  ;;  %v850_v5 = vmul.f32 %v1311_v22, %v837_v52 }
  0xf8   : > { %v851_v37 = vmul.f32 %v1311_v22, %v838_v11  ;;  %v829_v18 = vadd.f32 %v821_v9, %v807_v16  ;;  %v542_v10 = vsel %vm534_vm7, %v1481_v12, 0.0  ;;  %v543_v61 = vsel %vm535_vm1, %v1523_v30, 0.0 }
  0xf9   : > { %v544_v13 = vsel %vm536_vm0, %v1525_v4, 0.0  ;;  %v857_v3 = vadd.f32 %v849_v2, %v827_v44  ;;  %v858_v14 = vadd.f32 %v850_v5, %v828_v46  ;;  %v555_v8 = vmul.f32 %v1278_v57, %v542_v10  ;;  %v687_v46 = vld [vmem:[#allocation2 + $0x40] sm:$0xff] }
  0xfa   : > { %v556_v59 = vmul.f32 %v1278_v57, %v543_v61  ;;  %v859_v41 = vadd.f32 %v851_v37, %v829_v18  ;;  %vm956_vm6 = vcmask 388096   ;;  %v557_v19 = vmul.f32 %v1278_v57, %v544_v13 }
  0xfb   : > { %v584_v54 = vmul.f32 %v1271_v49, %v1536_v45  ;;  %v585_v34 = vmul.f32 %v1271_v49, %v1538_v1  ;;  %v872_v25 = vmul.f32 %v1543_v20, %v857_v3  ;;  %v873_v15 = vmul.f32 %v1543_v20, %v858_v14 }
  0xfc   : > { %v591_v21 = vadd.f32 %v1420_v26, %v1433_v56  ;;  %v656_v57 = vsel %vm648_vm2, %v1554_v50, 0.0  ;;  %v874_v36 = vmul.f32 %v1543_v20, %v859_v41  ;;  %v594_v49 = vadd.f32 %v1390_v62, %v557_v19 }
  0xfd   : > { %v592_v31 = vadd.f32 %v584_v54, %v555_v8  ;;  %v593_v9 = vadd.f32 %v585_v34, %v556_v59  ;;  %v887_v32 = vadd.f32 %v1561_v23, %v872_v25  ;;  %v888_v60 = vadd.f32 %v1561_v23, %v873_v15  ;;  %v724_v8 = vld [vmem:[#allocation2 + $0x41] sm:$0xff] }
  0xfe   : > { %v657_v17 = vsel %vm649_vm3, %v1568_v43, 0.0  ;;  %v658_v26 = vsel %vm650_vm4, %v1570_v58, 0.0  ;;  %v889_v56 = vadd.f32 %v1561_v23, %v874_v36  ;;  %v668_v52 = vmul.f32 %v1364_v48, %v1425_v27 }
  0xff   : > { %v669_v62 = vmul.f32 %v1364_v48, %v656_v57  ;;  %v670_v16 = vmul.f32 %v1364_v48, %v657_v17  ;;  %v895_v11 = vmax.f32 %v887_v32, 0.0  ;;  %v896_v2 = vmax.f32 %v888_v60, 0.0 }
 0x100   : > { %v671_v44 = vmul.f32 %v1364_v48, %v658_v26  ;;  %v692_v5 = vsel %vm533_vm10, %v1481_v12, 0.0  ;;  %v897_v37 = vmax.f32 %v889_v56, 0.0  ;;  %v676_v18 = vadd.f32 %v668_v52, %v591_v21  ;;  %v753_v21 = vld [vmem:[#allocation2 + $0x42] sm:$0xff] }
 0x101   : > { %v677_v10 = vadd.f32 %v669_v62, %v592_v31  ;;  %v678_v61 = vadd.f32 %v670_v16, %v593_v9  ;;  %v916_v27 = vadd.f32 %v1371_v51, %v895_v11  ;;  %v917_v13 = vadd.f32 %v1384_v55, %v896_v2  ;;  %v783_v26 = vld [vmem:[#allocation2 + $0x48] sm:$0xff]  ;;  %v1763_v52 = vld [vmem:[#allocation12_spill] sm:$0xff] }
 0x102   : > { %v679_v3 = vadd.f32 %v671_v44, %v594_v49  ;;  %v693_v14 = vsel %vm534_vm7, %v1523_v30, 0.0  ;;  %v918_v48 = vadd.f32 %v1359_v47, %v897_v37  ;;  %v694_v51 = vsel %vm535_vm1, %v1525_v4, 0.0 }
 0x103   : > { %v695_v55 = vsel %vm536_vm0, %v687_v46, 0.0  ;;  %v705_v12 = vmul.f32 %v1377_v53, %v692_v5  ;;  %v1063_v59 = vpack.c.bf16 %v916_v27, %v916_v27  ;;  %v1064_v41 = vpack.c.bf16 %v917_v13, %v917_v13 }
 0x104   : > { %v706_v19 = vmul.f32 %v1377_v53, %v693_v14  ;;  %v707_v54 = vmul.f32 %v1377_v53, %v694_v51  ;;  %v1065_v34 = vpack.c.bf16 %v918_v48, %v918_v48  ;;  %v708_v47 = vmul.f32 %v1377_v53, %v695_v55 }
 0x105   : > { %v713_v25 = vadd.f32 %v705_v12, %v676_v18  ;;  %v734_v15 = vmul.f32 %v1339_v29, %v1536_v45  ;;  %957 = vst.msk [vmem:[%s1608_s19] sm:$0xf] %vm956_vm6, %v1063_v59  ;;  %958 = vst.msk [vmem:[%s1608_s19 + $0x4] sm:$0xf] %vm956_vm6, %v1064_v41  ;;  %v735_v31 = vmul.f32 %v1339_v29, %v1538_v1  ;;  %v758_v60 = vsel %vm647_vm15, %v1554_v50, 0.0 }
 0x106   : > { %v714_v57 = vadd.f32 %v706_v19, %v677_v10  ;;  %v715_v36 = vadd.f32 %v707_v54, %v678_v61  ;;  %v737_v9 = vmul.f32 %v1339_v29, %v724_v8  ;;  %959 = vst.msk [vmem:[%s1608_s19 + $0x8] sm:$0xf] %vm956_vm6, %v1065_v34  ;;  %v716_v49 = vadd.f32 %v708_v47, %v679_v3 }
 0x107   : > { %v742_v53 = vadd.f32 %v734_v15, %v713_v25  ;;  %v759_v17 = vsel %vm648_vm2, %v1568_v43, 0.0  ;;  %v760_v29 = vsel %vm649_vm3, %v1570_v58, 0.0  ;;  %v761_v16 = vsel %vm650_vm4, %v753_v21, 0.0  ;;  %v1766_v25 = vld [vmem:[#allocation11_spill] sm:$0xff] }
 0x108   : > { %v743_v56 = vadd.f32 %v735_v31, %v714_v57  ;;  %v744_v62 = vadd.f32 %v1763_v52, %v715_v36  ;;  %v745_v11 = vadd.f32 %v737_v9, %v716_v49  ;;  %v771_v2 = vmul.f32 %v1471_v6, %v758_v60  ;;  %v1767_v60 = vld [vmem:[#allocation3_spill] sm:$0xff]  ;;  %v1770_v52 = vld [vmem:[#allocation5_spill] sm:$0xff] }
 0x109   : > { %v772_v44 = vmul.f32 %v1471_v6, %v759_v17  ;;  %v773_v5 = vmul.f32 %v1471_v6, %v760_v29  ;;  %v774_v37 = vmul.f32 %v1471_v6, %v761_v16  ;;  %v788_v18 = vsel %vm533_vm10, %v1523_v30, 0.0 }
 0x10a   : > { %v789_v10 = vsel %vm534_vm7, %v1525_v4, 0.0  ;;  %v790_v63 = vsel %vm535_vm1, %v687_v46, 0.0  ;;  %v779_v61 = vadd.f32 %v771_v2, %v742_v53  ;;  %v791_v3 = vsel %vm536_vm0, %v783_v26, 0.0 }
 0x10b   : > { %v780_v27 = vadd.f32 %v772_v44, %v743_v56  ;;  %v781_v13 = vadd.f32 %v773_v5, %v744_v62  ;;  %v782_v14 = vadd.f32 %v774_v37, %v745_v11  ;;  %v801_v6 = vmul.f32 %v1498_v0, %v788_v18  ;;  %v1772_v5 = vld [vmem:[#allocation6_spill] sm:$0xff] }
 0x10c   : > { %v802_v48 = vmul.f32 %v1498_v0, %v789_v10  ;;  %v803_v38 = vmul.f32 %v1498_v0, %v790_v63  ;;  %v804_v30 = vmul.f32 %v1498_v0, %v791_v3  ;;  %v822_v33 = vmul.f32 %v1328_v28, %v1536_v45  ;;  %v1774_v10 = vld [vmem:[#allocation7_spill] sm:$0xff] }
 0x10d   : > { %v823_v40 = vmul.f32 %v1328_v28, %v1538_v1  ;;  %v825_v4 = vmul.f32 %v1328_v28, %v724_v8  ;;  %v809_v46 = vadd.f32 %v801_v6, %v779_v61  ;;  %v839_v55 = vsel %vm646_vm13, %v1554_v50, 0.0  ;;  %v1764_v28 = vld [vmem:[#allocation13_spill] sm:$0xff] }
 0x10e   : > { %v810_v35 = vadd.f32 %v802_v48, %v780_v27  ;;  %v811_v51 = vadd.f32 %v803_v38, %v781_v13  ;;  %v812_v12 = vadd.f32 %v804_v30, %v782_v14  ;;  %v830_v59 = vadd.f32 %v822_v33, %v1527_v24 }
 0x10f   : > { %v840_v0 = vsel %vm647_vm15, %v1568_v43, 0.0  ;;  %v841_v45 = vsel %vm648_vm2, %v1570_v58, 0.0  ;;  %v831_v1 = vadd.f32 %v823_v40, %v809_v46  ;;  %v842_v19 = vsel %vm649_vm3, %v753_v21, 0.0 }
 0x110   : > { %v832_v8 = vadd.f32 %v1764_v28, %v810_v35  ;;  %v833_v41 = vadd.f32 %v825_v4, %v811_v51  ;;  %v834_v50 = vadd.f32 %v1765_v39, %v812_v12  ;;  %v852_v54 = vmul.f32 %v1311_v22, %v839_v55 }
 0x111   : > { %v853_v24 = vmul.f32 %v1311_v22, %v840_v0  ;;  %v854_v34 = vmul.f32 %v1311_v22, %v841_v45  ;;  %v855_v43 = vmul.f32 %v1311_v22, %v842_v19  ;;  %v1768_v17 = vmax.f32 %v1767_v60, 0.0 }
 0x112   : > { %v860_v47 = vadd.f32 %v852_v54, %v830_v59  ;;  %v864_v15 = vadd.f32 %v1766_v25, %v834_v50  ;;  %v1771_v62 = vmax.f32 %v1770_v52, 0.0  ;;  %v1773_v37 = vmax.f32 %v1772_v5, 0.0 }
 0x113   : > { %v861_v42 = vadd.f32 %v853_v24, %v831_v1  ;;  %v862_v58 = vadd.f32 %v854_v34, %v832_v8  ;;  %v863_v57 = vadd.f32 %v855_v43, %v833_v41  ;;  %v914_v56 = vsel %vm905_vm5, %v1768_v17, 0.0 }
 0x114   : > { %v875_v36 = vmul.f32 %v1543_v20, %v860_v47  ;;  %v879_v31 = vmul.f32 %v1543_v20, %v864_v15  ;;  %v912_v29 = vsel %vm905_vm5, %v1771_v62, 0.0  ;;  %v911_v18 = vsel %vm905_vm5, %v1773_v37, 0.0 }
 0x115   : > { %v876_v7 = vmul.f32 %v1543_v20, %v861_v42  ;;  %v877_v21 = vmul.f32 %v1543_v20, %v862_v58  ;;  %v878_v9 = vmul.f32 %v1543_v20, %v863_v57  ;;  %v1775_v63 = vmax.f32 %v1774_v10, 0.0 }
 0x116   : > { %v890_v49 = vadd.f32 %v1561_v23, %v875_v36  ;;  %v894_v32 = vadd.f32 %v1561_v23, %v879_v31 }
 0x117   : > { %v891_v22 = vadd.f32 %v1561_v23, %v876_v7  ;;  %v892_v53 = vadd.f32 %v1561_v23, %v877_v21  ;;  %v893_v20 = vadd.f32 %v1561_v23, %v878_v9  ;;  %v915_v61 = vsel %vm905_vm5, %v1775_v63, 0.0  ;;  %v1776_v23 = vld [vmem:[#allocation8_spill] sm:$0xff] }
 0x118   : > { %v898_v16 = vmax.f32 %v890_v49, 0.0  ;;  %v902_v44 = vmax.f32 %v894_v32, 0.0  ;;  %v1777_v13 = vmax.f32 %v1776_v23, 0.0 }
 0x119   : > { %v899_v11 = vmax.f32 %v891_v22, 0.0  ;;  %v900_v2 = vmax.f32 %v892_v53, 0.0  ;;  %v901_v27 = vmax.f32 %v893_v20, 0.0 }
 0x11a   : > { %v913_v3 = vsel %vm905_vm5, %v1777_v13, 0.0  ;;  %v919_v14 = vadd.f32 %v911_v18, %v898_v16  ;;  %v923_v38 = vadd.f32 %v915_v61, %v902_v44 }
 0x11b   : > { %v920_v6 = vadd.f32 %v912_v29, %v899_v11  ;;  %v921_v48 = vadd.f32 %v913_v3, %v900_v2  ;;  %v922_v30 = vadd.f32 %v914_v56, %v901_v27 }
 0x11c   : > { %v1066_v33 = vpack.c.bf16 %v919_v14, %v919_v14  ;;  %v1070_v46 = vpack.c.bf16 %v923_v38, %v923_v38 }
 0x11d   : > { %v1067_v40 = vpack.c.bf16 %v920_v6, %v920_v6  ;;  %v1068_v4 = vpack.c.bf16 %v921_v48, %v921_v48  ;;  %v1069_v35 = vpack.c.bf16 %v922_v30, %v922_v30 }
 0x11e   : > { %960 = vst.msk [vmem:[%s1608_s19 + $0xc] sm:$0xf] %vm956_vm6, %v1066_v33  ;;  %964 = vst.msk [vmem:[%s1608_s19 + $0x1c] sm:$0xf] %vm956_vm6, %v1070_v46 }
 0x11f   : > { %961 = vst.msk [vmem:[%s1608_s19 + $0x10] sm:$0xf] %vm956_vm6, %v1067_v40  ;;  %962 = vst.msk [vmem:[%s1608_s19 + $0x14] sm:$0xf] %vm956_vm6, %v1068_v4 }
 0x120   : > { %963 = vst.msk [vmem:[%s1608_s19 + $0x18] sm:$0xf] %vm956_vm6, %v1069_v35 }
 0x121 PF: > { %s18_s27 = sadd.s32 1, %s1111_s27  }
 0x122   : > { %p15_p4 = scmp.ge.s32.totalorder %s18_s27, 4  }
 0x124   :  { %17 = sbr.rel (!%p15_p4) target bundleno = 1 (0x1), region = 82 }

// kernel: _lambda_.19
= control target key start
LH: loop header
LB: loop body
LE: loop exit
PB: predicated region body
PF: predicated region fallthrough
CT: control target
= control target key end

     0   :  { %s759_s24 = smov 0   ;;  %s894_s0 = inlined_call_operand.vmem [shape: bf16[2,5,5,48], index: 0, kind: input, shape index: {}]   ;;  %s895_s1 = inlined_call_operand.vmem [shape: bf16[2,5,5,48], index: 1, kind: input, shape index: {}]   ;;  %s896_s2 = inlined_call_operand.vmem [shape: bf16[2,5,5,48], index: 2, kind: input, shape index: {}]   ;;  %s897_s3 = inlined_call_operand.vmem [shape: bf16[2,5,5,48], index: 3, kind: input, shape index: {}]   ;;  %s898_s4 = inlined_call_operand.vmem [shape: f32[9,48], index: 4, kind: input, shape index: {}]   ;;  %s899_s5 = inlined_call_operand.vmem [shape: f32[1,48], index: 5, kind: input, shape index: {}]   ;;  %s900_s6 = inlined_call_operand.vmem [shape: f32[1,48], index: 6, kind: input, shape index: {}]   ;;  %s901_s7 = inlined_call_operand.vmem [shape: bf16[2,4,4,48], index: 7, kind: output, shape index: {}]  }
   0x1 LB: > { %s677_s25 = sadd.s32 4294967295, %s717_s24   ;;  %p681_p0 = scmp.ge.s32.totalorder %s717_s24, 1  ;;  %s717_s24 = sphi %s759_s24, %s17_s24  }
   0x2   : > { %p267_p1 = scmp.lt.s32.totalorder %s717_s24, 3 }
   0x4   : > { %p268_p2 = pnand %p681_p0, %p267_p1 }
   0x5   : > { %p314_p3 = scmp.lt.s32.totalorder (!%p268_p2), %s677_s25, 1 }
   0x6   : > { %271 = sbr.rel (%p268_p2) target bundleno = 60 (0x3c), region = 48 }
   0xb   : > { %s903_s25 = smov (!%p314_p3, %s677_s25), 1  ;;  %vm349_vm0 = vcmask 389120   ;;  %v688_v36 = vld [vmem:[%s898_s4] ss:$0 sm:$0xff]  ;;  %v689_v37 = vld [vmem:[%s898_s4 + $0x1] ss:$0 sm:$0xff] }
   0xc   : > { %s702_s26 = smul.u32 20, %s903_s25  ;;  %v829_v39 = vld [vmem:[%s898_s4 + $0x2] ss:$0 sm:$0xff]  ;;  %v834_v43 = vld [vmem:[%s898_s4 + $0x3] ss:$0 sm:$0xff]  ;;  %s701_s17 = sshll.u32 %s903_s25, 3 }
   0xd   : > { %v839_v46 = vld [vmem:[%s898_s4 + $0x4] ss:$0 sm:$0xff]  ;;  %s338_s20 = scalar_lea.vmem %s901_s7, %s701_s17  ;;  %vm581_vm1 = vcmask 386048  }
   0xe   : > { %s773_s29 = scalar_lea.vmem %s894_s0, %s702_s26  ;;  %s778_s9 = scalar_lea.vmem %s895_s1, %s702_s26 }
   0xf   : > { %v339_v0 = vld [vmem:[%s773_s29] sm:$0x7]  ;;  %v340_v1 = vld [vmem:[%s773_s29 + $0x4] sm:$0x7]  ;;  %v341_v2 = vld [vmem:[%s773_s29 + $0x8] sm:$0x7]  ;;  %s328_s12 = scalar_lea.vmem %s896_s2, %s702_s26  ;;  %s792_s15 = scalar_lea.vmem %s897_s3, %s702_s26 }
  0x10   : > { %v344_v3 = vunpack.c.l.bf16 %v339_v0  ;;  %v345_v4 = vunpack.c.l.bf16 %v340_v1  ;;  %v346_v5 = vunpack.c.l.bf16 %v341_v2  ;;  %v342_v6 = vld [vmem:[%s773_s29 + $0xc] sm:$0x7]  ;;  %v355_v7 = vld [vmem:[%s778_s9] sm:$0x7]  ;;  %v356_v8 = vld [vmem:[%s778_s9 + $0x4] sm:$0x7] }
  0x11   : > { %v347_v9 = vunpack.c.l.bf16 %v342_v6  ;;  %v360_v10 = vunpack.c.l.bf16 %v355_v7  ;;  %v361_v11 = vunpack.c.l.bf16 %v356_v8  ;;  %v357_v12 = vld [vmem:[%s778_s9 + $0x8] sm:$0x7]  ;;  %v358_v13 = vld [vmem:[%s778_s9 + $0xc] sm:$0x7]  ;;  %v370_v14 = vld [vmem:[%s328_s12] sm:$0x7] }
  0x12   : > { %350 = vst.msk [vmem:[#allocation2] sm:$0x1f] %vm349_vm0, %v344_v3  ;;  %351 = vst.msk [vmem:[#allocation2 + $0x8] sm:$0x1f] %vm349_vm0, %v345_v4  ;;  %v362_v15 = vunpack.c.l.bf16 %v357_v12  ;;  %v363_v16 = vunpack.c.l.bf16 %v358_v13  ;;  %v375_v17 = vunpack.c.l.bf16 %v370_v14  ;;  %v371_v18 = vld [vmem:[%s328_s12 + $0x4] sm:$0x7] }
  0x13   : > { %352 = vst.msk [vmem:[#allocation2 + $0x10] sm:$0x1f] %vm349_vm0, %v346_v5  ;;  %v372_v19 = vld [vmem:[%s328_s12 + $0x8] sm:$0x7]  ;;  %v373_v20 = vld [vmem:[%s328_s12 + $0xc] sm:$0x7]  ;;  %v376_v21 = vunpack.c.l.bf16 %v371_v18 }
  0x14   : > { %353 = vst.msk [vmem:[#allocation2 + $0x18] sm:$0x1f] %vm349_vm0, %v347_v9  ;;  %365 = vst.msk [vmem:[#allocation3] sm:$0x1f] %vm349_vm0, %v360_v10  ;;  %v377_v22 = vunpack.c.l.bf16 %v372_v19  ;;  %v378_v23 = vunpack.c.l.bf16 %v373_v20  ;;  %v385_v24 = vld [vmem:[%s792_s15] sm:$0x7] }
  0x15   : > { %366 = vst.msk [vmem:[#allocation3 + $0x8] sm:$0x1f] %vm349_vm0, %v361_v11  ;;  %v386_v25 = vld [vmem:[%s792_s15 + $0x4] sm:$0x7]  ;;  %v387_v26 = vld [vmem:[%s792_s15 + $0x8] sm:$0x7]  ;;  %v390_v27 = vunpack.c.l.bf16 %v385_v24 }
  0x16   : > { %367 = vst.msk [vmem:[#allocation3 + $0x10] sm:$0x1f] %vm349_vm0, %v362_v15  ;;  %368 = vst.msk [vmem:[#allocation3 + $0x18] sm:$0x1f] %vm349_vm0, %v363_v16  ;;  %v391_v28 = vunpack.c.l.bf16 %v386_v25  ;;  %v392_v29 = vunpack.c.l.bf16 %v387_v26  ;;  %v388_v30 = vld [vmem:[%s792_s15 + $0xc] sm:$0x7] }
  0x17   : > { %380 = vst.msk [vmem:[#allocation4] sm:$0x1f] %vm349_vm0, %v375_v17  ;;  %v343_v31 = vld [vmem:[%s773_s29 + $0x10] sm:$0x7]  ;;  %381 = vst.msk [vmem:[#allocation4 + $0x8] sm:$0x1f] %vm349_vm0, %v376_v21  ;;  %v393_v33 = vunpack.c.l.bf16 %v388_v30 }
  0x18   : > { %v359_v32 = vld [vmem:[%s778_s9 + $0x10] sm:$0x7]  ;;  %382 = vst.msk [vmem:[#allocation4 + $0x10] sm:$0x1f] %vm349_vm0, %v377_v22  ;;  %383 = vst.msk [vmem:[#allocation4 + $0x18] sm:$0x1f] %vm349_vm0, %v378_v23  ;;  %v348_v34 = vunpack.c.l.bf16 %v343_v31 }
  0x19   : > { %v364_v35 = vunpack.c.l.bf16 %v359_v32  ;;  %395 = vst.msk [vmem:[#allocation5] sm:$0x1f] %vm349_vm0, %v390_v27  ;;  %396 = vst.msk [vmem:[#allocation5 + $0x8] sm:$0x1f] %vm349_vm0, %v391_v28  ;;  %v400_v38 = vld [vmem:[#allocation2] sm:$0xf] }
  0x1a   : > { %397 = vst.msk [vmem:[#allocation5 + $0x10] sm:$0x1f] %vm349_vm0, %v392_v29  ;;  %398 = vst.msk [vmem:[#allocation5 + $0x18] sm:$0x1f] %vm349_vm0, %v393_v33  ;;  %v409_v40 = vmul.f32 %v688_v36, %v400_v38  ;;  %v434_v42 = vld [vmem:[#allocation2 + $0x1] sm:$0xf] }
  0x1b   : > { %354 = vst.msk [vmem:[#allocation2 + $0x20] sm:$0x1f] %vm349_vm0, %v348_v34  ;;  %369 = vst.msk [vmem:[#allocation3 + $0x20] sm:$0x1f] %vm349_vm0, %v364_v35  ;;  %v417_v41 = vld [vmem:[#allocation3] sm:$0xf]  ;;  %v443_v53 = vmul.f32 %v829_v39, %v434_v42 }
  0x1c   : > { %v426_v44 = vmul.f32 %v689_v37, %v417_v41  ;;  %v401_v47 = vld [vmem:[#allocation2 + $0x8] sm:$0xf]  ;;  %v418_v49 = vld [vmem:[#allocation3 + $0x8] sm:$0xf]  ;;  %v849_v3 = vld [vmem:[%s898_s4 + $0x5] ss:$0 sm:$0xff] }
  0x1d   : > { %v410_v48 = vmul.f32 %v688_v36, %v401_v47  ;;  %v435_v50 = vld [vmem:[#allocation2 + $0x9] sm:$0xf]  ;;  %v427_v56 = vmul.f32 %v689_v37, %v418_v49  ;;  %v402_v63 = vld [vmem:[#allocation2 + $0x10] sm:$0xf]  ;;  %v419_v0 = vld [vmem:[#allocation3 + $0x10] sm:$0xf] }
  0x1e   : > { %v451_v45 = vld [vmem:[#allocation4] sm:$0xf]  ;;  %v452_v51 = vld [vmem:[#allocation4 + $0x8] sm:$0xf]  ;;  %v430_v52 = vadd.f32 %v426_v44, %v409_v40  ;;  %v444_v57 = vmul.f32 %v829_v39, %v435_v50  ;;  %v411_v4 = vmul.f32 %v688_v36, %v402_v63  ;;  %v428_v5 = vmul.f32 %v689_v37, %v419_v0  ;;  %v503_v8 = vld [vmem:[#allocation2 + $0x8] sm:$0xf] }
  0x1f   : > { %v460_v54 = vmul.f32 %v834_v43, %v451_v45  ;;  %v431_v61 = vadd.f32 %v427_v56, %v410_v48  ;;  %v461_v62 = vmul.f32 %v834_v43, %v452_v51  ;;  %v436_v1 = vld [vmem:[#allocation2 + $0x11] sm:$0xf]  ;;  %v453_v6 = vld [vmem:[#allocation4 + $0x10] sm:$0xf]  ;;  %v854_v9 = vld [vmem:[%s898_s4 + $0x6] ss:$0 sm:$0xff] }
  0x20   : > { %v468_v55 = vld [vmem:[#allocation5] sm:$0xf]  ;;  %v469_v58 = vld [vmem:[#allocation5 + $0x8] sm:$0xf]  ;;  %v447_v59 = vadd.f32 %v443_v53, %v430_v52  ;;  %v485_v2 = vld [vmem:[#allocation4 + $0x1] sm:$0xf]  ;;  %v432_v14 = vadd.f32 %v428_v5, %v411_v4  ;;  %v445_v15 = vmul.f32 %v829_v39, %v436_v1  ;;  %v462_v16 = vmul.f32 %v834_v43, %v453_v6 }
  0x21   : > { %v477_v60 = vmul.f32 %v839_v46, %v468_v55  ;;  %v448_v10 = vadd.f32 %v444_v57, %v431_v61  ;;  %v478_v11 = vmul.f32 %v839_v46, %v469_v58  ;;  %v470_v12 = vld [vmem:[#allocation5 + $0x10] sm:$0xf]  ;;  %v486_v13 = vld [vmem:[#allocation4 + $0x9] sm:$0xf]  ;;  %v420_v18 = vld [vmem:[#allocation3 + $0x18] sm:$0xf]  ;;  %v494_v20 = vmul.f32 %v849_v3, %v485_v2 }
  0x22   : > { %v464_v7 = vadd.f32 %v460_v54, %v447_v59  ;;  %v403_v17 = vld [vmem:[#allocation2 + $0x18] sm:$0xf]  ;;  %v454_v24 = vld [vmem:[#allocation4 + $0x18] sm:$0xf]  ;;  %v521_v25 = vld [vmem:[#allocation3 + $0x8] sm:$0xf]  ;;  %v449_v28 = vadd.f32 %v445_v15, %v432_v14  ;;  %v479_v29 = vmul.f32 %v839_v46, %v470_v12  ;;  %v429_v30 = vmul.f32 %v689_v37, %v420_v18 }
  0x23   : > { %v465_v21 = vadd.f32 %v461_v62, %v448_v10  ;;  %v412_v22 = vmul.f32 %v688_v36, %v403_v17  ;;  %v437_v23 = vld [vmem:[#allocation2 + $0x19] sm:$0xf]  ;;  %v695_v26 = vld [vmem:[%s898_s4 + $0x7] ss:$0 sm:$0xff]  ;;  %v504_v27 = vld [vmem:[#allocation2 + $0x10] sm:$0xf]  ;;  %v512_v32 = vmul.f32 %v854_v9, %v503_v8  ;;  %v495_v34 = vmul.f32 %v849_v3, %v486_v13 }
  0x24   : > { %v481_v19 = vadd.f32 %v477_v60, %v464_v7  ;;  %v487_v35 = vld [vmem:[#allocation4 + $0x11] sm:$0xf]  ;;  %v471_v36 = vld [vmem:[#allocation5 + $0x18] sm:$0xf]  ;;  %v538_v38 = vld [vmem:[#allocation2 + $0x9] sm:$0xf]  ;;  %v466_v42 = vadd.f32 %v462_v16, %v449_v28  ;;  %v446_v45 = vmul.f32 %v829_v39, %v437_v23  ;;  %v463_v37 = vmul.f32 %v834_v43, %v454_v24 }
  0x25   : > { %v482_v33 = vadd.f32 %v478_v11, %v465_v21  ;;  %v696_v40 = vld [vmem:[%s898_s4 + $0x8] ss:$0 sm:$0xff]  ;;  %v522_v41 = vld [vmem:[#allocation3 + $0x10] sm:$0xf]  ;;  %v433_v44 = vadd.f32 %v429_v30, %v412_v22  ;;  %v530_v48 = vmul.f32 %v695_v26, %v521_v25  ;;  %v513_v50 = vmul.f32 %v854_v9, %v504_v27  ;;  %v539_v52 = vld [vmem:[#allocation2 + $0x11] sm:$0xf] }
  0x26   : > { %v498_v31 = vadd.f32 %v494_v20, %v481_v19  ;;  %v505_v51 = vld [vmem:[#allocation2 + $0x18] sm:$0xf]  ;;  %v483_v53 = vadd.f32 %v479_v29, %v466_v42  ;;  %v496_v54 = vmul.f32 %v849_v3, %v487_v35  ;;  %v523_v55 = vld [vmem:[#allocation3 + $0x18] sm:$0xf]  ;;  %v480_v57 = vmul.f32 %v839_v46, %v471_v36  ;;  %v488_v61 = vld [vmem:[#allocation4 + $0x19] sm:$0xf] }
  0x27   : > { %v499_v49 = vadd.f32 %v495_v34, %v482_v33  ;;  %v450_v56 = vadd.f32 %v446_v45, %v433_v44  ;;  %v547_v59 = vmul.f32 %v696_v40, %v538_v38  ;;  %v531_v39 = vmul.f32 %v695_v26, %v522_v41  ;;  %v506_v43 = vld [vmem:[#allocation2 + $0x20] sm:$0xf]  ;;  %v540_v46 = vld [vmem:[#allocation2 + $0x19] sm:$0xf]  ;;  %v524_v7 = vld [vmem:[#allocation3 + $0x20] sm:$0xf] }
  0x28   : > { %v516_v47 = vadd.f32 %v512_v32, %v498_v31  ;;  %v697_v62 = vld [vmem:[%s899_s5] ss:$0 sm:$0xff]  ;;  %v500_v63 = vadd.f32 %v496_v54, %v483_v53  ;;  %v514_v0 = vmul.f32 %v854_v9, %v505_v51  ;;  %v548_v5 = vmul.f32 %v696_v40, %v539_v52  ;;  %v541_v22 = vld [vmem:[#allocation2 + $0x21] sm:$0xf] }
  0x29   : > { %v517_v60 = vadd.f32 %v513_v50, %v499_v49  ;;  %v467_v1 = vadd.f32 %v463_v37, %v450_v56  ;;  %v532_v6 = vmul.f32 %v695_v26, %v523_v55  ;;  %v698_v8 = vld [vmem:[%s900_s6] ss:$0 sm:$0xff]  ;;  %v497_v12 = vmul.f32 %v849_v3, %v488_v61 }
  0x2a   : > { %v534_v58 = vadd.f32 %v530_v48, %v516_v47  ;;  %v518_v10 = vadd.f32 %v514_v0, %v500_v63  ;;  %v515_v13 = vmul.f32 %v854_v9, %v506_v43  ;;  %v549_v17 = vmul.f32 %v696_v40, %v540_v46 }
  0x2b   : > { %v535_v4 = vadd.f32 %v531_v39, %v517_v60  ;;  %v484_v11 = vadd.f32 %v480_v57, %v467_v1  ;;  %v533_v19 = vmul.f32 %v695_v26, %v524_v7  ;;  %v550_v28 = vmul.f32 %v696_v40, %v541_v22 }
  0x2c   : > { %v551_v2 = vadd.f32 %v547_v59, %v534_v58  ;;  %v536_v16 = vadd.f32 %v532_v6, %v518_v10 }
  0x2d   : > { %v552_v15 = vadd.f32 %v548_v5, %v535_v4  ;;  %v501_v18 = vadd.f32 %v497_v12, %v484_v11 }
  0x2e   : > { %v562_v14 = vmul.f32 %v697_v62, %v551_v2  ;;  %v553_v23 = vadd.f32 %v549_v17, %v536_v16 }
  0x2f   : > { %v563_v21 = vmul.f32 %v697_v62, %v552_v15  ;;  %v519_v24 = vadd.f32 %v515_v13, %v501_v18 }
  0x30   : > { %v573_v20 = vadd.f32 %v698_v8, %v562_v14  ;;  %v564_v9 = vmul.f32 %v697_v62, %v553_v23 }
  0x31   : > { %v574_v25 = vadd.f32 %v698_v8, %v563_v21  ;;  %v537_v27 = vadd.f32 %v533_v19, %v519_v24 }
  0x32   : > { %v577_v3 = vpack.c.bf16 %v573_v20, %v573_v20  ;;  %v575_v30 = vadd.f32 %v698_v8, %v564_v9 }
  0x33   : > { %v578_v29 = vpack.c.bf16 %v574_v25, %v574_v25  ;;  %v554_v26 = vadd.f32 %v550_v28, %v537_v27 }
  0x34   : > { %582 = vst.msk [vmem:[%s338_s20] sm:$0x3] %vm581_vm1, %v577_v3  ;;  %v579_v31 = vpack.c.bf16 %v575_v30, %v575_v30 }
  0x35   : > { %583 = vst.msk [vmem:[%s338_s20 + $0x2] sm:$0x3] %vm581_vm1, %v578_v29  ;;  %v565_v32 = vmul.f32 %v697_v62, %v554_v26 }
  0x36   : > { %584 = vst.msk [vmem:[%s338_s20 + $0x4] sm:$0x3] %vm581_vm1, %v579_v31 }
  0x37   : > { %v576_v33 = vadd.f32 %v698_v8, %v565_v32 }
  0x39   : > { %v580_v34 = vpack.c.bf16 %v576_v33, %v576_v33 }
  0x3b   : > { %585 = vst.msk [vmem:[%s338_s20 + $0x6] sm:$0x3] %vm581_vm1, %v580_v34 }
  0x3c PF: > { %s17_s24 = sadd.s32 1, %s717_s24  }
  0x3d   : > { %p14_p4 = scmp.ge.s32.totalorder %s17_s24, 4  }
  0x3f   :  { %16 = sbr.rel (!%p14_p4) target bundleno = 1 (0x1), region = 89 }

// kernel: _lambda_.21
= control target key start
LH: loop header
LB: loop body
LE: loop exit
PB: predicated region body
PF: predicated region fallthrough
CT: control target
= control target key end

     0   :  { %s1017_s21 = smov 0   ;;  %s1131_s0 = inlined_call_operand.vmem [shape: bf16[2,16,48], index: 0, kind: input, shape index: {}]   ;;  %s1132_s1 = inlined_call_operand.vmem [shape: s32[16,1], index: 1, kind: input, shape index: {}]   ;;  %s1133_s2 = inlined_call_operand.vmem [shape: bf16[48,24], index: 2, kind: input, shape index: {}]   ;;  %s1134_s3 = inlined_call_operand.vmem [shape: f32[1,24], index: 3, kind: input, shape index: {}, may-alias: {3,10}]   ;;  %s1135_s4 = inlined_call_operand.vmem [shape: f32[1,24], index: 4, kind: input, shape index: {}, may-alias: {4,11}]   ;;  %s1136_s5 = inlined_call_operand.vmem [shape: f32[9,24], index: 5, kind: input, shape index: {}]   ;;  %s1137_s6 = inlined_call_operand.vmem [shape: f32[1,24], index: 6, kind: input, shape index: {}]   ;;  %s1138_s7 = inlined_call_operand.vmem [shape: f32[1,24], index: 7, kind: input, shape index: {}]   ;;  %s1139_s8 = inlined_call_operand.vmem [shape: bf16[2,16,16], index: 8, kind: input, shape index: {}]   ;;  %s1140_s9 = inlined_call_operand.vmem [shape: bf16[16,24], index: 9, kind: input, shape index: {}]   ;;  %s1141_s10 = inlined_call_operand.vmem [shape: f32[1,24], index: 10, kind: input, shape index: {}, may-alias: {3,10}]   ;;  %s1142_s11 = inlined_call_operand.vmem [shape: f32[1,24], index: 11, kind: input, shape index: {}, may-alias: {4,11}]   ;;  %s1143_s12 = inlined_call_operand.vmem [shape: bf16[2,16,24], index: 12, kind: output, shape index: {}]  }
   0x1 LB: > { %s857_s22 = sadd.s32 4294967295, %s947_s21   ;;  %p861_p0 = scmp.ge.s32.totalorder %s947_s21, 1  ;;  %s947_s21 = sphi %s1017_s21, %s22_s21  }
   0x2   : > { %p372_p1 = scmp.lt.s32.totalorder %s947_s21, 3 }
   0x4   : > { %p373_p2 = pnand %p861_p0, %p372_p1 }
   0x5   : > { %p419_p3 = scmp.lt.s32.totalorder (!%p373_p2), %s857_s22, 1 }
   0x6   : > { %376 = sbr.rel (%p373_p2) target bundleno = 266 (0x10a), region = 68 }
   0xb   : > { %vm529_vm0 = vcmask 192512   ;;  %v949_v0 = vmov 0.0   ;;  %v935_v1 = vld [vmem:[%s1133_s2 + $0x10] sm:$0xff]   ;;  %vm950_vm1 = vmmov 0   ;;  %v936_v2 = vld [vmem:[%s1133_s2 + $0x8] sm:$0xff]   ;;  %s1145_s22 = smov (!%p419_p3, %s857_s22), 1 }
   0xc   : > { %906 = vmatprep.subr.bf16.mxu0 %v949_v0  ;;  %530 = vst.msk [vmem:[#allocation2] sm:$0x1f] %vm529_vm0, %v949_v0  ;;  %531 = vst.msk [vmem:[#allocation2 + $0x15] sm:$0x1f] %vm529_vm0, %v949_v0  ;;  %916 = vmatprep.subr.bf16.mxu1 %v949_v0  ;;  %v939_v3 = vld [vmem:[%s1140_s9] sm:$0xff]   ;;  %v536_v5 = vld [vmem:[%s1132_s1 + $0x8] sm:$0xff] }
   0xd   : > { %912 = vmatprep.mubr.msk.bf16.mxu0 %vm950_vm1, %v949_v0  ;;  %918 = vmatprep.mubr.msk.bf16.mxu1 %vm950_vm1, %v949_v0  ;;  %v535_v4 = vld [vmem:[%s1132_s1] sm:$0xff]  ;;  %v951_v6 = vmov 0   ;;  %vm540_vm4 = vcmp.gt.s32.totalorder %v536_v5, 0  ;;  %s1040_s15 = sshll.u32 %s1145_s22, 3  ;;  %vm576_vm5 = vcmp.lt.s32.totalorder %v536_v5, 3  ;;  %vm714_vm6 = vcmask 130048  }
   0xe   : > { %907 = vmatpush3.bf16.msra.mxu0 %v935_v1  ;;  %933 = vset.pattern.permute.xlu0 %v951_v6  ;;  %vm539_vm2 = vcmp.gt.s32.totalorder %v535_v4, 0  ;;  %vm575_vm3 = vcmp.lt.s32.totalorder %v535_v4, 3  ;;  %v937_v9 = vld [vmem:[%s1133_s2] sm:$0xff]   ;;  %s423_s20 = scalar_lea.vmem %s1131_s0, %s1040_s15  ;;  %s428_s22 = scalar_lea.vmem %s1139_s8, %s1040_s15  ;;  %v542_v10 = vsel %vm540_vm4, 1, %v951_v6  ;;  %v578_v12 = vsel %vm576_vm5, 1, %v951_v6 }
   0xf   : > { %908 = vmatprep.subr.bf16.mxu0 %v949_v0  ;;  %934 = vset.pattern.permute.xlu1 %v951_v6  ;;  %v541_v7 = vsel %vm539_vm2, 1, %v951_v6  ;;  %v577_v8 = vsel %vm575_vm3, 1, %v951_v6  ;;  %v940_v11 = vld [vmem:[%s428_s22] sm:$0xff]   ;;  %vm466_vm7 = vcmask 392192   ;;  %vm532_vm8 = vcmask 195584   ;;  %s433_s25 = scalar_lea.vmem %s1143_s12, %s1040_s15 }
  0x10   : > { %917 = vmatpush3.bf16.msra.mxu1 %v939_v3  ;;  %544 = vperm.xlu0 %933, %v541_v7   ;;  %v938_v13 = vld [vmem:[%s423_s20] sm:$0xff]   ;;  %vm787_vm14 = vcmask 191488  }
  0x11   : > { %580 = vperm.xlu1 %934, %v577_v8   ;;  %v873_v15 = vld [vmem:[%s1134_s3] ss:$0 sm:$0xff]  ;;  %v876_v29 = vld [vmem:[%s1136_s5 + $0x1] ss:$0 sm:$0xff]  ;;  %v877_v37 = vld [vmem:[%s1136_s5 + $0x2] ss:$0 sm:$0xff] }
  0x12   : > { %909 = vmatpush3.bf16.msra.mxu0 %v936_v2  ;;  %v874_v18 = vld [vmem:[%s1135_s4] ss:$0 sm:$0xff]  ;;  %v878_v42 = vld [vmem:[%s1136_s5 + $0x3] ss:$0 sm:$0xff]  ;;  %v879_v44 = vld [vmem:[%s1136_s5 + $0x4] ss:$0 sm:$0xff] }
  0x13   : > { %910 = vmatprep.subr.bf16.mxu0 %v949_v0  ;;  %919 = vmatmul.mubr.msk.bf16.vlgmr.msra.gmra.mxu1 %vm714_vm6, %v940_v11  ;;  %v875_v31 = vld [vmem:[%s1136_s5] ss:$0 sm:$0xff]  ;;  %v880_v57 = vld [vmem:[%s1136_s5 + $0x5] ss:$0 sm:$0xff]  ;;  %v881_v1 = vld [vmem:[%s1136_s5 + $0x6] ss:$0 sm:$0xff] }
  0x14   : > { %547 = vperm.xlu0 %933, %v542_v10  }
  0x15   : > { %583 = vperm.xlu1 %934, %v578_v12  }
  0x16   : > { %911 = vmatpush3.bf16.msra.mxu0 %v937_v9  ;;  %v882_v9 = vld [vmem:[%s1136_s5 + $0x7] ss:$0 sm:$0xff] }
  0x19   : > { %913 = vmatmul.mubr.msk.bf16.vlgmr.msra.gmra.mxu0 %vm466_vm7, %v938_v13  ;;  %v690_v13 = vlaneseq }
  0x8b   : > { %v545_v28 = vpop.permute.xlu0 %544 }
  0x8c   : > { %vm549_vm9 = vcmp.eq.s32.totalorder %v545_v28, 1  ;;  %v581_v30 = vpop.permute.xlu1 %580 }
  0x8d   : > { %vm585_vm10 = vcmp.eq.s32.totalorder %v581_v30, 1  ;;  %v884_v30 = vld [vmem:[%s1137_s6] ss:$0 sm:$0xff] }
  0x8f   : > { %v548_v39 = vpop.permute.xlu0 %547 }
  0x90   : > { %vm550_vm11 = vcmp.eq.s32.totalorder %v548_v39, 1  ;;  %v584_v50 = vpop.permute.xlu1 %583 }
  0x91   : > { %vm586_vm12 = vcmp.eq.s32.totalorder %v584_v50, 1 }
  0xd3   : > { %v1053_v14 = vpop.f32.mrf.mxu1 }
  0xd5   : > { %v920_v16 = vpop.f32.mrf.mxu1 }
  0xd7   : > { %v1061_v20 = vpop.f32.mrf.mxu1 }
  0xd9   : > { %v504_v17 = vpop.f32.mrf.mxu0  ;;  %v921_v23 = vpop.f32.mrf.mxu1 }
  0xda   : > { %v518_v19 = vmul.f32 %v873_v15, %v504_v17 }
  0xdb   : > { %v914_v21 = vpop.f32.mrf.mxu0 }
  0xdc   : > { %v1063_v22 = vadd.f32 %v874_v18, %v518_v19 }
  0xdd   : > { %v507_v24 = vpop.f32.mrf.mxu0 }
  0xde   : > { %533 = vst.msk [vmem:[#allocation2 + $0x5] sm:$0xff] %vm532_vm8, %v1063_v22  ;;  %v519_v25 = vmul.f32 %v873_v15, %v507_v24 }
  0xdf   : > { %v915_v26 = vpop.f32.mrf.mxu0 }
  0xe0   : > { %v1066_v27 = vadd.f32 %v874_v18, %v519_v25  ;;  %v883_v18 = vld [vmem:[%s1136_s5 + $0x8] ss:$0 sm:$0xff] }
  0xe2   : > { %534 = vst.msk [vmem:[#allocation2 + $0xd] sm:$0xff] %vm532_vm8, %v1066_v27 }
  0xe5   : > { %v537_v32 = vld [vmem:[#allocation2] sm:$0xff] }
  0xe6   : > { %v562_v33 = vld [vmem:[#allocation2 + $0x1] sm:$0xff]  ;;  %v551_v35 = vsel %vm549_vm9, %v537_v32, 0.0  ;;  %v889_v32 = vld [vmem:[%s1141_s10] ss:$0 sm:$0xff] }
  0xe7   : > { %v598_v34 = vld [vmem:[#allocation2 + $0x4] sm:$0xff]  ;;  %v569_v36 = vmul.f32 %v876_v29, %v562_v33  ;;  %v558_v40 = vmul.f32 %v875_v31, %v551_v35  ;;  %v691_v33 = vand.u32 127, %v690_v13 }
  0xe8   : > { %v573_v38 = vld [vmem:[#allocation2 + $0x2] sm:$0xff]  ;;  %v600_v43 = vsel %vm549_vm9, %v598_v34, 0.0 }
  0xe9   : > { %v587_v41 = vsel %vm585_vm10, %v573_v38, 0.0  ;;  %v571_v45 = vadd.f32 %v569_v36, %v558_v40  ;;  %v635_v46 = vld [vmem:[#allocation2 + $0x8] sm:$0xff]  ;;  %v607_v55 = vmul.f32 %v878_v42, %v600_v43  ;;  %v636_v11 = vld [vmem:[#allocation2 + $0x10] sm:$0xff]  ;;  %vm692_vm13 = vcmp.lt.s32.totalorder %v691_v33, 12 }
  0xea   : > { %v594_v47 = vmul.f32 %v877_v37, %v587_v41  ;;  %v622_v48 = vld [vmem:[#allocation2 + $0x6] sm:$0xff]  ;;  %v552_v53 = vsel %vm550_vm11, %v635_v46, 0.0  ;;  %v637_v2 = vsel %vm549_vm9, %v635_v46, 0.0  ;;  %v623_v5 = vld [vmem:[#allocation2 + $0xe] sm:$0xff]  ;;  %v638_v26 = vsel %vm550_vm11, %v636_v11, 0.0 }
  0xeb   : > { %v648_v49 = vld [vmem:[#allocation2 + $0x9] sm:$0xff]  ;;  %v624_v58 = vsel %vm585_vm10, %v622_v48, 0.0  ;;  %v559_v59 = vmul.f32 %v875_v31, %v552_v53  ;;  %v644_v15 = vmul.f32 %v881_v1, %v637_v2  ;;  %v625_v17 = vsel %vm586_vm12, %v623_v5, 0.0  ;;  %v660_v31 = vld [vmem:[#allocation2 + $0x12] sm:$0xff] }
  0xec   : > { %v611_v51 = vld [vmem:[#allocation2 + $0x5] sm:$0xff]  ;;  %v596_v56 = vadd.f32 %v594_v47, %v571_v45  ;;  %v570_v60 = vmul.f32 %v876_v29, %v648_v49  ;;  %v631_v7 = vmul.f32 %v880_v57, %v624_v58  ;;  %v612_v8 = vld [vmem:[#allocation2 + $0xd] sm:$0xff]  ;;  %v655_v25 = vmul.f32 %v882_v9, %v648_v49  ;;  %v890_v45 = vld [vmem:[%s1142_s11] ss:$0 sm:$0xff] }
  0xed   : > { %v659_v52 = vld [vmem:[#allocation2 + $0xa] sm:$0xff]  ;;  %v618_v62 = vmul.f32 %v879_v44, %v611_v51  ;;  %v619_v23 = vmul.f32 %v879_v44, %v612_v8  ;;  %v632_v29 = vmul.f32 %v880_v57, %v625_v17  ;;  %v662_v39 = vsel %vm586_vm12, %v660_v31, 0.0  ;;  %v885_v44 = vld [vmem:[%s1138_s7] ss:$0 sm:$0xff] }
  0xee   : > { %v599_v54 = vld [vmem:[#allocation2 + $0xc] sm:$0xff]  ;;  %v609_v61 = vadd.f32 %v607_v55, %v596_v56  ;;  %v588_v0 = vsel %vm586_vm12, %v659_v52, 0.0  ;;  %v572_v3 = vadd.f32 %v570_v60, %v559_v59  ;;  %v661_v19 = vsel %vm585_vm10, %v659_v52, 0.0 }
  0xef   : > { %v601_v63 = vsel %vm550_vm11, %v599_v54, 0.0  ;;  %v595_v4 = vmul.f32 %v877_v37, %v588_v0  ;;  %v668_v35 = vmul.f32 %v883_v18, %v661_v19  ;;  %v649_v36 = vld [vmem:[#allocation2 + $0x11] sm:$0xff]  ;;  %v645_v37 = vmul.f32 %v881_v1, %v638_v26 }
  0xf0   : > { %v620_v6 = vadd.f32 %v618_v62, %v609_v61  ;;  %v608_v10 = vmul.f32 %v878_v42, %v601_v63  ;;  %v766_v41 = vmul.f32 %v889_v32, %v1053_v14  ;;  %v656_v43 = vmul.f32 %v882_v9, %v649_v36 }
  0xf1   : > { %v597_v12 = vadd.f32 %v595_v4, %v572_v3  ;;  %v669_v48 = vmul.f32 %v883_v18, %v662_v39  ;;  %v695_v51 = vsel %vm692_vm13, %v1063_v22, 0.0  ;;  %v767_v54 = vmul.f32 %v889_v32, %v1061_v20 }
  0xf2   : > { %v633_v16 = vadd.f32 %v631_v7, %v620_v6  ;;  %v775_v50 = vadd.f32 %v890_v45, %v766_v41  ;;  %v696_v57 = vsel %vm692_vm13, %v1066_v27, 0.0 }
  0xf3   : > { %v610_v21 = vadd.f32 %v608_v10, %v597_v12  ;;  %v776_v60 = vadd.f32 %v890_v45, %v767_v54 }
  0xf4   : > { %v646_v24 = vadd.f32 %v644_v15, %v633_v16 }
  0xf5   : > { %v621_v28 = vadd.f32 %v619_v23, %v610_v21 }
  0xf6   : > { %v657_v34 = vadd.f32 %v655_v25, %v646_v24 }
  0xf7   : > { %v634_v38 = vadd.f32 %v632_v29, %v621_v28 }
  0xf8   : > { %v670_v40 = vadd.f32 %v668_v35, %v657_v34 }
  0xf9   : > { %v647_v42 = vadd.f32 %v645_v37, %v634_v38 }
  0xfa   : > { %v679_v46 = vmul.f32 %v884_v30, %v670_v40 }
  0xfb   : > { %v658_v47 = vadd.f32 %v656_v43, %v647_v42 }
  0xfc   : > { %v688_v49 = vadd.f32 %v885_v44, %v679_v46 }
  0xfd   : > { %v671_v14 = vadd.f32 %v669_v48, %v658_v47 }
  0xfe   : > { %v697_v52 = vadd.f32 %v695_v51, %v688_v49 }
  0xff   : > { %v680_v53 = vmul.f32 %v884_v30, %v671_v14 }
 0x100   : > { %v777_v55 = vadd.f32 %v775_v50, %v697_v52 }
 0x101   : > { %v689_v56 = vadd.f32 %v885_v44, %v680_v53 }
 0x102   : > { %v898_v58 = vpack.c.bf16 %v777_v55, %v777_v55 }
 0x103   : > { %v698_v59 = vadd.f32 %v696_v57, %v689_v56 }
 0x104   : > { %788 = vst.msk [vmem:[%s433_s25] sm:$0xf] %vm787_vm14, %v898_v58 }
 0x105   : > { %v778_v61 = vadd.f32 %v776_v60, %v698_v59 }
 0x107   : > { %v899_v22 = vpack.c.bf16 %v778_v61, %v778_v61 }
 0x109   : > { %789 = vst.msk [vmem:[%s433_s25 + $0x4] sm:$0xf] %vm787_vm14, %v899_v22 }
 0x10a PF: > { %s22_s21 = sadd.s32 1, %s947_s21  }
 0x10b   : > { %p19_p4 = scmp.ge.s32.totalorder %s22_s21, 4  }
 0x10d   :  { %21 = sbr.rel (!%p19_p4) target bundleno = 1 (0x1), region = 101 }

// kernel: _lambda_.22
= control target key start
LH: loop header
LB: loop body
LE: loop exit
PB: predicated region body
PF: predicated region fallthrough
CT: control target
= control target key end

     0   :  { %s750_s27 = smov 0   ;;  %s851_s0 = inlined_call_operand.vmem [shape: bf16[2,16,24], index: 0, kind: input, shape index: {}]   ;;  %s852_s1 = inlined_call_operand.vmem [shape: s32[16,1], index: 1, kind: input, shape index: {}]   ;;  %s853_s2 = inlined_call_operand.vmem [shape: bf16[24,72], index: 2, kind: input, shape index: {}]   ;;  %s854_s3 = inlined_call_operand.vmem [shape: f32[1,72], index: 3, kind: input, shape index: {}]   ;;  %s855_s4 = inlined_call_operand.vmem [shape: f32[1,72], index: 4, kind: input, shape index: {}]   ;;  %s856_s5 = inlined_call_operand.vmem [shape: f32[9,72], index: 5, kind: input, shape index: {}]   ;;  %s857_s6 = inlined_call_operand.vmem [shape: f32[1,72], index: 6, kind: input, shape index: {}]   ;;  %s858_s7 = inlined_call_operand.vmem [shape: f32[1,72], index: 7, kind: input, shape index: {}]   ;;  %s859_s8 = inlined_call_operand.vmem [shape: bf16[2,16,72], index: 8, kind: output, shape index: {}]  }
   0x1 LB: > { %s633_s28 = sadd.s32 4294967295, %s700_s27   ;;  %p637_p0 = scmp.ge.s32.totalorder %s700_s27, 1  ;;  %s700_s27 = sphi %s750_s27, %s18_s27  }
   0x2   : > { %p262_p1 = scmp.lt.s32.totalorder %s700_s27, 3 }
   0x4   : > { %p263_p2 = pnand %p637_p0, %p262_p1 }
   0x5   : > { %p296_p3 = scmp.lt.s32.totalorder (!%p263_p2), %s633_s28, 1 }
   0x6   : > { %266 = sbr.rel (%p263_p2) target bundleno = 263 (0x107), region = 52 }
   0xb   : > { %vm395_vm0 = vcmask 585728   ;;  %v691_v0 = vld [vmem:[%s853_s2 + $0x8] ss:$0 sps:$4 sm:$0xff]   ;;  %v702_v1 = vmov 0.0   ;;  %vm330_vm1 = vcmask 1043456   ;;  %v401_v3 = vld [vmem:[%s852_s1] sm:$0xff] }
   0xc   : > { %670 = vmatprep.subr.bf16.mxu0 %v702_v1  ;;  %396 = vst.msk [vmem:[#allocation2] sm:$0x1f] %vm395_vm0, %v702_v1  ;;  %397 = vst.msk [vmem:[#allocation2 + $0x15] sm:$0x1f] %vm395_vm0, %v702_v1  ;;  %v332_v2 = vsel %vm330_vm1, %v691_v0, 0  ;;  %v692_v4 = vld [vmem:[%s853_s2] sm:$0xff]  }
   0xd   : > { %671 = vmatpush3.bf16.msra.mxu0 %v332_v2  ;;  %vm703_vm2 = vmmov 0   ;;  %vm405_vm3 = vcmp.gt.s32.totalorder %v401_v3, 0  ;;  %vm441_vm4 = vcmp.lt.s32.totalorder %v401_v3, 3  ;;  %v402_v5 = vld [vmem:[%s852_s1 + $0x8] sm:$0xff]  ;;  %s861_s28 = smov (!%p296_p3, %s633_s28), 1  ;;  %v704_v6 = vmov 0  }
   0xe   : > { %674 = vmatprep.mubr.msk.bf16.mxu0 %vm703_vm2, %v702_v1  ;;  %672 = vmatprep.subr.bf16.mxu0 %v702_v1  ;;  %v407_v7 = vsel %vm405_vm3, 1, %v704_v6  ;;  %v443_v8 = vsel %vm441_vm4, 1, %v704_v6  ;;  %vm406_vm5 = vcmp.gt.s32.totalorder %v402_v5, 0  ;;  %vm442_vm6 = vcmp.lt.s32.totalorder %v402_v5, 3  ;;  %s663_s15 = sshll.u32 %s861_s28, 3 }
   0xf   : > { %689 = vset.pattern.permute.xlu0 %v704_v6  ;;  %690 = vset.pattern.permute.xlu1 %v704_v6  ;;  %v408_v9 = vsel %vm406_vm5, 1, %v704_v6  ;;  %s300_s18 = scalar_lea.vmem %s851_s0, %s663_s15  ;;  %vm326_vm7 = vcmask 195584   ;;  %v444_v10 = vsel %vm442_vm6, 1, %v704_v6  ;;  %v646_v12 = vld [vmem:[%s854_s3] ss:$0 sm:$0xff]  ;;  %vm398_vm8 = vcmask 588800   ;;  %s305_s30 = scalar_lea.vmem %s859_s8, %s663_s15 }
  0x10   : > { %410 = vperm.xlu0 %689, %v407_v7   ;;  %446 = vperm.xlu1 %690, %v443_v8   ;;  %v693_v11 = vld [vmem:[%s300_s18] sm:$0xff]   ;;  %vm575_vm14 = vcmask 584704  }
  0x11   : > { %673 = vmatpush3.bf16.msra.mxu0 %v692_v4  ;;  %v647_v14 = vld [vmem:[%s855_s4] ss:$0 sm:$0xff]  ;;  %v649_v25 = vld [vmem:[%s856_s5 + $0x1] ss:$0 sm:$0xff]  ;;  %v650_v33 = vld [vmem:[%s856_s5 + $0x2] ss:$0 sm:$0xff] }
  0x12   : > { %v648_v27 = vld [vmem:[%s856_s5] ss:$0 sm:$0xff]  ;;  %v651_v38 = vld [vmem:[%s856_s5 + $0x3] ss:$0 sm:$0xff]  ;;  %v652_v40 = vld [vmem:[%s856_s5 + $0x4] ss:$0 sm:$0xff] }
  0x13   : > { %v653_v53 = vld [vmem:[%s856_s5 + $0x5] ss:$0 sm:$0xff]  ;;  %v654_v61 = vld [vmem:[%s856_s5 + $0x6] ss:$0 sm:$0xff]  ;;  %v655_v5 = vld [vmem:[%s856_s5 + $0x7] ss:$0 sm:$0xff] }
  0x14   : > { %413 = vperm.xlu0 %689, %v408_v9   ;;  %675 = vmatmul.mubr.msk.bf16.vlgmr.msra.gmra.mxu0 %vm326_vm7, %v693_v11 }
  0x15   : > { %449 = vperm.xlu1 %690, %v444_v10  }
  0x8b   : > { %v411_v24 = vpop.permute.xlu0 %410  ;;  %v447_v26 = vpop.permute.xlu1 %446 }
  0x8c   : > { %vm415_vm9 = vcmp.eq.s32.totalorder %v411_v24, 1  ;;  %vm451_vm10 = vcmp.eq.s32.totalorder %v447_v26, 1 }
  0x8f   : > { %v414_v35 = vpop.permute.xlu0 %413 }
  0x90   : > { %vm416_vm11 = vcmp.eq.s32.totalorder %v414_v35, 1  ;;  %v450_v46 = vpop.permute.xlu1 %449  ;;  %v658_v35 = vld [vmem:[%s858_s7] ss:$0 sm:$0xff] }
  0x91   : > { %vm452_vm12 = vcmp.eq.s32.totalorder %v450_v46, 1 }
  0xd4   : > { %v368_v13 = vpop.f32.mrf.mxu0 }
  0xd5   : > { %v382_v15 = vmul.f32 %v646_v12, %v368_v13 }
  0xd6   : > { %v676_v16 = vpop.f32.mrf.mxu0 }
  0xd7   : > { %v784_v17 = vadd.f32 %v647_v14, %v382_v15  ;;  %v558_v16 = vlaneseq }
  0xd8   : > { %v371_v18 = vpop.f32.mrf.mxu0 }
  0xd9   : > { %v393_v19 = vmax.f32 %v784_v17, 0.0  ;;  %v383_v20 = vmul.f32 %v646_v12, %v371_v18  ;;  %v656_v12 = vld [vmem:[%s856_s5 + $0x8] ss:$0 sm:$0xff] }
  0xda   : > { %v677_v21 = vpop.f32.mrf.mxu0 }
  0xdb   : > { %399 = vst.msk [vmem:[#allocation2 + $0x5] sm:$0xff] %vm398_vm8, %v393_v19  ;;  %v789_v22 = vadd.f32 %v647_v14, %v383_v20 }
  0xdd   : > { %v394_v23 = vmax.f32 %v789_v22, 0.0 }
  0xdf   : > { %400 = vst.msk [vmem:[#allocation2 + $0xd] sm:$0xff] %vm398_vm8, %v394_v23 }
  0xe2   : > { %v403_v28 = vld [vmem:[#allocation2] sm:$0xff] }
  0xe3   : > { %v428_v29 = vld [vmem:[#allocation2 + $0x1] sm:$0xff]  ;;  %v417_v31 = vsel %vm415_vm9, %v403_v28, 0.0 }
  0xe4   : > { %v464_v30 = vld [vmem:[#allocation2 + $0x4] sm:$0xff]  ;;  %v435_v32 = vmul.f32 %v649_v25, %v428_v29  ;;  %v424_v36 = vmul.f32 %v648_v27, %v417_v31  ;;  %v657_v31 = vld [vmem:[%s857_s6] ss:$0 sm:$0xff] }
  0xe5   : > { %v439_v34 = vld [vmem:[#allocation2 + $0x2] sm:$0xff]  ;;  %v466_v39 = vsel %vm415_vm9, %v464_v30, 0.0 }
  0xe6   : > { %v453_v37 = vsel %vm451_vm10, %v439_v34, 0.0  ;;  %v437_v41 = vadd.f32 %v435_v32, %v424_v36  ;;  %v501_v42 = vld [vmem:[#allocation2 + $0x8] sm:$0xff]  ;;  %v473_v51 = vmul.f32 %v651_v38, %v466_v39  ;;  %v502_v7 = vld [vmem:[#allocation2 + $0x10] sm:$0xff] }
  0xe7   : > { %v460_v43 = vmul.f32 %v650_v33, %v453_v37  ;;  %v488_v44 = vld [vmem:[#allocation2 + $0x6] sm:$0xff]  ;;  %v418_v49 = vsel %vm416_vm11, %v501_v42, 0.0  ;;  %v503_v62 = vsel %vm415_vm9, %v501_v42, 0.0  ;;  %v489_v1 = vld [vmem:[#allocation2 + $0xe] sm:$0xff]  ;;  %v504_v21 = vsel %vm416_vm11, %v502_v7, 0.0 }
  0xe8   : > { %v514_v45 = vld [vmem:[#allocation2 + $0x9] sm:$0xff]  ;;  %v490_v54 = vsel %vm451_vm10, %v488_v44, 0.0  ;;  %v425_v55 = vmul.f32 %v648_v27, %v418_v49  ;;  %v510_v9 = vmul.f32 %v654_v61, %v503_v62  ;;  %v491_v11 = vsel %vm452_vm12, %v489_v1, 0.0  ;;  %v526_v27 = vld [vmem:[#allocation2 + $0x12] sm:$0xff] }
  0xe9   : > { %v477_v47 = vld [vmem:[#allocation2 + $0x5] sm:$0xff]  ;;  %v462_v52 = vadd.f32 %v460_v43, %v437_v41  ;;  %v436_v56 = vmul.f32 %v649_v25, %v514_v45  ;;  %v497_v3 = vmul.f32 %v653_v53, %v490_v54  ;;  %v478_v4 = vld [vmem:[#allocation2 + $0xd] sm:$0xff]  ;;  %v521_v20 = vmul.f32 %v655_v5, %v514_v45 }
  0xea   : > { %v525_v48 = vld [vmem:[#allocation2 + $0xa] sm:$0xff]  ;;  %v484_v58 = vmul.f32 %v652_v40, %v477_v47  ;;  %v485_v15 = vmul.f32 %v652_v40, %v478_v4  ;;  %v498_v25 = vmul.f32 %v653_v53, %v491_v11  ;;  %v511_v32 = vmul.f32 %v654_v61, %v504_v21 }
  0xeb   : > { %v465_v50 = vld [vmem:[#allocation2 + $0xc] sm:$0xff]  ;;  %v475_v57 = vadd.f32 %v473_v51, %v462_v52  ;;  %v454_v60 = vsel %vm452_vm12, %v525_v48, 0.0  ;;  %v438_v63 = vadd.f32 %v436_v56, %v425_v55  ;;  %v527_v13 = vsel %vm451_vm10, %v525_v48, 0.0 }
  0xec   : > { %v467_v59 = vsel %vm416_vm11, %v465_v50, 0.0  ;;  %v461_v0 = vmul.f32 %v650_v33, %v454_v60  ;;  %v534_v29 = vmul.f32 %v656_v12, %v527_v13  ;;  %v515_v30 = vld [vmem:[#allocation2 + $0x11] sm:$0xff]  ;;  %v559_v33 = vand.u32 127, %v558_v16 }
  0xed   : > { %v486_v2 = vadd.f32 %v484_v58, %v475_v57  ;;  %v474_v6 = vmul.f32 %v651_v38, %v467_v59  ;;  %v528_v36 = vsel %vm452_vm12, %v526_v27, 0.0  ;;  %v522_v38 = vmul.f32 %v655_v5, %v515_v30 }
  0xee   : > { %v463_v8 = vadd.f32 %v461_v0, %v438_v63  ;;  %v535_v41 = vmul.f32 %v656_v12, %v528_v36  ;;  %vm560_vm13 = vcmp.lt.s32.totalorder %v559_v33, 36 }
  0xef   : > { %v499_v10 = vadd.f32 %v497_v3, %v486_v2  ;;  %v563_v45 = vsel %vm560_vm13, %v393_v19, 0.0  ;;  %v564_v51 = vsel %vm560_vm13, %v394_v23, 0.0 }
  0xf0   : > { %v476_v14 = vadd.f32 %v474_v6, %v463_v8 }
  0xf1   : > { %v512_v18 = vadd.f32 %v510_v9, %v499_v10 }
  0xf2   : > { %v487_v24 = vadd.f32 %v485_v15, %v476_v14 }
  0xf3   : > { %v523_v28 = vadd.f32 %v521_v20, %v512_v18 }
  0xf4   : > { %v500_v26 = vadd.f32 %v498_v25, %v487_v24 }
  0xf5   : > { %v536_v34 = vadd.f32 %v534_v29, %v523_v28 }
  0xf6   : > { %v513_v37 = vadd.f32 %v511_v32, %v500_v26 }
  0xf7   : > { %v545_v39 = vmul.f32 %v657_v31, %v536_v34 }
  0xf8   : > { %v524_v40 = vadd.f32 %v522_v38, %v513_v37 }
  0xf9   : > { %v554_v42 = vadd.f32 %v658_v35, %v545_v39 }
  0xfa   : > { %v537_v43 = vadd.f32 %v535_v41, %v524_v40 }
  0xfb   : > { %v556_v44 = vmax.f32 %v554_v42, 0.0 }
  0xfc   : > { %v546_v47 = vmul.f32 %v657_v31, %v537_v43 }
  0xfd   : > { %v565_v48 = vadd.f32 %v563_v45, %v556_v44 }
  0xfe   : > { %v555_v46 = vadd.f32 %v658_v35, %v546_v47 }
  0xff   : > { %v665_v49 = vpack.c.bf16 %v565_v48, %v565_v48 }
 0x100   : > { %v557_v50 = vmax.f32 %v555_v46, 0.0 }
 0x101   : > { %576 = vst.msk [vmem:[%s305_s30] sm:$0xf] %vm575_vm14, %v665_v49 }
 0x102   : > { %v566_v52 = vadd.f32 %v564_v51, %v557_v50 }
 0x104   : > { %v666_v53 = vpack.c.bf16 %v566_v52, %v566_v52 }
 0x106   : > { %577 = vst.msk [vmem:[%s305_s30 + $0x4] sm:$0xf] %vm575_vm14, %v666_v53 }
 0x107 PF: > { %s18_s27 = sadd.s32 1, %s700_s27  }
 0x108   : > { %p15_p4 = scmp.ge.s32.totalorder %s18_s27, 4  }
 0x10a   :  { %17 = sbr.rel (!%p15_p4) target bundleno = 1 (0x1), region = 82 }

// kernel: _lambda_.23
= control target key start
LH: loop header
LB: loop body
LE: loop exit
PB: predicated region body
PF: predicated region fallthrough
CT: control target
= control target key end

     0   :  { %s862_s30 = smov 0   ;;  %s967_s0 = inlined_call_operand.vmem [shape: bf16[2,16,72], index: 0, kind: input, shape index: {}]   ;;  %s968_s1 = inlined_call_operand.vmem [shape: s32[16,1], index: 1, kind: input, shape index: {}]   ;;  %s969_s2 = inlined_call_operand.vmem [shape: bf16[72,24], index: 2, kind: input, shape index: {}]   ;;  %s970_s3 = inlined_call_operand.vmem [shape: f32[1,24], index: 3, kind: input, shape index: {}]   ;;  %s971_s4 = inlined_call_operand.vmem [shape: f32[1,24], index: 4, kind: input, shape index: {}]   ;;  %s972_s5 = inlined_call_operand.vmem [shape: f32[9,24], index: 5, kind: input, shape index: {}]   ;;  %s973_s6 = inlined_call_operand.vmem [shape: f32[1,24], index: 6, kind: input, shape index: {}]   ;;  %s974_s7 = inlined_call_operand.vmem [shape: f32[1,24], index: 7, kind: input, shape index: {}]   ;;  %s975_s8 = inlined_call_operand.vmem [shape: bf16[2,16,24], index: 8, kind: input, shape index: {}]   ;;  %s976_s9 = inlined_call_operand.vmem [shape: bf16[2,16,24], index: 9, kind: output, shape index: {}]  }
   0x1 LB: > { %s718_s10 = sadd.s32 4294967295, %s807_s30   ;;  %p722_p0 = scmp.ge.s32.totalorder %s807_s30, 1  ;;  %s807_s30 = sphi %s862_s30, %s19_s30  }
   0x2   : > { %p297_p1 = scmp.lt.s32.totalorder %s807_s30, 3 }
   0x4   : > { %p298_p2 = pnand %p722_p0, %p297_p1 }
   0x5   : > { %p338_p3 = scmp.lt.s32.totalorder (!%p298_p2), %s718_s10, 1 }
   0x6   : > { %301 = sbr.rel (%p298_p2) target bundleno = 273 (0x111), region = 56 }
   0xb   : > { %vm464_vm0 = vcmask 192512   ;;  %v795_v0 = vld [vmem:[%s969_s2 + $0x20] ss:$0 sps:$4 sm:$0xff]   ;;  %v809_v1 = vmov 0.0   ;;  %vm401_vm1 = vcmask 1043456   ;;  %v796_v3 = vld [vmem:[%s969_s2 + $0x18] sm:$0xff]  }
   0xc   : > { %768 = vmatprep.subr.bf16.mxu0 %v809_v1  ;;  %465 = vst.msk [vmem:[#allocation2] sm:$0x1f] %vm464_vm0, %v809_v1  ;;  %466 = vst.msk [vmem:[#allocation2 + $0x15] sm:$0x1f] %vm464_vm0, %v809_v1  ;;  %v403_v2 = vsel %vm401_vm1, %v795_v0, 0  ;;  %vm810_vm2 = vmmov 0  }
   0xd   : > { %769 = vmatpush3.bf16.msra.mxu0 %v403_v2  ;;  %778 = vmatprep.mubr.msk.bf16.mxu0 %vm810_vm2, %v809_v1  ;;  %v470_v4 = vld [vmem:[%s968_s1] sm:$0xff]  ;;  %v471_v5 = vld [vmem:[%s968_s1 + $0x8] sm:$0xff]  ;;  %s978_s10 = smov (!%p338_p3, %s718_s10), 1  ;;  %v811_v6 = vmov 0   ;;  %v797_v7 = vld [vmem:[%s969_s2 + $0x10] sm:$0xff]   ;;  %vm397_vm7 = vcmask 588800  }
   0xe   : > { %770 = vmatprep.subr.bf16.mxu0 %v809_v1  ;;  %793 = vset.pattern.permute.xlu0 %v811_v6  ;;  %vm474_vm3 = vcmp.gt.s32.totalorder %v470_v4, 0  ;;  %vm510_vm4 = vcmp.lt.s32.totalorder %v470_v4, 3  ;;  %vm475_vm5 = vcmp.gt.s32.totalorder %v471_v5, 0  ;;  %vm511_vm6 = vcmp.lt.s32.totalorder %v471_v5, 3  ;;  %s885_s21 = sshll.u32 %s978_s10, 3  ;;  %v798_v12 = vld [vmem:[%s969_s2 + $0x8] sm:$0xff]  }
   0xf   : > { %794 = vset.pattern.permute.xlu1 %v811_v6  ;;  %v476_v8 = vsel %vm474_vm3, 1, %v811_v6  ;;  %v512_v9 = vsel %vm510_vm4, 1, %v811_v6  ;;  %s342_s24 = scalar_lea.vmem %s967_s0, %s885_s21  ;;  %v477_v10 = vsel %vm475_vm5, 1, %v811_v6  ;;  %v513_v11 = vsel %vm511_vm6, 1, %v811_v6  ;;  %v799_v13 = vld [vmem:[%s969_s2] sm:$0xff]   ;;  %s347_s14 = scalar_lea.vmem %s975_s8, %s885_s21 }
  0x10   : > { %479 = vperm.xlu0 %793, %v476_v8   ;;  %515 = vperm.xlu1 %794, %v512_v9   ;;  %v800_v14 = vld [vmem:[%s342_s24] sm:$0xff]   ;;  %vm467_vm8 = vcmask 195584   ;;  %s352_s22 = scalar_lea.vmem %s976_s9, %s885_s21  ;;  %vm648_vm14 = vcmask 191488  }
  0x11   : > { %771 = vmatpush3.bf16.msra.mxu0 %v796_v3  ;;  %v736_v15 = vld [vmem:[%s970_s3] ss:$0 sm:$0xff]  ;;  %v739_v26 = vld [vmem:[%s972_s5 + $0x1] ss:$0 sm:$0xff]  ;;  %v740_v34 = vld [vmem:[%s972_s5 + $0x2] ss:$0 sm:$0xff] }
  0x12   : > { %772 = vmatprep.subr.bf16.mxu0 %v809_v1  ;;  %v737_v17 = vld [vmem:[%s971_s4] ss:$0 sm:$0xff]  ;;  %v741_v39 = vld [vmem:[%s972_s5 + $0x3] ss:$0 sm:$0xff]  ;;  %v742_v41 = vld [vmem:[%s972_s5 + $0x4] ss:$0 sm:$0xff] }
  0x13   : > { %v738_v28 = vld [vmem:[%s972_s5] ss:$0 sm:$0xff]  ;;  %v743_v54 = vld [vmem:[%s972_s5 + $0x5] ss:$0 sm:$0xff]  ;;  %v744_v62 = vld [vmem:[%s972_s5 + $0x6] ss:$0 sm:$0xff] }
  0x14   : > { %482 = vperm.xlu0 %793, %v477_v10   ;;  %518 = vperm.xlu1 %794, %v513_v11   ;;  %v745_v6 = vld [vmem:[%s972_s5 + $0x7] ss:$0 sm:$0xff]  ;;  %v625_v10 = vlaneseq }
  0x15   : > { %773 = vmatpush3.bf16.msra.mxu0 %v797_v7 }
  0x16   : > { %774 = vmatprep.subr.bf16.mxu0 %v809_v1 }
  0x19   : > { %775 = vmatpush3.bf16.msra.mxu0 %v798_v12 }
  0x1a   : > { %776 = vmatprep.subr.bf16.mxu0 %v809_v1 }
  0x1d   : > { %777 = vmatpush3.bf16.msra.mxu0 %v799_v13 }
  0x20   : > { %779 = vmatmul.mubr.msk.bf16.vlgmr.msra.gmra.mxu0 %vm397_vm7, %v800_v14  ;;  %v746_v14 = vld [vmem:[%s972_s5 + $0x8] ss:$0 sm:$0xff] }
  0x8b   : > { %v480_v25 = vpop.permute.xlu0 %479  ;;  %v516_v27 = vpop.permute.xlu1 %515 }
  0x8c   : > { %vm484_vm9 = vcmp.eq.s32.totalorder %v480_v25, 1  ;;  %vm520_vm10 = vcmp.eq.s32.totalorder %v516_v27, 1  ;;  %v747_v27 = vld [vmem:[%s973_s6] ss:$0 sm:$0xff] }
  0x8f   : > { %v483_v36 = vpop.permute.xlu0 %482  ;;  %v519_v47 = vpop.permute.xlu1 %518 }
  0x90   : > { %vm485_vm11 = vcmp.eq.s32.totalorder %v483_v36, 1  ;;  %vm521_vm12 = vcmp.eq.s32.totalorder %v519_v47, 1  ;;  %v748_v36 = vld [vmem:[%s974_s7] ss:$0 sm:$0xff] }
  0xe0   : > { %v439_v16 = vpop.f32.mrf.mxu0 }
  0xe1   : > { %v453_v18 = vmul.f32 %v736_v15, %v439_v16 }
  0xe2   : > { %v780_v19 = vpop.f32.mrf.mxu0 }
  0xe3   : > { %v903_v20 = vadd.f32 %v737_v17, %v453_v18 }
  0xe4   : > { %v442_v21 = vpop.f32.mrf.mxu0 }
  0xe5   : > { %468 = vst.msk [vmem:[#allocation2 + $0x5] sm:$0xff] %vm467_vm8, %v903_v20  ;;  %v454_v22 = vmul.f32 %v736_v15, %v442_v21 }
  0xe6   : > { %v781_v23 = vpop.f32.mrf.mxu0 }
  0xe7   : > { %v906_v24 = vadd.f32 %v737_v17, %v454_v22 }
  0xe9   : > { %469 = vst.msk [vmem:[#allocation2 + $0xd] sm:$0xff] %vm467_vm8, %v906_v24 }
  0xec   : > { %v472_v29 = vld [vmem:[#allocation2] sm:$0xff] }
  0xed   : > { %v497_v30 = vld [vmem:[#allocation2 + $0x1] sm:$0xff]  ;;  %v486_v32 = vsel %vm484_vm9, %v472_v29, 0.0 }
  0xee   : > { %v533_v31 = vld [vmem:[#allocation2 + $0x4] sm:$0xff]  ;;  %v504_v33 = vmul.f32 %v739_v26, %v497_v30  ;;  %v493_v37 = vmul.f32 %v738_v28, %v486_v32 }
  0xef   : > { %v508_v35 = vld [vmem:[#allocation2 + $0x2] sm:$0xff]  ;;  %v535_v40 = vsel %vm484_vm9, %v533_v31, 0.0 }
  0xf0   : > { %v522_v38 = vsel %vm520_vm10, %v508_v35, 0.0  ;;  %v506_v42 = vadd.f32 %v504_v33, %v493_v37  ;;  %v570_v43 = vld [vmem:[#allocation2 + $0x8] sm:$0xff]  ;;  %v542_v52 = vmul.f32 %v741_v39, %v535_v40  ;;  %v571_v8 = vld [vmem:[#allocation2 + $0x10] sm:$0xff]  ;;  %v759_v35 = vld [vmem:[%s347_s14] sm:$0xff]  }
  0xf1   : > { %v529_v44 = vmul.f32 %v740_v34, %v522_v38  ;;  %v557_v45 = vld [vmem:[#allocation2 + $0x6] sm:$0xff]  ;;  %v487_v50 = vsel %vm485_vm11, %v570_v43, 0.0  ;;  %v572_v63 = vsel %vm484_vm9, %v570_v43, 0.0  ;;  %v558_v2 = vld [vmem:[#allocation2 + $0xe] sm:$0xff]  ;;  %v573_v21 = vsel %vm485_vm11, %v571_v8, 0.0 }
  0xf2   : > { %v583_v46 = vld [vmem:[#allocation2 + $0x9] sm:$0xff]  ;;  %v559_v55 = vsel %vm520_vm10, %v557_v45, 0.0  ;;  %v494_v56 = vmul.f32 %v738_v28, %v487_v50  ;;  %v579_v11 = vmul.f32 %v744_v62, %v572_v63  ;;  %v560_v13 = vsel %vm521_vm12, %v558_v2, 0.0  ;;  %v595_v25 = vld [vmem:[#allocation2 + $0x12] sm:$0xff] }
  0xf3   : > { %v546_v48 = vld [vmem:[#allocation2 + $0x5] sm:$0xff]  ;;  %v531_v53 = vadd.f32 %v529_v44, %v506_v42  ;;  %v505_v57 = vmul.f32 %v739_v26, %v583_v46  ;;  %v566_v4 = vmul.f32 %v743_v54, %v559_v55  ;;  %v547_v5 = vld [vmem:[#allocation2 + $0xd] sm:$0xff]  ;;  %v590_v19 = vmul.f32 %v745_v6, %v583_v46 }
  0xf4   : > { %v594_v49 = vld [vmem:[#allocation2 + $0xa] sm:$0xff]  ;;  %v553_v59 = vmul.f32 %v742_v41, %v546_v48  ;;  %v554_v17 = vmul.f32 %v742_v41, %v547_v5  ;;  %v567_v23 = vmul.f32 %v743_v54, %v560_v13  ;;  %v626_v26 = vand.u32 127, %v625_v10 }
  0xf5   : > { %v534_v51 = vld [vmem:[#allocation2 + $0xc] sm:$0xff]  ;;  %v544_v58 = vadd.f32 %v542_v52, %v531_v53  ;;  %v523_v61 = vsel %vm521_vm12, %v594_v49, 0.0  ;;  %v507_v0 = vadd.f32 %v505_v57, %v494_v56  ;;  %v596_v15 = vsel %vm520_vm10, %v594_v49, 0.0 }
  0xf6   : > { %v536_v60 = vsel %vm485_vm11, %v534_v51, 0.0  ;;  %v530_v1 = vmul.f32 %v740_v34, %v523_v61  ;;  %v603_v29 = vmul.f32 %v746_v14, %v596_v15  ;;  %v584_v30 = vld [vmem:[#allocation2 + $0x11] sm:$0xff]  ;;  %v580_v31 = vmul.f32 %v744_v62, %v573_v21 }
  0xf7   : > { %v555_v3 = vadd.f32 %v553_v59, %v544_v58  ;;  %v543_v7 = vmul.f32 %v741_v39, %v536_v60  ;;  %v597_v34 = vsel %vm521_vm12, %v595_v25, 0.0  ;;  %v591_v38 = vmul.f32 %v745_v6, %v584_v30 }
  0xf8   : > { %v532_v9 = vadd.f32 %v530_v1, %v507_v0  ;;  %vm627_vm13 = vcmp.lt.s32.totalorder %v626_v26, 12  ;;  %v604_v41 = vmul.f32 %v746_v14, %v597_v34  ;;  %v760_v42 = vunpack.c.l.bf16 %v759_v35 }
  0xf9   : > { %v568_v12 = vadd.f32 %v566_v4, %v555_v3  ;;  %v630_v44 = vsel %vm627_vm13, %v903_v20, 0.0  ;;  %v761_v50 = vunpack.c.h.bf16 %v759_v35  ;;  %v631_v51 = vsel %vm627_vm13, %v906_v24, 0.0 }
  0xfa   : > { %v545_v16 = vadd.f32 %v543_v7, %v532_v9 }
  0xfb   : > { %v581_v18 = vadd.f32 %v579_v11, %v568_v12 }
  0xfc   : > { %v556_v22 = vadd.f32 %v554_v17, %v545_v16 }
  0xfd   : > { %v592_v28 = vadd.f32 %v590_v19, %v581_v18 }
  0xfe   : > { %v569_v32 = vadd.f32 %v567_v23, %v556_v22 }
  0xff   : > { %v605_v33 = vadd.f32 %v603_v29, %v592_v28 }
 0x100   : > { %v582_v37 = vadd.f32 %v580_v31, %v569_v32 }
 0x101   : > { %v614_v39 = vmul.f32 %v747_v27, %v605_v33 }
 0x102   : > { %v593_v40 = vadd.f32 %v591_v38, %v582_v37 }
 0x103   : > { %v623_v43 = vadd.f32 %v748_v36, %v614_v39 }
 0x104   : > { %v606_v45 = vadd.f32 %v604_v41, %v593_v40 }
 0x105   : > { %v632_v46 = vadd.f32 %v630_v44, %v623_v43 }
 0x106   : > { %v615_v47 = vmul.f32 %v747_v27, %v606_v45 }
 0x107   : > { %v638_v48 = vadd.f32 %v760_v42, %v632_v46 }
 0x108   : > { %v624_v49 = vadd.f32 %v748_v36, %v615_v47 }
 0x109   : > { %v756_v52 = vpack.c.bf16 %v638_v48, %v638_v48 }
 0x10a   : > { %v633_v53 = vadd.f32 %v631_v51, %v624_v49 }
 0x10b   : > { %649 = vst.msk [vmem:[%s352_s22] sm:$0xf] %vm648_vm14, %v756_v52 }
 0x10c   : > { %v639_v54 = vadd.f32 %v761_v50, %v633_v53 }
 0x10e   : > { %v757_v55 = vpack.c.bf16 %v639_v54, %v639_v54 }
 0x110   : > { %650 = vst.msk [vmem:[%s352_s22 + $0x4] sm:$0xf] %vm648_vm14, %v757_v55 }
 0x111 PF: > { %s19_s30 = sadd.s32 1, %s807_s30  }
 0x112   : > { %p16_p4 = scmp.ge.s32.totalorder %s19_s30, 4  }
 0x114   :  { %18 = sbr.rel (!%p16_p4) target bundleno = 1 (0x1), region = 89 }

// kernel: _lambda_.26
= control target key start
LH: loop header
LB: loop body
LE: loop exit
PB: predicated region body
PF: predicated region fallthrough
CT: control target
= control target key end

     0   :  { %s882_s24 = smov 0   ;;  %s1019_s0 = inlined_call_operand.vmem [shape: bf16[2,4,4,24], index: 0, kind: input, shape index: {}]   ;;  %s1020_s1 = inlined_call_operand.vmem [shape: bf16[2,4,4,24], index: 1, kind: input, shape index: {}]   ;;  %s1021_s2 = inlined_call_operand.vmem [shape: bf16[2,4,4,24], index: 2, kind: input, shape index: {}]   ;;  %s1022_s3 = inlined_call_operand.vmem [shape: bf16[2,4,4,24], index: 3, kind: input, shape index: {}]   ;;  %s1023_s4 = inlined_call_operand.vmem [shape: f32[25,24], index: 4, kind: input, shape index: {}]   ;;  %s1024_s5 = inlined_call_operand.vmem [shape: f32[1,24], index: 5, kind: input, shape index: {}]   ;;  %s1025_s6 = inlined_call_operand.vmem [shape: f32[1,24], index: 6, kind: input, shape index: {}]   ;;  %s1026_s7 = inlined_call_operand.vmem [shape: bf16[2,2,2,24], index: 7, kind: output, shape index: {}]  }
   0x1 LB: > { %s779_s25 = sadd.s32 4294967295, %s840_s24   ;;  %p783_p0 = scmp.ge.s32.totalorder %s840_s24, 1  ;;  %s840_s24 = sphi %s882_s24, %s17_s24  }
   0x2   : > { %p267_p1 = scmp.lt.s32.totalorder %s840_s24, 3 }
   0x4   : > { %p268_p2 = pnand %p783_p0, %p267_p1 }
   0x5   : > { %p313_p3 = scmp.lt.s32.totalorder (!%p268_p2), %s779_s25, 1 }
   0x6   : > { %271 = sbr.rel (%p268_p2) target bundleno = 84 (0x54), region = 48 }
   0xb   : > { %s1028_s25 = smov (!%p313_p3, %s779_s25), 1  ;;  %vm345_vm0 = vcmask 191488   ;;  %v793_v28 = vld [vmem:[%s1023_s4] ss:$0 sm:$0xff]  ;;  %v794_v30 = vld [vmem:[%s1023_s4 + $0x1] ss:$0 sm:$0xff] }
   0xc   : > { %s822_s26 = sshll.u32 %s1028_s25, 3  ;;  %v795_v34 = vld [vmem:[%s1023_s4 + $0x2] ss:$0 sm:$0xff]  ;;  %v796_v41 = vld [vmem:[%s1023_s4 + $0x3] ss:$0 sm:$0xff]  ;;  %s792_s30 = sshll.u32 %s1028_s25, 1 }
   0xd   : > { %s896_s29 = scalar_lea.vmem %s1019_s0, %s822_s26  ;;  %s901_s9 = scalar_lea.vmem %s1020_s1, %s822_s26  ;;  %v797_v44 = vld [vmem:[%s1023_s4 + $0x4] ss:$0 sm:$0xff]  ;;  %v798_v51 = vld [vmem:[%s1023_s4 + $0x5] ss:$0 sm:$0xff]  ;;  %v799_v59 = vld [vmem:[%s1023_s4 + $0x6] ss:$0 sm:$0xff] }
   0xe   : > { %v337_v0 = vld [vmem:[%s896_s29] sm:$0x3]  ;;  %v338_v1 = vld [vmem:[%s896_s29 + $0x2] sm:$0x3]  ;;  %s327_s12 = scalar_lea.vmem %s1021_s2, %s822_s26  ;;  %s332_s15 = scalar_lea.vmem %s1022_s3, %s822_s26  ;;  %v339_v14 = vld [vmem:[%s896_s29 + $0x4] sm:$0x3] }
   0xf   : > { %v350_v2 = vld [vmem:[%s901_s9] sm:$0x3]  ;;  %v341_v3 = vunpack.c.l.bf16 %v337_v0  ;;  %v342_v4 = vunpack.c.l.bf16 %v338_v1  ;;  %v351_v6 = vld [vmem:[%s901_s9 + $0x2] sm:$0x3]  ;;  %v343_v17 = vunpack.c.l.bf16 %v339_v14  ;;  %v352_v18 = vld [vmem:[%s901_s9 + $0x4] sm:$0x3]  ;;  %s336_s10 = scalar_lea.vmem %s1026_s7, %s792_s30 }
  0x10   : > { %v354_v5 = vunpack.c.l.bf16 %v350_v2  ;;  %v362_v7 = vld [vmem:[%s327_s12] sm:$0x3]  ;;  %v363_v8 = vld [vmem:[%s327_s12 + $0x2] sm:$0x3]  ;;  %v355_v9 = vunpack.c.l.bf16 %v351_v6  ;;  %v364_v19 = vld [vmem:[%s327_s12 + $0x4] sm:$0x3]  ;;  %v356_v21 = vunpack.c.l.bf16 %v352_v18 }
  0x11   : > { %v366_v10 = vunpack.c.l.bf16 %v362_v7  ;;  %v367_v11 = vunpack.c.l.bf16 %v363_v8  ;;  %v374_v12 = vld [vmem:[%s332_s15] sm:$0x3]  ;;  %v375_v13 = vld [vmem:[%s332_s15 + $0x2] sm:$0x3]  ;;  %346 = vst.msk [vmem:[#allocation2] sm:$0xf] %vm345_vm0, %v341_v3  ;;  %v368_v22 = vunpack.c.l.bf16 %v364_v19 }
  0x12   : > { %347 = vst.msk [vmem:[#allocation2 + $0x4] sm:$0xf] %vm345_vm0, %v342_v4  ;;  %358 = vst.msk [vmem:[#allocation3] sm:$0xf] %vm345_vm0, %v354_v5  ;;  %v378_v15 = vunpack.c.l.bf16 %v374_v12  ;;  %v379_v16 = vunpack.c.l.bf16 %v375_v13  ;;  %v376_v20 = vld [vmem:[%s332_s15 + $0x4] sm:$0x3] }
  0x13   : > { %359 = vst.msk [vmem:[#allocation3 + $0x4] sm:$0xf] %vm345_vm0, %v355_v9  ;;  %370 = vst.msk [vmem:[#allocation4] sm:$0xf] %vm345_vm0, %v366_v10  ;;  %v380_v23 = vunpack.c.l.bf16 %v376_v20  ;;  %v340_v24 = vld [vmem:[%s896_s29 + $0x6] sm:$0x3] }
  0x14   : > { %371 = vst.msk [vmem:[#allocation4 + $0x4] sm:$0xf] %vm345_vm0, %v367_v11  ;;  %v353_v25 = vld [vmem:[%s901_s9 + $0x6] sm:$0x3]  ;;  %382 = vst.msk [vmem:[#allocation5] sm:$0xf] %vm345_vm0, %v378_v15  ;;  %v344_v26 = vunpack.c.l.bf16 %v340_v24 }
  0x15   : > { %383 = vst.msk [vmem:[#allocation5 + $0x4] sm:$0xf] %vm345_vm0, %v379_v16  ;;  %348 = vst.msk [vmem:[#allocation2 + $0x8] sm:$0xf] %vm345_vm0, %v343_v17  ;;  %v357_v27 = vunpack.c.l.bf16 %v353_v25  ;;  %v800_v6 = vld [vmem:[%s1023_s4 + $0x7] ss:$0 sm:$0xff] }
  0x16   : > { %360 = vst.msk [vmem:[#allocation3 + $0x8] sm:$0xf] %vm345_vm0, %v356_v21  ;;  %372 = vst.msk [vmem:[#allocation4 + $0x8] sm:$0xf] %vm345_vm0, %v368_v22  ;;  %v801_v13 = vld [vmem:[%s1023_s4 + $0x8] ss:$0 sm:$0xff] }
  0x17   : > { %384 = vst.msk [vmem:[#allocation5 + $0x8] sm:$0xf] %vm345_vm0, %v380_v23  ;;  %349 = vst.msk [vmem:[#allocation2 + $0xc] sm:$0xf] %vm345_vm0, %v344_v26  ;;  %v802_v18 = vld [vmem:[%s1023_s4 + $0x9] ss:$0 sm:$0xff] }
  0x18   : > { %361 = vst.msk [vmem:[#allocation3 + $0xc] sm:$0xf] %vm345_vm0, %v357_v27  ;;  %v386_v29 = vld [vmem:[#allocation2] sm:$0x3]  ;;  %v430_v47 = vld [vmem:[#allocation2 + $0x2] sm:$0x3] }
  0x19   : > { %v393_v31 = vmul.f32 %v793_v28, %v386_v29  ;;  %v387_v32 = vld [vmem:[#allocation2 + $0x4] sm:$0x3]  ;;  %v408_v33 = vld [vmem:[#allocation2 + $0x1] sm:$0x3]  ;;  %v397_v36 = vld [vmem:[#allocation3] sm:$0x3]  ;;  %v437_v60 = vmul.f32 %v797_v44, %v430_v47 }
  0x1a   : > { %v394_v35 = vmul.f32 %v793_v28, %v387_v32  ;;  %v409_v37 = vld [vmem:[#allocation2 + $0x5] sm:$0x3]  ;;  %v404_v38 = vmul.f32 %v794_v30, %v397_v36  ;;  %v398_v39 = vld [vmem:[#allocation3 + $0x4] sm:$0x3]  ;;  %v419_v40 = vld [vmem:[#allocation3 + $0x1] sm:$0x3]  ;;  %v415_v43 = vmul.f32 %v795_v34, %v408_v33 }
  0x1b   : > { %v405_v42 = vmul.f32 %v794_v30, %v398_v39  ;;  %v420_v46 = vld [vmem:[#allocation3 + $0x5] sm:$0x3]  ;;  %v416_v48 = vmul.f32 %v795_v34, %v409_v37  ;;  %v441_v50 = vld [vmem:[#allocation4] sm:$0x3]  ;;  %v431_v52 = vld [vmem:[#allocation2 + $0x6] sm:$0x3]  ;;  %v426_v54 = vmul.f32 %v796_v41, %v419_v40 }
  0x1c   : > { %v406_v45 = vadd.f32 %v404_v38, %v393_v31  ;;  %v442_v55 = vld [vmem:[#allocation4 + $0x4] sm:$0x3]  ;;  %v427_v57 = vmul.f32 %v796_v41, %v420_v46  ;;  %v452_v58 = vld [vmem:[#allocation5] sm:$0x3]  ;;  %v448_v62 = vmul.f32 %v798_v51, %v441_v50  ;;  %v453_v63 = vld [vmem:[#allocation5 + $0x4] sm:$0x3]  ;;  %v438_v0 = vmul.f32 %v797_v44, %v431_v52 }
  0x1d   : > { %v407_v49 = vadd.f32 %v405_v42, %v394_v35  ;;  %v449_v2 = vmul.f32 %v798_v51, %v442_v55  ;;  %v459_v4 = vmul.f32 %v799_v59, %v452_v58  ;;  %v463_v5 = vld [vmem:[#allocation4 + $0x1] sm:$0x3]  ;;  %v460_v8 = vmul.f32 %v799_v59, %v453_v63  ;;  %v464_v10 = vld [vmem:[#allocation4 + $0x5] sm:$0x3]  ;;  %v474_v12 = vld [vmem:[#allocation5 + $0x1] sm:$0x3] }
  0x1e   : > { %v417_v53 = vadd.f32 %v415_v43, %v406_v45  ;;  %v470_v14 = vmul.f32 %v800_v6, %v463_v5  ;;  %v475_v16 = vld [vmem:[#allocation5 + $0x5] sm:$0x3]  ;;  %v485_v17 = vld [vmem:[#allocation4 + $0x2] sm:$0x3]  ;;  %v471_v19 = vmul.f32 %v800_v6, %v464_v10  ;;  %v486_v21 = vld [vmem:[#allocation4 + $0x6] sm:$0x3]  ;;  %v481_v23 = vmul.f32 %v801_v13, %v474_v12 }
  0x1f   : > { %v418_v56 = vadd.f32 %v416_v48, %v407_v49  ;;  %v498_v24 = vld [vmem:[#allocation2 + $0x8] sm:$0x3]  ;;  %v497_v25 = vld [vmem:[#allocation2 + $0x4] sm:$0x3]  ;;  %v803_v26 = vld [vmem:[%s1023_s4 + $0xa] ss:$0 sm:$0xff]  ;;  %v482_v28 = vmul.f32 %v801_v13, %v475_v16  ;;  %v492_v29 = vmul.f32 %v802_v18, %v485_v17  ;;  %v493_v34 = vmul.f32 %v802_v18, %v486_v21 }
  0x20   : > { %v428_v61 = vadd.f32 %v426_v54, %v417_v53  ;;  %v510_v31 = vld [vmem:[#allocation3 + $0x8] sm:$0x3]  ;;  %v509_v32 = vld [vmem:[#allocation3 + $0x4] sm:$0x3]  ;;  %v804_v33 = vld [vmem:[%s1023_s4 + $0xb] ss:$0 sm:$0xff]  ;;  %v505_v36 = vmul.f32 %v803_v26, %v498_v24  ;;  %v504_v37 = vmul.f32 %v803_v26, %v497_v25 }
  0x21   : > { %v429_v1 = vadd.f32 %v427_v57, %v418_v56  ;;  %v520_v39 = vld [vmem:[#allocation2 + $0x5] sm:$0x3]  ;;  %v805_v40 = vld [vmem:[%s1023_s4 + $0xc] ss:$0 sm:$0xff]  ;;  %v517_v42 = vmul.f32 %v804_v33, %v510_v31  ;;  %v516_v43 = vmul.f32 %v804_v33, %v509_v32  ;;  %v521_v44 = vld [vmem:[#allocation2 + $0x9] sm:$0x3] }
  0x22   : > { %v439_v3 = vadd.f32 %v437_v60, %v428_v61  ;;  %v531_v46 = vld [vmem:[#allocation3 + $0x5] sm:$0x3]  ;;  %v806_v48 = vld [vmem:[%s1023_s4 + $0xd] ss:$0 sm:$0xff]  ;;  %v527_v49 = vmul.f32 %v805_v40, %v520_v39  ;;  %v532_v50 = vld [vmem:[#allocation3 + $0x9] sm:$0x3]  ;;  %v528_v52 = vmul.f32 %v805_v40, %v521_v44 }
  0x23   : > { %v440_v7 = vadd.f32 %v438_v0, %v429_v1  ;;  %v542_v53 = vld [vmem:[#allocation2 + $0x6] sm:$0x3]  ;;  %v807_v54 = vld [vmem:[%s1023_s4 + $0xe] ss:$0 sm:$0xff]  ;;  %v538_v57 = vmul.f32 %v806_v48, %v531_v46  ;;  %v543_v58 = vld [vmem:[#allocation2 + $0xa] sm:$0x3]  ;;  %v539_v63 = vmul.f32 %v806_v48, %v532_v50 }
  0x24   : > { %v450_v9 = vadd.f32 %v448_v62, %v439_v3  ;;  %v555_v59 = vld [vmem:[#allocation4 + $0x8] sm:$0x3]  ;;  %v554_v60 = vld [vmem:[#allocation4 + $0x4] sm:$0x3]  ;;  %v808_v61 = vld [vmem:[%s1023_s4 + $0xf] ss:$0 sm:$0xff]  ;;  %v549_v1 = vmul.f32 %v807_v54, %v542_v53  ;;  %v550_v6 = vmul.f32 %v807_v54, %v543_v58 }
  0x25   : > { %v451_v11 = vadd.f32 %v449_v2, %v440_v7  ;;  %v567_v2 = vld [vmem:[#allocation5 + $0x8] sm:$0x3]  ;;  %v566_v3 = vld [vmem:[#allocation5 + $0x4] sm:$0x3]  ;;  %v562_v7 = vmul.f32 %v808_v61, %v555_v59  ;;  %v577_v10 = vld [vmem:[#allocation4 + $0x5] sm:$0x3] }
  0x26   : > { %v461_v15 = vadd.f32 %v459_v4, %v450_v9  ;;  %v809_v4 = vld [vmem:[%s1023_s4 + $0x10] ss:$0 sm:$0xff]  ;;  %v561_v9 = vmul.f32 %v808_v61, %v554_v60  ;;  %v578_v16 = vld [vmem:[#allocation4 + $0x9] sm:$0x3]  ;;  %v588_v17 = vld [vmem:[#allocation5 + $0x5] sm:$0x3] }
  0x27   : > { %v462_v20 = vadd.f32 %v460_v8, %v451_v11  ;;  %v810_v11 = vld [vmem:[%s1023_s4 + $0x11] ss:$0 sm:$0xff]  ;;  %v574_v13 = vmul.f32 %v809_v4, %v567_v2  ;;  %v811_v18 = vld [vmem:[%s1023_s4 + $0x12] ss:$0 sm:$0xff]  ;;  %v812_v24 = vld [vmem:[%s1023_s4 + $0x13] ss:$0 sm:$0xff] }
  0x28   : > { %v472_v22 = vadd.f32 %v470_v14, %v461_v15  ;;  %v573_v15 = vmul.f32 %v809_v4, %v566_v3  ;;  %v584_v21 = vmul.f32 %v810_v11, %v577_v10  ;;  %v585_v26 = vmul.f32 %v810_v11, %v578_v16  ;;  %v611_v31 = vld [vmem:[#allocation2 + $0x8] sm:$0x3]  ;;  %v813_v32 = vld [vmem:[%s1023_s4 + $0x14] ss:$0 sm:$0xff]  ;;  %v814_v39 = vld [vmem:[%s1023_s4 + $0x15] ss:$0 sm:$0xff] }
  0x29   : > { %v473_v27 = vadd.f32 %v471_v19, %v462_v20  ;;  %v618_v44 = vmul.f32 %v813_v32, %v611_v31  ;;  %v815_v46 = vld [vmem:[%s1023_s4 + $0x16] ss:$0 sm:$0xff]  ;;  %v816_v53 = vld [vmem:[%s1023_s4 + $0x17] ss:$0 sm:$0xff]  ;;  %v656_v58 = vld [vmem:[#allocation2 + $0xa] sm:$0x3] }
  0x2a   : > { %v483_v30 = vadd.f32 %v481_v23, %v472_v22  ;;  %v589_v22 = vld [vmem:[#allocation5 + $0x9] sm:$0x3]  ;;  %v599_v23 = vld [vmem:[#allocation4 + $0x6] sm:$0x3]  ;;  %v817_v59 = vld [vmem:[%s1023_s4 + $0x18] ss:$0 sm:$0xff] }
  0x2b   : > { %v484_v35 = vadd.f32 %v482_v28, %v473_v27  ;;  %v595_v28 = vmul.f32 %v811_v18, %v588_v17  ;;  %v663_v4 = vmul.f32 %v817_v59, %v656_v58  ;;  %vm687_vm1 = vcmask 188416  }
  0x2c   : > { %v494_v38 = vadd.f32 %v492_v29, %v483_v30  ;;  %v600_v29 = vld [vmem:[#allocation4 + $0xa] sm:$0x3]  ;;  %v612_v30 = vld [vmem:[#allocation2 + $0xc] sm:$0x3] }
  0x2d   : > { %v495_v41 = vadd.f32 %v493_v34, %v484_v35  ;;  %v596_v34 = vmul.f32 %v811_v18, %v589_v22 }
  0x2e   : > { %v506_v45 = vadd.f32 %v504_v37, %v494_v38  ;;  %v624_v37 = vld [vmem:[#allocation3 + $0xc] sm:$0x3]  ;;  %v623_v38 = vld [vmem:[#allocation3 + $0x8] sm:$0x3] }
  0x2f   : > { %v507_v47 = vadd.f32 %v505_v36, %v495_v41  ;;  %v606_v36 = vmul.f32 %v812_v24, %v599_v23  ;;  %v607_v41 = vmul.f32 %v812_v24, %v600_v29  ;;  %v631_v48 = vmul.f32 %v814_v39, %v624_v37 }
  0x30   : > { %v518_v51 = vadd.f32 %v516_v43, %v506_v45  ;;  %v634_v45 = vld [vmem:[#allocation2 + $0x9] sm:$0x3]  ;;  %v630_v50 = vmul.f32 %v814_v39, %v623_v38 }
  0x31   : > { %v519_v55 = vadd.f32 %v517_v42, %v507_v47  ;;  %v619_v42 = vmul.f32 %v813_v32, %v612_v30 }
  0x32   : > { %v529_v56 = vadd.f32 %v527_v49, %v518_v51  ;;  %v635_v51 = vld [vmem:[#allocation2 + $0xd] sm:$0x3] }
  0x33   : > { %v530_v62 = vadd.f32 %v528_v52, %v519_v55  ;;  %v645_v52 = vld [vmem:[#allocation3 + $0x9] sm:$0x3]  ;;  %v642_v61 = vmul.f32 %v815_v46, %v635_v51 }
  0x34   : > { %v540_v0 = vadd.f32 %v538_v57, %v529_v56  ;;  %v641_v56 = vmul.f32 %v815_v46, %v634_v45  ;;  %v646_v57 = vld [vmem:[#allocation3 + $0xd] sm:$0x3] }
  0x35   : > { %v541_v5 = vadd.f32 %v539_v63, %v530_v62  ;;  %v652_v63 = vmul.f32 %v816_v53, %v645_v52  ;;  %v653_v2 = vmul.f32 %v816_v53, %v646_v57 }
  0x36   : > { %v551_v8 = vadd.f32 %v549_v1, %v540_v0  ;;  %v657_v0 = vld [vmem:[#allocation2 + $0xe] sm:$0x3] }
  0x37   : > { %v552_v12 = vadd.f32 %v550_v6, %v541_v5  ;;  %v818_v5 = vld [vmem:[%s1024_s5] ss:$0 sm:$0xff] }
  0x38   : > { %v563_v14 = vadd.f32 %v561_v9, %v551_v8  ;;  %v819_v9 = vld [vmem:[%s1025_s6] ss:$0 sm:$0xff] }
  0x39   : > { %v564_v19 = vadd.f32 %v562_v7, %v552_v12  ;;  %v664_v7 = vmul.f32 %v817_v59, %v657_v0 }
  0x3a   : > { %v575_v20 = vadd.f32 %v573_v15, %v563_v14 }
  0x3b   : > { %v576_v25 = vadd.f32 %v574_v13, %v564_v19 }
  0x3c   : > { %v586_v27 = vadd.f32 %v584_v21, %v575_v20 }
  0x3d   : > { %v587_v33 = vadd.f32 %v585_v26, %v576_v25 }
  0x3e   : > { %v597_v35 = vadd.f32 %v595_v28, %v586_v27 }
  0x3f   : > { %v598_v40 = vadd.f32 %v596_v34, %v587_v33 }
  0x40   : > { %v608_v43 = vadd.f32 %v606_v36, %v597_v35 }
  0x41   : > { %v609_v47 = vadd.f32 %v607_v41, %v598_v40 }
  0x42   : > { %v620_v49 = vadd.f32 %v618_v44, %v608_v43 }
  0x43   : > { %v621_v54 = vadd.f32 %v619_v42, %v609_v47 }
  0x44   : > { %v632_v55 = vadd.f32 %v630_v50, %v620_v49 }
  0x45   : > { %v633_v60 = vadd.f32 %v631_v48, %v621_v54 }
  0x46   : > { %v643_v62 = vadd.f32 %v641_v56, %v632_v55 }
  0x47   : > { %v644_v1 = vadd.f32 %v642_v61, %v633_v60 }
  0x48   : > { %v654_v3 = vadd.f32 %v652_v63, %v643_v62 }
  0x49   : > { %v655_v6 = vadd.f32 %v653_v2, %v644_v1 }
  0x4a   : > { %v665_v8 = vadd.f32 %v663_v4, %v654_v3 }
  0x4b   : > { %v666_v10 = vadd.f32 %v664_v7, %v655_v6 }
  0x4c   : > { %v674_v11 = vmul.f32 %v818_v5, %v665_v8 }
  0x4d   : > { %v675_v12 = vmul.f32 %v818_v5, %v666_v10 }
  0x4e   : > { %v683_v13 = vadd.f32 %v819_v9, %v674_v11 }
  0x4f   : > { %v684_v14 = vadd.f32 %v819_v9, %v675_v12 }
  0x50   : > { %v685_v15 = vpack.c.bf16 %v683_v13, %v683_v13 }
  0x51   : > { %v686_v16 = vpack.c.bf16 %v684_v14, %v684_v14 }
  0x52   : > { %688 = vst.msk [vmem:[%s336_s10] sm:$0x1] %vm687_vm1, %v685_v15 }
  0x53   : > { %689 = vst.msk [vmem:[%s336_s10 + $0x1] sm:$0x1] %vm687_vm1, %v686_v16 }
  0x54 PF: > { %s17_s24 = sadd.s32 1, %s840_s24  }
  0x55   : > { %p14_p4 = scmp.ge.s32.totalorder %s17_s24, 4  }
  0x57   :  { %16 = sbr.rel (!%p14_p4) target bundleno = 1 (0x1), region = 93 }

// kernel: _lambda_.28
= control target key start
LH: loop header
LB: loop body
LE: loop exit
PB: predicated region body
PF: predicated region fallthrough
CT: control target
= control target key end

     0   :  { %vm43_vm0 = vcmask 1043456   ;;  %v136_v0 = vmov 0.0   ;;  %vm137_vm1 = vmmov 0   ;;  %vm39_vm2 = vcmask 326656   ;;  %s184_s1 = inlined_call_operand.vmem [shape: bf16[40,72], index: 1, kind: input, shape index: {}]   ;;  %s185_s0 = inlined_call_operand.vmem [shape: bf16[8,40], index: 0, kind: input, shape index: {}]   ;;  %s186_s2 = inlined_call_operand.vmem [shape: f32[1,72], index: 2, kind: input, shape index: {}]   ;;  %s187_s3 = inlined_call_operand.vmem [shape: f32[1,72], index: 3, kind: input, shape index: {}]   ;;  %s188_s4 = inlined_call_operand.vmem [shape: bf16[8,72], index: 4, kind: output, shape index: {}]  }
   0x1   :  { %121 = vmatprep.subr.bf16.mxu0 %v136_v0  ;;  %v133_v1 = vld [vmem:[%s184_s1 + $0x10] ss:$0 sps:$4 sm:$0xff]   ;;  %127 = vmatprep.mubr.msk.bf16.mxu0 %vm137_vm1, %v136_v0  ;;  %v134_v3 = vld [vmem:[%s184_s1 + $0x8] sm:$0xff]   ;;  %v135_v4 = vld [vmem:[%s184_s1] sm:$0xff]   ;;  %vm105_vm3 = vcmask 584704  }
   0x2   :  { %v45_v2 = vsel %vm43_vm0, %v133_v1, 0  ;;  %v18_v5 = vld [vmem:[%s185_s0] sm:$0xf] }
   0x3   :  { %122 = vmatpush3.bf16.msra.mxu0 %v45_v2  ;;  %v115_v6 = vld [vmem:[%s186_s2] ss:$0 sm:$0xff] }
   0x4   :  { %123 = vmatprep.subr.bf16.mxu0 %v136_v0  ;;  %v116_v8 = vld [vmem:[%s187_s3] ss:$0 sm:$0xff] }
   0x7   :  { %124 = vmatpush3.bf16.msra.mxu0 %v134_v3 }
   0x8   :  { %125 = vmatprep.subr.bf16.mxu0 %v136_v0 }
   0xb   :  { %126 = vmatpush3.bf16.msra.mxu0 %v135_v4 }
   0xe   :  { %128 = vmatmul.mubr.msk.bf16.vlgmr.msra.gmra.mxu0 %vm39_vm2, %v18_v5 }
  0xce   :  { %v81_v7 = vpop.f32.mrf.mxu0 }
  0xcf   :  { %v94_v9 = vmul.f32 %v115_v6, %v81_v7 }
  0xd0   :  { %v129_v10 = vpop.f32.mrf.mxu0 }
  0xd1   :  { %v102_v11 = vadd.f32 %v116_v8, %v94_v9 }
  0xd2   :  { %v84_v12 = vpop.f32.mrf.mxu0 }
  0xd3   :  { %v103_v13 = vmax.f32 %v102_v11, 0.0 }
  0xd4   :  { %v130_v14 = vpop.f32.mrf.mxu0 }
  0xd5   :  { %v104_v15 = vpack.c.bf16 %v103_v13, %v103_v13 }
  0xd7   :  { %106 = vst.msk [vmem:[%s188_s4] sm:$0xf] %vm105_vm3, %v104_v15 }

// kernel: _lambda_.27
= control target key start
LH: loop header
LB: loop body
LE: loop exit
PB: predicated region body
PF: predicated region fallthrough
CT: control target
= control target key end

     0   :  { %s950_s21 = smov 0   ;;  %s1052_s0 = inlined_call_operand.vmem [shape: bf16[2,4,72], index: 0, kind: input, shape index: {}]   ;;  %s1053_s1 = inlined_call_operand.vmem [shape: s32[4,1], index: 1, kind: input, shape index: {}]   ;;  %s1054_s2 = inlined_call_operand.vmem [shape: bf16[72,40], index: 2, kind: input, shape index: {}]   ;;  %s1055_s3 = inlined_call_operand.vmem [shape: f32[1,40], index: 3, kind: input, shape index: {}, may-alias: {3,10}]   ;;  %s1056_s4 = inlined_call_operand.vmem [shape: f32[1,40], index: 4, kind: input, shape index: {}, may-alias: {4,11}]   ;;  %s1057_s5 = inlined_call_operand.vmem [shape: f32[9,40], index: 5, kind: input, shape index: {}]   ;;  %s1058_s6 = inlined_call_operand.vmem [shape: f32[1,40], index: 6, kind: input, shape index: {}]   ;;  %s1059_s7 = inlined_call_operand.vmem [shape: f32[1,40], index: 7, kind: input, shape index: {}]   ;;  %s1060_s8 = inlined_call_operand.vmem [shape: bf16[2,4,24], index: 8, kind: input, shape index: {}]   ;;  %s1061_s9 = inlined_call_operand.vmem [shape: bf16[24,40], index: 9, kind: input, shape index: {}]   ;;  %s1062_s10 = inlined_call_operand.vmem [shape: f32[1,40], index: 10, kind: input, shape index: {}, may-alias: {3,10}]   ;;  %s1063_s11 = inlined_call_operand.vmem [shape: f32[1,40], index: 11, kind: input, shape index: {}, may-alias: {4,11}]   ;;  %s1064_s12 = inlined_call_operand.vmem [shape: bf16[2,4,40], index: 12, kind: output, shape index: {}]  }
   0x1 LB: > { %s790_s22 = sadd.s32 4294967295, %s880_s21   ;;  %p794_p0 = scmp.ge.s32.totalorder %s880_s21, 1  ;;  %s880_s21 = sphi %s950_s21, %s22_s21  }
   0x2   : > { %p370_p1 = scmp.lt.s32.totalorder %s880_s21, 3 }
   0x4   : > { %p371_p2 = pnand %p794_p0, %p370_p1 }
   0x5   : > { %p414_p3 = scmp.lt.s32.totalorder (!%p371_p2), %s790_s22, 1 }
   0x6   : > { %374 = sbr.rel (%p371_p2) target bundleno = 268 (0x10c), region = 68 }
   0xb   : > { %v867_v0 = vld [vmem:[%s1054_s2 + $0x20] ss:$0 sps:$4 sm:$0xff]   ;;  %vm468_vm0 = vcmask 1043456   ;;  %v882_v1 = vmov 0.0   ;;  %vm883_vm1 = vmmov 0   ;;  %v868_v3 = vld [vmem:[%s1054_s2 + $0x18] sm:$0xff]   ;;  %v638_v60 = vlaneseq }
   0xc   : > { %833 = vmatprep.subr.bf16.mxu0 %v882_v1  ;;  %847 = vmatprep.subr.bf16.mxu1 %v882_v1  ;;  %v470_v2 = vsel %vm468_vm0, %v867_v0, 0  ;;  %s1066_s22 = smov (!%p414_p3, %s790_s22), 1  ;;  %v872_v4 = vld [vmem:[%s1061_s9 + $0x8] ss:$0 sps:$4 sm:$0xff]   ;;  %v869_v5 = vld [vmem:[%s1054_s2 + $0x10] sm:$0xff]   ;;  %v884_v7 = vmov 0  }
   0xd   : > { %843 = vmatprep.mubr.msk.bf16.mxu0 %vm883_vm1, %v882_v1  ;;  %851 = vmatprep.mubr.msk.bf16.mxu1 %vm883_vm1, %v882_v1  ;;  %v663_v6 = vsel %vm468_vm0, %v872_v4, 0  ;;  %v533_v8 = vld [vmem:[%s1053_s1] sm:$0xf]  ;;  %s975_s15 = sshll.u32 %s1066_s22, 1  ;;  %v870_v11 = vld [vmem:[%s1054_s2 + $0x8] sm:$0xff]   ;;  %vm658_vm4 = vcmask 195584  }
   0xe   : > { %834 = vmatpush3.bf16.msra.mxu0 %v470_v2  ;;  %866 = vset.pattern.permute.xlu0 %v884_v7  ;;  %v873_v9 = vld [vmem:[%s1061_s9] sm:$0xff]   ;;  %vm535_vm2 = vcmp.gt.s32.totalorder %v533_v8, 0  ;;  %vm558_vm3 = vcmp.lt.s32.totalorder %v533_v8, 1  ;;  %s421_s20 = scalar_lea.vmem %s1060_s8, %s975_s15  ;;  %s417_s28 = scalar_lea.vmem %s1052_s0, %s975_s15  ;;  %vm464_vm5 = vcmask 588800   ;;  %vm528_vm6 = vcmask 321536  }
   0xf   : > { %835 = vmatprep.subr.bf16.mxu0 %v882_v1  ;;  %848 = vmatpush3.bf16.msra.mxu1 %v663_v6  ;;  %v536_v10 = vsel %vm535_vm2, 1, %v884_v7  ;;  %v559_v12 = vsel %vm558_vm3, 1, %v884_v7  ;;  %v645_v13 = vld [vmem:[%s421_s20] sm:$0x3]  ;;  %529 = vst.msk [vmem:[#allocation2] sm:$0x7] %vm528_vm6, %v882_v1  ;;  %s425_s29 = scalar_lea.vmem %s1064_s12, %s975_s15 }
  0x10   : > { %849 = vmatprep.subr.bf16.mxu1 %v882_v1  ;;  %538 = vperm.xlu0 %866, %v536_v10   ;;  %v871_v14 = vld [vmem:[%s1054_s2] sm:$0xff]   ;;  %530 = vst.msk [vmem:[#allocation2 + $0x7] sm:$0x7] %vm528_vm6, %v882_v1  ;;  %vm531_vm7 = vcmask 322560   ;;  %v814_v63 = vld [vmem:[%s1057_s5 + $0x8] ss:$0 sm:$0xff] }
  0x11   : > { %v427_v15 = vld [vmem:[%s417_s28] sm:$0x3]  ;;  %v808_v37 = vld [vmem:[%s1057_s5 + $0x2] ss:$0 sm:$0xff]  ;;  %v809_v40 = vld [vmem:[%s1057_s5 + $0x3] ss:$0 sm:$0xff] }
  0x12   : > { %836 = vmatpush3.bf16.msra.mxu0 %v868_v3  ;;  %v804_v19 = vld [vmem:[%s1055_s3] ss:$0 sm:$0xff]  ;;  %v807_v30 = vld [vmem:[%s1057_s5 + $0x1] ss:$0 sm:$0xff]  ;;  %v810_v45 = vld [vmem:[%s1057_s5 + $0x4] ss:$0 sm:$0xff] }
  0x13   : > { %837 = vmatprep.subr.bf16.mxu0 %v882_v1  ;;  %850 = vmatpush3.bf16.msra.mxu1 %v873_v9  ;;  %v805_v22 = vld [vmem:[%s1056_s4] ss:$0 sm:$0xff]  ;;  %v811_v49 = vld [vmem:[%s1057_s5 + $0x5] ss:$0 sm:$0xff]  ;;  %v812_v53 = vld [vmem:[%s1057_s5 + $0x6] ss:$0 sm:$0xff] }
  0x14   : > { %561 = vperm.xlu0 %866, %v559_v12   ;;  %v806_v31 = vld [vmem:[%s1057_s5] ss:$0 sm:$0xff]  ;;  %v813_v58 = vld [vmem:[%s1057_s5 + $0x7] ss:$0 sm:$0xff]  ;;  %v639_v4 = vand.u32 127, %v638_v60  ;;  %vm723_vm11 = vcmask 320512  }
  0x15   : > { %v820_v3 = vld [vmem:[%s1062_s10] ss:$0 sm:$0xff] }
  0x16   : > { %838 = vmatpush3.bf16.msra.mxu0 %v869_v5  ;;  %852 = vmatmul.mubr.msk.bf16.vlgmr.msra.gmra.mxu1 %vm658_vm4, %v645_v13  ;;  %v815_v7 = vld [vmem:[%s1058_s6] ss:$0 sm:$0xff]  ;;  %vm640_vm10 = vcmp.lt.s32.totalorder %v639_v4, 20 }
  0x17   : > { %839 = vmatprep.subr.bf16.mxu0 %v882_v1  ;;  %v816_v10 = vld [vmem:[%s1059_s7] ss:$0 sm:$0xff] }
  0x1a   : > { %840 = vmatpush3.bf16.msra.mxu0 %v870_v11  ;;  %v821_v11 = vld [vmem:[%s1063_s11] ss:$0 sm:$0xff] }
  0x1b   : > { %841 = vmatprep.subr.bf16.mxu0 %v882_v1 }
  0x1e   : > { %842 = vmatpush3.bf16.msra.mxu0 %v871_v14 }
  0x21   : > { %844 = vmatmul.mubr.msk.bf16.vlgmr.msra.gmra.mxu0 %vm464_vm5, %v427_v15 }
  0x8b   : > { %v539_v25 = vpop.permute.xlu0 %538 }
  0x8c   : > { %vm540_vm8 = vcmp.eq.s32.totalorder %v539_v25, 1 }
  0x8f   : > { %v562_v29 = vpop.permute.xlu0 %561 }
  0x90   : > { %vm563_vm9 = vcmp.eq.s32.totalorder %v562_v29, 1 }
  0xd6   : > { %v699_v16 = vpop.f32.mrf.mxu1 }
  0xd7   : > { %v712_v9 = vmul.f32 %v820_v3, %v699_v16 }
  0xd8   : > { %v853_v17 = vpop.f32.mrf.mxu1 }
  0xd9   : > { %v720_v14 = vadd.f32 %v821_v11, %v712_v9 }
  0xda   : > { %v702_v18 = vpop.f32.mrf.mxu1 }
  0xdc   : > { %v854_v20 = vpop.f32.mrf.mxu1 }
  0xe1   : > { %v506_v21 = vpop.f32.mrf.mxu0 }
  0xe2   : > { %v519_v23 = vmul.f32 %v804_v19, %v506_v21 }
  0xe3   : > { %v845_v24 = vpop.f32.mrf.mxu0 }
  0xe4   : > { %v527_v26 = vadd.f32 %v805_v22, %v519_v23 }
  0xe5   : > { %v509_v27 = vpop.f32.mrf.mxu0 }
  0xe6   : > { %532 = vst.msk [vmem:[#allocation2 + $0x3] sm:$0xf] %vm531_vm7, %v527_v26  ;;  %v643_v15 = vsel %vm640_vm10, %v527_v26, 0.0 }
  0xe7   : > { %v846_v28 = vpop.f32.mrf.mxu0 }
  0xed   : > { %v534_v32 = vld [vmem:[#allocation2] sm:$0xf]  ;;  %v588_v43 = vld [vmem:[#allocation2 + $0x4] sm:$0xf] }
  0xee   : > { %v549_v33 = vld [vmem:[#allocation2 + $0x1] sm:$0xf]  ;;  %v541_v35 = vsel %vm540_vm8, %v534_v32, 0.0  ;;  %v589_v50 = vsel %vm563_vm9, %v588_v43, 0.0  ;;  %v597_v54 = vsel %vm540_vm8, %v588_v43, 0.0 }
  0xef   : > { %v557_v34 = vld [vmem:[#allocation2 + $0x2] sm:$0xf]  ;;  %v555_v36 = vmul.f32 %v807_v30, %v549_v33  ;;  %v547_v39 = vmul.f32 %v806_v31, %v541_v35  ;;  %v595_v56 = vmul.f32 %v811_v49, %v589_v50  ;;  %v613_v57 = vld [vmem:[#allocation2 + $0x6] sm:$0xf]  ;;  %v603_v61 = vmul.f32 %v812_v53, %v597_v54 }
  0xf0   : > { %v564_v38 = vsel %vm563_vm9, %v557_v34, 0.0  ;;  %v572_v41 = vsel %vm540_vm8, %v557_v34, 0.0  ;;  %v580_v46 = vld [vmem:[#allocation2 + $0x3] sm:$0xf]  ;;  %v614_v0 = vsel %vm563_vm9, %v613_v57, 0.0 }
  0xf1   : > { %v556_v42 = vadd.f32 %v555_v36, %v547_v39  ;;  %v570_v44 = vmul.f32 %v808_v37, %v564_v38  ;;  %v578_v47 = vmul.f32 %v809_v40, %v572_v41  ;;  %v586_v52 = vmul.f32 %v810_v45, %v580_v46  ;;  %v605_v59 = vld [vmem:[#allocation2 + $0x5] sm:$0xf] }
  0xf2   : > { %v611_v2 = vmul.f32 %v813_v58, %v605_v59  ;;  %v620_v6 = vmul.f32 %v814_v63, %v614_v0 }
  0xf3   : > { %v571_v48 = vadd.f32 %v570_v44, %v556_v42 }
  0xf5   : > { %v579_v51 = vadd.f32 %v578_v47, %v571_v48 }
  0xf7   : > { %v587_v55 = vadd.f32 %v586_v52, %v579_v51 }
  0xf9   : > { %v596_v62 = vadd.f32 %v595_v56, %v587_v55 }
  0xfb   : > { %v604_v1 = vadd.f32 %v603_v61, %v596_v62 }
  0xfd   : > { %v612_v5 = vadd.f32 %v611_v2, %v604_v1 }
  0xff   : > { %v621_v8 = vadd.f32 %v620_v6, %v612_v5 }
 0x101   : > { %v629_v12 = vmul.f32 %v815_v7, %v621_v8 }
 0x103   : > { %v637_v13 = vadd.f32 %v816_v10, %v629_v12 }
 0x105   : > { %v644_v17 = vadd.f32 %v643_v15, %v637_v13 }
 0x107   : > { %v721_v18 = vadd.f32 %v720_v14, %v644_v17 }
 0x109   : > { %v722_v16 = vpack.c.bf16 %v721_v18, %v721_v18 }
 0x10b   : > { %724 = vst.msk [vmem:[%s425_s29] sm:$0x3] %vm723_vm11, %v722_v16 }
 0x10c PF: > { %s22_s21 = sadd.s32 1, %s880_s21  }
 0x10d   : > { %p19_p4 = scmp.ge.s32.totalorder %s22_s21, 4  }
 0x10f   :  { %21 = sbr.rel (!%p19_p4) target bundleno = 1 (0x1), region = 101 }

// kernel: _lambda_.25
= control target key start
LH: loop header
LB: loop body
LE: loop exit
PB: predicated region body
PF: predicated region fallthrough
CT: control target
= control target key end

     0   :  { %s882_s24 = smov 0   ;;  %s1019_s0 = inlined_call_operand.vmem [shape: bf16[2,4,4,72], index: 0, kind: input, shape index: {}]   ;;  %s1020_s1 = inlined_call_operand.vmem [shape: bf16[2,4,4,72], index: 1, kind: input, shape index: {}]   ;;  %s1021_s2 = inlined_call_operand.vmem [shape: bf16[2,4,4,72], index: 2, kind: input, shape index: {}]   ;;  %s1022_s3 = inlined_call_operand.vmem [shape: bf16[2,4,4,72], index: 3, kind: input, shape index: {}]   ;;  %s1023_s4 = inlined_call_operand.vmem [shape: f32[25,72], index: 4, kind: input, shape index: {}]   ;;  %s1024_s5 = inlined_call_operand.vmem [shape: f32[1,72], index: 5, kind: input, shape index: {}]   ;;  %s1025_s6 = inlined_call_operand.vmem [shape: f32[1,72], index: 6, kind: input, shape index: {}]   ;;  %s1026_s7 = inlined_call_operand.vmem [shape: bf16[2,2,2,72], index: 7, kind: output, shape index: {}]  }
   0x1 LB: > { %s779_s25 = sadd.s32 4294967295, %s840_s24   ;;  %p783_p0 = scmp.ge.s32.totalorder %s840_s24, 1  ;;  %s840_s24 = sphi %s882_s24, %s17_s24  }
   0x2   : > { %p267_p1 = scmp.lt.s32.totalorder %s840_s24, 3 }
   0x4   : > { %p268_p2 = pnand %p783_p0, %p267_p1 }
   0x5   : > { %p313_p3 = scmp.lt.s32.totalorder (!%p268_p2), %s779_s25, 1 }
   0x6   : > { %271 = sbr.rel (%p268_p2) target bundleno = 84 (0x54), region = 48 }
   0xb   : > { %s1028_s25 = smov (!%p313_p3, %s779_s25), 1  ;;  %vm345_vm0 = vcmask 584704   ;;  %v793_v28 = vld [vmem:[%s1023_s4] ss:$0 sm:$0xff]  ;;  %v794_v30 = vld [vmem:[%s1023_s4 + $0x1] ss:$0 sm:$0xff] }
   0xc   : > { %s822_s26 = sshll.u32 %s1028_s25, 3  ;;  %v795_v34 = vld [vmem:[%s1023_s4 + $0x2] ss:$0 sm:$0xff]  ;;  %v796_v41 = vld [vmem:[%s1023_s4 + $0x3] ss:$0 sm:$0xff]  ;;  %s792_s30 = sshll.u32 %s1028_s25, 1 }
   0xd   : > { %s896_s29 = scalar_lea.vmem %s1019_s0, %s822_s26  ;;  %s901_s9 = scalar_lea.vmem %s1020_s1, %s822_s26  ;;  %v797_v44 = vld [vmem:[%s1023_s4 + $0x4] ss:$0 sm:$0xff]  ;;  %v798_v51 = vld [vmem:[%s1023_s4 + $0x5] ss:$0 sm:$0xff]  ;;  %v799_v59 = vld [vmem:[%s1023_s4 + $0x6] ss:$0 sm:$0xff] }
   0xe   : > { %v337_v0 = vld [vmem:[%s896_s29] sm:$0x3]  ;;  %v338_v1 = vld [vmem:[%s896_s29 + $0x2] sm:$0x3]  ;;  %s327_s12 = scalar_lea.vmem %s1021_s2, %s822_s26  ;;  %s332_s15 = scalar_lea.vmem %s1022_s3, %s822_s26  ;;  %v339_v14 = vld [vmem:[%s896_s29 + $0x4] sm:$0x3] }
   0xf   : > { %v350_v2 = vld [vmem:[%s901_s9] sm:$0x3]  ;;  %v341_v3 = vunpack.c.l.bf16 %v337_v0  ;;  %v342_v4 = vunpack.c.l.bf16 %v338_v1  ;;  %v351_v6 = vld [vmem:[%s901_s9 + $0x2] sm:$0x3]  ;;  %v343_v17 = vunpack.c.l.bf16 %v339_v14  ;;  %v352_v18 = vld [vmem:[%s901_s9 + $0x4] sm:$0x3]  ;;  %s336_s10 = scalar_lea.vmem %s1026_s7, %s792_s30 }
  0x10   : > { %v354_v5 = vunpack.c.l.bf16 %v350_v2  ;;  %v362_v7 = vld [vmem:[%s327_s12] sm:$0x3]  ;;  %v363_v8 = vld [vmem:[%s327_s12 + $0x2] sm:$0x3]  ;;  %v355_v9 = vunpack.c.l.bf16 %v351_v6  ;;  %v364_v19 = vld [vmem:[%s327_s12 + $0x4] sm:$0x3]  ;;  %v356_v21 = vunpack.c.l.bf16 %v352_v18 }
  0x11   : > { %v366_v10 = vunpack.c.l.bf16 %v362_v7  ;;  %v367_v11 = vunpack.c.l.bf16 %v363_v8  ;;  %v374_v12 = vld [vmem:[%s332_s15] sm:$0x3]  ;;  %v375_v13 = vld [vmem:[%s332_s15 + $0x2] sm:$0x3]  ;;  %346 = vst.msk [vmem:[#allocation2] sm:$0xf] %vm345_vm0, %v341_v3  ;;  %v368_v22 = vunpack.c.l.bf16 %v364_v19 }
  0x12   : > { %347 = vst.msk [vmem:[#allocation2 + $0x4] sm:$0xf] %vm345_vm0, %v342_v4  ;;  %358 = vst.msk [vmem:[#allocation3] sm:$0xf] %vm345_vm0, %v354_v5  ;;  %v378_v15 = vunpack.c.l.bf16 %v374_v12  ;;  %v379_v16 = vunpack.c.l.bf16 %v375_v13  ;;  %v376_v20 = vld [vmem:[%s332_s15 + $0x4] sm:$0x3] }
  0x13   : > { %359 = vst.msk [vmem:[#allocation3 + $0x4] sm:$0xf] %vm345_vm0, %v355_v9  ;;  %370 = vst.msk [vmem:[#allocation4] sm:$0xf] %vm345_vm0, %v366_v10  ;;  %v380_v23 = vunpack.c.l.bf16 %v376_v20  ;;  %v340_v24 = vld [vmem:[%s896_s29 + $0x6] sm:$0x3] }
  0x14   : > { %371 = vst.msk [vmem:[#allocation4 + $0x4] sm:$0xf] %vm345_vm0, %v367_v11  ;;  %v353_v25 = vld [vmem:[%s901_s9 + $0x6] sm:$0x3]  ;;  %382 = vst.msk [vmem:[#allocation5] sm:$0xf] %vm345_vm0, %v378_v15  ;;  %v344_v26 = vunpack.c.l.bf16 %v340_v24 }
  0x15   : > { %383 = vst.msk [vmem:[#allocation5 + $0x4] sm:$0xf] %vm345_vm0, %v379_v16  ;;  %348 = vst.msk [vmem:[#allocation2 + $0x8] sm:$0xf] %vm345_vm0, %v343_v17  ;;  %v357_v27 = vunpack.c.l.bf16 %v353_v25  ;;  %v800_v6 = vld [vmem:[%s1023_s4 + $0x7] ss:$0 sm:$0xff] }
  0x16   : > { %360 = vst.msk [vmem:[#allocation3 + $0x8] sm:$0xf] %vm345_vm0, %v356_v21  ;;  %372 = vst.msk [vmem:[#allocation4 + $0x8] sm:$0xf] %vm345_vm0, %v368_v22  ;;  %v801_v13 = vld [vmem:[%s1023_s4 + $0x8] ss:$0 sm:$0xff] }
  0x17   : > { %384 = vst.msk [vmem:[#allocation5 + $0x8] sm:$0xf] %vm345_vm0, %v380_v23  ;;  %349 = vst.msk [vmem:[#allocation2 + $0xc] sm:$0xf] %vm345_vm0, %v344_v26  ;;  %v802_v18 = vld [vmem:[%s1023_s4 + $0x9] ss:$0 sm:$0xff] }
  0x18   : > { %361 = vst.msk [vmem:[#allocation3 + $0xc] sm:$0xf] %vm345_vm0, %v357_v27  ;;  %v386_v29 = vld [vmem:[#allocation2] sm:$0x3]  ;;  %v430_v47 = vld [vmem:[#allocation2 + $0x2] sm:$0x3] }
  0x19   : > { %v393_v31 = vmul.f32 %v793_v28, %v386_v29  ;;  %v387_v32 = vld [vmem:[#allocation2 + $0x4] sm:$0x3]  ;;  %v408_v33 = vld [vmem:[#allocation2 + $0x1] sm:$0x3]  ;;  %v397_v36 = vld [vmem:[#allocation3] sm:$0x3]  ;;  %v437_v60 = vmul.f32 %v797_v44, %v430_v47 }
  0x1a   : > { %v394_v35 = vmul.f32 %v793_v28, %v387_v32  ;;  %v409_v37 = vld [vmem:[#allocation2 + $0x5] sm:$0x3]  ;;  %v404_v38 = vmul.f32 %v794_v30, %v397_v36  ;;  %v398_v39 = vld [vmem:[#allocation3 + $0x4] sm:$0x3]  ;;  %v419_v40 = vld [vmem:[#allocation3 + $0x1] sm:$0x3]  ;;  %v415_v43 = vmul.f32 %v795_v34, %v408_v33 }
  0x1b   : > { %v405_v42 = vmul.f32 %v794_v30, %v398_v39  ;;  %v420_v46 = vld [vmem:[#allocation3 + $0x5] sm:$0x3]  ;;  %v416_v48 = vmul.f32 %v795_v34, %v409_v37  ;;  %v441_v50 = vld [vmem:[#allocation4] sm:$0x3]  ;;  %v431_v52 = vld [vmem:[#allocation2 + $0x6] sm:$0x3]  ;;  %v426_v54 = vmul.f32 %v796_v41, %v419_v40 }
  0x1c   : > { %v406_v45 = vadd.f32 %v404_v38, %v393_v31  ;;  %v442_v55 = vld [vmem:[#allocation4 + $0x4] sm:$0x3]  ;;  %v427_v57 = vmul.f32 %v796_v41, %v420_v46  ;;  %v452_v58 = vld [vmem:[#allocation5] sm:$0x3]  ;;  %v448_v62 = vmul.f32 %v798_v51, %v441_v50  ;;  %v453_v63 = vld [vmem:[#allocation5 + $0x4] sm:$0x3]  ;;  %v438_v0 = vmul.f32 %v797_v44, %v431_v52 }
  0x1d   : > { %v407_v49 = vadd.f32 %v405_v42, %v394_v35  ;;  %v449_v2 = vmul.f32 %v798_v51, %v442_v55  ;;  %v459_v4 = vmul.f32 %v799_v59, %v452_v58  ;;  %v463_v5 = vld [vmem:[#allocation4 + $0x1] sm:$0x3]  ;;  %v460_v8 = vmul.f32 %v799_v59, %v453_v63  ;;  %v464_v10 = vld [vmem:[#allocation4 + $0x5] sm:$0x3]  ;;  %v474_v12 = vld [vmem:[#allocation5 + $0x1] sm:$0x3] }
  0x1e   : > { %v417_v53 = vadd.f32 %v415_v43, %v406_v45  ;;  %v470_v14 = vmul.f32 %v800_v6, %v463_v5  ;;  %v475_v16 = vld [vmem:[#allocation5 + $0x5] sm:$0x3]  ;;  %v485_v17 = vld [vmem:[#allocation4 + $0x2] sm:$0x3]  ;;  %v471_v19 = vmul.f32 %v800_v6, %v464_v10  ;;  %v486_v21 = vld [vmem:[#allocation4 + $0x6] sm:$0x3]  ;;  %v481_v23 = vmul.f32 %v801_v13, %v474_v12 }
  0x1f   : > { %v418_v56 = vadd.f32 %v416_v48, %v407_v49  ;;  %v498_v24 = vld [vmem:[#allocation2 + $0x8] sm:$0x3]  ;;  %v497_v25 = vld [vmem:[#allocation2 + $0x4] sm:$0x3]  ;;  %v803_v26 = vld [vmem:[%s1023_s4 + $0xa] ss:$0 sm:$0xff]  ;;  %v482_v28 = vmul.f32 %v801_v13, %v475_v16  ;;  %v492_v29 = vmul.f32 %v802_v18, %v485_v17  ;;  %v493_v34 = vmul.f32 %v802_v18, %v486_v21 }
  0x20   : > { %v428_v61 = vadd.f32 %v426_v54, %v417_v53  ;;  %v510_v31 = vld [vmem:[#allocation3 + $0x8] sm:$0x3]  ;;  %v509_v32 = vld [vmem:[#allocation3 + $0x4] sm:$0x3]  ;;  %v804_v33 = vld [vmem:[%s1023_s4 + $0xb] ss:$0 sm:$0xff]  ;;  %v505_v36 = vmul.f32 %v803_v26, %v498_v24  ;;  %v504_v37 = vmul.f32 %v803_v26, %v497_v25 }
  0x21   : > { %v429_v1 = vadd.f32 %v427_v57, %v418_v56  ;;  %v520_v39 = vld [vmem:[#allocation2 + $0x5] sm:$0x3]  ;;  %v805_v40 = vld [vmem:[%s1023_s4 + $0xc] ss:$0 sm:$0xff]  ;;  %v517_v42 = vmul.f32 %v804_v33, %v510_v31  ;;  %v516_v43 = vmul.f32 %v804_v33, %v509_v32  ;;  %v521_v44 = vld [vmem:[#allocation2 + $0x9] sm:$0x3] }
  0x22   : > { %v439_v3 = vadd.f32 %v437_v60, %v428_v61  ;;  %v531_v46 = vld [vmem:[#allocation3 + $0x5] sm:$0x3]  ;;  %v806_v48 = vld [vmem:[%s1023_s4 + $0xd] ss:$0 sm:$0xff]  ;;  %v527_v49 = vmul.f32 %v805_v40, %v520_v39  ;;  %v532_v50 = vld [vmem:[#allocation3 + $0x9] sm:$0x3]  ;;  %v528_v52 = vmul.f32 %v805_v40, %v521_v44 }
  0x23   : > { %v440_v7 = vadd.f32 %v438_v0, %v429_v1  ;;  %v542_v53 = vld [vmem:[#allocation2 + $0x6] sm:$0x3]  ;;  %v807_v54 = vld [vmem:[%s1023_s4 + $0xe] ss:$0 sm:$0xff]  ;;  %v538_v57 = vmul.f32 %v806_v48, %v531_v46  ;;  %v543_v58 = vld [vmem:[#allocation2 + $0xa] sm:$0x3]  ;;  %v539_v63 = vmul.f32 %v806_v48, %v532_v50 }
  0x24   : > { %v450_v9 = vadd.f32 %v448_v62, %v439_v3  ;;  %v555_v59 = vld [vmem:[#allocation4 + $0x8] sm:$0x3]  ;;  %v554_v60 = vld [vmem:[#allocation4 + $0x4] sm:$0x3]  ;;  %v808_v61 = vld [vmem:[%s1023_s4 + $0xf] ss:$0 sm:$0xff]  ;;  %v549_v1 = vmul.f32 %v807_v54, %v542_v53  ;;  %v550_v6 = vmul.f32 %v807_v54, %v543_v58 }
  0x25   : > { %v451_v11 = vadd.f32 %v449_v2, %v440_v7  ;;  %v567_v2 = vld [vmem:[#allocation5 + $0x8] sm:$0x3]  ;;  %v566_v3 = vld [vmem:[#allocation5 + $0x4] sm:$0x3]  ;;  %v562_v7 = vmul.f32 %v808_v61, %v555_v59  ;;  %v577_v10 = vld [vmem:[#allocation4 + $0x5] sm:$0x3] }
  0x26   : > { %v461_v15 = vadd.f32 %v459_v4, %v450_v9  ;;  %v809_v4 = vld [vmem:[%s1023_s4 + $0x10] ss:$0 sm:$0xff]  ;;  %v561_v9 = vmul.f32 %v808_v61, %v554_v60  ;;  %v578_v16 = vld [vmem:[#allocation4 + $0x9] sm:$0x3]  ;;  %v588_v17 = vld [vmem:[#allocation5 + $0x5] sm:$0x3] }
  0x27   : > { %v462_v20 = vadd.f32 %v460_v8, %v451_v11  ;;  %v810_v11 = vld [vmem:[%s1023_s4 + $0x11] ss:$0 sm:$0xff]  ;;  %v574_v13 = vmul.f32 %v809_v4, %v567_v2  ;;  %v811_v18 = vld [vmem:[%s1023_s4 + $0x12] ss:$0 sm:$0xff]  ;;  %v812_v24 = vld [vmem:[%s1023_s4 + $0x13] ss:$0 sm:$0xff] }
  0x28   : > { %v472_v22 = vadd.f32 %v470_v14, %v461_v15  ;;  %v573_v15 = vmul.f32 %v809_v4, %v566_v3  ;;  %v584_v21 = vmul.f32 %v810_v11, %v577_v10  ;;  %v585_v26 = vmul.f32 %v810_v11, %v578_v16  ;;  %v611_v31 = vld [vmem:[#allocation2 + $0x8] sm:$0x3]  ;;  %v813_v32 = vld [vmem:[%s1023_s4 + $0x14] ss:$0 sm:$0xff]  ;;  %v814_v39 = vld [vmem:[%s1023_s4 + $0x15] ss:$0 sm:$0xff] }
  0x29   : > { %v473_v27 = vadd.f32 %v471_v19, %v462_v20  ;;  %v618_v44 = vmul.f32 %v813_v32, %v611_v31  ;;  %v815_v46 = vld [vmem:[%s1023_s4 + $0x16] ss:$0 sm:$0xff]  ;;  %v816_v53 = vld [vmem:[%s1023_s4 + $0x17] ss:$0 sm:$0xff]  ;;  %v656_v58 = vld [vmem:[#allocation2 + $0xa] sm:$0x3] }
  0x2a   : > { %v483_v30 = vadd.f32 %v481_v23, %v472_v22  ;;  %v589_v22 = vld [vmem:[#allocation5 + $0x9] sm:$0x3]  ;;  %v599_v23 = vld [vmem:[#allocation4 + $0x6] sm:$0x3]  ;;  %v817_v59 = vld [vmem:[%s1023_s4 + $0x18] ss:$0 sm:$0xff] }
  0x2b   : > { %v484_v35 = vadd.f32 %v482_v28, %v473_v27  ;;  %v595_v28 = vmul.f32 %v811_v18, %v588_v17  ;;  %v663_v4 = vmul.f32 %v817_v59, %v656_v58  ;;  %vm687_vm1 = vcmask 581632  }
  0x2c   : > { %v494_v38 = vadd.f32 %v492_v29, %v483_v30  ;;  %v600_v29 = vld [vmem:[#allocation4 + $0xa] sm:$0x3]  ;;  %v612_v30 = vld [vmem:[#allocation2 + $0xc] sm:$0x3] }
  0x2d   : > { %v495_v41 = vadd.f32 %v493_v34, %v484_v35  ;;  %v596_v34 = vmul.f32 %v811_v18, %v589_v22 }
  0x2e   : > { %v506_v45 = vadd.f32 %v504_v37, %v494_v38  ;;  %v624_v37 = vld [vmem:[#allocation3 + $0xc] sm:$0x3]  ;;  %v623_v38 = vld [vmem:[#allocation3 + $0x8] sm:$0x3] }
  0x2f   : > { %v507_v47 = vadd.f32 %v505_v36, %v495_v41  ;;  %v606_v36 = vmul.f32 %v812_v24, %v599_v23  ;;  %v607_v41 = vmul.f32 %v812_v24, %v600_v29  ;;  %v631_v48 = vmul.f32 %v814_v39, %v624_v37 }
  0x30   : > { %v518_v51 = vadd.f32 %v516_v43, %v506_v45  ;;  %v634_v45 = vld [vmem:[#allocation2 + $0x9] sm:$0x3]  ;;  %v630_v50 = vmul.f32 %v814_v39, %v623_v38 }
  0x31   : > { %v519_v55 = vadd.f32 %v517_v42, %v507_v47  ;;  %v619_v42 = vmul.f32 %v813_v32, %v612_v30 }
  0x32   : > { %v529_v56 = vadd.f32 %v527_v49, %v518_v51  ;;  %v635_v51 = vld [vmem:[#allocation2 + $0xd] sm:$0x3] }
  0x33   : > { %v530_v62 = vadd.f32 %v528_v52, %v519_v55  ;;  %v645_v52 = vld [vmem:[#allocation3 + $0x9] sm:$0x3]  ;;  %v642_v61 = vmul.f32 %v815_v46, %v635_v51 }
  0x34   : > { %v540_v0 = vadd.f32 %v538_v57, %v529_v56  ;;  %v641_v56 = vmul.f32 %v815_v46, %v634_v45  ;;  %v646_v57 = vld [vmem:[#allocation3 + $0xd] sm:$0x3] }
  0x35   : > { %v541_v5 = vadd.f32 %v539_v63, %v530_v62  ;;  %v652_v63 = vmul.f32 %v816_v53, %v645_v52  ;;  %v653_v2 = vmul.f32 %v816_v53, %v646_v57 }
  0x36   : > { %v551_v8 = vadd.f32 %v549_v1, %v540_v0  ;;  %v657_v0 = vld [vmem:[#allocation2 + $0xe] sm:$0x3] }
  0x37   : > { %v552_v12 = vadd.f32 %v550_v6, %v541_v5  ;;  %v818_v5 = vld [vmem:[%s1024_s5] ss:$0 sm:$0xff] }
  0x38   : > { %v563_v14 = vadd.f32 %v561_v9, %v551_v8  ;;  %v819_v9 = vld [vmem:[%s1025_s6] ss:$0 sm:$0xff] }
  0x39   : > { %v564_v19 = vadd.f32 %v562_v7, %v552_v12  ;;  %v664_v7 = vmul.f32 %v817_v59, %v657_v0 }
  0x3a   : > { %v575_v20 = vadd.f32 %v573_v15, %v563_v14 }
  0x3b   : > { %v576_v25 = vadd.f32 %v574_v13, %v564_v19 }
  0x3c   : > { %v586_v27 = vadd.f32 %v584_v21, %v575_v20 }
  0x3d   : > { %v587_v33 = vadd.f32 %v585_v26, %v576_v25 }
  0x3e   : > { %v597_v35 = vadd.f32 %v595_v28, %v586_v27 }
  0x3f   : > { %v598_v40 = vadd.f32 %v596_v34, %v587_v33 }
  0x40   : > { %v608_v43 = vadd.f32 %v606_v36, %v597_v35 }
  0x41   : > { %v609_v47 = vadd.f32 %v607_v41, %v598_v40 }
  0x42   : > { %v620_v49 = vadd.f32 %v618_v44, %v608_v43 }
  0x43   : > { %v621_v54 = vadd.f32 %v619_v42, %v609_v47 }
  0x44   : > { %v632_v55 = vadd.f32 %v630_v50, %v620_v49 }
  0x45   : > { %v633_v60 = vadd.f32 %v631_v48, %v621_v54 }
  0x46   : > { %v643_v62 = vadd.f32 %v641_v56, %v632_v55 }
  0x47   : > { %v644_v1 = vadd.f32 %v642_v61, %v633_v60 }
  0x48   : > { %v654_v3 = vadd.f32 %v652_v63, %v643_v62 }
  0x49   : > { %v655_v6 = vadd.f32 %v653_v2, %v644_v1 }
  0x4a   : > { %v665_v8 = vadd.f32 %v663_v4, %v654_v3 }
  0x4b   : > { %v666_v10 = vadd.f32 %v664_v7, %v655_v6 }
  0x4c   : > { %v674_v11 = vmul.f32 %v818_v5, %v665_v8 }
  0x4d   : > { %v675_v12 = vmul.f32 %v818_v5, %v666_v10 }
  0x4e   : > { %v683_v13 = vadd.f32 %v819_v9, %v674_v11 }
  0x4f   : > { %v684_v14 = vadd.f32 %v819_v9, %v675_v12 }
  0x50   : > { %v685_v15 = vpack.c.bf16 %v683_v13, %v683_v13 }
  0x51   : > { %v686_v16 = vpack.c.bf16 %v684_v14, %v684_v14 }
  0x52   : > { %688 = vst.msk [vmem:[%s336_s10] sm:$0x1] %vm687_vm1, %v685_v15 }
  0x53   : > { %689 = vst.msk [vmem:[%s336_s10 + $0x1] sm:$0x1] %vm687_vm1, %v686_v16 }
  0x54 PF: > { %s17_s24 = sadd.s32 1, %s840_s24  }
  0x55   : > { %p14_p4 = scmp.ge.s32.totalorder %s17_s24, 4  }
  0x57   :  { %16 = sbr.rel (!%p14_p4) target bundleno = 1 (0x1), region = 93 }

// kernel: _lambda_.29
= control target key start
LH: loop header
LB: loop body
LE: loop exit
PB: predicated region body
PF: predicated region fallthrough
CT: control target
= control target key end

     0   :  { %vm330_vm0 = vcmask 1043456   ;;  %v2002_v7 = vmov 0   ;;  %vm29_vm1 = vcmask 584704   ;;  %vm98_vm2 = vcmask 1041409   ;;  %s2507_s0 = inlined_call_operand.vmem [shape: bf16[2,4,72], index: 0, kind: input, shape index: {}]   ;;  %s2508_s1 = inlined_call_operand.vmem [shape: bf16[72,1280], index: 1, kind: input, shape index: {}]   ;;  %s2509_s2 = inlined_call_operand.vmem [shape: f32[1,1280], index: 2, kind: input, shape index: {}]   ;;  %s2510_s3 = inlined_call_operand.vmem [shape: f32[1,1280], index: 3, kind: input, shape index: {}]   ;;  %s2511_s4 = inlined_call_operand.vmem [shape: bf16[1280,10], index: 4, kind: input, shape index: {}]   ;;  %s2512_s5 = inlined_call_operand.vmem [shape: f32[1,10], index: 5, kind: input, shape index: {}]   ;;  %s2513_s6 = inlined_call_operand.hbm [shape: f32[2,10], index: 6, kind: output, shape index: {}]  }
   0x1   :  { %v89_v0 = vld [vmem:[%s2508_s1 + $0x140] sm:$0xff]  ;;  %v90_v1 = vld [vmem:[%s2508_s1 + $0x148] sm:$0xff]  ;;  %v1834_v6 = vld [vmem:[%s2508_s1 + $0xf4] ss:$40 sps:$4 sm:$0xff]   ;;  %393 = vmatprep.mubr.bf16.mxu0 %v2002_v7  ;;  %434 = vmatprep.mubr.bf16.mxu1 %v2002_v7  ;;  %vm326_vm3 = vcmask 588800  }
   0x2   :  { %v1618_v2 = vcombine.high %v89_v0, %v89_v0  ;;  %v1617_v3 = vcombine.low %v89_v0, %v89_v0  ;;  %v1620_v4 = vcombine.high %v90_v1, %v90_v1  ;;  %v1619_v5 = vcombine.low %v90_v1, %v90_v1  ;;  %v1837_v8 = vld [vmem:[%s2508_s1 + $0xfc] ss:$40 sps:$4 sm:$0xff]   ;;  %v1836_v11 = vld [vmem:[%s2508_s1 + $0xf0] ss:$40 sps:$4 sm:$0xff]   ;;  %v1843_v14 = vld [vmem:[%s2508_s1 + $0xac] ss:$40 sps:$4 sm:$0xff]  }
   0x3   :  { %v1839_v12 = vld [vmem:[%s2508_s1 + $0xf8] ss:$40 sps:$4 sm:$0xff]   ;;  %v1840_v13 = vld [vmem:[%s2508_s1 + $0xa4] ss:$40 sps:$4 sm:$0xff]   ;;  %v1845_v16 = vld [vmem:[%s2508_s1 + $0xa8] ss:$40 sps:$4 sm:$0xff]  }
   0x4   :  { %1627 = vmatprep.subr.msk.bf16.mxu0 %vm330_vm0, %v1618_v2  ;;  %v332_v9 = vsel %vm330_vm0, %v1617_v3, 0  ;;  %1629 = vmatprep.subr.msk.bf16.mxu1 %vm330_vm0, %v1620_v4  ;;  %v338_v10 = vsel %vm330_vm0, %v1619_v5, 0  ;;  %v1842_v15 = vld [vmem:[%s2508_s1 + $0xa0] ss:$40 sps:$4 sm:$0xff]   ;;  %v1846_v17 = vld [vmem:[%s2508_s1 + $0x54] ss:$40 sps:$4 sm:$0xff]  }
   0x5   :  { %368 = vmatpush1.bf16.msra.mxu0 %v332_v9  ;;  %409 = vmatpush1.bf16.msra.mxu1 %v338_v10  ;;  %v1849_v18 = vld [vmem:[%s2508_s1 + $0x5c] ss:$40 sps:$4 sm:$0xff]   ;;  %v1848_v19 = vld [vmem:[%s2508_s1 + $0x50] ss:$40 sps:$4 sm:$0xff]   ;;  %v25_v20 = vld [vmem:[%s2507_s0] sm:$0x3] }
   0x6   :  { %369 = vmatprep.subr.bf16.mxu0 %v1834_v6  ;;  %410 = vmatprep.subr.bf16.mxu1 %v1837_v8  ;;  %v26_v21 = vld [vmem:[%s2507_s0 + $0x2] sm:$0x3]  ;;  %v27_v23 = vunpack.c.l.bf16 %v25_v20  ;;  %v1852_v25 = vld [vmem:[%s2508_s1 + $0x4] ss:$40 sps:$4 sm:$0xff]   ;;  %v91_v27 = vld [vmem:[%s2508_s1 + $0x150] sm:$0xff] }
   0x7   :  { %v1851_v22 = vld [vmem:[%s2508_s1 + $0x58] ss:$40 sps:$4 sm:$0xff]   ;;  %v28_v24 = vunpack.c.l.bf16 %v26_v21  ;;  %v1855_v26 = vld [vmem:[%s2508_s1 + $0xc] ss:$40 sps:$4 sm:$0xff]   ;;  %v1857_v34 = vld [vmem:[%s2508_s1 + $0x8] ss:$40 sps:$4 sm:$0xff]   ;;  %v1622_v35 = vcombine.high %v91_v27, %v91_v27  ;;  %v1621_v51 = vcombine.low %v91_v27, %v91_v27 }
   0x8   :  { %v30_v28 = vsel %vm29_vm1, %v27_v23, 0.0  ;;  %v92_v30 = vld [vmem:[%s2508_s1 + $0x158] sm:$0xff]  ;;  %v1854_v33 = vld [vmem:[%s2508_s1] ss:$40 sps:$4 sm:$0xff]   ;;  %v1862_v55 = vld [vmem:[%s2508_s1 + $0x104] ss:$40 sps:$4 sm:$0xff]  }
   0x9   :  { %370 = vmatpush1.bf16.msra.mxu0 %v1836_v11  ;;  %411 = vmatpush1.bf16.msra.mxu1 %v1839_v12  ;;  %v37_v29 = vsel %vm29_vm1, %v28_v24, 0.0  ;;  %v31_v31 = vrot.slane %v30_v28, 4  ;;  %v1624_v38 = vcombine.high %v92_v30, %v92_v30  ;;  %v1623_v52 = vcombine.low %v92_v30, %v92_v30  ;;  %v1870_v60 = vld [vmem:[%s2508_s1 + $0x10c] ss:$40 sps:$4 sm:$0xff]   ;;  %v1860_v61 = vld [vmem:[%s2508_s1 + $0x100] ss:$40 sps:$4 sm:$0xff]  }
   0xa   :  { %371 = vmatprep.subr.bf16.mxu0 %v1840_v13  ;;  %412 = vmatprep.subr.bf16.mxu1 %v1843_v14  ;;  %v38_v32 = vrot.slane %v37_v29, 4  ;;  %v344_v57 = vsel %vm330_vm0, %v1621_v51, 0  ;;  %v1866_v62 = vld [vmem:[%s2508_s1 + $0xb4] ss:$40 sps:$4 sm:$0xff]   ;;  %v1868_v63 = vld [vmem:[%s2508_s1 + $0x108] ss:$40 sps:$4 sm:$0xff]  }
   0xb   :  { %v32_v36 = vadd.f32 %v31_v31, %v30_v28  ;;  %v350_v58 = vsel %vm330_vm0, %v1623_v52, 0  ;;  %v1876_v0 = vld [vmem:[%s2508_s1 + $0xbc] ss:$40 sps:$4 sm:$0xff]   ;;  %v1864_v1 = vld [vmem:[%s2508_s1 + $0xb0] ss:$40 sps:$4 sm:$0xff]   ;;  %v1908_v23 = vld [vmem:[%s2511_s4 + $0x68] sm:$0xff]  }
   0xc   :  { %v39_v37 = vadd.f32 %v38_v32, %v37_v29  ;;  %v1873_v2 = vld [vmem:[%s2508_s1 + $0x64] ss:$40 sps:$4 sm:$0xff]   ;;  %v1874_v3 = vld [vmem:[%s2508_s1 + $0xb8] ss:$40 sps:$4 sm:$0xff]   ;;  %v1879_v8 = vld [vmem:[%s2508_s1 + $0x14] ss:$40 sps:$4 sm:$0xff]  }
   0xd   :  { %372 = vmatpush1.bf16.msra.mxu0 %v1842_v15  ;;  %413 = vmatpush1.bf16.msra.mxu1 %v1845_v16  ;;  %v33_v39 = vrot.slane %v32_v36, 2  ;;  %v1882_v4 = vld [vmem:[%s2508_s1 + $0x6c] ss:$40 sps:$4 sm:$0xff]   ;;  %v1871_v5 = vld [vmem:[%s2508_s1 + $0x60] ss:$40 sps:$4 sm:$0xff]   ;;  %v1900_v16 = vld [vmem:[%s2511_s4 + $0x78] sm:$0xff]  }
   0xe   :  { %373 = vmatprep.subr.bf16.mxu0 %v1846_v17  ;;  %414 = vmatprep.subr.bf16.mxu1 %v1849_v18  ;;  %v40_v40 = vrot.slane %v39_v37, 2  ;;  %v93_v6 = vld [vmem:[%s2508_s1 + $0x160] sm:$0xff]  ;;  %v1880_v9 = vld [vmem:[%s2508_s1 + $0x68] ss:$40 sps:$4 sm:$0xff]   ;;  %v1890_v17 = vld [vmem:[%s2508_s1 + $0x114] ss:$40 sps:$4 sm:$0xff]  }
   0xf   :  { %v34_v41 = vadd.f32 %v33_v39, %v32_v36  ;;  %v1885_v10 = vld [vmem:[%s2508_s1 + $0x1c] ss:$40 sps:$4 sm:$0xff]   ;;  %v1625_v11 = vcombine.low %v93_v6, %v93_v6  ;;  %v1877_v12 = vld [vmem:[%s2508_s1 + $0x10] ss:$40 sps:$4 sm:$0xff]   ;;  %v1626_v14 = vcombine.high %v93_v6, %v93_v6  ;;  %v1891_v24 = vld [vmem:[%s2508_s1 + $0xc0] ss:$40 sps:$4 sm:$0xff]  }
  0x10   :  { %v41_v42 = vadd.f32 %v40_v40, %v39_v37  ;;  %v1883_v13 = vld [vmem:[%s2508_s1 + $0x18] ss:$40 sps:$4 sm:$0xff]   ;;  %v1893_v21 = vld [vmem:[%s2508_s1 + $0xc4] ss:$40 sps:$4 sm:$0xff]   ;;  %v1906_v36 = vld [vmem:[%s2511_s4 + $0xf0] sm:$0xff]  }
  0x11   :  { %374 = vmatpush1.bf16.msra.mxu0 %v1848_v19  ;;  %415 = vmatpush1.bf16.msra.mxu1 %v1851_v22  ;;  %v35_v43 = vrot.slane %v34_v41, 1  ;;  %v356_v15 = vsel %vm330_vm0, %v1625_v11, 0  ;;  %v1901_v18 = vld [vmem:[%s2511_s4 + $0x38] sm:$0xff]   ;;  %v1904_v19 = vld [vmem:[%s2511_s4 + $0x70] sm:$0xff]   ;;  %v1899_v28 = vld [vmem:[%s2508_s1 + $0x24] ss:$40 sps:$4 sm:$0xff]  }
  0x12   :  { %375 = vmatprep.subr.bf16.mxu0 %v1852_v25  ;;  %416 = vmatprep.subr.bf16.mxu1 %v1855_v26  ;;  %v42_v44 = vrot.slane %v41_v42, 1  ;;  %v1888_v20 = vld [vmem:[%s2508_s1 + $0x110] ss:$40 sps:$4 sm:$0xff]   ;;  %v1896_v25 = vld [vmem:[%s2508_s1 + $0x74] ss:$40 sps:$4 sm:$0xff]   ;;  %v1909_v26 = vld [vmem:[%s2511_s4 + $0x28] sm:$0xff]  }
  0x13   :  { %v36_v45 = vadd.f32 %v35_v43, %v34_v41  ;;  %v1905_v22 = vld [vmem:[%s2511_s4 + $0x30] sm:$0xff]   ;;  %v1913_v29 = vld [vmem:[%s2511_s4 + $0x20] sm:$0xff]   ;;  %v1916_v30 = vld [vmem:[%s2511_s4 + $0x58] sm:$0xff]  }
  0x14   :  { %v43_v46 = vadd.f32 %v42_v44, %v41_v42  ;;  %v1894_v27 = vld [vmem:[%s2508_s1 + $0x70] ss:$40 sps:$4 sm:$0xff]   ;;  %v1897_v31 = vld [vmem:[%s2508_s1 + $0x20] ss:$40 sps:$4 sm:$0xff]  }
  0x15   :  { %376 = vmatpush1.bf16.msra.mxu0 %v1854_v33  ;;  %417 = vmatpush1.bf16.msra.mxu1 %v1857_v34  ;;  %v45_v47 = vmul.f32 0.25, %v36_v45  ;;  %v1902_v32 = vld [vmem:[%s2511_s4 + $0xf8] sm:$0xff]   ;;  %v1920_v34 = vld [vmem:[%s2511_s4 + $0x50] sm:$0xff]   ;;  %v1911_v39 = vld [vmem:[%s2511_s4 + $0xa8] sm:$0xff]  }
  0x16   :  { %1631 = vmatprep.subr.msk.bf16.mxu0 %vm330_vm0, %v1622_v35  ;;  %1633 = vmatprep.subr.msk.bf16.mxu1 %vm330_vm0, %v1624_v38  ;;  %v46_v48 = vmul.f32 0.25, %v43_v46  ;;  %v1917_v33 = vld [vmem:[%s2511_s4 + $0x18] sm:$0xff]   ;;  %v1907_v37 = vld [vmem:[%s2511_s4 + $0xb0] sm:$0xff]   ;;  %v1910_v38 = vld [vmem:[%s2511_s4 + $0xe8] sm:$0xff]  }
  0x17   :  { %v47_v49 = vpack.c.bf16 %v45_v47, %v45_v47  ;;  %v1903_v35 = vld [vmem:[%s2511_s4 + $0xb8] sm:$0xff]   ;;  %v1914_v40 = vld [vmem:[%s2511_s4 + $0xe0] sm:$0xff]  }
  0x18   :  { %v48_v50 = vpack.c.bf16 %v46_v48, %v46_v48  ;;  %v1915_v41 = vld [vmem:[%s2511_s4 + $0xa0] sm:$0xff]   ;;  %v1918_v42 = vld [vmem:[%s2511_s4 + $0xd8] sm:$0xff]  }
  0x19   :  { %v96_v53 = vunpack.c.l.b16 %v47_v49  ;;  %v1919_v43 = vld [vmem:[%s2511_s4 + $0x98] sm:$0xff]  }
  0x1a   :  { %v97_v54 = vunpack.c.l.b16 %v48_v50 }
  0x1c   :  { %v99_v56 = vsel %vm98_vm2, %v97_v54, %v96_v53 }
  0x1d   :  { %v2118_v59 = vpack.c.b16 %v99_v56, %v99_v56 }
  0x1f   :  { %1628 = vmatmul.mubr.msk.bf16.vlgmr.msra.gmra.mxu0 %vm326_vm3, %v2118_v59  ;;  %1630 = vmatmul.mubr.msk.bf16.vlgmr.msra.gmra.mxu1 %vm326_vm3, %v2118_v59 }
  0x20   :  { %450 = vmatpush1.bf16.msra.mxu0 %v344_v57  ;;  %491 = vmatpush1.bf16.msra.mxu1 %v350_v58 }
  0x21   :  { %451 = vmatprep.subr.bf16.mxu0 %v1862_v55  ;;  %492 = vmatprep.subr.bf16.mxu1 %v1870_v60 }
  0x22   :  { %475 = vmatprep.mubr.bf16.mxu0 %v2002_v7  ;;  %516 = vmatprep.mubr.bf16.mxu1 %v2002_v7 }
  0x24   :  { %452 = vmatpush1.bf16.msra.mxu0 %v1860_v61  ;;  %493 = vmatpush1.bf16.msra.mxu1 %v1868_v63 }
  0x25   :  { %453 = vmatprep.subr.bf16.mxu0 %v1866_v62  ;;  %494 = vmatprep.subr.bf16.mxu1 %v1876_v0 }
  0x28   :  { %454 = vmatpush1.bf16.msra.mxu0 %v1864_v1  ;;  %495 = vmatpush1.bf16.msra.mxu1 %v1874_v3 }
  0x29   :  { %455 = vmatprep.subr.bf16.mxu0 %v1873_v2  ;;  %496 = vmatprep.subr.bf16.mxu1 %v1882_v4 }
  0x2c   :  { %456 = vmatpush1.bf16.msra.mxu0 %v1871_v5  ;;  %497 = vmatpush1.bf16.msra.mxu1 %v1880_v9 }
  0x2d   :  { %457 = vmatprep.subr.bf16.mxu0 %v1879_v8  ;;  %498 = vmatprep.subr.bf16.mxu1 %v1885_v10 }
  0x30   :  { %458 = vmatpush1.bf16.msra.mxu0 %v1877_v12  ;;  %499 = vmatpush1.bf16.msra.mxu1 %v1883_v13 }
  0x31   :  { %1635 = vmatprep.subr.msk.bf16.mxu0 %vm330_vm0, %v1626_v14  ;;  %1718 = vmatprep.subr.bf16.mxu1 %v1900_v16 }
  0x33   :  { %1632 = vmatmul.mubr.msk.bf16.vlgmr.msra.gmra.mxu0 %vm326_vm3, %v2118_v59  ;;  %1634 = vmatmul.mubr.msk.bf16.vlgmr.msra.gmra.mxu1 %vm326_vm3, %v2118_v59 }
  0x34   :  { %532 = vmatpush1.bf16.msra.mxu0 %v356_v15  ;;  %557 = vmatprep.mubr.bf16.mxu0 %v2002_v7  ;;  %v1912_v7 = vld [vmem:[%s2511_s4 + $0x60] sm:$0xff]  }
  0x35   :  { %533 = vmatprep.subr.bf16.mxu0 %v1890_v17  ;;  %1719 = vmatpush3.bf16.msra.mxu1 %v1901_v18 }
  0x36   :  { %1720 = vmatprep.subr.bf16.mxu1 %v1904_v19 }
  0x38   :  { %534 = vmatpush1.bf16.msra.mxu0 %v1888_v20 }
  0x39   :  { %535 = vmatprep.subr.bf16.mxu0 %v1893_v21  ;;  %1721 = vmatpush3.bf16.msra.mxu1 %v1905_v22 }
  0x3a   :  { %1722 = vmatprep.subr.bf16.mxu1 %v1908_v23 }
  0x3c   :  { %536 = vmatpush1.bf16.msra.mxu0 %v1891_v24 }
  0x3d   :  { %537 = vmatprep.subr.bf16.mxu0 %v1896_v25  ;;  %1723 = vmatpush3.bf16.msra.mxu1 %v1909_v26 }
  0x3e   :  { %1724 = vmatprep.subr.bf16.mxu1 %v1912_v7 }
  0x40   :  { %538 = vmatpush1.bf16.msra.mxu0 %v1894_v27 }
  0x41   :  { %539 = vmatprep.subr.bf16.mxu0 %v1899_v28  ;;  %1725 = vmatpush3.bf16.msra.mxu1 %v1913_v29 }
  0x42   :  { %1726 = vmatprep.subr.bf16.mxu1 %v1916_v30 }
  0x44   :  { %540 = vmatpush1.bf16.msra.mxu0 %v1897_v31 }
  0x45   :  { %1740 = vmatprep.subr.bf16.mxu0 %v1902_v32  ;;  %1727 = vmatpush3.bf16.msra.mxu1 %v1917_v33 }
  0x46   :  { %1728 = vmatprep.subr.bf16.mxu1 %v1920_v34 }
  0x47   :  { %1636 = vmatmul.mubr.msk.bf16.vlgmr.msra.gmra.mxu0 %vm326_vm3, %v2118_v59 }
  0x48   :  { %1741 = vmatpush3.bf16.msra.mxu0 %v1903_v35 }
  0x49   :  { %1742 = vmatprep.subr.bf16.mxu0 %v1906_v36 }
  0x4c   :  { %1743 = vmatpush3.bf16.msra.mxu0 %v1907_v37 }
  0x4d   :  { %1744 = vmatprep.subr.bf16.mxu0 %v1910_v38 }
  0x50   :  { %1745 = vmatpush3.bf16.msra.mxu0 %v1911_v39 }
  0x51   :  { %1746 = vmatprep.subr.bf16.mxu0 %v1914_v40 }
  0x54   :  { %1747 = vmatpush3.bf16.msra.mxu0 %v1915_v41 }
  0x55   :  { %1748 = vmatprep.subr.bf16.mxu0 %v1918_v42 }
  0x56   :  { %11 = vsyncpa [#allocation3], 0  ;;  %v1921_v44 = vld [vmem:[%s2511_s4 + $0x10] sm:$0xff]   ;;  %v1924_v47 = vld [vmem:[%s2511_s4 + $0x48] sm:$0xff]   ;;  %v570_v57 = vlaneseq  ;;  %s2003_s26 = smov [#allocation2]   ;;  %vm1561_vm4 = vcmask 74752  }
  0x57   :  { %v1922_v45 = vld [vmem:[%s2511_s4 + $0xd0] sm:$0xff]   ;;  %1729 = vmatpush3.bf16.msra.mxu1 %v1921_v44  ;;  %v1925_v48 = vld [vmem:[%s2511_s4 + $0x8] sm:$0xff]   ;;  %v1928_v51 = vld [vmem:[%s2511_s4 + $0x40] sm:$0xff]  }
  0x58   :  { %1749 = vmatpush3.bf16.msra.mxu0 %v1919_v43  ;;  %v1923_v46 = vld [vmem:[%s2511_s4 + $0x90] sm:$0xff]   ;;  %1730 = vmatprep.subr.bf16.mxu1 %v1924_v47  ;;  %v1926_v49 = vld [vmem:[%s2511_s4 + $0xc8] sm:$0xff]   ;;  %v1929_v52 = vld [vmem:[%s2511_s4] sm:$0xff]   ;;  %v2309_v58 = vshrl.u32 %v570_v57, 7 }
  0x59   :  { %1750 = vmatprep.subr.bf16.mxu0 %v1922_v45  ;;  %v1927_v50 = vld [vmem:[%s2511_s4 + $0x88] sm:$0xff]   ;;  %v1930_v53 = vld [vmem:[%s2511_s4 + $0xc0] sm:$0xff]   ;;  %v1932_v55 = vld [vmem:[%s2511_s4 + $0x178] sm:$0xff]  }
  0x5a   :  { %v1931_v54 = vld [vmem:[%s2511_s4 + $0x80] sm:$0xff]   ;;  %v1934_v56 = vld [vmem:[%s2511_s4 + $0x1f8] sm:$0xff]   ;;  %v2312_v59 = vsub.s32 0, %v2309_v58  ;;  %v580_v60 = vsub.s32 2, %v2309_v58  ;;  %v2321_v62 = vsub.s32 1, %v2309_v58  ;;  %v584_v63 = vsub.s32 3, %v2309_v58 }
  0x5b   :  { %1731 = vmatpush3.bf16.msra.mxu1 %v1925_v48  ;;  %v2318_v61 = vld [vmem:[%s2509_s2] sm:$0xff]  ;;  %v1933_v32 = vld [vmem:[%s2511_s4 + $0x138] sm:$0xff]   ;;  %v1936_v35 = vld [vmem:[%s2511_s4 + $0x170] sm:$0xff]   ;;  %v592_v41 = vsub.s32 5, %v2309_v58  ;;  %v600_v42 = vsub.s32 7, %v2309_v58 }
  0x5c   :  { %1751 = vmatpush3.bf16.msra.mxu0 %v1923_v46  ;;  %1732 = vmatprep.subr.bf16.mxu1 %v1928_v51  ;;  %v2327_v0 = vld [vmem:[%s2510_s3] sm:$0xff]  ;;  %v573_v1 = vrot.slane %v2318_v61, %v2312_v59  ;;  %v581_v2 = vrot.slane %v2318_v61, %v580_v60  ;;  %v577_v4 = vrot.slane %v2318_v61, %v2321_v62  ;;  %v1935_v33 = vld [vmem:[%s2511_s4 + $0x1b8] sm:$0xff]   ;;  %v1938_v36 = vld [vmem:[%s2511_s4 + $0x1f0] sm:$0xff]   ;;  %v596_v51 = vsub.s32 6, %v2309_v58 }
  0x5d   :  { %1752 = vmatprep.subr.bf16.mxu0 %v1926_v49  ;;  %v637_v3 = vrot.slane %v2327_v0, %v2312_v59  ;;  %v645_v5 = vrot.slane %v2327_v0, %v580_v60  ;;  %v585_v6 = vrot.slane %v2318_v61, %v584_v63  ;;  %v641_v11 = vrot.slane %v2327_v0, %v2321_v62  ;;  %v1937_v37 = vld [vmem:[%s2511_s4 + $0x130] sm:$0xff]   ;;  %v1940_v39 = vld [vmem:[%s2511_s4 + $0x168] sm:$0xff]   ;;  %v1944_v45 = vld [vmem:[%s2511_s4 + $0x160] sm:$0xff]  }
  0x5e   :  { %v649_v13 = vrot.slane %v2327_v0, %v584_v63  ;;  %v1939_v38 = vld [vmem:[%s2511_s4 + $0x1b0] sm:$0xff]   ;;  %v1942_v40 = vld [vmem:[%s2511_s4 + $0x1e8] sm:$0xff]   ;;  %v1946_v46 = vld [vmem:[%s2511_s4 + $0x1e0] sm:$0xff]   ;;  %v593_v47 = vrot.slane %v2318_v61, %v592_v41  ;;  %v601_v48 = vrot.slane %v2318_v61, %v600_v42 }
  0x5f   :  { %1733 = vmatpush3.bf16.msra.mxu1 %v1929_v52  ;;  %v1941_v43 = vld [vmem:[%s2511_s4 + $0x128] sm:$0xff]   ;;  %v1945_v52 = vld [vmem:[%s2511_s4 + $0x120] sm:$0xff]   ;;  %v1948_v57 = vld [vmem:[%s2511_s4 + $0x158] sm:$0xff]  }
  0x60   :  { %1753 = vmatpush3.bf16.msra.mxu0 %v1927_v50  ;;  %1762 = vmatprep.subr.bf16.mxu1 %v1932_v55  ;;  %v1943_v44 = vld [vmem:[%s2511_s4 + $0x1a8] sm:$0xff]   ;;  %v665_v55 = vrot.slane %v2327_v0, %v600_v42  ;;  %v1950_v63 = vld [vmem:[%s2511_s4 + $0x1d8] sm:$0xff]  }
  0x61   :  { %1754 = vmatprep.subr.bf16.mxu0 %v1930_v53  ;;  %v1947_v53 = vld [vmem:[%s2511_s4 + $0x1a0] sm:$0xff]  }
  0x64   :  { %1755 = vmatpush3.bf16.msra.mxu0 %v1931_v54  ;;  %v657_v54 = vrot.slane %v2327_v0, %v592_v41  ;;  %v1965_v41 = vld [vmem:[%s2511_s4 + $0x238] sm:$0xff]  }
  0x65   :  { %1784 = vmatprep.subr.bf16.mxu0 %v1934_v56  ;;  %v588_v56 = vsub.s32 4, %v2309_v58  ;;  %v1949_v58 = vld [vmem:[%s2511_s4 + $0x118] sm:$0xff]  }
  0xdf   :  { %v395_v8 = vpop.f32.mrf.mxu0  ;;  %v436_v9 = vpop.f32.mrf.mxu1 }
  0xe0   :  { %v620_v10 = vmul.f32 %v573_v1, %v395_v8  ;;  %v622_v12 = vmul.f32 %v581_v2, %v436_v9  ;;  %v1951_v9 = vld [vmem:[%s2511_s4 + $0x198] sm:$0xff]  }
  0xe1   :  { %v397_v14 = vpop.f32.mrf.mxu0  ;;  %v438_v15 = vpop.f32.mrf.mxu1 }
  0xe2   :  { %v684_v16 = vadd.f32 %v637_v3, %v620_v10  ;;  %v621_v17 = vmul.f32 %v577_v4, %v397_v14  ;;  %v686_v18 = vadd.f32 %v645_v5, %v622_v12  ;;  %v623_v19 = vmul.f32 %v585_v6, %v438_v15  ;;  %v1952_v12 = vld [vmem:[%s2511_s4 + $0x150] sm:$0xff]  }
  0xe3   :  { %v399_v20 = vpop.f32.mrf.mxu0  ;;  %v440_v21 = vpop.f32.mrf.mxu1  ;;  %v597_v5 = vrot.slane %v2318_v61, %v596_v51  ;;  %v1954_v14 = vld [vmem:[%s2511_s4 + $0x1d0] sm:$0xff]  }
  0xe4   :  { %v685_v22 = vadd.f32 %v641_v11, %v621_v17  ;;  %v696_v23 = vmax.f32 %v686_v18, 0.0  ;;  %v687_v24 = vadd.f32 %v649_v13, %v623_v19  ;;  %v694_v25 = vmax.f32 %v684_v16, 0.0  ;;  %v1955_v21 = vld [vmem:[%s2511_s4 + $0x190] sm:$0xff]  }
  0xe5   :  { %v400_v26 = vpop.f32.mrf.mxu0  ;;  %v441_v7 = vpop.f32.mrf.mxu1  ;;  %v589_v11 = vrot.slane %v2318_v61, %v588_v56  ;;  %v661_v19 = vrot.slane %v2327_v0, %v596_v51  ;;  %v1953_v61 = vld [vmem:[%s2511_s4 + $0x110] sm:$0xff]  }
  0xe6   :  { %v695_v27 = vmax.f32 %v685_v22, 0.0  ;;  %v697_v28 = vmax.f32 %v687_v24, 0.0  ;;  %v706_v29 = vpack.c.bf16 %v696_v23, %v696_v23  ;;  %v704_v34 = vpack.c.bf16 %v694_v25, %v694_v25  ;;  %v1956_v25 = vld [vmem:[%s2511_s4 + $0x148] sm:$0xff]  }
  0xe7   :  { %v653_v24 = vrot.slane %v2327_v0, %v588_v56  ;;  %v1958_v26 = vld [vmem:[%s2511_s4 + $0x1c8] sm:$0xff]   ;;  %v1972_v56 = vld [vmem:[%s2511_s4 + $0x258] sm:$0xff]  }
  0xe8   :  { %v705_v30 = vpack.c.bf16 %v695_v27, %v695_v27  ;;  %v707_v31 = vpack.c.bf16 %v697_v28, %v697_v28  ;;  %v1957_v27 = vld [vmem:[%s2511_s4 + $0x108] sm:$0xff]  }
  0xe9   :  { %v1959_v0 = vld [vmem:[%s2511_s4 + $0x188] sm:$0xff]  }
  0xea   :  { %1393 = vmatprep.mubr.bf16.mxu1 %v705_v30  ;;  %1433 = vmatprep.mubr.bf16.mxu0 %v707_v31  ;;  %v1962_v30 = vld [vmem:[%s2511_s4 + $0x1c0] sm:$0xff]  }
  0xeb   :  { %1394 = vmatmul.mubr.bf16.vlgmr.msra.gmra.mxu1 %v704_v34  ;;  %1434 = vmatmul.mubr.bf16.vlgmr.msra.gmra.mxu0 %v706_v29  ;;  %v1960_v29 = vld [vmem:[%s2511_s4 + $0x140] sm:$0xff]  }
  0xec   :  { %1763 = vmatpush3.bf16.msra.mxu1 %v1933_v32  ;;  %1785 = vmatpush3.bf16.msra.mxu0 %v1935_v33  ;;  %v567_v32 = vld [vmem:[%s2509_s2 + $0x8] sm:$0x3]  ;;  %v1961_v33 = vld [vmem:[%s2511_s4 + $0x100] sm:$0xff]  }
  0xed   :  { %1764 = vmatprep.subr.bf16.mxu1 %v1936_v35  ;;  %1786 = vmatprep.subr.bf16.mxu0 %v1938_v36  ;;  %v1963_v34 = vld [vmem:[%s2511_s4 + $0x180] sm:$0xff]   ;;  %v1964_v36 = vld [vmem:[%s2511_s4 + $0x278] sm:$0xff]  }
  0xf0   :  { %1765 = vmatpush3.bf16.msra.mxu1 %v1937_v37  ;;  %1787 = vmatpush3.bf16.msra.mxu0 %v1939_v38  ;;  %v631_v37 = vld [vmem:[%s2510_s3 + $0x8] sm:$0x3]  ;;  %v609_v38 = vrot.slane %v567_v32, %v2321_v62  ;;  %s1569_s3 = sshll.u32 %s2003_s26, 4  ;;  %s1570_s3 = int_to_ptr.vmem [resolvable:$true] %s1569_s3 }
  0xf1   :  { %1766 = vmatprep.subr.bf16.mxu1 %v1940_v39  ;;  %1788 = vmatprep.subr.bf16.mxu0 %v1942_v40  ;;  %v673_v42 = vrot.slane %v631_v37, %v2321_v62  ;;  %v1968_v62 = vld [vmem:[%s2511_s4 + $0x268] sm:$0xff]   ;;  %s1980_s27 = scalar_lea.vmem %s1570_s3, 32  ;;  %p1985_p1 = scmp.lt.s32.totalorder %s1570_s3, %s1570_s3 }
  0xf2   :  { %p1981_p0 = scmp.ne.s32.totalorder %s1570_s3, %s1980_s27  ;;  %p1986_p2 = scmp.lt.s32.totalorder %s1980_s27, %s1980_s27 }
  0xf3   :  { %v477_v49 = vpop.f32.mrf.mxu0  ;;  %v518_v50 = vpop.f32.mrf.mxu1 }
  0xf4   :  { %1767 = vmatpush3.bf16.msra.mxu1 %v1941_v43  ;;  %1789 = vmatpush3.bf16.msra.mxu0 %v1943_v44  ;;  %v626_v18 = vmul.f32 %v597_v5, %v518_v50  ;;  %v624_v23 = vmul.f32 %v589_v11, %v477_v49  ;;  %v1966_v44 = vld [vmem:[%s2511_s4 + $0x270] sm:$0xff]   ;;  %v1977_v5 = vld [vmem:[%s2511_s4 + $0x208] sm:$0xff]   ;;  %p1987_p3 = por %p1986_p2, %p1985_p1 }
  0xf5   :  { %1768 = vmatprep.subr.bf16.mxu1 %v1944_v45  ;;  %1790 = vmatprep.subr.bf16.mxu0 %v1946_v46  ;;  %v479_v60 = vpop.f32.mrf.mxu0  ;;  %v520_v1 = vpop.f32.mrf.mxu1 }
  0xf6   :  { %v625_v2 = vmul.f32 %v593_v47, %v479_v60  ;;  %v627_v3 = vmul.f32 %v601_v48, %v520_v1  ;;  %v690_v7 = vadd.f32 %v661_v19, %v626_v18  ;;  %v688_v28 = vadd.f32 %v653_v24, %v624_v23  ;;  %v1967_v48 = vld [vmem:[%s2511_s4 + $0x230] sm:$0xff]   ;;  %p1988_p4 = pnand %p1987_p3, %p1981_p0 }
  0xf7   :  { %v481_v4 = vpop.f32.mrf.mxu0  ;;  %v522_v6 = vpop.f32.mrf.mxu1  ;;  %v605_v60 = vrot.slane %v567_v32, %v2312_v59  ;;  %v1975_v1 = vld [vmem:[%s2511_s4 + $0x210] sm:$0xff]  }
  0xf8   :  { %1769 = vmatpush3.bf16.msra.mxu1 %v1945_v52  ;;  %1791 = vmatpush3.bf16.msra.mxu0 %v1947_v53  ;;  %v689_v8 = vadd.f32 %v657_v54, %v625_v2  ;;  %v691_v10 = vadd.f32 %v665_v55, %v627_v3  ;;  %v700_v31 = vmax.f32 %v690_v7, 0.0  ;;  %v698_v35 = vmax.f32 %v688_v28, 0.0  ;;  %v1969_v52 = vld [vmem:[%s2511_s4 + $0x228] sm:$0xff]   ;;  %v1970_v54 = vld [vmem:[%s2511_s4 + $0x260] sm:$0xff]  }
  0xf9   :  { %1770 = vmatprep.subr.bf16.mxu1 %v1948_v57  ;;  %1792 = vmatprep.subr.bf16.mxu0 %v1950_v63  ;;  %v482_v13 = vpop.f32.mrf.mxu0  ;;  %v523_v15 = vpop.f32.mrf.mxu1  ;;  %v1971_v55 = vld [vmem:[%s2511_s4 + $0x220] sm:$0xff]   ;;  %v1973_v57 = vld [vmem:[%s2511_s4 + $0x218] sm:$0xff]   ;;  %v1974_v63 = vld [vmem:[%s2511_s4 + $0x250] sm:$0xff]   ;;  %v669_v3 = vrot.slane %v631_v37, %v2312_v59 }
  0xfa   :  { %v699_v16 = vmax.f32 %v689_v8, 0.0  ;;  %v701_v17 = vmax.f32 %v691_v10, 0.0  ;;  %v710_v39 = vpack.c.bf16 %v700_v31, %v700_v31  ;;  %v708_v43 = vpack.c.bf16 %v698_v35, %v698_v35  ;;  %v1976_v4 = vld [vmem:[%s2511_s4 + $0x248] sm:$0xff]   ;;  %v1978_v8 = vld [vmem:[%s2511_s4 + $0x240] sm:$0xff]  }
  0xfb   :  { %v1979_v59 = vld [vmem:[%s2511_s4 + $0x200] sm:$0xff]  }
  0xfc   :  { %v709_v20 = vpack.c.bf16 %v699_v16, %v699_v16  ;;  %1771 = vmatpush3.bf16.msra.mxu1 %v1949_v58  ;;  %1793 = vmatpush3.bf16.msra.mxu0 %v1951_v9  ;;  %v711_v22 = vpack.c.bf16 %v701_v17, %v701_v17 }
  0xfd   :  { %1772 = vmatprep.subr.bf16.mxu1 %v1952_v12  ;;  %1794 = vmatprep.subr.bf16.mxu0 %v1954_v14 }
  0xfe   :  { %1473 = vmatprep.mubr.bf16.mxu1 %v709_v20  ;;  %1513 = vmatprep.mubr.bf16.mxu0 %v711_v22 }
 0x100   :  { %1773 = vmatpush3.bf16.msra.mxu1 %v1953_v61  ;;  %1795 = vmatpush3.bf16.msra.mxu0 %v1955_v21 }
 0x101   :  { %1774 = vmatprep.subr.bf16.mxu1 %v1956_v25  ;;  %1796 = vmatprep.subr.bf16.mxu0 %v1958_v26  ;;  %v1637_v26 = vld [vmem:[%s2512_s5] ss:$0 sm:$0xff] }
 0x104   :  { %1775 = vmatpush3.bf16.msra.mxu1 %v1957_v27  ;;  %1797 = vmatpush3.bf16.msra.mxu0 %v1959_v0 }
 0x105   :  { %1776 = vmatprep.subr.bf16.mxu1 %v1960_v29  ;;  %1798 = vmatprep.subr.bf16.mxu0 %v1962_v30 }
 0x107   :  { %v559_v40 = vpop.f32.mrf.mxu0 }
 0x108   :  { %1777 = vmatpush3.bf16.msra.mxu1 %v1961_v33  ;;  %1799 = vmatpush3.bf16.msra.mxu0 %v1963_v34  ;;  %v628_v2 = vmul.f32 %v605_v60, %v559_v40 }
 0x109   :  { %1806 = vmatprep.subr.bf16.mxu1 %v1964_v36  ;;  %v561_v45 = vpop.f32.mrf.mxu0 }
 0x10a   :  { %v629_v46 = vmul.f32 %v609_v38, %v561_v45  ;;  %v692_v6 = vadd.f32 %v669_v3, %v628_v2 }
 0x10b   :  { %1474 = vmatmul.mubr.bf16.vlgmr.msra.gmra.mxu1 %v708_v43  ;;  %1514 = vmatmul.mubr.bf16.vlgmr.msra.gmra.mxu0 %v710_v39  ;;  %v563_v47 = vpop.f32.mrf.mxu0 }
 0x10c   :  { %1807 = vmatpush3.bf16.msra.mxu1 %v1965_v41  ;;  %v693_v49 = vadd.f32 %v673_v42, %v629_v46  ;;  %v702_v58 = vmax.f32 %v692_v6, 0.0 }
 0x10d   :  { %1808 = vmatprep.subr.bf16.mxu1 %v1966_v44  ;;  %v564_v50 = vpop.f32.mrf.mxu0 }
 0x10e   :  { %v703_v51 = vmax.f32 %v693_v49, 0.0  ;;  %v712_v9 = vpack.c.bf16 %v702_v58, %v702_v58 }
 0x110   :  { %1809 = vmatpush3.bf16.msra.mxu1 %v1967_v48  ;;  %v713_v53 = vpack.c.bf16 %v703_v51, %v703_v51 }
 0x111   :  { %1810 = vmatprep.subr.bf16.mxu1 %v1968_v62 }
 0x112   :  { %1553 = vmatprep.mubr.bf16.mxu1 %v713_v53 }
 0x114   :  { %1811 = vmatpush3.bf16.msra.mxu1 %v1969_v52 }
 0x115   :  { %1812 = vmatprep.subr.bf16.mxu1 %v1970_v54 }
 0x118   :  { %1813 = vmatpush3.bf16.msra.mxu1 %v1971_v55 }
 0x119   :  { %1814 = vmatprep.subr.bf16.mxu1 %v1972_v56 }
 0x11c   :  { %1815 = vmatpush3.bf16.msra.mxu1 %v1973_v57 }
 0x11d   :  { %1816 = vmatprep.subr.bf16.mxu1 %v1974_v63 }
 0x120   :  { %1817 = vmatpush3.bf16.msra.mxu1 %v1975_v1 }
 0x121   :  { %1818 = vmatprep.subr.bf16.mxu1 %v1976_v4 }
 0x124   :  { %1819 = vmatpush3.bf16.msra.mxu1 %v1977_v5 }
 0x125   :  { %1820 = vmatprep.subr.bf16.mxu1 %v1978_v8 }
 0x128   :  { %1821 = vmatpush3.bf16.msra.mxu1 %v1979_v59 }
 0x12b   :  { %1554 = vmatmul.mubr.bf16.vlgmr.msra.gmra.mxu1 %v712_v9 }
 0x1ab   :  { %v1734_v10 = vpop.f32.mrf.mxu1  ;;  %v1756_v11 = vpop.f32.mrf.mxu0 }
 0x1ad   :  { %v1735_v12 = vpop.f32.mrf.mxu1  ;;  %v1757_v13 = vpop.f32.mrf.mxu0 }
 0x1ae   :  { %v1736_v25 = vadd.f32 %v1735_v12, %v1734_v10  ;;  %v1758_v27 = vadd.f32 %v1757_v13, %v1756_v11 }
 0x1af   :  { %v1737_v14 = vpop.f32.mrf.mxu1  ;;  %v1759_v15 = vpop.f32.mrf.mxu0 }
 0x1b0   :  { %v1396_v7 = vadd.f32 %v1736_v25, %v1637_v26 }
 0x1b1   :  { %v1738_v16 = vpop.f32.mrf.mxu1  ;;  %v1760_v17 = vpop.f32.mrf.mxu0 }
 0x1b2   :  { %v1436_v28 = vadd.f32 %v1758_v27, %v1396_v7 }
 0x1cb   :  { %v1778_v18 = vpop.f32.mrf.mxu1  ;;  %v1800_v19 = vpop.f32.mrf.mxu0 }
 0x1cd   :  { %v1779_v20 = vpop.f32.mrf.mxu1  ;;  %v1801_v61 = vpop.f32.mrf.mxu0 }
 0x1ce   :  { %v1780_v0 = vadd.f32 %v1779_v20, %v1778_v18  ;;  %v1802_v30 = vadd.f32 %v1801_v61, %v1800_v19 }
 0x1cf   :  { %v1781_v21 = vpop.f32.mrf.mxu1  ;;  %v1803_v22 = vpop.f32.mrf.mxu0 }
 0x1d0   :  { %v1476_v29 = vadd.f32 %v1780_v0, %v1436_v28 }
 0x1d1   :  { %v1782_v23 = vpop.f32.mrf.mxu1  ;;  %v1804_v24 = vpop.f32.mrf.mxu0 }
 0x1d2   :  { %v1516_v33 = vadd.f32 %v1802_v30, %v1476_v29 }
 0x1eb   :  { %v1822_v31 = vpop.f32.mrf.mxu1 }
 0x1ed   :  { %v1823_v32 = vpop.f32.mrf.mxu1 }
 0x1ee   :  { %v1824_v34 = vadd.f32 %v1823_v32, %v1822_v31 }
 0x1ef   :  { %v1825_v35 = vpop.f32.mrf.mxu1 }
 0x1f0   :  { %v1556_v36 = vadd.f32 %v1824_v34, %v1516_v33 }
 0x1f1   :  { %v1826_v37 = vpop.f32.mrf.mxu1 }
 0x1f2   :  { %1562 = vst.msk [vmem:[#allocation2] sm:$0x3] %vm1561_vm4, %v1556_v36 }
 0x1f3   :  { %1991 = shalt.err (!%p1988_p4)
}
 0x1f4   :  { %1572 = dma.vmem_to_hbm [thread:$0]  %s1570_s3, 32, %s2513_s6, [#allocation3]  }
 0x1f5   :  { %2000 = dma.done.wait [#allocation3], 32  }
 0x1f6   :  { %2001 = vsyncadd [#allocation3], 4294967264 }
 0x1f7   :  { %1576 = vsyncpa [#allocation3], 1 }

</bundles_post_ra>
